<compile_context>
chip_gen: v5e
topology: v5e:2x2
jax: 0.10.0
libtpu: 0.0.40
codegen_flags: <defaults>
</compile_context>

<pallas_src>
import math
import numpy as np
import jax
import jax.numpy as jnp
from jax import lax
from jax.experimental import pallas as pl
from jax.experimental.pallas import tpu as pltpu

# ----- ConvFlow config (small but representative) -----
B = 2
IN_CH = 4
HALF = IN_CH // 2
FILTER = 64            # filter_channels
KSIZE = 3              # kernel_size
N_LAYERS = 3           # n_layers (DDSConv depth); dilation = kernel_size ** i
NUM_BINS = 10
TAIL_BOUND = 5.0
T = 128                # time steps per batch element (power of two, lane-dense)

LANES = B * T          # 256: batch fused onto lanes
WIDE = HALF * LANES    # 512: spline lanes (both transformed channels side by side)

PROJ_OUT = HALF * (3 * NUM_BINS - 1)   # 58 (reference layout)
GROUP_STRIDE = 16                      # rows per (widths|heights|derivs) group, 8-aligned
CH_STRIDE = 3 * GROUP_STRIDE           # 48 rows per transformed channel
PROJ_PAD = HALF * CH_STRIDE            # 96 padded proj rows

MIN_BIN_WIDTH = 1e-3
MIN_BIN_HEIGHT = 1e-3
MIN_DERIVATIVE = 1e-3
LN_EPS = 1e-5
INV_SQRT_FC = 1.0 / math.sqrt(FILTER)
DERIV_PAD_CONST = float(np.log(np.exp(1.0 - MIN_DERIVATIVE) - 1.0))

# packed parameter-table column layout (table shape: (PROJ_PAD, 128))
COL_B_PRE = 0
COL_W_PRE = 1                      # HALF columns
COL_W_SEP = COL_W_PRE + HALF       # N_LAYERS*KSIZE columns
COL_CVEC = COL_W_SEP + N_LAYERS * KSIZE   # N_LAYERS*6 columns
COL_B_PROJ = COL_CVEC + N_LAYERS * 6      # 1 column (full PROJ_PAD rows)
PTAB_COLS = 128


# ----------------------------- shared math helpers -----------------------------
def _gelu(x):
    # tanh-approximate GELU (used identically in kernel and reference)
    c = 0.7978845608028654
    return 0.5 * x * (1.0 + jnp.tanh(c * (x + 0.044715 * x * x * x)))


def _softplus(x):
    return jnp.maximum(x, 0.0) + jnp.log1p(jnp.exp(-jnp.abs(x)))


def _softmax_sublanes(x):
    m = jnp.max(x, axis=0, keepdims=True)
    e = jnp.exp(x - m)
    return e / jnp.sum(e, axis=0, keepdims=True)


# --------------------------------- Pallas kernel --------------------------------
def conv_flow_kernel(x_ref, mask_ref, g_ref, ptab_ref, w_1x1_ref, w_proj_ref,
                     out_ref, ld_ref):
    mask = mask_ref[...]                  # (1, LANES)
    x0 = x_ref[:HALF, :]                  # (HALF, LANES)
    x1 = x_ref[HALF:, :]                  # (HALF, LANES)

    # ---- hoisted per-offset shift masks (time/batch boundary zero padding) ----
    lane = lax.broadcasted_iota(jnp.int32, (1, LANES), 1)
    t_local = lane & (T - 1)              # T is a power of two
    shift_mask = {}
    for i in range(N_LAYERS):
        dil = KSIZE ** i
        shift_mask[dil] = (t_local < (T - dil)).astype(jnp.float32)
        shift_mask[-dil] = (t_local >= dil).astype(jnp.float32)

    def tap(xm, off):
        """s[:, t] = xm[:, t + off] within each length-T batch segment, 0 outside."""
        if off == 0:
            return xm
        rolled = pltpu.roll(xm, shift=(-off) % LANES, axis=1)
        return rolled * shift_mask[off]

    # ---- LayerNorm over channels: sums on the MXU, var = E[y^2] - mu^2 ----
    ones_c = jnp.ones((1, FILTER), jnp.float32)
    inv_fc = 1.0 / FILTER

    def layer_norm_ch(y, gamma, beta):
        s1 = jnp.dot(ones_c, y, preferred_element_type=jnp.float32)       # (1, L)
        s2 = jnp.dot(ones_c, y * y, preferred_element_type=jnp.float32)   # (1, L)
        mu = s1 * inv_fc
        var = s2 * inv_fc - mu * mu
        return (y - mu) * lax.rsqrt(var + LN_EPS) * gamma + beta

    # ---- pre: 1x1 conv HALF -> FILTER (depth-2 -> two broadcast VPU FMAs) ----
    h = (ptab_ref[:FILTER, COL_B_PRE:COL_B_PRE + 1]
         + ptab_ref[:FILTER, COL_W_PRE:COL_W_PRE + 1] * x0[0:1, :]
         + ptab_ref[:FILTER, COL_W_PRE + 1:COL_W_PRE + 2] * x0[1:2, :])
    # DDSConv conditioning g is a plain add in this module.
    h = h + g_ref[...]

    # ---- DDSConv ----
    for i in range(N_LAYERS):
        dil = KSIZE ** i
        pad = (KSIZE * dil - dil) // 2
        wbase = COL_W_SEP + KSIZE * i
        cbase = COL_CVEC + 6 * i
        xm = h * mask
        # depthwise dilated conv: K register-resident shifted taps + FMAs,
        # accumulator seeded with bias + first tap.
        y = (ptab_ref[:FILTER, cbase:cbase + 1]
             + ptab_ref[:FILTER, wbase:wbase + 1] * tap(xm, 0 * dil - pad))
        for k in range(1, KSIZE):
            y = y + ptab_ref[:FILTER, wbase + k:wbase + k + 1] * tap(xm, k * dil - pad)
        y = _gelu(layer_norm_ch(y, ptab_ref[:FILTER, cbase + 1:cbase + 2],
                                ptab_ref[:FILTER, cbase + 2:cbase + 3]))
        # 1x1 conv FILTER -> FILTER: one deep (C, C) @ (C, LANES) MXU matmul.
        y = (jnp.dot(w_1x1_ref[i], y, preferred_element_type=jnp.float32)
             + ptab_ref[:FILTER, cbase + 3:cbase + 4])
        y = _gelu(layer_norm_ch(y, ptab_ref[:FILTER, cbase + 4:cbase + 5],
                                ptab_ref[:FILTER, cbase + 5:cbase + 6]))
        h = h + y
    h = h * mask

    # ---- proj: 1x1 conv FILTER -> PROJ_PAD rows (16-row aligned groups), + bias, mask
    hp = (jnp.dot(w_proj_ref[...], h, preferred_element_type=jnp.float32)
          + ptab_ref[:, COL_B_PROJ:COL_B_PROJ + 1]) * mask            # (PROJ_PAD, LANES)

    # ---- rational-quadratic spline, fully vectorized over bins AND channels ----
    def both(group_off, n):
        # gather the same group for both channels side by side on lanes -> (n, WIDE)
        return jnp.concatenate(
            [hp[c * CH_STRIDE + group_off: c * CH_STRIDE + group_off + n, :]
             for c in range(HALF)], axis=1)

    uw = both(0, NUM_BINS) * INV_SQRT_FC                   # (NB, WIDE)
    uh = both(GROUP_STRIDE, NUM_BINS) * INV_SQRT_FC        # (NB, WIDE)
    ud = both(2 * GROUP_STRIDE, NUM_BINS - 1)              # (NB-1, WIDE)

    widths = MIN_BIN_WIDTH + (1.0 - MIN_BIN_WIDTH * NUM_BINS) * _softmax_sublanes(uw)
    heights = MIN_BIN_HEIGHT + (1.0 - MIN_BIN_HEIGHT * NUM_BINS) * _softmax_sublanes(uh)
    derivs = MIN_DERIVATIVE + _softplus(ud)                # interior knot derivatives

    # exclusive cumulative sums via a small strictly-lower-triangular MXU matmul
    row = lax.broadcasted_iota(jnp.int32, (NUM_BINS, NUM_BINS), 0)
    col = lax.broadcasted_iota(jnp.int32, (NUM_BINS, NUM_BINS), 1)
    tri = (col < row).astype(jnp.float32)                  # (NB, NB)
    two_tb = 2.0 * TAIL_BOUND
    cw_lo = -TAIL_BOUND + two_tb * jnp.dot(tri, widths, preferred_element_type=jnp.float32)
    ch_lo = -TAIL_BOUND + two_tb * jnp.dot(tri, heights, preferred_element_type=jnp.float32)

    tb_row = jnp.full((1, WIDE), TAIL_BOUND, jnp.float32)
    # upper knot edges: next bin's lower edge (identical values -> exact partition),
    # last bin forced to the right tail bound.
    cw_hi = jnp.concatenate([cw_lo[1:, :], tb_row], axis=0)          # (NB, WIDE)
    ch_hi = jnp.concatenate([ch_lo[1:, :], tb_row], axis=0)          # (NB, WIDE)

    ones_row = jnp.ones((1, WIDE), jnp.float32)
    d_lo = jnp.concatenate([ones_row, derivs], axis=0)               # (NB, WIDE)
    d_hi = jnp.concatenate([derivs, ones_row], axis=0)               # (NB, WIDE)

    v = jnp.concatenate([x1[c:c + 1, :] for c in range(HALF)], axis=1)  # (1, WIDE)
    inside = (v >= -TAIL_BOUND) & (v <= TAIL_BOUND)
    vc = jnp.clip(v, -TAIL_BOUND, TAIL_BOUND)

    is_last = lax.broadcasted_iota(jnp.int32, (NUM_BINS, 1), 0) == (NUM_BINS - 1)
    sel = ((vc >= cw_lo) & ((vc < cw_hi) | is_last)).astype(jnp.float32)  # one-hot (NB, WIDE)

    def pick(q):
        return jnp.sum(sel * q, axis=0, keepdims=True)               # (1, WIDE)

    sel_cw = pick(cw_lo)
    sel_w = pick(cw_hi - cw_lo)
    sel_ch = pick(ch_lo)
    sel_h = pick(ch_hi - ch_lo)
    sel_dlo = pick(d_lo)
    sel_dhi = pick(d_hi)

    theta = (vc - sel_cw) / sel_w
    one_m_theta = 1.0 - theta
    tomt = theta * one_m_theta
    theta2 = theta * theta
    delta = sel_h / sel_w
    num = sel_h * (delta * theta2 + sel_dlo * tomt)
    den = delta + (sel_dlo + sel_dhi - 2.0 * delta) * tomt
    out_in = sel_ch + num / den
    dnum = (delta * delta) * (sel_dhi * theta2 + 2.0 * delta * tomt
                              + sel_dlo * one_m_theta * one_m_theta)
    lad_in = jnp.log(dnum) - 2.0 * jnp.log(den)

    x1w = jnp.where(inside, out_in, v)                 # linear tails: identity outside
    ladw = jnp.where(inside, lad_in, 0.0)

    # split the wide spline lanes back per channel and store everything once
    x1_out = jnp.concatenate(
        [x1w[:, c * LANES:(c + 1) * LANES] for c in range(HALF)], axis=0)   # (HALF, LANES)
    lad_sum = ladw[:, 0:LANES] + ladw[:, LANES:2 * LANES]                   # (1, LANES)

    out_ref[...] = jnp.concatenate([x0, x1_out], axis=0) * mask
    ld_ref[...] = lad_sum * mask


# ----------------------------------- wrapper ------------------------------------
def conv_flow_forward(x, x_mask, g, kparams):
    """x: (B, IN_CH, T), x_mask: (B, 1, T), g: (B, FILTER, T) -- PyTorch NCW layout."""
    ptab, w_1x1, w_proj = kparams

    # fuse batch onto the lane axis (layout plumbing only)
    x_wide = x.transpose(1, 0, 2).reshape(IN_CH, LANES)
    g_wide = g.transpose(1, 0, 2).reshape(FILTER, LANES)
    m_wide = x_mask.transpose(1, 0, 2).reshape(1, LANES)

    vspec = lambda: pl.BlockSpec(memory_space=pltpu.MemorySpace.VMEM)
    x_out_wide, ld_wide = pl.pallas_call(
        conv_flow_kernel,
        out_shape=(jax.ShapeDtypeStruct((IN_CH, LANES), jnp.float32),
                   jax.ShapeDtypeStruct((1, LANES), jnp.float32)),
        in_specs=[vspec() for _ in range(6)],
        out_specs=(vspec(), vspec()),
    )(x_wide, m_wide, g_wide, ptab, w_1x1, w_proj)

    x_out = x_out_wide.reshape(IN_CH, B, T).transpose(1, 0, 2)
    logdet = jnp.sum(ld_wide.reshape(B, T), axis=1)
    return x_out, logdet


conv_flow_forward = jax.jit(conv_flow_forward)


# -------------------- pure-JAX reference (PyTorch semantics) --------------------
def _layer_norm_ref(x, gamma, beta):
    mu = jnp.mean(x, axis=1, keepdims=True)
    var = jnp.mean((x - mu) ** 2, axis=1, keepdims=True)
    return (x - mu) / jnp.sqrt(var + LN_EPS) * gamma[None, :, None] + beta[None, :, None]


def _rq_spline_ref(inputs, uw, uh, ud):
    left = bottom = -TAIL_BOUND
    right = top = TAIL_BOUND
    inside = (inputs >= left) & (inputs <= right)

    ud_full = jnp.pad(ud, ((0, 0), (0, 0), (0, 0), (1, 1)),
                      constant_values=DERIV_PAD_CONST)

    widths = jax.nn.softmax(uw, axis=-1)
    widths = MIN_BIN_WIDTH + (1.0 - MIN_BIN_WIDTH * NUM_BINS) * widths
    cumw = jnp.cumsum(widths, axis=-1)
    cumw = jnp.pad(cumw, ((0, 0), (0, 0), (0, 0), (1, 0)))
    cumw = (right - left) * cumw + left
    cumw = cumw.at[..., 0].set(left).at[..., -1].set(right)
    widths = cumw[..., 1:] - cumw[..., :-1]

    derivs = MIN_DERIVATIVE + _softplus(ud_full)

    heights = jax.nn.softmax(uh, axis=-1)
    heights = MIN_BIN_HEIGHT + (1.0 - MIN_BIN_HEIGHT * NUM_BINS) * heights
    cumh = jnp.cumsum(heights, axis=-1)
    cumh = jnp.pad(cumh, ((0, 0), (0, 0), (0, 0), (1, 0)))
    cumh = (top - bottom) * cumh + bottom
    cumh = cumh.at[..., 0].set(bottom).at[..., -1].set(top)
    heights = cumh[..., 1:] - cumh[..., :-1]

    v = jnp.clip(inputs, left, right)
    cw_search = cumw.at[..., -1].add(1e-6)
    bin_idx = jnp.sum((v[..., None] >= cw_search).astype(jnp.int32), axis=-1) - 1
    bin_idx = jnp.clip(bin_idx, 0, NUM_BINS - 1)[..., None]

    def take(a):
        return jnp.take_along_axis(a, bin_idx, axis=-1)[..., 0]

    in_cw = take(cumw[..., :NUM_BINS])
    in_w = take(widths)
    in_ch = take(cumh[..., :NUM_BINS])
    in_h = take(heights)
    in_delta = take(heights / widths)
    in_dlo = take(derivs[..., :NUM_BINS])
    in_dhi = take(derivs[..., 1:])

    theta = (v - in_cw) / in_w
    tomt = theta * (1.0 - theta)
    num = in_h * (in_delta * theta ** 2 + in_dlo * tomt)
    den = in_delta + (in_dlo + in_dhi - 2.0 * in_delta) * tomt
    out = in_ch + num / den
    dnum = in_delta ** 2 * (in_dhi * theta ** 2 + 2.0 * in_delta * tomt
                            + in_dlo * (1.0 - theta) ** 2)
    lad = jnp.log(dnum) - 2.0 * jnp.log(den)

    out = jnp.where(inside, out, inputs)
    lad = jnp.where(inside, lad, 0.0)
    return out, lad


def conv_flow_reference(x, x_mask, g, tp):
    P = lax.Precision.HIGHEST
    x0, x1 = x[:, :HALF], x[:, HALF:]
    h = jnp.einsum('oc,bct->bot', tp['w_pre'], x0, precision=P) + tp['b_pre'][None, :, None]
    # DDSConv
    h = h + g
    for i in range(N_LAYERS):
        dil = KSIZE ** i
        pad = (KSIZE * dil - dil) // 2
        xm = h * x_mask
        y = lax.conv_general_dilated(
            xm, tp['w_sep'][i][:, None, :],
            window_strides=(1,), padding=[(pad, pad)], rhs_dilation=(dil,),
            dimension_numbers=('NCH', 'OIH', 'NCH'),
            feature_group_count=FILTER, precision=P,
        ) + tp['b_sep'][i][None, :, None]
        y = _gelu(_layer_norm_ref(y, tp['gamma1'][i], tp['beta1'][i]))
        y = jnp.einsum('oc,bct->bot', tp['w_1x1'][i], y, precision=P) + tp['b_1x1'][i][None, :, None]
        y = _gelu(_layer_norm_ref(y, tp['gamma2'][i], tp['beta2'][i]))
        h = h + y
    h = h * x_mask
    hp = (jnp.einsum('oc,bct->bot', tp['w_proj'], h, precision=P)
          + tp['b_proj'][None, :, None]) * x_mask

    b_, c_, t_ = x0.shape
    hp = hp.reshape(b_, c_, 3 * NUM_BINS - 1, t_).transpose(0, 1, 3, 2)   # (B, HALF, T, 29)
    uw = hp[..., :NUM_BINS] * INV_SQRT_FC
    uh = hp[..., NUM_BINS:2 * NUM_BINS] * INV_SQRT_FC
    ud = hp[..., 2 * NUM_BINS:]

    x1_out, lad = _rq_spline_ref(x1, uw, uh, ud)
    x_out = jnp.concatenate([x0, x1_out], axis=1) * x_mask
    logdet = jnp.sum(lad * x_mask, axis=(1, 2))
    return x_out, logdet


# ------------------- deterministic parameter construction -------------------
def make_params(key):
    ks = jax.random.split(key, 12)
    w_pre = 0.3 * jax.random.normal(ks[0], (FILTER, HALF), jnp.float32)
    b_pre = 0.1 * jax.random.normal(ks[1], (FILTER,), jnp.float32)
    w_sep = 0.3 * jax.random.normal(ks[2], (N_LAYERS, FILTER, KSIZE), jnp.float32)
    b_sep = 0.1 * jax.random.normal(ks[3], (N_LAYERS, FILTER), jnp.float32)
    gamma1 = 1.0 + 0.1 * jax.random.normal(ks[4], (N_LAYERS, FILTER), jnp.float32)
    beta1 = 0.1 * jax.random.normal(ks[5], (N_LAYERS, FILTER), jnp.float32)
    w_1x1 = (0.3 / math.sqrt(FILTER)) * jax.random.normal(
        ks[6], (N_LAYERS, FILTER, FILTER), jnp.float32)
    b_1x1 = 0.1 * jax.random.normal(ks[7], (N_LAYERS, FILTER), jnp.float32)
    gamma2 = 1.0 + 0.1 * jax.random.normal(ks[8], (N_LAYERS, FILTER), jnp.float32)
    beta2 = 0.1 * jax.random.normal(ks[9], (N_LAYERS, FILTER), jnp.float32)
    # The module zero-inits proj; small random weights are used so the spline is exercised.
    w_proj = (0.5 / math.sqrt(FILTER)) * jax.random.normal(
        ks[10], (PROJ_OUT, FILTER), jnp.float32)
    b_proj = 0.1 * jax.random.normal(ks[11], (PROJ_OUT,), jnp.float32)

    tparams = dict(w_pre=w_pre, b_pre=b_pre, w_sep=w_sep, b_sep=b_sep,
                   gamma1=gamma1, beta1=beta1, w_1x1=w_1x1, b_1x1=b_1x1,
                   gamma2=gamma2, beta2=beta2, w_proj=w_proj, b_proj=b_proj)

    # ---- kernel layouts ----
    # (1) single packed parameter table (PROJ_PAD, 128) for all lane-sparse vectors
    ptab = jnp.zeros((PROJ_PAD, PTAB_COLS), jnp.float32)
    ptab = ptab.at[:FILTER, COL_B_PRE].set(b_pre)
    ptab = ptab.at[:FILTER, COL_W_PRE:COL_W_PRE + HALF].set(w_pre)
    for i in range(N_LAYERS):
        ptab = ptab.at[:FILTER, COL_W_SEP + i * KSIZE:COL_W_SEP + (i + 1) * KSIZE].set(w_sep[i])
        cbase = COL_CVEC + 6 * i
        ptab = ptab.at[:FILTER, cbase + 0].set(b_sep[i])
        ptab = ptab.at[:FILTER, cbase + 1].set(gamma1[i])
        ptab = ptab.at[:FILTER, cbase + 2].set(beta1[i])
        ptab = ptab.at[:FILTER, cbase + 3].set(b_1x1[i])
        ptab = ptab.at[:FILTER, cbase + 4].set(gamma2[i])
        ptab = ptab.at[:FILTER, cbase + 5].set(beta2[i])

    # (2) proj re-layout: per channel, each of (widths, heights, derivs) padded to a
    #     16-row group so every slice base in the kernel is 8-sublane aligned.
    w_proj_k = jnp.zeros((PROJ_PAD, FILTER), jnp.float32)
    b_proj_v = jnp.zeros((PROJ_PAD,), jnp.float32)
    groups = [(0, NUM_BINS), (NUM_BINS, NUM_BINS), (2 * NUM_BINS, NUM_BINS - 1)]
    for c in range(HALF):
        src = c * (3 * NUM_BINS - 1)
        dst = c * CH_STRIDE
        for gi, (off, n) in enumerate(groups):
            r = dst + gi * GROUP_STRIDE
            w_proj_k = w_proj_k.at[r:r + n].set(w_proj[src + off:src + off + n])
            b_proj_v = b_proj_v.at[r:r + n].set(b_proj[src + off:src + off + n])
    ptab = ptab.at[:, COL_B_PROJ].set(b_proj_v)

    kparams = (ptab, w_1x1, w_proj_k)
    return tparams, kparams


if __name__ == "__main__":
    key = jax.random.PRNGKey(0)
    k_x, k_g, k_p = jax.random.split(key, 3)

    x = jax.random.normal(k_x, (B, IN_CH, T), jnp.float32)
    x = x.at[:, HALF:, :].multiply(3.0)          # spread x1 so the linear tails are exercised
    g = jax.random.normal(k_g, (B, FILTER, T), jnp.float32)
    lengths = jnp.array([T, T - 37], jnp.int32)
    x_mask = (jnp.arange(T)[None, None, :] < lengths[:, None, None]).astype(jnp.float32)

    tparams, kparams = make_params(k_p)

    x_out, logdet = conv_flow_forward(x, x_mask, g, kparams)
    x_out = jax.block_until_ready(x_out)
    logdet = jax.block_until_ready(logdet)

    x_ref, logdet_ref = conv_flow_reference(x, x_mask, g, tparams)

    assert x_out.shape == (B, IN_CH, T) and logdet.shape == (B,)
    err_x = float(jnp.max(jnp.abs(x_out - x_ref)))
    err_ld = float(jnp.max(jnp.abs(logdet - logdet_ref)))
    assert jnp.allclose(x_out, x_ref, atol=5e-3, rtol=5e-3), f"x max abs err {err_x}"
    assert jnp.allclose(logdet, logdet_ref, atol=5e-2, rtol=5e-3), f"logdet max abs err {err_ld}"
    print("KERNEL_OK")
</pallas_src>

<mosaic_0001>
module attributes {stable_mosaic.version = 11 : i64} {
  func.func @conv_flow_kernel(%arg0: memref<4x256xf32, #tpu.memory_space<vmem>>, %arg1: memref<1x256xf32, #tpu.memory_space<vmem>>, %arg2: memref<64x256xf32, #tpu.memory_space<vmem>>, %arg3: memref<96x128xf32, #tpu.memory_space<vmem>>, %arg4: memref<3x64x64xf32, #tpu.memory_space<vmem>>, %arg5: memref<96x64xf32, #tpu.memory_space<vmem>>, %arg6: memref<4x256xf32, #tpu.memory_space<vmem>>, %arg7: memref<1x256xf32, #tpu.memory_space<vmem>>) attributes {dimension_semantics = [], scalar_prefetch = 0 : i64, scratch_operands = 0 : i64, tpu.core_type = #tpu.core_type<tc>} {
    %c0 = arith.constant 0 : index
    %c0_0 = arith.constant 0 : index
    %0 = vector.load %arg1[%c0, %c0_0] : memref<1x256xf32, #tpu.memory_space<vmem>>, vector<1x256xf32>
    %c0_1 = arith.constant 0 : index
    %c0_2 = arith.constant 0 : index
    %1 = vector.load %arg0[%c0_1, %c0_2] : memref<4x256xf32, #tpu.memory_space<vmem>>, vector<2x256xf32>
    %c2 = arith.constant 2 : index
    %c0_3 = arith.constant 0 : index
    %2 = vector.load %arg0[%c2, %c0_3] : memref<4x256xf32, #tpu.memory_space<vmem>>, vector<2x256xf32>
    %3 = tpu.iota {dimensions = array<i32: 1>} : vector<1x256xi32>
    %c127_i32 = arith.constant 127 : i32
    %4 = vector.broadcast %c127_i32 : i32 to vector<1x256xi32>
    %5 = arith.andi %3, %4 : vector<1x256xi32>
    %c127_i32_4 = arith.constant 127 : i32
    %6 = vector.broadcast %c127_i32_4 : i32 to vector<1x256xi32>
    %7 = arith.cmpi slt, %5, %6 : vector<1x256xi32>
    %8 = arith.extui %7 : vector<1x256xi1> to vector<1x256xi32>
    %9 = arith.sitofp %8 : vector<1x256xi32> to vector<1x256xf32>
    %c1_i32 = arith.constant 1 : i32
    %10 = vector.broadcast %c1_i32 : i32 to vector<1x256xi32>
    %11 = arith.cmpi sge, %5, %10 : vector<1x256xi32>
    %12 = arith.extui %11 : vector<1x256xi1> to vector<1x256xi32>
    %13 = arith.sitofp %12 : vector<1x256xi32> to vector<1x256xf32>
    %c125_i32 = arith.constant 125 : i32
    %14 = vector.broadcast %c125_i32 : i32 to vector<1x256xi32>
    %15 = arith.cmpi slt, %5, %14 : vector<1x256xi32>
    %16 = arith.extui %15 : vector<1x256xi1> to vector<1x256xi32>
    %17 = arith.sitofp %16 : vector<1x256xi32> to vector<1x256xf32>
    %c3_i32 = arith.constant 3 : i32
    %18 = vector.broadcast %c3_i32 : i32 to vector<1x256xi32>
    %19 = arith.cmpi sge, %5, %18 : vector<1x256xi32>
    %20 = arith.extui %19 : vector<1x256xi1> to vector<1x256xi32>
    %21 = arith.sitofp %20 : vector<1x256xi32> to vector<1x256xf32>
    %c119_i32 = arith.constant 119 : i32
    %22 = vector.broadcast %c119_i32 : i32 to vector<1x256xi32>
    %23 = arith.cmpi slt, %5, %22 : vector<1x256xi32>
    %24 = arith.extui %23 : vector<1x256xi1> to vector<1x256xi32>
    %25 = arith.sitofp %24 : vector<1x256xi32> to vector<1x256xf32>
    %c9_i32 = arith.constant 9 : i32
    %26 = vector.broadcast %c9_i32 : i32 to vector<1x256xi32>
    %27 = arith.cmpi sge, %5, %26 : vector<1x256xi32>
    %28 = arith.extui %27 : vector<1x256xi1> to vector<1x256xi32>
    %29 = arith.sitofp %28 : vector<1x256xi32> to vector<1x256xf32>
    %cst = arith.constant 1.000000e+00 : f32
    %30 = vector.broadcast %cst : f32 to vector<1x64xf32>
    %c0_5 = arith.constant 0 : index
    %c0_6 = arith.constant 0 : index
    %31 = vector.load %arg3[%c0_5, %c0_6] : memref<96x128xf32, #tpu.memory_space<vmem>>, vector<64x1xf32>
    %c0_7 = arith.constant 0 : index
    %c1 = arith.constant 1 : index
    %32 = vector.load %arg3[%c0_7, %c1] : memref<96x128xf32, #tpu.memory_space<vmem>>, vector<64x1xf32>
    %33 = vector.extract_strided_slice %1 {offsets = [0, 0], sizes = [1, 256], strides = [1, 1]} : vector<2x256xf32> to vector<1x256xf32>
    %34 = vector.broadcast %32 : vector<64x1xf32> to vector<64x256xf32>
    %35 = vector.broadcast %33 : vector<1x256xf32> to vector<64x256xf32>
    %36 = arith.mulf %34, %35 : vector<64x256xf32>
    %37 = vector.broadcast %31 : vector<64x1xf32> to vector<64x256xf32>
    %38 = arith.addf %37, %36 : vector<64x256xf32>
    %c0_8 = arith.constant 0 : index
    %c2_9 = arith.constant 2 : index
    %39 = vector.load %arg3[%c0_8, %c2_9] : memref<96x128xf32, #tpu.memory_space<vmem>>, vector<64x1xf32>
    %40 = vector.extract_strided_slice %1 {offsets = [1, 0], sizes = [1, 256], strides = [1, 1]} : vector<2x256xf32> to vector<1x256xf32>
    %41 = vector.broadcast %39 : vector<64x1xf32> to vector<64x256xf32>
    %42 = vector.broadcast %40 : vector<1x256xf32> to vector<64x256xf32>
    %43 = arith.mulf %41, %42 : vector<64x256xf32>
    %44 = arith.addf %38, %43 : vector<64x256xf32>
    %c0_10 = arith.constant 0 : index
    %c0_11 = arith.constant 0 : index
    %45 = vector.load %arg2[%c0_10, %c0_11] : memref<64x256xf32, #tpu.memory_space<vmem>>, vector<64x256xf32>
    %46 = arith.addf %44, %45 : vector<64x256xf32>
    %47 = vector.broadcast %0 : vector<1x256xf32> to vector<64x256xf32>
    %48 = arith.mulf %46, %47 : vector<64x256xf32>
    %c0_12 = arith.constant 0 : index
    %c12 = arith.constant 12 : index
    %49 = vector.load %arg3[%c0_12, %c12] : memref<96x128xf32, #tpu.memory_space<vmem>>, vector<64x1xf32>
    %c0_13 = arith.constant 0 : index
    %c3 = arith.constant 3 : index
    %50 = vector.load %arg3[%c0_13, %c3] : memref<96x128xf32, #tpu.memory_space<vmem>>, vector<64x1xf32>
    %c1_i32_14 = arith.constant 1 : i32
    %51 = tpu.dynamic_rotate %48 by %c1_i32_14 dim 1 : vector<64x256xf32>, i32 -> vector<64x256xf32>
    %52 = vector.broadcast %13 : vector<1x256xf32> to vector<64x256xf32>
    %53 = arith.mulf %51, %52 : vector<64x256xf32>
    %54 = vector.broadcast %50 : vector<64x1xf32> to vector<64x256xf32>
    %55 = arith.mulf %54, %53 : vector<64x256xf32>
    %56 = vector.broadcast %49 : vector<64x1xf32> to vector<64x256xf32>
    %57 = arith.addf %56, %55 : vector<64x256xf32>
    %c0_15 = arith.constant 0 : index
    %c4 = arith.constant 4 : index
    %58 = vector.load %arg3[%c0_15, %c4] : memref<96x128xf32, #tpu.memory_space<vmem>>, vector<64x1xf32>
    %59 = vector.broadcast %58 : vector<64x1xf32> to vector<64x256xf32>
    %60 = arith.mulf %59, %48 : vector<64x256xf32>
    %61 = arith.addf %57, %60 : vector<64x256xf32>
    %c0_16 = arith.constant 0 : index
    %c5 = arith.constant 5 : index
    %62 = vector.load %arg3[%c0_16, %c5] : memref<96x128xf32, #tpu.memory_space<vmem>>, vector<64x1xf32>
    %c255_i32 = arith.constant 255 : i32
    %63 = tpu.dynamic_rotate %48 by %c255_i32 dim 1 : vector<64x256xf32>, i32 -> vector<64x256xf32>
    %64 = vector.broadcast %9 : vector<1x256xf32> to vector<64x256xf32>
    %65 = arith.mulf %63, %64 : vector<64x256xf32>
    %66 = vector.broadcast %62 : vector<64x1xf32> to vector<64x256xf32>
    %67 = arith.mulf %66, %65 : vector<64x256xf32>
    %68 = arith.addf %61, %67 : vector<64x256xf32>
    %c0_17 = arith.constant 0 : index
    %c13 = arith.constant 13 : index
    %69 = vector.load %arg3[%c0_17, %c13] : memref<96x128xf32, #tpu.memory_space<vmem>>, vector<64x1xf32>
    %c0_18 = arith.constant 0 : index
    %c14 = arith.constant 14 : index
    %70 = vector.load %arg3[%c0_18, %c14] : memref<96x128xf32, #tpu.memory_space<vmem>>, vector<64x1xf32>
    %cst_19 = arith.constant dense<0.000000e+00> : vector<1x256xf32>
    %71 = tpu.matmul %30, %68, %cst_19 {dimension_numbers = #tpu.dot_dimension_numbers<[1], [0], [0], [1], [0, 0, 1, 1], [], []>} : vector<1x64xf32>, vector<64x256xf32>, vector<1x256xf32> -> vector<1x256xf32>
    %72 = arith.mulf %68, %68 : vector<64x256xf32>
    %cst_20 = arith.constant dense<0.000000e+00> : vector<1x256xf32>
    %73 = tpu.matmul %30, %72, %cst_20 {dimension_numbers = #tpu.dot_dimension_numbers<[1], [0], [0], [1], [0, 0, 1, 1], [], []>} : vector<1x64xf32>, vector<64x256xf32>, vector<1x256xf32> -> vector<1x256xf32>
    %cst_21 = arith.constant 1.562500e-02 : f32
    %74 = vector.broadcast %cst_21 : f32 to vector<1x256xf32>
    %75 = arith.mulf %71, %74 : vector<1x256xf32>
    %cst_22 = arith.constant 1.562500e-02 : f32
    %76 = vector.broadcast %cst_22 : f32 to vector<1x256xf32>
    %77 = arith.mulf %73, %76 : vector<1x256xf32>
    %78 = arith.mulf %75, %75 : vector<1x256xf32>
    %79 = arith.subf %77, %78 : vector<1x256xf32>
    %80 = vector.broadcast %75 : vector<1x256xf32> to vector<64x256xf32>
    %81 = arith.subf %68, %80 : vector<64x256xf32>
    %cst_23 = arith.constant 9.99999974E-6 : f32
    %82 = vector.broadcast %cst_23 : f32 to vector<1x256xf32>
    %83 = arith.addf %79, %82 : vector<1x256xf32>
    %84 = math.rsqrt %83 : vector<1x256xf32>
    %85 = vector.broadcast %84 : vector<1x256xf32> to vector<64x256xf32>
    %86 = arith.mulf %81, %85 : vector<64x256xf32>
    %87 = vector.broadcast %69 : vector<64x1xf32> to vector<64x256xf32>
    %88 = arith.mulf %86, %87 : vector<64x256xf32>
    %89 = vector.broadcast %70 : vector<64x1xf32> to vector<64x256xf32>
    %90 = arith.addf %88, %89 : vector<64x256xf32>
    %cst_24 = arith.constant 5.000000e-01 : f32
    %91 = vector.broadcast %cst_24 : f32 to vector<64x256xf32>
    %92 = arith.mulf %91, %90 : vector<64x256xf32>
    %cst_25 = arith.constant 4.471500e-02 : f32
    %93 = vector.broadcast %cst_25 : f32 to vector<64x256xf32>
    %94 = arith.mulf %93, %90 : vector<64x256xf32>
    %95 = arith.mulf %94, %90 : vector<64x256xf32>
    %96 = arith.mulf %95, %90 : vector<64x256xf32>
    %97 = arith.addf %90, %96 : vector<64x256xf32>
    %cst_26 = arith.constant 0.797884583 : f32
    %98 = vector.broadcast %cst_26 : f32 to vector<64x256xf32>
    %99 = arith.mulf %98, %97 : vector<64x256xf32>
    %100 = math.tanh %99 : vector<64x256xf32>
    %cst_27 = arith.constant 1.000000e+00 : f32
    %101 = vector.broadcast %cst_27 : f32 to vector<64x256xf32>
    %102 = arith.addf %101, %100 : vector<64x256xf32>
    %103 = arith.mulf %92, %102 : vector<64x256xf32>
    %c0_28 = arith.constant 0 : index
    %c0_29 = arith.constant 0 : index
    %c0_30 = arith.constant 0 : index
    %104 = vector.load %arg4[%c0_28, %c0_29, %c0_30] : memref<3x64x64xf32, #tpu.memory_space<vmem>>, vector<1x64x64xf32>
    %105 = vector.shape_cast %104 : vector<1x64x64xf32> to vector<64x64xf32>
    %cst_31 = arith.constant dense<0.000000e+00> : vector<64x256xf32>
    %106 = tpu.matmul %105, %103, %cst_31 {dimension_numbers = #tpu.dot_dimension_numbers<[1], [0], [0], [1], [0, 0, 1, 1], [], []>} : vector<64x64xf32>, vector<64x256xf32>, vector<64x256xf32> -> vector<64x256xf32>
    %c0_32 = arith.constant 0 : index
    %c15 = arith.constant 15 : index
    %107 = vector.load %arg3[%c0_32, %c15] : memref<96x128xf32, #tpu.memory_space<vmem>>, vector<64x1xf32>
    %108 = vector.broadcast %107 : vector<64x1xf32> to vector<64x256xf32>
    %109 = arith.addf %106, %108 : vector<64x256xf32>
    %c0_33 = arith.constant 0 : index
    %c16 = arith.constant 16 : index
    %110 = vector.load %arg3[%c0_33, %c16] : memref<96x128xf32, #tpu.memory_space<vmem>>, vector<64x1xf32>
    %c0_34 = arith.constant 0 : index
    %c17 = arith.constant 17 : index
    %111 = vector.load %arg3[%c0_34, %c17] : memref<96x128xf32, #tpu.memory_space<vmem>>, vector<64x1xf32>
    %cst_35 = arith.constant dense<0.000000e+00> : vector<1x256xf32>
    %112 = tpu.matmul %30, %109, %cst_35 {dimension_numbers = #tpu.dot_dimension_numbers<[1], [0], [0], [1], [0, 0, 1, 1], [], []>} : vector<1x64xf32>, vector<64x256xf32>, vector<1x256xf32> -> vector<1x256xf32>
    %113 = arith.mulf %109, %109 : vector<64x256xf32>
    %cst_36 = arith.constant dense<0.000000e+00> : vector<1x256xf32>
    %114 = tpu.matmul %30, %113, %cst_36 {dimension_numbers = #tpu.dot_dimension_numbers<[1], [0], [0], [1], [0, 0, 1, 1], [], []>} : vector<1x64xf32>, vector<64x256xf32>, vector<1x256xf32> -> vector<1x256xf32>
    %cst_37 = arith.constant 1.562500e-02 : f32
    %115 = vector.broadcast %cst_37 : f32 to vector<1x256xf32>
    %116 = arith.mulf %112, %115 : vector<1x256xf32>
    %cst_38 = arith.constant 1.562500e-02 : f32
    %117 = vector.broadcast %cst_38 : f32 to vector<1x256xf32>
    %118 = arith.mulf %114, %117 : vector<1x256xf32>
    %119 = arith.mulf %116, %116 : vector<1x256xf32>
    %120 = arith.subf %118, %119 : vector<1x256xf32>
    %121 = vector.broadcast %116 : vector<1x256xf32> to vector<64x256xf32>
    %122 = arith.subf %109, %121 : vector<64x256xf32>
    %cst_39 = arith.constant 9.99999974E-6 : f32
    %123 = vector.broadcast %cst_39 : f32 to vector<1x256xf32>
    %124 = arith.addf %120, %123 : vector<1x256xf32>
    %125 = math.rsqrt %124 : vector<1x256xf32>
    %126 = vector.broadcast %125 : vector<1x256xf32> to vector<64x256xf32>
    %127 = arith.mulf %122, %126 : vector<64x256xf32>
    %128 = vector.broadcast %110 : vector<64x1xf32> to vector<64x256xf32>
    %129 = arith.mulf %127, %128 : vector<64x256xf32>
    %130 = vector.broadcast %111 : vector<64x1xf32> to vector<64x256xf32>
    %131 = arith.addf %129, %130 : vector<64x256xf32>
    %cst_40 = arith.constant 5.000000e-01 : f32
    %132 = vector.broadcast %cst_40 : f32 to vector<64x256xf32>
    %133 = arith.mulf %132, %131 : vector<64x256xf32>
    %cst_41 = arith.constant 4.471500e-02 : f32
    %134 = vector.broadcast %cst_41 : f32 to vector<64x256xf32>
    %135 = arith.mulf %134, %131 : vector<64x256xf32>
    %136 = arith.mulf %135, %131 : vector<64x256xf32>
    %137 = arith.mulf %136, %131 : vector<64x256xf32>
    %138 = arith.addf %131, %137 : vector<64x256xf32>
    %cst_42 = arith.constant 0.797884583 : f32
    %139 = vector.broadcast %cst_42 : f32 to vector<64x256xf32>
    %140 = arith.mulf %139, %138 : vector<64x256xf32>
    %141 = math.tanh %140 : vector<64x256xf32>
    %cst_43 = arith.constant 1.000000e+00 : f32
    %142 = vector.broadcast %cst_43 : f32 to vector<64x256xf32>
    %143 = arith.addf %142, %141 : vector<64x256xf32>
    %144 = arith.mulf %133, %143 : vector<64x256xf32>
    %145 = arith.addf %46, %144 : vector<64x256xf32>
    %146 = vector.broadcast %0 : vector<1x256xf32> to vector<64x256xf32>
    %147 = arith.mulf %145, %146 : vector<64x256xf32>
    %c0_44 = arith.constant 0 : index
    %c18 = arith.constant 18 : index
    %148 = vector.load %arg3[%c0_44, %c18] : memref<96x128xf32, #tpu.memory_space<vmem>>, vector<64x1xf32>
    %c0_45 = arith.constant 0 : index
    %c6 = arith.constant 6 : index
    %149 = vector.load %arg3[%c0_45, %c6] : memref<96x128xf32, #tpu.memory_space<vmem>>, vector<64x1xf32>
    %c3_i32_46 = arith.constant 3 : i32
    %150 = tpu.dynamic_rotate %147 by %c3_i32_46 dim 1 : vector<64x256xf32>, i32 -> vector<64x256xf32>
    %151 = vector.broadcast %21 : vector<1x256xf32> to vector<64x256xf32>
    %152 = arith.mulf %150, %151 : vector<64x256xf32>
    %153 = vector.broadcast %149 : vector<64x1xf32> to vector<64x256xf32>
    %154 = arith.mulf %153, %152 : vector<64x256xf32>
    %155 = vector.broadcast %148 : vector<64x1xf32> to vector<64x256xf32>
    %156 = arith.addf %155, %154 : vector<64x256xf32>
    %c0_47 = arith.constant 0 : index
    %c7 = arith.constant 7 : index
    %157 = vector.load %arg3[%c0_47, %c7] : memref<96x128xf32, #tpu.memory_space<vmem>>, vector<64x1xf32>
    %158 = vector.broadcast %157 : vector<64x1xf32> to vector<64x256xf32>
    %159 = arith.mulf %158, %147 : vector<64x256xf32>
    %160 = arith.addf %156, %159 : vector<64x256xf32>
    %c0_48 = arith.constant 0 : index
    %c8 = arith.constant 8 : index
    %161 = vector.load %arg3[%c0_48, %c8] : memref<96x128xf32, #tpu.memory_space<vmem>>, vector<64x1xf32>
    %c253_i32 = arith.constant 253 : i32
    %162 = tpu.dynamic_rotate %147 by %c253_i32 dim 1 : vector<64x256xf32>, i32 -> vector<64x256xf32>
    %163 = vector.broadcast %17 : vector<1x256xf32> to vector<64x256xf32>
    %164 = arith.mulf %162, %163 : vector<64x256xf32>
    %165 = vector.broadcast %161 : vector<64x1xf32> to vector<64x256xf32>
    %166 = arith.mulf %165, %164 : vector<64x256xf32>
    %167 = arith.addf %160, %166 : vector<64x256xf32>
    %c0_49 = arith.constant 0 : index
    %c19 = arith.constant 19 : index
    %168 = vector.load %arg3[%c0_49, %c19] : memref<96x128xf32, #tpu.memory_space<vmem>>, vector<64x1xf32>
    %c0_50 = arith.constant 0 : index
    %c20 = arith.constant 20 : index
    %169 = vector.load %arg3[%c0_50, %c20] : memref<96x128xf32, #tpu.memory_space<vmem>>, vector<64x1xf32>
    %cst_51 = arith.constant dense<0.000000e+00> : vector<1x256xf32>
    %170 = tpu.matmul %30, %167, %cst_51 {dimension_numbers = #tpu.dot_dimension_numbers<[1], [0], [0], [1], [0, 0, 1, 1], [], []>} : vector<1x64xf32>, vector<64x256xf32>, vector<1x256xf32> -> vector<1x256xf32>
    %171 = arith.mulf %167, %167 : vector<64x256xf32>
    %cst_52 = arith.constant dense<0.000000e+00> : vector<1x256xf32>
    %172 = tpu.matmul %30, %171, %cst_52 {dimension_numbers = #tpu.dot_dimension_numbers<[1], [0], [0], [1], [0, 0, 1, 1], [], []>} : vector<1x64xf32>, vector<64x256xf32>, vector<1x256xf32> -> vector<1x256xf32>
    %cst_53 = arith.constant 1.562500e-02 : f32
    %173 = vector.broadcast %cst_53 : f32 to vector<1x256xf32>
    %174 = arith.mulf %170, %173 : vector<1x256xf32>
    %cst_54 = arith.constant 1.562500e-02 : f32
    %175 = vector.broadcast %cst_54 : f32 to vector<1x256xf32>
    %176 = arith.mulf %172, %175 : vector<1x256xf32>
    %177 = arith.mulf %174, %174 : vector<1x256xf32>
    %178 = arith.subf %176, %177 : vector<1x256xf32>
    %179 = vector.broadcast %174 : vector<1x256xf32> to vector<64x256xf32>
    %180 = arith.subf %167, %179 : vector<64x256xf32>
    %cst_55 = arith.constant 9.99999974E-6 : f32
    %181 = vector.broadcast %cst_55 : f32 to vector<1x256xf32>
    %182 = arith.addf %178, %181 : vector<1x256xf32>
    %183 = math.rsqrt %182 : vector<1x256xf32>
    %184 = vector.broadcast %183 : vector<1x256xf32> to vector<64x256xf32>
    %185 = arith.mulf %180, %184 : vector<64x256xf32>
    %186 = vector.broadcast %168 : vector<64x1xf32> to vector<64x256xf32>
    %187 = arith.mulf %185, %186 : vector<64x256xf32>
    %188 = vector.broadcast %169 : vector<64x1xf32> to vector<64x256xf32>
    %189 = arith.addf %187, %188 : vector<64x256xf32>
    %cst_56 = arith.constant 5.000000e-01 : f32
    %190 = vector.broadcast %cst_56 : f32 to vector<64x256xf32>
    %191 = arith.mulf %190, %189 : vector<64x256xf32>
    %cst_57 = arith.constant 4.471500e-02 : f32
    %192 = vector.broadcast %cst_57 : f32 to vector<64x256xf32>
    %193 = arith.mulf %192, %189 : vector<64x256xf32>
    %194 = arith.mulf %193, %189 : vector<64x256xf32>
    %195 = arith.mulf %194, %189 : vector<64x256xf32>
    %196 = arith.addf %189, %195 : vector<64x256xf32>
    %cst_58 = arith.constant 0.797884583 : f32
    %197 = vector.broadcast %cst_58 : f32 to vector<64x256xf32>
    %198 = arith.mulf %197, %196 : vector<64x256xf32>
    %199 = math.tanh %198 : vector<64x256xf32>
    %cst_59 = arith.constant 1.000000e+00 : f32
    %200 = vector.broadcast %cst_59 : f32 to vector<64x256xf32>
    %201 = arith.addf %200, %199 : vector<64x256xf32>
    %202 = arith.mulf %191, %201 : vector<64x256xf32>
    %c1_60 = arith.constant 1 : index
    %c0_61 = arith.constant 0 : index
    %c0_62 = arith.constant 0 : index
    %203 = vector.load %arg4[%c1_60, %c0_61, %c0_62] : memref<3x64x64xf32, #tpu.memory_space<vmem>>, vector<1x64x64xf32>
    %204 = vector.shape_cast %203 : vector<1x64x64xf32> to vector<64x64xf32>
    %cst_63 = arith.constant dense<0.000000e+00> : vector<64x256xf32>
    %205 = tpu.matmul %204, %202, %cst_63 {dimension_numbers = #tpu.dot_dimension_numbers<[1], [0], [0], [1], [0, 0, 1, 1], [], []>} : vector<64x64xf32>, vector<64x256xf32>, vector<64x256xf32> -> vector<64x256xf32>
    %c0_64 = arith.constant 0 : index
    %c21 = arith.constant 21 : index
    %206 = vector.load %arg3[%c0_64, %c21] : memref<96x128xf32, #tpu.memory_space<vmem>>, vector<64x1xf32>
    %207 = vector.broadcast %206 : vector<64x1xf32> to vector<64x256xf32>
    %208 = arith.addf %205, %207 : vector<64x256xf32>
    %c0_65 = arith.constant 0 : index
    %c22 = arith.constant 22 : index
    %209 = vector.load %arg3[%c0_65, %c22] : memref<96x128xf32, #tpu.memory_space<vmem>>, vector<64x1xf32>
    %c0_66 = arith.constant 0 : index
    %c23 = arith.constant 23 : index
    %210 = vector.load %arg3[%c0_66, %c23] : memref<96x128xf32, #tpu.memory_space<vmem>>, vector<64x1xf32>
    %cst_67 = arith.constant dense<0.000000e+00> : vector<1x256xf32>
    %211 = tpu.matmul %30, %208, %cst_67 {dimension_numbers = #tpu.dot_dimension_numbers<[1], [0], [0], [1], [0, 0, 1, 1], [], []>} : vector<1x64xf32>, vector<64x256xf32>, vector<1x256xf32> -> vector<1x256xf32>
    %212 = arith.mulf %208, %208 : vector<64x256xf32>
    %cst_68 = arith.constant dense<0.000000e+00> : vector<1x256xf32>
    %213 = tpu.matmul %30, %212, %cst_68 {dimension_numbers = #tpu.dot_dimension_numbers<[1], [0], [0], [1], [0, 0, 1, 1], [], []>} : vector<1x64xf32>, vector<64x256xf32>, vector<1x256xf32> -> vector<1x256xf32>
    %cst_69 = arith.constant 1.562500e-02 : f32
    %214 = vector.broadcast %cst_69 : f32 to vector<1x256xf32>
    %215 = arith.mulf %211, %214 : vector<1x256xf32>
    %cst_70 = arith.constant 1.562500e-02 : f32
    %216 = vector.broadcast %cst_70 : f32 to vector<1x256xf32>
    %217 = arith.mulf %213, %216 : vector<1x256xf32>
    %218 = arith.mulf %215, %215 : vector<1x256xf32>
    %219 = arith.subf %217, %218 : vector<1x256xf32>
    %220 = vector.broadcast %215 : vector<1x256xf32> to vector<64x256xf32>
    %221 = arith.subf %208, %220 : vector<64x256xf32>
    %cst_71 = arith.constant 9.99999974E-6 : f32
    %222 = vector.broadcast %cst_71 : f32 to vector<1x256xf32>
    %223 = arith.addf %219, %222 : vector<1x256xf32>
    %224 = math.rsqrt %223 : vector<1x256xf32>
    %225 = vector.broadcast %224 : vector<1x256xf32> to vector<64x256xf32>
    %226 = arith.mulf %221, %225 : vector<64x256xf32>
    %227 = vector.broadcast %209 : vector<64x1xf32> to vector<64x256xf32>
    %228 = arith.mulf %226, %227 : vector<64x256xf32>
    %229 = vector.broadcast %210 : vector<64x1xf32> to vector<64x256xf32>
    %230 = arith.addf %228, %229 : vector<64x256xf32>
    %cst_72 = arith.constant 5.000000e-01 : f32
    %231 = vector.broadcast %cst_72 : f32 to vector<64x256xf32>
    %232 = arith.mulf %231, %230 : vector<64x256xf32>
    %cst_73 = arith.constant 4.471500e-02 : f32
    %233 = vector.broadcast %cst_73 : f32 to vector<64x256xf32>
    %234 = arith.mulf %233, %230 : vector<64x256xf32>
    %235 = arith.mulf %234, %230 : vector<64x256xf32>
    %236 = arith.mulf %235, %230 : vector<64x256xf32>
    %237 = arith.addf %230, %236 : vector<64x256xf32>
    %cst_74 = arith.constant 0.797884583 : f32
    %238 = vector.broadcast %cst_74 : f32 to vector<64x256xf32>
    %239 = arith.mulf %238, %237 : vector<64x256xf32>
    %240 = math.tanh %239 : vector<64x256xf32>
    %cst_75 = arith.constant 1.000000e+00 : f32
    %241 = vector.broadcast %cst_75 : f32 to vector<64x256xf32>
    %242 = arith.addf %241, %240 : vector<64x256xf32>
    %243 = arith.mulf %232, %242 : vector<64x256xf32>
    %244 = arith.addf %145, %243 : vector<64x256xf32>
    %245 = vector.broadcast %0 : vector<1x256xf32> to vector<64x256xf32>
    %246 = arith.mulf %244, %245 : vector<64x256xf32>
    %c0_76 = arith.constant 0 : index
    %c24 = arith.constant 24 : index
    %247 = vector.load %arg3[%c0_76, %c24] : memref<96x128xf32, #tpu.memory_space<vmem>>, vector<64x1xf32>
    %c0_77 = arith.constant 0 : index
    %c9 = arith.constant 9 : index
    %248 = vector.load %arg3[%c0_77, %c9] : memref<96x128xf32, #tpu.memory_space<vmem>>, vector<64x1xf32>
    %c9_i32_78 = arith.constant 9 : i32
    %249 = tpu.dynamic_rotate %246 by %c9_i32_78 dim 1 : vector<64x256xf32>, i32 -> vector<64x256xf32>
    %250 = vector.broadcast %29 : vector<1x256xf32> to vector<64x256xf32>
    %251 = arith.mulf %249, %250 : vector<64x256xf32>
    %252 = vector.broadcast %248 : vector<64x1xf32> to vector<64x256xf32>
    %253 = arith.mulf %252, %251 : vector<64x256xf32>
    %254 = vector.broadcast %247 : vector<64x1xf32> to vector<64x256xf32>
    %255 = arith.addf %254, %253 : vector<64x256xf32>
    %c0_79 = arith.constant 0 : index
    %c10 = arith.constant 10 : index
    %256 = vector.load %arg3[%c0_79, %c10] : memref<96x128xf32, #tpu.memory_space<vmem>>, vector<64x1xf32>
    %257 = vector.broadcast %256 : vector<64x1xf32> to vector<64x256xf32>
    %258 = arith.mulf %257, %246 : vector<64x256xf32>
    %259 = arith.addf %255, %258 : vector<64x256xf32>
    %c0_80 = arith.constant 0 : index
    %c11 = arith.constant 11 : index
    %260 = vector.load %arg3[%c0_80, %c11] : memref<96x128xf32, #tpu.memory_space<vmem>>, vector<64x1xf32>
    %c247_i32 = arith.constant 247 : i32
    %261 = tpu.dynamic_rotate %246 by %c247_i32 dim 1 : vector<64x256xf32>, i32 -> vector<64x256xf32>
    %262 = vector.broadcast %25 : vector<1x256xf32> to vector<64x256xf32>
    %263 = arith.mulf %261, %262 : vector<64x256xf32>
    %264 = vector.broadcast %260 : vector<64x1xf32> to vector<64x256xf32>
    %265 = arith.mulf %264, %263 : vector<64x256xf32>
    %266 = arith.addf %259, %265 : vector<64x256xf32>
    %c0_81 = arith.constant 0 : index
    %c25 = arith.constant 25 : index
    %267 = vector.load %arg3[%c0_81, %c25] : memref<96x128xf32, #tpu.memory_space<vmem>>, vector<64x1xf32>
    %c0_82 = arith.constant 0 : index
    %c26 = arith.constant 26 : index
    %268 = vector.load %arg3[%c0_82, %c26] : memref<96x128xf32, #tpu.memory_space<vmem>>, vector<64x1xf32>
    %cst_83 = arith.constant dense<0.000000e+00> : vector<1x256xf32>
    %269 = tpu.matmul %30, %266, %cst_83 {dimension_numbers = #tpu.dot_dimension_numbers<[1], [0], [0], [1], [0, 0, 1, 1], [], []>} : vector<1x64xf32>, vector<64x256xf32>, vector<1x256xf32> -> vector<1x256xf32>
    %270 = arith.mulf %266, %266 : vector<64x256xf32>
    %cst_84 = arith.constant dense<0.000000e+00> : vector<1x256xf32>
    %271 = tpu.matmul %30, %270, %cst_84 {dimension_numbers = #tpu.dot_dimension_numbers<[1], [0], [0], [1], [0, 0, 1, 1], [], []>} : vector<1x64xf32>, vector<64x256xf32>, vector<1x256xf32> -> vector<1x256xf32>
    %cst_85 = arith.constant 1.562500e-02 : f32
    %272 = vector.broadcast %cst_85 : f32 to vector<1x256xf32>
    %273 = arith.mulf %269, %272 : vector<1x256xf32>
    %cst_86 = arith.constant 1.562500e-02 : f32
    %274 = vector.broadcast %cst_86 : f32 to vector<1x256xf32>
    %275 = arith.mulf %271, %274 : vector<1x256xf32>
    %276 = arith.mulf %273, %273 : vector<1x256xf32>
    %277 = arith.subf %275, %276 : vector<1x256xf32>
    %278 = vector.broadcast %273 : vector<1x256xf32> to vector<64x256xf32>
    %279 = arith.subf %266, %278 : vector<64x256xf32>
    %cst_87 = arith.constant 9.99999974E-6 : f32
    %280 = vector.broadcast %cst_87 : f32 to vector<1x256xf32>
    %281 = arith.addf %277, %280 : vector<1x256xf32>
    %282 = math.rsqrt %281 : vector<1x256xf32>
    %283 = vector.broadcast %282 : vector<1x256xf32> to vector<64x256xf32>
    %284 = arith.mulf %279, %283 : vector<64x256xf32>
    %285 = vector.broadcast %267 : vector<64x1xf32> to vector<64x256xf32>
    %286 = arith.mulf %284, %285 : vector<64x256xf32>
    %287 = vector.broadcast %268 : vector<64x1xf32> to vector<64x256xf32>
    %288 = arith.addf %286, %287 : vector<64x256xf32>
    %cst_88 = arith.constant 5.000000e-01 : f32
    %289 = vector.broadcast %cst_88 : f32 to vector<64x256xf32>
    %290 = arith.mulf %289, %288 : vector<64x256xf32>
    %cst_89 = arith.constant 4.471500e-02 : f32
    %291 = vector.broadcast %cst_89 : f32 to vector<64x256xf32>
    %292 = arith.mulf %291, %288 : vector<64x256xf32>
    %293 = arith.mulf %292, %288 : vector<64x256xf32>
    %294 = arith.mulf %293, %288 : vector<64x256xf32>
    %295 = arith.addf %288, %294 : vector<64x256xf32>
    %cst_90 = arith.constant 0.797884583 : f32
    %296 = vector.broadcast %cst_90 : f32 to vector<64x256xf32>
    %297 = arith.mulf %296, %295 : vector<64x256xf32>
    %298 = math.tanh %297 : vector<64x256xf32>
    %cst_91 = arith.constant 1.000000e+00 : f32
    %299 = vector.broadcast %cst_91 : f32 to vector<64x256xf32>
    %300 = arith.addf %299, %298 : vector<64x256xf32>
    %301 = arith.mulf %290, %300 : vector<64x256xf32>
    %c2_92 = arith.constant 2 : index
    %c0_93 = arith.constant 0 : index
    %c0_94 = arith.constant 0 : index
    %302 = vector.load %arg4[%c2_92, %c0_93, %c0_94] : memref<3x64x64xf32, #tpu.memory_space<vmem>>, vector<1x64x64xf32>
    %303 = vector.shape_cast %302 : vector<1x64x64xf32> to vector<64x64xf32>
    %cst_95 = arith.constant dense<0.000000e+00> : vector<64x256xf32>
    %304 = tpu.matmul %303, %301, %cst_95 {dimension_numbers = #tpu.dot_dimension_numbers<[1], [0], [0], [1], [0, 0, 1, 1], [], []>} : vector<64x64xf32>, vector<64x256xf32>, vector<64x256xf32> -> vector<64x256xf32>
    %c0_96 = arith.constant 0 : index
    %c27 = arith.constant 27 : index
    %305 = vector.load %arg3[%c0_96, %c27] : memref<96x128xf32, #tpu.memory_space<vmem>>, vector<64x1xf32>
    %306 = vector.broadcast %305 : vector<64x1xf32> to vector<64x256xf32>
    %307 = arith.addf %304, %306 : vector<64x256xf32>
    %c0_97 = arith.constant 0 : index
    %c28 = arith.constant 28 : index
    %308 = vector.load %arg3[%c0_97, %c28] : memref<96x128xf32, #tpu.memory_space<vmem>>, vector<64x1xf32>
    %c0_98 = arith.constant 0 : index
    %c29 = arith.constant 29 : index
    %309 = vector.load %arg3[%c0_98, %c29] : memref<96x128xf32, #tpu.memory_space<vmem>>, vector<64x1xf32>
    %cst_99 = arith.constant dense<0.000000e+00> : vector<1x256xf32>
    %310 = tpu.matmul %30, %307, %cst_99 {dimension_numbers = #tpu.dot_dimension_numbers<[1], [0], [0], [1], [0, 0, 1, 1], [], []>} : vector<1x64xf32>, vector<64x256xf32>, vector<1x256xf32> -> vector<1x256xf32>
    %311 = arith.mulf %307, %307 : vector<64x256xf32>
    %cst_100 = arith.constant dense<0.000000e+00> : vector<1x256xf32>
    %312 = tpu.matmul %30, %311, %cst_100 {dimension_numbers = #tpu.dot_dimension_numbers<[1], [0], [0], [1], [0, 0, 1, 1], [], []>} : vector<1x64xf32>, vector<64x256xf32>, vector<1x256xf32> -> vector<1x256xf32>
    %cst_101 = arith.constant 1.562500e-02 : f32
    %313 = vector.broadcast %cst_101 : f32 to vector<1x256xf32>
    %314 = arith.mulf %310, %313 : vector<1x256xf32>
    %cst_102 = arith.constant 1.562500e-02 : f32
    %315 = vector.broadcast %cst_102 : f32 to vector<1x256xf32>
    %316 = arith.mulf %312, %315 : vector<1x256xf32>
    %317 = arith.mulf %314, %314 : vector<1x256xf32>
    %318 = arith.subf %316, %317 : vector<1x256xf32>
    %319 = vector.broadcast %314 : vector<1x256xf32> to vector<64x256xf32>
    %320 = arith.subf %307, %319 : vector<64x256xf32>
    %cst_103 = arith.constant 9.99999974E-6 : f32
    %321 = vector.broadcast %cst_103 : f32 to vector<1x256xf32>
    %322 = arith.addf %318, %321 : vector<1x256xf32>
    %323 = math.rsqrt %322 : vector<1x256xf32>
    %324 = vector.broadcast %323 : vector<1x256xf32> to vector<64x256xf32>
    %325 = arith.mulf %320, %324 : vector<64x256xf32>
    %326 = vector.broadcast %308 : vector<64x1xf32> to vector<64x256xf32>
    %327 = arith.mulf %325, %326 : vector<64x256xf32>
    %328 = vector.broadcast %309 : vector<64x1xf32> to vector<64x256xf32>
    %329 = arith.addf %327, %328 : vector<64x256xf32>
    %cst_104 = arith.constant 5.000000e-01 : f32
    %330 = vector.broadcast %cst_104 : f32 to vector<64x256xf32>
    %331 = arith.mulf %330, %329 : vector<64x256xf32>
    %cst_105 = arith.constant 4.471500e-02 : f32
    %332 = vector.broadcast %cst_105 : f32 to vector<64x256xf32>
    %333 = arith.mulf %332, %329 : vector<64x256xf32>
    %334 = arith.mulf %333, %329 : vector<64x256xf32>
    %335 = arith.mulf %334, %329 : vector<64x256xf32>
    %336 = arith.addf %329, %335 : vector<64x256xf32>
    %cst_106 = arith.constant 0.797884583 : f32
    %337 = vector.broadcast %cst_106 : f32 to vector<64x256xf32>
    %338 = arith.mulf %337, %336 : vector<64x256xf32>
    %339 = math.tanh %338 : vector<64x256xf32>
    %cst_107 = arith.constant 1.000000e+00 : f32
    %340 = vector.broadcast %cst_107 : f32 to vector<64x256xf32>
    %341 = arith.addf %340, %339 : vector<64x256xf32>
    %342 = arith.mulf %331, %341 : vector<64x256xf32>
    %343 = arith.addf %244, %342 : vector<64x256xf32>
    %344 = vector.broadcast %0 : vector<1x256xf32> to vector<64x256xf32>
    %345 = arith.mulf %343, %344 : vector<64x256xf32>
    %c0_108 = arith.constant 0 : index
    %c0_109 = arith.constant 0 : index
    %346 = vector.load %arg5[%c0_108, %c0_109] : memref<96x64xf32, #tpu.memory_space<vmem>>, vector<96x64xf32>
    %cst_110 = arith.constant dense<0.000000e+00> : vector<96x256xf32>
    %347 = tpu.matmul %346, %345, %cst_110 {dimension_numbers = #tpu.dot_dimension_numbers<[1], [0], [0], [1], [0, 0, 1, 1], [], []>} : vector<96x64xf32>, vector<64x256xf32>, vector<96x256xf32> -> vector<96x256xf32>
    %c0_111 = arith.constant 0 : index
    %c30 = arith.constant 30 : index
    %348 = vector.load %arg3[%c0_111, %c30] : memref<96x128xf32, #tpu.memory_space<vmem>>, vector<96x1xf32>
    %349 = vector.broadcast %348 : vector<96x1xf32> to vector<96x256xf32>
    %350 = arith.addf %347, %349 : vector<96x256xf32>
    %351 = vector.broadcast %0 : vector<1x256xf32> to vector<96x256xf32>
    %352 = arith.mulf %350, %351 : vector<96x256xf32>
    %353 = vector.extract_strided_slice %352 {offsets = [0, 0], sizes = [10, 256], strides = [1, 1]} : vector<96x256xf32> to vector<10x256xf32>
    %354 = vector.extract_strided_slice %352 {offsets = [48, 0], sizes = [10, 256], strides = [1, 1]} : vector<96x256xf32> to vector<10x256xf32>
    %355 = tpu.concatenate %353, %354 in 1 : vector<10x256xf32>, vector<10x256xf32> -> vector<10x512xf32>
    %cst_112 = arith.constant 1.250000e-01 : f32
    %356 = vector.broadcast %cst_112 : f32 to vector<10x512xf32>
    %357 = arith.mulf %355, %356 : vector<10x512xf32>
    %358 = vector.extract_strided_slice %352 {offsets = [16, 0], sizes = [10, 256], strides = [1, 1]} : vector<96x256xf32> to vector<10x256xf32>
    %359 = vector.extract_strided_slice %352 {offsets = [64, 0], sizes = [10, 256], strides = [1, 1]} : vector<96x256xf32> to vector<10x256xf32>
    %360 = tpu.concatenate %358, %359 in 1 : vector<10x256xf32>, vector<10x256xf32> -> vector<10x512xf32>
    %cst_113 = arith.constant 1.250000e-01 : f32
    %361 = vector.broadcast %cst_113 : f32 to vector<10x512xf32>
    %362 = arith.mulf %360, %361 : vector<10x512xf32>
    %363 = vector.extract_strided_slice %352 {offsets = [32, 0], sizes = [9, 256], strides = [1, 1]} : vector<96x256xf32> to vector<9x256xf32>
    %364 = vector.extract_strided_slice %352 {offsets = [80, 0], sizes = [9, 256], strides = [1, 1]} : vector<96x256xf32> to vector<9x256xf32>
    %365 = tpu.concatenate %363, %364 in 1 : vector<9x256xf32>, vector<9x256xf32> -> vector<9x512xf32>
    %cst_114 = arith.constant dense<0xFF800000> : vector<512xf32>
    %366 = vector.multi_reduction <maximumf>, %357, %cst_114 [0] : vector<10x512xf32> to vector<512xf32>
    %367 = vector.shape_cast %366 : vector<512xf32> to vector<1x512xf32>
    %368 = vector.broadcast %367 : vector<1x512xf32> to vector<10x512xf32>
    %369 = arith.subf %357, %368 : vector<10x512xf32>
    %370 = math.exp %369 : vector<10x512xf32>
    %cst_115 = arith.constant dense<0.000000e+00> : vector<512xf32>
    %371 = vector.multi_reduction <add>, %370, %cst_115 [0] : vector<10x512xf32> to vector<512xf32>
    %372 = vector.shape_cast %371 : vector<512xf32> to vector<1x512xf32>
    %373 = vector.broadcast %372 : vector<1x512xf32> to vector<10x512xf32>
    %374 = arith.divf %370, %373 : vector<10x512xf32>
    %cst_116 = arith.constant 9.900000e-01 : f32
    %375 = vector.broadcast %cst_116 : f32 to vector<10x512xf32>
    %376 = arith.mulf %375, %374 : vector<10x512xf32>
    %cst_117 = arith.constant 1.000000e-03 : f32
    %377 = vector.broadcast %cst_117 : f32 to vector<10x512xf32>
    %378 = arith.addf %377, %376 : vector<10x512xf32>
    %cst_118 = arith.constant dense<0xFF800000> : vector<512xf32>
    %379 = vector.multi_reduction <maximumf>, %362, %cst_118 [0] : vector<10x512xf32> to vector<512xf32>
    %380 = vector.shape_cast %379 : vector<512xf32> to vector<1x512xf32>
    %381 = vector.broadcast %380 : vector<1x512xf32> to vector<10x512xf32>
    %382 = arith.subf %362, %381 : vector<10x512xf32>
    %383 = math.exp %382 : vector<10x512xf32>
    %cst_119 = arith.constant dense<0.000000e+00> : vector<512xf32>
    %384 = vector.multi_reduction <add>, %383, %cst_119 [0] : vector<10x512xf32> to vector<512xf32>
    %385 = vector.shape_cast %384 : vector<512xf32> to vector<1x512xf32>
    %386 = vector.broadcast %385 : vector<1x512xf32> to vector<10x512xf32>
    %387 = arith.divf %383, %386 : vector<10x512xf32>
    %cst_120 = arith.constant 9.900000e-01 : f32
    %388 = vector.broadcast %cst_120 : f32 to vector<10x512xf32>
    %389 = arith.mulf %388, %387 : vector<10x512xf32>
    %cst_121 = arith.constant 1.000000e-03 : f32
    %390 = vector.broadcast %cst_121 : f32 to vector<10x512xf32>
    %391 = arith.addf %390, %389 : vector<10x512xf32>
    %cst_122 = arith.constant 0.000000e+00 : f32
    %392 = vector.broadcast %cst_122 : f32 to vector<9x512xf32>
    %393 = arith.maximumf %365, %392 : vector<9x512xf32>
    %394 = math.absf %365 : vector<9x512xf32>
    %cst_123 = arith.constant 0.000000e+00 : f32
    %395 = vector.broadcast %cst_123 : f32 to vector<9x512xf32>
    %396 = arith.subf %395, %394 : vector<9x512xf32>
    %397 = math.exp %396 : vector<9x512xf32>
    %398 = math.log1p %397 : vector<9x512xf32>
    %399 = arith.addf %393, %398 : vector<9x512xf32>
    %cst_124 = arith.constant 1.000000e-03 : f32
    %400 = vector.broadcast %cst_124 : f32 to vector<9x512xf32>
    %401 = arith.addf %400, %399 : vector<9x512xf32>
    %402 = tpu.iota {dimensions = array<i32: 0>} : vector<10x10xi32>
    %403 = tpu.iota {dimensions = array<i32: 1>} : vector<10x10xi32>
    %404 = arith.cmpi slt, %403, %402 : vector<10x10xi32>
    %405 = arith.extui %404 : vector<10x10xi1> to vector<10x10xi32>
    %406 = arith.sitofp %405 : vector<10x10xi32> to vector<10x10xf32>
    %cst_125 = arith.constant dense<0.000000e+00> : vector<10x512xf32>
    %407 = tpu.matmul %406, %378, %cst_125 {dimension_numbers = #tpu.dot_dimension_numbers<[1], [0], [0], [1], [0, 0, 1, 1], [], []>} : vector<10x10xf32>, vector<10x512xf32>, vector<10x512xf32> -> vector<10x512xf32>
    %cst_126 = arith.constant 1.000000e+01 : f32
    %408 = vector.broadcast %cst_126 : f32 to vector<10x512xf32>
    %409 = arith.mulf %408, %407 : vector<10x512xf32>
    %cst_127 = arith.constant -5.000000e+00 : f32
    %410 = vector.broadcast %cst_127 : f32 to vector<10x512xf32>
    %411 = arith.addf %410, %409 : vector<10x512xf32>
    %cst_128 = arith.constant dense<0.000000e+00> : vector<10x512xf32>
    %412 = tpu.matmul %406, %391, %cst_128 {dimension_numbers = #tpu.dot_dimension_numbers<[1], [0], [0], [1], [0, 0, 1, 1], [], []>} : vector<10x10xf32>, vector<10x512xf32>, vector<10x512xf32> -> vector<10x512xf32>
    %cst_129 = arith.constant 1.000000e+01 : f32
    %413 = vector.broadcast %cst_129 : f32 to vector<10x512xf32>
    %414 = arith.mulf %413, %412 : vector<10x512xf32>
    %cst_130 = arith.constant -5.000000e+00 : f32
    %415 = vector.broadcast %cst_130 : f32 to vector<10x512xf32>
    %416 = arith.addf %415, %414 : vector<10x512xf32>
    %cst_131 = arith.constant 5.000000e+00 : f32
    %417 = vector.broadcast %cst_131 : f32 to vector<1x512xf32>
    %418 = vector.extract_strided_slice %411 {offsets = [1, 0], sizes = [9, 512], strides = [1, 1]} : vector<10x512xf32> to vector<9x512xf32>
    %419 = tpu.concatenate %418, %417 in 0 : vector<9x512xf32>, vector<1x512xf32> -> vector<10x512xf32>
    %420 = vector.extract_strided_slice %416 {offsets = [1, 0], sizes = [9, 512], strides = [1, 1]} : vector<10x512xf32> to vector<9x512xf32>
    %421 = tpu.concatenate %420, %417 in 0 : vector<9x512xf32>, vector<1x512xf32> -> vector<10x512xf32>
    %cst_132 = arith.constant 1.000000e+00 : f32
    %422 = vector.broadcast %cst_132 : f32 to vector<1x512xf32>
    %423 = tpu.concatenate %422, %401 in 0 : vector<1x512xf32>, vector<9x512xf32> -> vector<10x512xf32>
    %424 = tpu.concatenate %401, %422 in 0 : vector<9x512xf32>, vector<1x512xf32> -> vector<10x512xf32>
    %425 = vector.extract_strided_slice %2 {offsets = [0, 0], sizes = [1, 256], strides = [1, 1]} : vector<2x256xf32> to vector<1x256xf32>
    %426 = vector.extract_strided_slice %2 {offsets = [1, 0], sizes = [1, 256], strides = [1, 1]} : vector<2x256xf32> to vector<1x256xf32>
    %427 = tpu.concatenate %425, %426 in 1 : vector<1x256xf32>, vector<1x256xf32> -> vector<1x512xf32>
    %cst_133 = arith.constant -5.000000e+00 : f32
    %428 = vector.broadcast %cst_133 : f32 to vector<1x512xf32>
    %429 = arith.cmpf oge, %427, %428 : vector<1x512xf32>
    %cst_134 = arith.constant 5.000000e+00 : f32
    %430 = vector.broadcast %cst_134 : f32 to vector<1x512xf32>
    %431 = arith.cmpf ole, %427, %430 : vector<1x512xf32>
    %432 = arith.andi %429, %431 : vector<1x512xi1>
    %cst_135 = arith.constant -5.000000e+00 : f32
    %cst_136 = arith.constant 5.000000e+00 : f32
    %433 = vector.broadcast %cst_135 : f32 to vector<1x512xf32>
    %434 = arith.maximumf %433, %427 : vector<1x512xf32>
    %435 = vector.broadcast %cst_136 : f32 to vector<1x512xf32>
    %436 = arith.minimumf %435, %434 : vector<1x512xf32>
    %437 = tpu.iota {dimensions = array<i32: 0>} : vector<10x1xi32>
    %c9_i32_137 = arith.constant 9 : i32
    %438 = vector.broadcast %c9_i32_137 : i32 to vector<10x1xi32>
    %439 = arith.cmpi eq, %437, %438 : vector<10x1xi32>
    %440 = vector.broadcast %436 : vector<1x512xf32> to vector<10x512xf32>
    %441 = arith.cmpf oge, %440, %411 : vector<10x512xf32>
    %442 = vector.broadcast %436 : vector<1x512xf32> to vector<10x512xf32>
    %443 = arith.cmpf olt, %442, %419 : vector<10x512xf32>
    %444 = vector.broadcast %439 : vector<10x1xi1> to vector<10x512xi1>
    %445 = arith.ori %443, %444 : vector<10x512xi1>
    %446 = arith.andi %441, %445 : vector<10x512xi1>
    %447 = arith.extui %446 : vector<10x512xi1> to vector<10x512xi32>
    %448 = arith.sitofp %447 : vector<10x512xi32> to vector<10x512xf32>
    %449 = arith.mulf %448, %411 : vector<10x512xf32>
    %cst_138 = arith.constant dense<0.000000e+00> : vector<512xf32>
    %450 = vector.multi_reduction <add>, %449, %cst_138 [0] : vector<10x512xf32> to vector<512xf32>
    %451 = vector.shape_cast %450 : vector<512xf32> to vector<1x512xf32>
    %452 = arith.subf %419, %411 : vector<10x512xf32>
    %453 = arith.mulf %448, %452 : vector<10x512xf32>
    %cst_139 = arith.constant dense<0.000000e+00> : vector<512xf32>
    %454 = vector.multi_reduction <add>, %453, %cst_139 [0] : vector<10x512xf32> to vector<512xf32>
    %455 = vector.shape_cast %454 : vector<512xf32> to vector<1x512xf32>
    %456 = arith.mulf %448, %416 : vector<10x512xf32>
    %cst_140 = arith.constant dense<0.000000e+00> : vector<512xf32>
    %457 = vector.multi_reduction <add>, %456, %cst_140 [0] : vector<10x512xf32> to vector<512xf32>
    %458 = vector.shape_cast %457 : vector<512xf32> to vector<1x512xf32>
    %459 = arith.subf %421, %416 : vector<10x512xf32>
    %460 = arith.mulf %448, %459 : vector<10x512xf32>
    %cst_141 = arith.constant dense<0.000000e+00> : vector<512xf32>
    %461 = vector.multi_reduction <add>, %460, %cst_141 [0] : vector<10x512xf32> to vector<512xf32>
    %462 = vector.shape_cast %461 : vector<512xf32> to vector<1x512xf32>
    %463 = arith.mulf %448, %423 : vector<10x512xf32>
    %cst_142 = arith.constant dense<0.000000e+00> : vector<512xf32>
    %464 = vector.multi_reduction <add>, %463, %cst_142 [0] : vector<10x512xf32> to vector<512xf32>
    %465 = vector.shape_cast %464 : vector<512xf32> to vector<1x512xf32>
    %466 = arith.mulf %448, %424 : vector<10x512xf32>
    %cst_143 = arith.constant dense<0.000000e+00> : vector<512xf32>
    %467 = vector.multi_reduction <add>, %466, %cst_143 [0] : vector<10x512xf32> to vector<512xf32>
    %468 = vector.shape_cast %467 : vector<512xf32> to vector<1x512xf32>
    %469 = arith.subf %436, %451 : vector<1x512xf32>
    %470 = arith.divf %469, %455 : vector<1x512xf32>
    %cst_144 = arith.constant 1.000000e+00 : f32
    %471 = vector.broadcast %cst_144 : f32 to vector<1x512xf32>
    %472 = arith.subf %471, %470 : vector<1x512xf32>
    %473 = arith.mulf %470, %472 : vector<1x512xf32>
    %474 = arith.mulf %470, %470 : vector<1x512xf32>
    %475 = arith.divf %462, %455 : vector<1x512xf32>
    %476 = arith.mulf %475, %474 : vector<1x512xf32>
    %477 = arith.mulf %465, %473 : vector<1x512xf32>
    %478 = arith.addf %476, %477 : vector<1x512xf32>
    %479 = arith.mulf %462, %478 : vector<1x512xf32>
    %480 = arith.addf %465, %468 : vector<1x512xf32>
    %cst_145 = arith.constant 2.000000e+00 : f32
    %481 = vector.broadcast %cst_145 : f32 to vector<1x512xf32>
    %482 = arith.mulf %481, %475 : vector<1x512xf32>
    %483 = arith.subf %480, %482 : vector<1x512xf32>
    %484 = arith.mulf %483, %473 : vector<1x512xf32>
    %485 = arith.addf %475, %484 : vector<1x512xf32>
    %486 = arith.divf %479, %485 : vector<1x512xf32>
    %487 = arith.addf %458, %486 : vector<1x512xf32>
    %488 = arith.mulf %475, %475 : vector<1x512xf32>
    %489 = arith.mulf %468, %474 : vector<1x512xf32>
    %cst_146 = arith.constant 2.000000e+00 : f32
    %490 = vector.broadcast %cst_146 : f32 to vector<1x512xf32>
    %491 = arith.mulf %490, %475 : vector<1x512xf32>
    %492 = arith.mulf %491, %473 : vector<1x512xf32>
    %493 = arith.addf %489, %492 : vector<1x512xf32>
    %494 = arith.mulf %465, %472 : vector<1x512xf32>
    %495 = arith.mulf %494, %472 : vector<1x512xf32>
    %496 = arith.addf %493, %495 : vector<1x512xf32>
    %497 = arith.mulf %488, %496 : vector<1x512xf32>
    %498 = math.log %497 : vector<1x512xf32>
    %499 = math.log %485 : vector<1x512xf32>
    %cst_147 = arith.constant 2.000000e+00 : f32
    %500 = vector.broadcast %cst_147 : f32 to vector<1x512xf32>
    %501 = arith.mulf %500, %499 : vector<1x512xf32>
    %502 = arith.subf %498, %501 : vector<1x512xf32>
    %503 = arith.select %432, %487, %427 : vector<1x512xi1>, vector<1x512xf32>
    %cst_148 = arith.constant 0.000000e+00 : f32
    %504 = vector.broadcast %cst_148 : f32 to vector<1x512xf32>
    %505 = arith.select %432, %502, %504 : vector<1x512xi1>, vector<1x512xf32>
    %506 = vector.extract_strided_slice %503 {offsets = [0, 0], sizes = [1, 256], strides = [1, 1]} : vector<1x512xf32> to vector<1x256xf32>
    %507 = vector.extract_strided_slice %503 {offsets = [0, 256], sizes = [1, 256], strides = [1, 1]} : vector<1x512xf32> to vector<1x256xf32>
    %508 = tpu.concatenate %506, %507 in 0 : vector<1x256xf32>, vector<1x256xf32> -> vector<2x256xf32>
    %509 = vector.extract_strided_slice %505 {offsets = [0, 0], sizes = [1, 256], strides = [1, 1]} : vector<1x512xf32> to vector<1x256xf32>
    %510 = vector.extract_strided_slice %505 {offsets = [0, 256], sizes = [1, 256], strides = [1, 1]} : vector<1x512xf32> to vector<1x256xf32>
    %511 = arith.addf %509, %510 : vector<1x256xf32>
    %512 = tpu.concatenate %1, %508 in 0 : vector<2x256xf32>, vector<2x256xf32> -> vector<4x256xf32>
    %513 = vector.broadcast %0 : vector<1x256xf32> to vector<4x256xf32>
    %514 = arith.mulf %512, %513 : vector<4x256xf32>
    %c0_149 = arith.constant 0 : index
    %c0_150 = arith.constant 0 : index
    %515 = vector.load %arg6[%c0_149, %c0_150] : memref<4x256xf32, #tpu.memory_space<vmem>>, vector<4x256xf32>
    tpu.vector_store %arg6[%c0_149, %c0_150], %514 {strides = array<i32>} : memref<4x256xf32, #tpu.memory_space<vmem>>, vector<4x256xf32>,
    %516 = arith.mulf %511, %0 : vector<1x256xf32>
    %c0_151 = arith.constant 0 : index
    %c0_152 = arith.constant 0 : index
    %517 = vector.load %arg7[%c0_151, %c0_152] : memref<1x256xf32, #tpu.memory_space<vmem>>, vector<1x256xf32>
    tpu.vector_store %arg7[%c0_151, %c0_152], %516 {strides = array<i32>} : memref<1x256xf32, #tpu.memory_space<vmem>>, vector<1x256xf32>,
    return
  }
}

</mosaic_0001>

<bundles_post_ra>
// kernel: conv_flow_forward.1
= control target key start
LH: loop header
LB: loop body
LE: loop exit
PB: predicated region body
PF: predicated region fallthrough
CT: control target
= control target key end

     0   :  { %v6810_v3 = vmov 0   ;;  %v6811_v4 = vmov 1   ;;  %s11932_s0 = inlined_call_operand.vmem [shape: f32[4,256], index: 0, kind: input, shape index: {}]   ;;  %s11933_s1 = inlined_call_operand.vmem [shape: f32[1,256], index: 1, kind: input, shape index: {}]   ;;  %s11934_s2 = inlined_call_operand.vmem [shape: f32[64,256], index: 2, kind: input, shape index: {}]   ;;  %s11935_s3 = inlined_call_operand.vmem [shape: f32[96,128], index: 3, kind: input, shape index: {}]   ;;  %s11936_s4 = inlined_call_operand.vmem [shape: f32[3,64,64], index: 4, kind: input, shape index: {}]   ;;  %s11937_s5 = inlined_call_operand.vmem [shape: f32[96,64], index: 5, kind: input, shape index: {}]   ;;  %s11938_s6 = inlined_call_operand.hbm [shape: f32[4,256], index: 6, kind: output, shape index: {0}]   ;;  %s11939_s7 = inlined_call_operand.vmem [shape: f32[1,256], index: 7, kind: output, shape index: {1}]  }
   0x1   :  { %v6893_v0 = vld [vmem:[%s11935_s3 + $0x38] sm:$0xff]  ;;  %v6898_v1 = vld [vmem:[%s11935_s3 + $0x28] sm:$0xff]  ;;  %v6903_v2 = vld [vmem:[%s11935_s3 + $0x20] sm:$0xff]  ;;  %6283 = vset.pattern.permute.xlu0 %v6810_v3  ;;  %6276 = vset.pattern.permute.xlu1 %v6810_v3 }
   0x2   :  { %12038 = vst [vmem:[#allocation5_spill] sm:$0xff] %v6893_v0  ;;  %6278 = vset.pattern.permute.xlu2 %v6811_v4  ;;  %170 = vperm.xlu1 %6276, %v6893_v0  }
   0x3   :  { %13 = vsyncpa [#allocation3], 0  ;;  %105 = vperm.xlu2 %6278, %v6898_v1   ;;  %158 = vperm.xlu0 %6283, %v6903_v2   ;;  %v6911_v5 = vld [vmem:[%s11935_s3 + $0x30] sm:$0xff]  ;;  %v6812_v6 = vmov 2   ;;  %v6922_v7 = vld [vmem:[%s11935_s3 + $0x8] sm:$0xff]  ;;  %v6813_v12 = vmov 3  }
   0x4   :  { %v6927_v8 = vld [vmem:[%s11935_s3 + $0x18] sm:$0xff]  ;;  %v6935_v9 = vld [vmem:[%s11935_s3 + $0x10] sm:$0xff]  ;;  %v27_v10 = vld [vmem:[%s11932_s0] sm:$0x33]  ;;  %v6814_v13 = vmov 12   ;;  %v6815_v14 = vmov 4  }
   0x5   :  { %6018 = vst [vmem:[#allocation1] ss:$2 sm:$0xff] %v27_v10  ;;  %v6952_v11 = vld [vmem:[%s11935_s3] sm:$0xff]  ;;  %v119_v18 = vperm.slane %v27_v10, 0  ;;  %v120_v19 = vperm.slane %v27_v10, 4  ;;  %v221_v20 = vperm.slane %v27_v10, 1 }
   0x6   :  { %v222_v21 = vperm.slane %v27_v10, 5  ;;  %v26_v35 = vld [vmem:[%s11933_s1] sm:$0x3]  ;;  %v274_v37 = vld [vmem:[%s11934_s2 + $0x78] sm:$0xff]  ;;  %v273_v38 = vld [vmem:[%s11934_s2 + $0x70] sm:$0xff]  ;;  %s6816_s1 = smov 1  }
   0x7   :  { %v6969_v23 = vperm.slane %v119_v18, 0  ;;  %v6971_v24 = vperm.slane %v120_v19, 0  ;;  %v6973_v25 = vperm.slane %v221_v20, 1  ;;  %v6990_v41 = vperm.slane %v26_v35, 1  ;;  %s6817_s25 = smov 127   ;;  %s6830_s23 = smov 3  }
   0x8   :  { %v6975_v26 = vperm.slane %v222_v21, 1  ;;  %v6992_v42 = vperm.slane %v26_v35, 0  ;;  %vm666_vm5 = vcmask 523264   ;;  %s6831_s24 = smov 125   ;;  %s6061_s11 = sshll.u32 %s11938_s6, 4  ;;  %s6062_s11 = int_to_ptr.hbm [resolvable:$true] %s6061_s11 }
   0x9   :  { %12039 = vst [vmem:[#allocation6_spill] sm:$0xff] %v6990_v41 }
   0xa   :  { %6277 = vset.pattern.permute.xlu1 %v6812_v6  ;;  %12040 = vst [vmem:[#allocation7_spill] sm:$0xff] %v6992_v42 }
   0xb   :  { %6279 = vset.pattern.permute.xlu2 %v6810_v3  ;;  %6284 = vset.pattern.permute.xlu0 %v6811_v4 }
   0xc   :  { %218 = vperm.xlu1 %6277, %v6893_v0   ;;  %166 = vperm.xlu2 %6279, %v6911_v5  }
   0xd   :  { %115 = vperm.xlu0 %6284, %v6893_v0  }
  0x14   :  { %6280 = vset.pattern.permute.xlu1 %v6811_v4  ;;  %162 = vperm.xlu2 %6279, %v6898_v1  }
  0x15   :  { %110 = vperm.xlu0 %6284, %v6911_v5   ;;  %100 = vperm.xlu1 %6280, %v6903_v2  }
  0x1c   :  { %6282 = vset.pattern.permute.xlu2 %v6811_v4 }
  0x1d   :  { %85 = vperm.xlu0 %6284, %v6922_v7   ;;  %6281 = vset.pattern.permute.xlu1 %v6812_v6 }
  0x1e   :  { %95 = vperm.xlu2 %6282, %v6927_v8   ;;  %210 = vperm.xlu1 %6281, %v6898_v1  }
  0x25   :  { %6287 = vset.pattern.permute.xlu0 %v6812_v6 }
  0x26   :  { %90 = vperm.xlu2 %6282, %v6935_v9   ;;  %214 = vperm.xlu0 %6287, %v6911_v5  }
  0x27   :  { %206 = vperm.xlu1 %6281, %v6903_v2  }
  0x2e   :  { %6286 = vset.pattern.permute.xlu2 %v6812_v6  ;;  %194 = vperm.xlu0 %6287, %v6922_v7  }
  0x2f   :  { %202 = vperm.xlu2 %6286, %v6927_v8   ;;  %6285 = vset.pattern.permute.xlu1 %v6810_v3 }
  0x30   :  { %154 = vperm.xlu1 %6285, %v6927_v8  }
  0x37   :  { %198 = vperm.xlu2 %6286, %v6935_v9  }
  0x38   :  { %150 = vperm.xlu1 %6285, %v6935_v9  }
  0x3f   :  { %6289 = vset.pattern.permute.xlu2 %v6810_v3 }
  0x40   :  { %146 = vperm.xlu2 %6289, %v6922_v7   ;;  %6288 = vset.pattern.permute.xlu1 %v6811_v4 }
  0x41   :  { %80 = vperm.xlu1 %6288, %v6952_v11  }
  0x48   :  { %6291 = vset.pattern.permute.xlu2 %v6812_v6 }
  0x49   :  { %190 = vperm.xlu2 %6291, %v6952_v11   ;;  %6290 = vset.pattern.permute.xlu1 %v6810_v3 }
  0x4a   :  { %142 = vperm.xlu1 %6290, %v6952_v11  }
  0x51   :  { %6292 = vset.pattern.permute.xlu2 %v6813_v12 }
  0x52   :  { %406 = vperm.xlu2 %6292, %v6893_v0   ;;  %6293 = vset.pattern.permute.xlu1 %v6813_v12 }
  0x53   :  { %402 = vperm.xlu1 %6293, %v6911_v5  }
  0x5a   :  { %6294 = vset.pattern.permute.xlu2 %v6814_v13 }
  0x5b   :  { %454 = vperm.xlu2 %6294, %v6893_v0   ;;  %6295 = vset.pattern.permute.xlu1 %v6814_v13 }
  0x5c   :  { %450 = vperm.xlu1 %6295, %v6911_v5  }
  0x5d   :  { %v106_v15 = vpop.permute.xlu2 %105 }
  0x5e   :  { %v135_v54 = vmul.f32 %v6969_v23, %v106_v15  ;;  %v136_v56 = vmul.f32 %v6971_v24, %v106_v15  ;;  %v272_v15 = vld [vmem:[%s11934_s2 + $0x68] sm:$0xff] }
  0x63   :  { %6296 = vset.pattern.permute.xlu2 %v6815_v14 }
  0x64   :  { %498 = vperm.xlu2 %6296, %v6911_v5  }
  0x66   :  { %v167_v22 = vpop.permute.xlu2 %166 }
  0x6e   :  { %v163_v36 = vpop.permute.xlu2 %162 }
  0x6f   :  { %v183_v3 = vadd.f32 %v163_v36, %v135_v54  ;;  %v184_v18 = vadd.f32 %v163_v36, %v136_v56 }
  0x74   :  { %v171_v16 = vpop.permute.xlu1 %170 }
  0x75   :  { %v6967_v17 = vpop.permute.xlu0 %158 }
  0x78   :  { %v96_v49 = vpop.permute.xlu2 %95 }
  0x7e   :  { %v219_v27 = vpop.permute.xlu1 %218 }
  0x7f   :  { %v116_v28 = vpop.permute.xlu0 %115  ;;  %v241_v31 = vmul.f32 %v6973_v25, %v219_v27  ;;  %v242_v32 = vmul.f32 %v6975_v26, %v219_v27 }
  0x80   :  { %v139_v29 = vmul.f32 %v6969_v23, %v116_v28  ;;  %v140_v30 = vmul.f32 %v6971_v24, %v116_v28  ;;  %v7019_v57 = vpop.permute.xlu2 %90 }
  0x82   :  { %v187_v33 = vadd.f32 %v171_v16, %v139_v29  ;;  %v188_v34 = vadd.f32 %v171_v16, %v140_v30  ;;  %v271_v16 = vld [vmem:[%s11934_s2 + $0x60] sm:$0xff]  ;;  %v131_v30 = vmul.f32 %v6969_v23, %v96_v49 }
  0x84   :  { %v257_v39 = vadd.f32 %v241_v31, %v187_v33  ;;  %v258_v40 = vadd.f32 %v242_v32, %v188_v34 }
  0x86   :  { %v6994_v43 = vadd.f32 %v274_v37, %v258_v40  ;;  %v6996_v44 = vadd.f32 %v273_v38, %v257_v39  ;;  %v270_v37 = vld [vmem:[%s11934_s2 + $0x58] sm:$0xff]  ;;  %v269_v38 = vld [vmem:[%s11934_s2 + $0x50] sm:$0xff]  ;;  %v11940_v39 = vmov 5  }
  0x87   :  { %v111_v45 = vpop.permute.xlu0 %110  ;;  %v101_v46 = vpop.permute.xlu1 %100  ;;  %6299 = vset.pattern.permute.xlu0 %v11940_v39  ;;  %6297 = vset.pattern.permute.xlu1 %v11940_v39 }
  0x88   :  { %12041 = vst [vmem:[#allocation8_spill] sm:$0xff] %v6994_v43  ;;  %v7000_v47 = vmul.f32 %v6990_v41, %v6994_v43  ;;  %v7004_v48 = vmul.f32 %v6992_v42, %v6996_v44  ;;  %v137_v52 = vmul.f32 %v6969_v23, %v111_v45  ;;  %v138_v53 = vmul.f32 %v6971_v24, %v111_v45 }
  0x89   :  { %12042 = vst [vmem:[#allocation9_spill] sm:$0xff] %v6996_v44  ;;  %v134_v55 = vmul.f32 %v6971_v24, %v101_v46  ;;  %v133_v40 = vmul.f32 %v6969_v23, %v101_v46  ;;  %v203_v45 = vpop.permute.xlu2 %202  ;;  %v132_v46 = vmul.f32 %v6971_v24, %v96_v49  ;;  %v267_v49 = vld [vmem:[%s11934_s2 + $0x40] sm:$0xff] }
  0x8a   :  { %342 = vrot.lane.b32.xlu2 %v7000_v47, %s6816_s1  ;;  %326 = vrot.lane.b32.xlu1 %v7004_v48, %s6816_s1  ;;  %v185_v59 = vadd.f32 %v167_v22, %v137_v52  ;;  %v186_v60 = vadd.f32 %v167_v22, %v138_v53  ;;  %v268_v22 = vld [vmem:[%s11934_s2 + $0x48] sm:$0xff] }
  0x8b   :  { %v182_v4 = vadd.f32 %v6967_v17, %v134_v55 }
  0x8f   :  { %v7010_v50 = vpop.permute.xlu0 %85 }
  0x90   :  { %v211_v51 = vpop.permute.xlu1 %210 }
  0x91   :  { %v237_v6 = vmul.f32 %v6973_v25, %v211_v51  ;;  %v238_v19 = vmul.f32 %v6975_v26, %v211_v51  ;;  %v233_v51 = vmul.f32 %v6973_v25, %v203_v45 }
  0x92   :  { %551 = vrot.lane.b32.xlu2 %v7004_v48, %s6817_s25 }
  0x93   :  { %v253_v31 = vadd.f32 %v237_v6, %v183_v3  ;;  %v254_v33 = vadd.f32 %v238_v19, %v184_v18  ;;  %v199_v19 = vpop.permute.xlu2 %198 }
  0x95   :  { %v7072_v55 = vadd.f32 %v270_v37, %v254_v33  ;;  %v7074_v56 = vadd.f32 %v269_v38, %v253_v31  ;;  %v128_v33 = vmul.f32 %v6971_v24, %v7010_v50  ;;  %v232_v38 = vmul.f32 %v6975_v26, %v199_v19 }
  0x97   :  { %12046 = vst [vmem:[#allocation13_spill] sm:$0xff] %v7072_v55 }
  0x98   :  { %v215_v58 = vpop.permute.xlu0 %214  ;;  %12047 = vst [vmem:[#allocation14_spill] sm:$0xff] %v7074_v56 }
  0x99   :  { %v239_v61 = vmul.f32 %v6973_v25, %v215_v58  ;;  %v240_v62 = vmul.f32 %v6975_v26, %v215_v58  ;;  %v207_v63 = vpop.permute.xlu1 %206  ;;  %v181_v58 = vadd.f32 %v6967_v17, %v133_v40  ;;  %v234_v17 = vmul.f32 %v6975_v26, %v203_v45 }
  0x9a   :  { %v236_v10 = vmul.f32 %v6975_v26, %v207_v63  ;;  %v235_v53 = vmul.f32 %v6973_v25, %v207_v63  ;;  %v265_v63 = vld [vmem:[%s11934_s2 + $0x30] sm:$0xff] }
  0x9b   :  { %v255_v20 = vadd.f32 %v239_v61, %v185_v59  ;;  %v256_v21 = vadd.f32 %v240_v62, %v186_v60  ;;  %v7080_v61 = vmul.f32 %v6990_v41, %v7072_v55  ;;  %v7084_v62 = vmul.f32 %v6992_v42, %v7074_v56  ;;  %v147_v31 = vpop.permute.xlu2 %146 }
  0x9c   :  { %v252_v27 = vadd.f32 %v236_v10, %v182_v4  ;;  %v251_v60 = vadd.f32 %v235_v53, %v181_v58  ;;  %v176_v45 = vadd.f32 %v147_v31, %v128_v33  ;;  %v262_v53 = vld [vmem:[%s11934_s2 + $0x18] sm:$0xff] }
  0x9d   :  { %v7036_v28 = vadd.f32 %v272_v15, %v256_v21  ;;  %v7038_v29 = vadd.f32 %v271_v16, %v255_v20  ;;  %v266_v16 = vld [vmem:[%s11934_s2 + $0x38] sm:$0xff] }
  0x9e   :  { %v7041_v32 = vadd.f32 %v268_v22, %v252_v27  ;;  %v7101_v6 = vadd.f32 %v267_v49, %v251_v60  ;;  %v130_v22 = vmul.f32 %v6971_v24, %v7019_v57 }
  0x9f   :  { %12043 = vst [vmem:[#allocation10_spill] sm:$0xff] %v7036_v28  ;;  %v7045_v34 = vmul.f32 %v6990_v41, %v7036_v28  ;;  %v7049_v35 = vmul.f32 %v6992_v42, %v7038_v29 }
  0xa0   :  { %12044 = vst [vmem:[#allocation11_spill] sm:$0xff] %v7038_v29  ;;  %v7053_v36 = vmul.f32 %v6990_v41, %v7041_v32  ;;  %v7112_v18 = vmul.f32 %v6992_v42, %v7101_v6  ;;  %v195_v27 = vpop.permute.xlu0 %194 }
  0xa1   :  { %12045 = vst [vmem:[#allocation12_spill] sm:$0xff] %v7041_v32  ;;  %340 = vrot.lane.b32.xlu1 %v7045_v34, %s6816_s1  ;;  %324 = vrot.lane.b32.xlu0 %v7049_v35, %s6816_s1  ;;  %v230_v37 = vmul.f32 %v6975_v26, %v195_v27 }
  0xa2   :  { %336 = vrot.lane.b32.xlu2 %v7053_v36, %s6816_s1  ;;  %v155_v52 = vpop.permute.xlu1 %154  ;;  %12049 = vst [vmem:[#allocation16_spill] sm:$0xff] %v7101_v6 }
  0xa3   :  { %v179_v54 = vadd.f32 %v155_v52, %v131_v30  ;;  %v180_v3 = vadd.f32 %v155_v52, %v132_v46 }
  0xa5   :  { %v249_v59 = vadd.f32 %v233_v51, %v179_v54  ;;  %v250_v10 = vadd.f32 %v234_v17, %v180_v3  ;;  %v246_v51 = vadd.f32 %v230_v37, %v176_v45  ;;  %v264_v54 = vld [vmem:[%s11934_s2 + $0x28] sm:$0xff]  ;;  %v191_v17 = vpop.permute.xlu2 %190 }
  0xa7   :  { %v7099_v4 = vadd.f32 %v265_v63, %v249_v59  ;;  %v7118_v20 = vadd.f32 %v266_v16, %v250_v10  ;;  %v7147_v46 = vadd.f32 %v262_v53, %v246_v51  ;;  %v129_v59 = vmul.f32 %v6969_v23, %v7019_v57  ;;  %v263_v10 = vld [vmem:[%s11934_s2 + $0x20] sm:$0xff] }
  0xa8   :  { %v231_v57 = vmul.f32 %v6973_v25, %v199_v19  ;;  %v229_v19 = vmul.f32 %v6973_v25, %v195_v27 }
  0xa9   :  { %338 = vrot.lane.b32.xlu1 %v7080_v61, %s6816_s1  ;;  %322 = vrot.lane.b32.xlu0 %v7084_v62, %s6816_s1  ;;  %12048 = vst [vmem:[#allocation15_spill] sm:$0xff] %v7099_v4  ;;  %v7105_v15 = vmul.f32 %v6992_v42, %v7099_v4  ;;  %v7124_v21 = vmul.f32 %v6990_v41, %v7118_v20 }
  0xaa   :  { %565 = vrot.lane.b32.xlu2 %v7045_v34, %s6817_s25  ;;  %12050 = vst [vmem:[#allocation17_spill] sm:$0xff] %v7118_v20  ;;  %v151_v30 = vpop.permute.xlu1 %150  ;;  %v7155_v60 = vmul.f32 %v6990_v41, %v7147_v46  ;;  %v11958_v20 = vlaneseq }
  0xab   :  { %v178_v40 = vadd.f32 %v151_v30, %v130_v22  ;;  %12051 = vst [vmem:[#allocation18_spill] sm:$0xff] %v7147_v46  ;;  %v177_v49 = vadd.f32 %v151_v30, %v129_v59  ;;  %v127_v22 = vmul.f32 %v6969_v23, %v7010_v50 }
  0xac   :  { %12053 = vst [vmem:[#allocation20_spill] sm:$0xff] %v7155_v60 }
  0xad   :  { %v248_v52 = vadd.f32 %v232_v38, %v178_v40  ;;  %v247_v3 = vadd.f32 %v231_v57, %v177_v49  ;;  %v175_v30 = vadd.f32 %v147_v31, %v127_v22  ;;  %v7181_v33 = vpop.permute.xlu2 %406  ;;  %v261_v40 = vld [vmem:[%s11934_s2 + $0x10] sm:$0xff] }
  0xaf   :  { %v7149_v58 = vadd.f32 %v264_v54, %v248_v52  ;;  %v7176_v16 = vadd.f32 %v263_v10, %v247_v3  ;;  %v245_v38 = vadd.f32 %v229_v19, %v175_v30  ;;  %v228_v54 = vmul.f32 %v6975_v26, %v191_v17 }
  0xb1   :  { %567 = vrot.lane.b32.xlu0 %v7000_v47, %s6817_s25  ;;  %320 = vrot.lane.b32.xlu1 %v7112_v18, %s6816_s1  ;;  %12052 = vst [vmem:[#allocation19_spill] sm:$0xff] %v7149_v58  ;;  %v7159_v63 = vmul.f32 %v6990_v41, %v7149_v58  ;;  %v7185_v37 = vmul.f32 %v6992_v42, %v7176_v16  ;;  %v7334_v58 = vand.u32 127, %v11958_v20 }
  0xb2   :  { %318 = vrot.lane.b32.xlu2 %v7105_v15, %s6816_s1  ;;  %12055 = vst [vmem:[#allocation22_spill] sm:$0xff] %v7176_v16  ;;  %v7195_v50 = vadd.f32 %v261_v40, %v245_v38  ;;  %v259_v40 = vld [vmem:[%s11934_s2] sm:$0xff] }
  0xb3   :  { %12054 = vst [vmem:[#allocation21_spill] sm:$0xff] %v7159_v63  ;;  %v81_v45 = vpop.permute.xlu1 %80  ;;  %v31_v28 = vadd.s32 128, %v7334_v58  ;;  %vm40_vm0 = vcmp.ge.s32.totalorder %v7334_v58, 1  ;;  %vm344_vm2 = vcmp.lt.s32.totalorder %v7334_v58, 1  ;;  %vm34_vm3 = vcmp.lt.s32.totalorder %v7334_v58, 127 }
  0xb4   :  { %12056 = vst [vmem:[#allocation23_spill] sm:$0xff] %v7195_v50  ;;  %v7201_v31 = vmul.f32 %v6992_v42, %v7195_v50  ;;  %v126_v51 = vmul.f32 %v6971_v24, %v81_v45  ;;  %v260_v24 = vld [vmem:[%s11934_s2 + $0x8] sm:$0xff]  ;;  %v125_v26 = vmul.f32 %v6969_v23, %v81_v45  ;;  %v12062_v50 = vmov 5  }
  0xb5   :  { %v7197_v27 = vpop.permute.xlu2 %454  ;;  %v7343_v29 = vand.u32 127, %v31_v28  ;;  %v11968_v28 = vmov 0.0  }
  0xb6   :  { %12057 = vst [vmem:[#allocation24_spill] sm:$0xff] %v7201_v31  ;;  %v7359_v43 = vsel %vm40_vm0, 1.0, %v11968_v28 }
  0xb7   :  { %12065 = vst [vmem:[#allocation31_spill] sm:$0xff] %v7343_v29  ;;  %vm41_vm1 = vcmp.ge.s32.totalorder %v7343_v29, 1  ;;  %vm35_vm4 = vcmp.lt.s32.totalorder %v7343_v29, 127 }
  0xb8   :  { %v7362_v44 = vsel %vm41_vm1, 1.0, %v11968_v28 }
  0xb9   :  { %334 = vrot.lane.b32.xlu0 %v7124_v21, %s6816_s1  ;;  %549 = vrot.lane.b32.xlu1 %v7049_v35, %s6817_s25 }
  0xba   :  { %563 = vrot.lane.b32.xlu2 %v7080_v61, %s6817_s25 }
  0xbc   :  { %v143_v53 = vpop.permute.xlu1 %142 }
  0xbd   :  { %v174_v59 = vadd.f32 %v143_v53, %v126_v51  ;;  %v173_v19 = vadd.f32 %v143_v53, %v125_v26 }
  0xbe   :  { %v7210_v52 = vpop.permute.xlu2 %498 }
  0xbf   :  { %v244_v57 = vadd.f32 %v228_v54, %v174_v59 }
  0xc1   :  { %627 = vperm.xlu0 %6299, %v6911_v5   ;;  %631 = vperm.xlu1 %6297, %v6893_v0   ;;  %v7225_v3 = vadd.f32 %v260_v24, %v244_v57 }
  0xc2   :  { %494 = vperm.xlu2 %6296, %v6898_v1  }
  0xc3   :  { %12058 = vst [vmem:[#allocation25_spill] sm:$0xff] %v7225_v3  ;;  %v7232_v22 = vmul.f32 %v6990_v41, %v7225_v3 }
  0xc5   :  { %v7227_v10 = vpop.permute.xlu1 %402  ;;  %12059 = vst [vmem:[#allocation26_spill] sm:$0xff] %v7232_v22 }
  0xc9   :  { %330 = vrot.lane.b32.xlu0 %v7155_v60, %s6816_s1  ;;  %547 = vrot.lane.b32.xlu1 %v7084_v62, %s6817_s25 }
  0xca   :  { %332 = vrot.lane.b32.xlu2 %v7159_v63, %s6816_s1  ;;  %6298 = vset.pattern.permute.xlu1 %v6814_v13 }
  0xce   :  { %v7243_v38 = vpop.permute.xlu1 %450 }
  0xd1   :  { %619 = vperm.xlu0 %6299, %v6903_v2   ;;  %446 = vperm.xlu1 %6298, %v6898_v1  }
  0xd2   :  { %561 = vrot.lane.b32.xlu2 %v7053_v36, %s6817_s25 }
  0xd9   :  { %6302 = vset.pattern.permute.xlu0 %v6813_v12  ;;  %316 = vrot.lane.b32.xlu1 %v7185_v37, %s6816_s1 }
  0xda   :  { %398 = vperm.xlu0 %6302, %v6898_v1   ;;  %490 = vperm.xlu2 %6296, %v6903_v2  }
  0xe1   :  { %545 = vrot.lane.b32.xlu1 %v7112_v18, %s6817_s25 }
  0xe2   :  { %394 = vperm.xlu0 %6302, %v6903_v2   ;;  %314 = vrot.lane.b32.xlu2 %v7201_v31, %s6816_s1 }
  0xe4   :  { %v7217_v49 = vpop.permute.xlu2 %342 }
  0xe9   :  { %442 = vperm.xlu1 %6298, %v6903_v2  }
  0xea   :  { %390 = vperm.xlu0 %6302, %v6927_v8   ;;  %559 = vrot.lane.b32.xlu2 %v7124_v21, %s6817_s25 }
  0xec   :  { %v7241_v30 = vpop.permute.xlu2 %551 }
  0xf1   :  { %6300 = vset.pattern.permute.xlu1 %v11940_v39 }
  0xf2   :  { %386 = vperm.xlu0 %6302, %v6935_v9   ;;  %623 = vperm.xlu1 %6300, %v6898_v1   ;;  %v227_v1 = vmul.f32 %v6973_v25, %v191_v17 }
  0xf3   :  { %486 = vperm.xlu2 %6296, %v6927_v8  }
  0xf4   :  { %v243_v23 = vadd.f32 %v227_v1, %v173_v19 }
  0xf6   :  { %v7255_v17 = vadd.f32 %v259_v40, %v243_v23 }
  0xf8   :  { %12060 = vst [vmem:[#allocation27_spill] sm:$0xff] %v7255_v17  ;;  %v7259_v45 = vmul.f32 %v6992_v42, %v7255_v17 }
  0xfa   :  { %382 = vperm.xlu0 %6302, %v6922_v7   ;;  %543 = vrot.lane.b32.xlu1 %v7105_v15, %s6817_s25  ;;  %12061 = vst [vmem:[#allocation28_spill] sm:$0xff] %v7259_v45 }
  0xfb   :  { %328 = vrot.lane.b32.xlu2 %v7232_v22, %s6816_s1  ;;  %6301 = vset.pattern.permute.xlu1 %v6814_v13 }
  0xfc   :  { %v7253_v25 = vpop.permute.xlu2 %336  ;;  %v7263_v51 = vpop.permute.xlu1 %326 }
 0x102   :  { %6303 = vset.pattern.permute.xlu0 %v6815_v14  ;;  %438 = vperm.xlu1 %6301, %v6927_v8  }
 0x103   :  { %557 = vrot.lane.b32.xlu2 %v7159_v63, %s6817_s25  ;;  %502 = vperm.xlu0 %6303, %v6893_v0  }
 0x104   :  { %v7268_v14 = vpop.permute.xlu2 %565 }
 0x10a   :  { %312 = vrot.lane.b32.xlu1 %v7259_v45, %s6816_s1 }
 0x10b   :  { %482 = vperm.xlu2 %6296, %v6935_v9   ;;  %555 = vrot.lane.b32.xlu0 %v7155_v60, %s6817_s25 }
 0x10c   :  { %v7276_v59 = vpop.permute.xlu2 %318 }
 0x112   :  { %541 = vrot.lane.b32.xlu1 %v7185_v37, %s6817_s25 }
 0x113   :  { %539 = vrot.lane.b32.xlu2 %v7201_v31, %s6817_s25  ;;  %v341_v53 = vpop.permute.xlu1 %340  ;;  %v325_v54 = vpop.permute.xlu0 %324  ;;  %478 = vperm.xlu0 %6303, %v6922_v7  }
 0x114   :  { %6306 = vset.pattern.permute.xlu2 %v6814_v13  ;;  %v7285_v26 = vpop.permute.xlu2 %563  ;;  %v359_v20 = vsel %vm344_vm2, %v341_v53, %v325_v54  ;;  %v351_v42 = vsel %vm344_vm2, %v325_v54, %v341_v53 }
 0x115   :  { %v373_v60 = vmul.f32 %v7359_v43, %v359_v20  ;;  %v374_v53 = vmul.f32 %v7362_v44, %v351_v42 }
 0x117   :  { %v422_v0 = vmul.f32 %v7227_v10, %v374_v53 }
 0x11a   :  { %434 = vperm.xlu1 %6301, %v6935_v9  }
 0x11b   :  { %430 = vperm.xlu2 %6306, %v6922_v7   ;;  %v7280_v57 = vpop.permute.xlu1 %338  ;;  %474 = vperm.xlu0 %6303, %v6952_v11   ;;  %v7283_v24 = vpop.permute.xlu0 %322 }
 0x11c   :  { %v7301_v40 = vpop.permute.xlu2 %494 }
 0x122   :  { %6304 = vset.pattern.permute.xlu1 %v11940_v39 }
 0x123   :  { %537 = vrot.lane.b32.xlu2 %v7259_v45, %s6817_s25  ;;  %v7290_v13 = vpop.permute.xlu0 %567  ;;  %v7292_v1 = vpop.permute.xlu1 %320  ;;  %615 = vperm.xlu1 %6304, %v6927_v8   ;;  %v360_v45 = vsel %vm344_vm2, %v7217_v49, %v7263_v51 }
 0x124   :  { %v7312_v8 = vpop.permute.xlu2 %332  ;;  %v375_v28 = vmul.f32 %v7359_v43, %v360_v45  ;;  %v517_v45 = vmul.f32 %v7210_v52, %v7049_v35  ;;  %v350_v35 = vsel %vm344_vm2, %v7283_v24, %v7280_v57 }
 0x12b   :  { %v7295_v19 = vpop.permute.xlu0 %334  ;;  %v7297_v23 = vpop.permute.xlu1 %549  ;;  %6305 = vset.pattern.permute.xlu1 %v6813_v12  ;;  %426 = vperm.xlu2 %6306, %v6952_v11  }
 0x12c   :  { %378 = vperm.xlu1 %6305, %v6952_v11   ;;  %v7320_v16 = vpop.permute.xlu2 %561 }
 0x133   :  { %v7304_v39 = vpop.permute.xlu0 %627  ;;  %v7306_v3 = vpop.permute.xlu1 %631  ;;  %6308 = vset.pattern.permute.xlu2 %v12062_v50 }
 0x134   :  { %6307 = vset.pattern.permute.xlu1 %v12062_v50  ;;  %603 = vperm.xlu2 %6308, %v6952_v11  }
 0x135   :  { %611 = vperm.xlu1 %6307, %v6935_v9   ;;  %v7327_v9 = vpop.permute.xlu2 %490 }
 0x13b   :  { %v7314_v12 = vpop.permute.xlu0 %330  ;;  %v7316_v17 = vpop.permute.xlu1 %547 }
 0x13c   :  { %12063 = vst [vmem:[#allocation29_spill] sm:$0xff] %v7314_v12 }
 0x13d   :  { %553 = vrot.lane.b32.xlu1 %v7232_v22, %s6817_s25  ;;  %v7338_v55 = vpop.permute.xlu2 %314  ;;  %v352_v22 = vsel %vm344_vm2, %v7263_v51, %v7217_v49  ;;  %v423_v49 = vmul.f32 %v7181_v33, %v375_v28  ;;  %v518_v51 = vmul.f32 %v7210_v52, %v7045_v34  ;;  %v12066_v28 = vmov 0.0   ;;  %s6849_s25 = smov [#allocation2]  }
 0x13e   :  { %12064 = vst [vmem:[#allocation30_spill] sm:$0xff] %v7338_v55  ;;  %v376_v12 = vmul.f32 %v7362_v44, %v352_v22  ;;  %v421_v55 = vmul.f32 %v7227_v10, %v373_v60  ;;  %v470_v10 = vadd.f32 %v7243_v38, %v422_v0  ;;  %v7411_v0 = vsel %vm34_vm3, 1.0, %v12066_v28  ;;  %s6059_s9 = sshll.u32 %s6849_s25, 4  ;;  %s6060_s9 = int_to_ptr.vmem [resolvable:$true] %s6059_s9 }
 0x13f   :  { %v7414_v34 = vsel %vm35_vm4, 1.0, %v12066_v28  ;;  %v577_v52 = vsel %vm34_vm3, %v7241_v30, %v7290_v13  ;;  %v515_v28 = vmul.f32 %v7301_v40, %v7084_v62  ;;  %vm1684_vm4 = vcmp.lt.s32.totalorder %v7334_v58, 3 }
 0x140   :  { %v424_v20 = vmul.f32 %v7181_v33, %v376_v12  ;;  %v469_v42 = vadd.f32 %v7243_v38, %v421_v55  ;;  %v358_v33 = vsel %vm344_vm2, %v7280_v57, %v7283_v24  ;;  %v471_v12 = vadd.f32 %v7197_v27, %v423_v49 }
 0x141   :  { %v576_v38 = vsel %vm34_vm3, %v7297_v23, %v7268_v14  ;;  %v584_v57 = vsel %vm34_vm3, %v7268_v14, %v7297_v23  ;;  %v371_v53 = vmul.f32 %v7359_v43, %v358_v33  ;;  %v349_v49 = vsel %vm344_vm2, %v7292_v1, %v7253_v25 }
 0x142   :  { %v472_v55 = vadd.f32 %v7197_v27, %v424_v20  ;;  %v585_v27 = vsel %vm34_vm3, %v7290_v13, %v7241_v30  ;;  %v533_v24 = vadd.f32 %v517_v45, %v469_v42  ;;  %v357_v30 = vsel %vm344_vm2, %v7253_v25, %v7292_v1 }
 0x143   :  { %v7322_v46 = vpop.permute.xlu1 %446  ;;  %v7324_v4 = vpop.permute.xlu0 %619  ;;  %v534_v13 = vadd.f32 %v518_v51, %v470_v10  ;;  %v372_v20 = vmul.f32 %v7362_v44, %v350_v35  ;;  %v516_v14 = vmul.f32 %v7301_v40, %v7080_v61  ;;  %v600_v23 = vmul.f32 %v7411_v0, %v577_v52 }
 0x144   :  { %v601_v42 = vmul.f32 %v7414_v34, %v585_v27  ;;  %v598_v45 = vmul.f32 %v7411_v0, %v576_v38  ;;  %v599_v33 = vmul.f32 %v7414_v34, %v584_v57  ;;  %v575_v25 = vsel %vm34_vm3, %v7316_v17, %v7285_v26 }
 0x145   :  { %607 = vperm.xlu1 %6307, %v6922_v7   ;;  %v7349_v41 = vpop.permute.xlu2 %559  ;;  %v369_v62 = vmul.f32 %v7359_v43, %v357_v30  ;;  %v370_v10 = vmul.f32 %v7362_v44, %v349_v49  ;;  %v648_v52 = vmul.f32 %v7306_v3, %v600_v23  ;;  %v513_v57 = vmul.f32 %v7327_v9, %v7112_v18 }
 0x146   :  { %v646_v51 = vmul.f32 %v7304_v39, %v598_v45  ;;  %v647_v35 = vmul.f32 %v7304_v39, %v599_v33  ;;  %v649_v27 = vmul.f32 %v7306_v3, %v601_v42 }
 0x14b   :  { %v7329_v11 = vpop.permute.xlu1 %316 }
 0x14c   :  { %v7331_v50 = vpop.permute.xlu0 %398 }
 0x14d   :  { %v7382_v63 = vpop.permute.xlu2 %486  ;;  %v419_v61 = vmul.f32 %v7331_v50, %v371_v53  ;;  %v420_v40 = vmul.f32 %v7331_v50, %v372_v20  ;;  %v583_v53 = vsel %vm34_vm3, %v7285_v26, %v7316_v17  ;;  %v596_v50 = vmul.f32 %v7411_v0, %v575_v25 }
 0x14e   :  { %v597_v45 = vmul.f32 %v7414_v34, %v583_v53 }
 0x14f   :  { %v467_v23 = vadd.f32 %v7322_v46, %v419_v61  ;;  %v468_v17 = vadd.f32 %v7322_v46, %v420_v40 }
 0x151   :  { %v532_v40 = vadd.f32 %v516_v14, %v468_v17 }
 0x153   :  { %v7336_v32 = vpop.permute.xlu1 %545 }
 0x154   :  { %v7340_v56 = vpop.permute.xlu0 %394  ;;  %v574_v39 = vsel %vm34_vm3, %v7336_v32, %v7320_v16  ;;  %v582_v26 = vsel %vm34_vm3, %v7320_v16, %v7336_v32 }
 0x155   :  { %v7454_v1 = vpop.permute.xlu2 %328  ;;  %v417_v49 = vmul.f32 %v7340_v56, %v369_v62  ;;  %v418_v3 = vmul.f32 %v7340_v56, %v370_v10  ;;  %v7494_v62 = vadd.f32 %v646_v51, %v533_v24  ;;  %v595_v10 = vmul.f32 %v7414_v34, %v582_v26 }
 0x157   :  { %v643_v14 = vmul.f32 %v7324_v4, %v595_v10 }
 0x15b   :  { %v7345_v7 = vpop.permute.xlu1 %442 }
 0x15c   :  { %v7347_v6 = vpop.permute.xlu0 %390  ;;  %v465_v42 = vadd.f32 %v7345_v7, %v417_v49  ;;  %v466_v33 = vadd.f32 %v7345_v7, %v418_v3 }
 0x15e   :  { %v529_v7 = vadd.f32 %v513_v57, %v465_v42 }
 0x164   :  { %v7374_v54 = vpop.permute.xlu0 %386  ;;  %v7376_v31 = vpop.permute.xlu1 %623 }
 0x165   :  { %v644_v46 = vmul.f32 %v7376_v31, %v596_v50  ;;  %v645_v32 = vmul.f32 %v7376_v31, %v597_v45 }
 0x16c   :  { %v7391_v22 = vpop.permute.xlu0 %382  ;;  %v7393_v60 = vpop.permute.xlu1 %543 }
 0x174   :  { %v7464_v38 = vpop.permute.xlu1 %438 }
 0x175   :  { %v503_v30 = vpop.permute.xlu0 %502 }
 0x176   :  { %v519_v20 = vmul.f32 %v503_v30, %v7004_v48  ;;  %v520_v18 = vmul.f32 %v503_v30, %v7000_v47  ;;  %v514_v47 = vmul.f32 %v7327_v9, %v7053_v36  ;;  %v594_v48 = vmul.f32 %v7411_v0, %v574_v39  ;;  %v7504_v9 = vpop.permute.xlu2 %557 }
 0x178   :  { %v535_v56 = vadd.f32 %v519_v20, %v471_v12  ;;  %v536_v25 = vadd.f32 %v520_v18, %v472_v55  ;;  %v7502_v12 = vadd.f32 %v647_v35, %v534_v13  ;;  %v531_v55 = vadd.f32 %v515_v28, %v467_v23 }
 0x179   :  { %v530_v36 = vadd.f32 %v514_v47, %v466_v33  ;;  %v642_v28 = vmul.f32 %v7324_v4, %v594_v48  ;;  %v7518_v13 = vadd.f32 %v645_v32, %v532_v40  ;;  %v722_v35 = vmul.f32 %v7494_v62, %v7494_v62 }
 0x17a   :  { %v7498_v16 = vadd.f32 %v648_v52, %v535_v56  ;;  %v7500_v61 = vadd.f32 %v649_v27, %v536_v25  ;;  %v7514_v52 = vadd.f32 %v644_v46, %v531_v55  ;;  %v723_v57 = vmul.f32 %v7502_v12, %v7502_v12 }
 0x17b   :  { %v7524_v27 = vadd.f32 %v642_v28, %v529_v7  ;;  %v7529_v53 = vadd.f32 %v643_v14, %v530_v36  ;;  %v721_v50 = vmul.f32 %v7518_v13, %v7518_v13  ;;  %v348_v20 = vsel %vm344_vm2, %v7276_v59, %v7295_v19 }
 0x17c   :  { %678 = vmatpush.msra.mxu0 %v7498_v16  ;;  %698 = vmatpush.msra.mxu1 %v7500_v61  ;;  %v7508_v24 = vpop.permute.xlu1 %312  ;;  %v724_v31 = vmul.f32 %v7498_v16, %v7498_v16  ;;  %v725_v51 = vmul.f32 %v7500_v61, %v7500_v61  ;;  %v720_v4 = vmul.f32 %v7514_v52, %v7514_v52 }
 0x17d   :  { %v718_v49 = vmul.f32 %v7524_v27, %v7524_v27  ;;  %v719_v30 = vmul.f32 %v7529_v53, %v7529_v53  ;;  %v356_v18 = vsel %vm344_vm2, %v7295_v19, %v7276_v59  ;;  %v368_v26 = vmul.f32 %v7362_v44, %v348_v20 }
 0x17e   :  { %679 = vmatpush.msra.mxu0 %v7494_v62  ;;  %699 = vmatpush.msra.mxu1 %v7502_v12  ;;  %v483_v3 = vpop.permute.xlu2 %482  ;;  %v367_v17 = vmul.f32 %v7359_v43, %v356_v18  ;;  %v573_v56 = vsel %vm34_vm3, %v7393_v60, %v7349_v41  ;;  %v581_v59 = vsel %vm34_vm3, %v7349_v41, %v7393_v60  ;;  %v12067_v18 = vld [vmem:[#allocation21_spill] sm:$0xff] }
 0x17f   :  { %734 = vmatpush.msra.mxu2 %v724_v31  ;;  %754 = vmatpush.msra.mxu3 %v725_v51  ;;  %v416_v45 = vmul.f32 %v7347_v6, %v368_v26  ;;  %v511_v47 = vmul.f32 %v7382_v63, %v7105_v15  ;;  %v592_v48 = vmul.f32 %v7411_v0, %v573_v56  ;;  %v556_v51 = vpop.permute.xlu0 %555  ;;  %v12068_v26 = vld [vmem:[#allocation5_spill] sm:$0xff] }
 0x180   :  { %680 = vmatpush.msra.mxu0 %v7514_v52  ;;  %700 = vmatpush.msra.mxu1 %v7518_v13  ;;  %v415_v42 = vmul.f32 %v7347_v6, %v367_v17  ;;  %v512_v6 = vmul.f32 %v7382_v63, %v7124_v21  ;;  %v593_v46 = vmul.f32 %v7414_v34, %v581_v59 }
 0x181   :  { %735 = vmatpush.msra.mxu2 %v722_v35  ;;  %755 = vmatpush.msra.mxu3 %v723_v57  ;;  %v464_v25 = vadd.f32 %v7464_v38, %v416_v45  ;;  %v347_v63 = vsel %vm344_vm2, %v7329_v11, %v7312_v8  ;;  %v355_v36 = vsel %vm344_vm2, %v7312_v8, %v7329_v11  ;;  %v6821_v8 = vmov 14  }
 0x182   :  { %681 = vmatpush.msra.mxu0 %v7524_v27  ;;  %701 = vmatpush.msra.mxu1 %v7529_v53  ;;  %v463_v19 = vadd.f32 %v7464_v38, %v415_v42  ;;  %v365_v28 = vmul.f32 %v7359_v43, %v355_v36  ;;  %v366_v14 = vmul.f32 %v7362_v44, %v347_v63 }
 0x183   :  { %736 = vmatpush.msra.mxu2 %v720_v4  ;;  %756 = vmatpush.msra.mxu3 %v721_v50  ;;  %v528_v7 = vadd.f32 %v512_v6, %v464_v25  ;;  %v510_v17 = vmul.f32 %v483_v3, %v12067_v18 }
 0x184   :  { %v542_v39 = vpop.permute.xlu1 %541  ;;  %v527_v32 = vadd.f32 %v511_v47, %v463_v19  ;;  %v413_v35 = vmul.f32 %v7374_v54, %v365_v28  ;;  %v414_v57 = vmul.f32 %v7374_v54, %v366_v14  ;;  %6313 = vset.pattern.permute.xlu0 %v6821_v8  ;;  %6310 = vset.pattern.permute.xlu2 %v6821_v8 }
 0x185   :  { %737 = vmatpush.msra.mxu2 %v718_v49  ;;  %757 = vmatpush.msra.mxu3 %v719_v30  ;;  %v572_v4 = vsel %vm34_vm3, %v542_v39, %v7504_v9  ;;  %v580_v50 = vsel %vm34_vm3, %v7504_v9, %v542_v39  ;;  %v6820_v49 = vmov 13   ;;  %v509_v54 = vmul.f32 %v483_v3, %v7185_v37 }
 0x186   :  { %v7554_v33 = vpop.permute.xlu2 %539  ;;  %6309 = vset.pattern.permute.xlu1 %v6820_v49  ;;  %897 = vperm.xlu0 %6313, %v6903_v2   ;;  %v590_v9 = vmul.f32 %v7411_v0, %v572_v4  ;;  %v591_v39 = vmul.f32 %v7414_v34, %v580_v50  ;;  %v345_v37 = vsel %vm344_vm2, %v7508_v24, %v7454_v1 }
 0x187   :  { %857 = vperm.xlu1 %6309, %v6911_v5   ;;  %909 = vperm.xlu2 %6310, %v12068_v26   ;;  %v479_v5 = vpop.permute.xlu0 %478  ;;  %v353_v3 = vsel %vm344_vm2, %v7454_v1, %v7508_v24  ;;  %v7637_v1 = vld [vmem:[%s11935_s3 + $0x28] sm:$0xff]  ;;  %v571_v4 = vsel %vm34_vm3, %v7554_v33, %v556_v51 }
 0x18c   :  { %v435_v23 = vpop.permute.xlu1 %434 }
 0x18d   :  { %v461_v30 = vadd.f32 %v435_v23, %v413_v35  ;;  %v462_v20 = vadd.f32 %v435_v23, %v414_v57 }
 0x18e   :  { %v7576_v38 = vpop.permute.xlu2 %430  ;;  %6314 = vset.pattern.permute.xlu0 %v6820_v49 }
 0x18f   :  { %v525_v45 = vadd.f32 %v509_v54, %v461_v30  ;;  %v526_v56 = vadd.f32 %v510_v17, %v462_v20  ;;  %853 = vperm.xlu1 %6309, %v7637_v1   ;;  %v475_v50 = vpop.permute.xlu0 %474 }
 0x195   :  { %v616_v10 = vpop.permute.xlu1 %615 }
 0x196   :  { %v640_v55 = vmul.f32 %v616_v10, %v592_v48  ;;  %v641_v40 = vmul.f32 %v616_v10, %v593_v46  ;;  %v538_v11 = vpop.permute.xlu2 %537  ;;  %v12069_v48 = vld [vmem:[#allocation30_spill] sm:$0xff]  ;;  %v12070_v46 = vld [vmem:[#allocation29_spill] sm:$0xff] }
 0x197   :  { %v354_v10 = vsel %vm344_vm2, %v12070_v46, %v12069_v48  ;;  %v346_v24 = vsel %vm344_vm2, %v12069_v48, %v12070_v46  ;;  %6311 = vset.pattern.permute.xlu1 %v6821_v8  ;;  %vm52_vm2 = vcmp.ge.s32.totalorder %v7334_v58, 3 }
 0x198   :  { %v7572_v41 = vadd.f32 %v640_v55, %v527_v32  ;;  %v7574_v60 = vadd.f32 %v641_v40, %v528_v7  ;;  %v361_v32 = vmul.f32 %v7359_v43, %v353_v3  ;;  %v362_v7 = vmul.f32 %v7362_v44, %v345_v37  ;;  %v7650_v40 = vld [vmem:[%s11935_s3 + $0x38] sm:$0xff]  ;;  %901 = vperm.xlu1 %6311, %v7637_v1   ;;  %v7688_v3 = vld [vmem:[%s11935_s3 + $0x20] sm:$0xff] }
 0x199   :  { %861 = vperm.xlu0 %6314, %v7650_v40   ;;  %v364_v35 = vmul.f32 %v7362_v44, %v346_v24  ;;  %v12072_v44 = vld [vmem:[#allocation20_spill] sm:$0xff] }
 0x19a   :  { %682 = vmatpush.msra.mxu0 %v7572_v41  ;;  %702 = vmatpush.msra.mxu1 %v7574_v60  ;;  %v716_v15 = vmul.f32 %v7572_v41, %v7572_v41  ;;  %v717_v21 = vmul.f32 %v7574_v60, %v7574_v60  ;;  %v508_v18 = vmul.f32 %v479_v5, %v12072_v44 }
 0x19c   :  { %738 = vmatpush.msra.mxu2 %v716_v15  ;;  %758 = vmatpush.msra.mxu3 %v717_v21  ;;  %v7656_v15 = vld [vmem:[%s11935_s3 + $0x30] sm:$0xff]  ;;  %v363_v21 = vmul.f32 %v7359_v43, %v354_v10  ;;  %v579_v43 = vsel %vm34_vm3, %v556_v51, %v7554_v33  ;;  %v588_v51 = vmul.f32 %v7411_v0, %v571_v4 }
 0x19d   :  { %905 = vperm.xlu2 %6310, %v7656_v15  }
 0x19e   :  { %v379_v31 = vpop.permute.xlu1 %378  ;;  %v427_v25 = vpop.permute.xlu2 %426  ;;  %v411_v57 = vmul.f32 %v7391_v22, %v363_v21 }
 0x19f   :  { %v409_v28 = vmul.f32 %v379_v31, %v361_v32  ;;  %v410_v14 = vmul.f32 %v379_v31, %v362_v7  ;;  %v12071_v31 = vld [vmem:[#allocation24_spill] sm:$0xff] }
 0x1a0   :  { %v507_v54 = vmul.f32 %v479_v5, %v12071_v31  ;;  %6315 = vset.pattern.permute.xlu1 %v6820_v49 }
 0x1a1   :  { %v458_v26 = vadd.f32 %v427_v25, %v410_v14  ;;  %849 = vperm.xlu0 %6314, %v7688_v3   ;;  %v7736_v14 = vld [vmem:[%s11935_s3 + $0x10] sm:$0xff] }
 0x1a2   :  { %841 = vperm.xlu1 %6315, %v7736_v14  }
 0x1a5   :  { %6312 = vset.pattern.permute.xlu2 %v6820_v49  ;;  %v7744_v49 = vld [vmem:[%s11935_s3 + $0x8] sm:$0xff] }
 0x1a6   :  { %v604_v17 = vpop.permute.xlu2 %603 }
 0x1a7   :  { %v612_v42 = vpop.permute.xlu1 %611 }
 0x1a8   :  { %v638_v23 = vmul.f32 %v612_v42, %v590_v9  ;;  %v639_v59 = vmul.f32 %v612_v42, %v591_v39  ;;  %v459_v9 = vadd.f32 %v7576_v38, %v411_v57  ;;  %v457_v39 = vadd.f32 %v427_v25, %v409_v28  ;;  %v7730_v28 = vld [vmem:[%s11935_s3] sm:$0xff] }
 0x1a9   :  { %v589_v42 = vmul.f32 %v7414_v34, %v579_v43  ;;  %833 = vperm.xlu0 %6314, %v7730_v28  }
 0x1aa   :  { %v7612_v19 = vadd.f32 %v638_v23, %v525_v45  ;;  %v7614_v2 = vadd.f32 %v639_v59, %v526_v56  ;;  %v12073_v45 = vld [vmem:[#allocation28_spill] sm:$0xff]  ;;  %837 = vperm.xlu1 %6315, %v7744_v49  }
 0x1ab   :  { %v505_v56 = vmul.f32 %v475_v50, %v12073_v45 }
 0x1ac   :  { %683 = vmatpush.msra.mxu0 %v7612_v19  ;;  %703 = vmatpush.msra.mxu1 %v7614_v2  ;;  %v714_v47 = vmul.f32 %v7612_v19, %v7612_v19  ;;  %v715_v6 = vmul.f32 %v7614_v2, %v7614_v2 }
 0x1ae   :  { %739 = vmatpush.msra.mxu2 %v714_v47  ;;  %759 = vmatpush.msra.mxu3 %v715_v6  ;;  %v7695_v47 = vld [vmem:[%s11935_s3 + $0x18] sm:$0xff]  ;;  %v521_v6 = vadd.f32 %v505_v56, %v457_v39 }
 0x1af   :  { %v554_v55 = vpop.permute.xlu1 %553  ;;  %845 = vperm.xlu2 %6312, %v7695_v47  }
 0x1b0   :  { %v570_v63 = vsel %vm34_vm3, %v538_v11, %v554_v55  ;;  %v578_v36 = vsel %vm34_vm3, %v554_v55, %v538_v11  ;;  %v412_v11 = vmul.f32 %v7391_v22, %v364_v35  ;;  %v12074_v22 = vld [vmem:[#allocation26_spill] sm:$0xff]  ;;  %vm53_vm3 = vcmp.ge.s32.totalorder %v7343_v29, 3 }
 0x1b1   :  { %v586_v30 = vmul.f32 %v7411_v0, %v570_v63  ;;  %v587_v20 = vmul.f32 %v7414_v34, %v578_v36  ;;  %v506_v23 = vmul.f32 %v475_v50, %v12074_v22  ;;  %v523_v0 = vadd.f32 %v507_v54, %v459_v9 }
 0x1b2   :  { %v460_v33 = vadd.f32 %v7576_v38, %v412_v11  ;;  %v11975_v36 = vmov 1.0   ;;  %6317 = vset.pattern.permute.xlu1 %v6821_v8 }
 0x1b3   :  { %v634_v59 = vmul.f32 %v604_v17, %v586_v30  ;;  %v635_v5 = vmul.f32 %v604_v17, %v587_v20  ;;  %v522_v48 = vadd.f32 %v506_v23, %v458_v26  ;;  %885 = vperm.xlu1 %6317, %v7744_v49  }
 0x1b4   :  { %v524_v34 = vadd.f32 %v508_v18, %v460_v33 }
 0x1b5   :  { %v7702_v24 = vadd.f32 %v634_v59, %v521_v6  ;;  %v7704_v32 = vadd.f32 %v635_v5, %v522_v48 }
 0x1b7   :  { %v608_v37 = vpop.permute.xlu1 %607  ;;  %v710_v21 = vmul.f32 %v7702_v24, %v7702_v24  ;;  %v711_v63 = vmul.f32 %v7704_v32, %v7704_v32  ;;  %6316 = vset.pattern.permute.xlu2 %v6821_v8 }
 0x1b8   :  { %v636_v38 = vmul.f32 %v608_v37, %v588_v51  ;;  %v637_v25 = vmul.f32 %v608_v37, %v589_v42  ;;  %893 = vperm.xlu2 %6316, %v7695_v47  }
 0x1ba   :  { %v7698_v46 = vadd.f32 %v636_v38, %v523_v0  ;;  %v7700_v10 = vadd.f32 %v637_v25, %v524_v34 }
 0x1bc   :  { %684 = vmatpush.msra.mxu0 %v7698_v46  ;;  %704 = vmatpush.msra.mxu1 %v7700_v10  ;;  %v712_v7 = vmul.f32 %v7698_v46, %v7698_v46  ;;  %v713_v55 = vmul.f32 %v7700_v10, %v7700_v10 }
 0x1be   :  { %685 = vmatpush.msra.mxu0 %v7702_v24  ;;  %705 = vmatpush.msra.mxu1 %v7704_v32 }
 0x1bf   :  { %740 = vmatpush.msra.mxu2 %v712_v7  ;;  %760 = vmatpush.msra.mxu3 %v713_v55 }
 0x1c0   :  { %6086 = vmatmul.msk.f32.vlgmr.msra.gmra.mxu0 %vm666_vm5, %v11975_v36  ;;  %6087 = vmatmul.msk.f32.vlgmr.msra.gmra.mxu1 %vm666_vm5, %v11975_v36 }
 0x1c1   :  { %741 = vmatpush.msra.mxu2 %v710_v21  ;;  %761 = vmatpush.msra.mxu3 %v711_v63 }
 0x1c2   :  { %6088 = vmatmul.msk.f32.vlgmr.msra.gmra.mxu2 %vm666_vm5, %v11975_v36  ;;  %6089 = vmatmul.msk.f32.vlgmr.msra.gmra.mxu3 %vm666_vm5, %v11975_v36 }
 0x1c3   :  { %889 = vperm.xlu2 %6316, %v7736_v14  }
 0x1cb   :  { %881 = vperm.xlu2 %6316, %v7730_v28  }
 0x1e1   :  { %v7753_v57 = vpop.permute.xlu2 %909 }
 0x1f7   :  { %v7757_v17 = vpop.permute.xlu2 %905 }
 0x1f8   :  { %v7759_v51 = vpop.permute.xlu0 %897 }
 0x1f9   :  { %v7751_v35 = vpop.permute.xlu1 %857 }
 0x201   :  { %v7755_v20 = vpop.permute.xlu1 %853 }
 0x209   :  { %v846_v56 = vpop.permute.xlu2 %845 }
 0x20a   :  { %v7761_v42 = vpop.permute.xlu1 %901 }
 0x20b   :  { %v862_v34 = vpop.permute.xlu0 %861 }
 0x214   :  { %v842_v38 = vpop.permute.xlu1 %841 }
 0x23d   :  { %v687_v4 = vpop.f32.mrf.mxu0  ;;  %v707_v43 = vpop.f32.mrf.mxu1 }
 0x23e   :  { %v766_v50 = vmul.f32 0.015625, %v687_v4  ;;  %v767_v30 = vmul.f32 0.015625, %v707_v43  ;;  %v894_v43 = vpop.permute.xlu2 %893 }
 0x240   :  { %v770_v11 = vmul.f32 %v766_v50, %v766_v50  ;;  %v771_v31 = vmul.f32 %v767_v30, %v767_v30  ;;  %v7763_v25 = vperm.slane %v766_v50, 0  ;;  %v7765_v48 = vperm.slane %v767_v30, 0 }
 0x242   :  { %v782_v4 = vsub.f32 %v7572_v41, %v7763_v25  ;;  %v783_v50 = vsub.f32 %v7574_v60, %v7765_v48  ;;  %v787_v30 = vsub.f32 %v7518_v13, %v7765_v48  ;;  %v780_v41 = vsub.f32 %v7612_v19, %v7763_v25  ;;  %v838_v19 = vpop.permute.xlu1 %837 }
 0x243   :  { %v781_v60 = vsub.f32 %v7614_v2, %v7765_v48  ;;  %v784_v13 = vsub.f32 %v7524_v27, %v7763_v25  ;;  %v779_v2 = vsub.f32 %v7700_v10, %v7765_v48  ;;  %v778_v27 = vsub.f32 %v7698_v46, %v7763_v25 }
 0x245   :  { %v743_v54 = vpop.f32.mrf.mxu2  ;;  %v763_v44 = vpop.f32.mrf.mxu3 }
 0x246   :  { %v768_v18 = vmul.f32 0.015625, %v743_v54  ;;  %v769_v8 = vmul.f32 0.015625, %v763_v44 }
 0x248   :  { %v772_v9 = vsub.f32 %v768_v18, %v770_v11  ;;  %v773_v39 = vsub.f32 %v769_v8, %v771_v31  ;;  %v786_v31 = vsub.f32 %v7514_v52, %v7763_v25  ;;  %v790_v18 = vsub.f32 %v7498_v16, %v7763_v25 }
 0x24a   :  { %v792_v26 = vadd.f32 1e-05, %v772_v9  ;;  %v793_v33 = vadd.f32 1e-05, %v773_v39  ;;  %v791_v9 = vsub.f32 %v7500_v61, %v7765_v48  ;;  %v785_v61 = vsub.f32 %v7529_v53, %v7765_v48 }
 0x24c   :  { %6417 = vrsqrt.f32 %v792_v26  ;;  %vm810_vm7 = vweird.f32 %v793_v33  ;;  %vm800_vm9 = vweird.f32 %v792_v26 }
 0x24d   :  { %6419 = vrsqrt.f32 %v793_v33 }
 0x252   :  { %v6418_v45 = vpop.eup %6417 }
 0x253   :  { %v6420_v22 = vpop.eup %6419  ;;  %v795_v23 = vmul.f32 %v6418_v45, %v792_v26  ;;  %vm801_vm6 = vweird.f32 %v6418_v45 }
 0x254   :  { %v805_v59 = vmul.f32 %v6420_v22, %v793_v33  ;;  %vm811_vm8 = vweird.f32 %v6420_v22  ;;  %vm802_vm10 = vmor %vm800_vm9, %vm801_vm6  ;;  %vm46_vm6 = vcmp.lt.s32.totalorder %v7334_v58, 125 }
 0x255   :  { %v796_v5 = vmul.f32 %v6418_v45, %v795_v23  ;;  %vm812_vm11 = vmor %vm810_vm7, %vm811_vm8  ;;  %vm47_vm7 = vcmp.lt.s32.totalorder %v7343_v29, 125 }
 0x256   :  { %v806_v37 = vmul.f32 %v6420_v22, %v805_v59  ;;  %v850_v59 = vpop.permute.xlu0 %849 }
 0x257   :  { %v797_v0 = vmul.f32 0.5, %v796_v5 }
 0x258   :  { %v807_v6 = vmul.f32 0.5, %v806_v37 }
 0x259   :  { %v798_v7 = vsub.f32 1.5, %v797_v0 }
 0x25a   :  { %v808_v55 = vsub.f32 1.5, %v807_v6  ;;  %v776_v6 = vsub.f32 %v7702_v24, %v7763_v25  ;;  %v788_v24 = vsub.f32 %v7494_v62, %v7763_v25 }
 0x25b   :  { %v799_v21 = vmul.f32 %v6418_v45, %v798_v7  ;;  %v777_v7 = vsub.f32 %v7704_v32, %v7765_v48 }
 0x25c   :  { %v809_v63 = vmul.f32 %v6420_v22, %v808_v55 }
 0x25d   :  { %v803_v11 = vsel %vm802_vm10, %v6418_v45, %v799_v21 }
 0x25e   :  { %v814_v54 = vperm.slane %v803_v11, 0  ;;  %v813_v44 = vsel %vm812_vm11, %v6420_v22, %v809_v63 }
 0x25f   :  { %v815_v8 = vperm.slane %v813_v44, 0 }
 0x260   :  { %v822_v39 = vmul.f32 %v814_v54, %v782_v4  ;;  %v826_v52 = vmul.f32 %v814_v54, %v786_v31  ;;  %v830_v26 = vmul.f32 %v814_v54, %v790_v18  ;;  %v820_v33 = vmul.f32 %v814_v54, %v780_v41 }
 0x261   :  { %v823_v45 = vmul.f32 %v815_v8, %v783_v50  ;;  %v827_v22 = vmul.f32 %v815_v8, %v787_v30  ;;  %v831_v16 = vmul.f32 %v815_v8, %v791_v9  ;;  %v821_v23 = vmul.f32 %v815_v8, %v781_v60 }
 0x262   :  { %v878_v5 = vmul.f32 %v862_v34, %v830_v26  ;;  %v874_v37 = vmul.f32 %v7755_v20, %v826_v52  ;;  %v870_v55 = vmul.f32 %v846_v56, %v822_v39  ;;  %v824_v63 = vmul.f32 %v814_v54, %v784_v13  ;;  %v834_v26 = vpop.permute.xlu0 %833 }
 0x263   :  { %v879_v0 = vmul.f32 %v862_v34, %v831_v16  ;;  %v875_v21 = vmul.f32 %v7755_v20, %v827_v22  ;;  %v871_v4 = vmul.f32 %v846_v56, %v823_v45  ;;  %v868_v10 = vmul.f32 %v842_v38, %v820_v33  ;;  %v890_v34 = vpop.permute.xlu2 %889  ;;  %v886_v33 = vpop.permute.xlu1 %885 }
 0x264   :  { %v926_v53 = vadd.f32 %v7753_v57, %v878_v5  ;;  %v869_v11 = vmul.f32 %v842_v38, %v821_v23  ;;  %v825_v50 = vmul.f32 %v815_v8, %v785_v61  ;;  %v872_v30 = vmul.f32 %v850_v59, %v824_v63 }
 0x265   :  { %v927_v46 = vadd.f32 %v7753_v57, %v879_v0  ;;  %v819_v31 = vmul.f32 %v815_v8, %v779_v2  ;;  %v922_v32 = vadd.f32 %v7761_v42, %v874_v37  ;;  %v818_v18 = vmul.f32 %v814_v54, %v778_v27 }
 0x266   :  { %v873_v44 = vmul.f32 %v850_v59, %v825_v50  ;;  %v789_v20 = vsub.f32 %v7502_v12, %v7765_v48  ;;  %v7805_v56 = vadd.f32 %v7761_v42, %v875_v21  ;;  %v7807_v38 = vadd.f32 %v894_v43, %v870_v55 }
 0x267   :  { %v816_v41 = vmul.f32 %v814_v54, %v776_v6  ;;  %v958_v57 = vmul.f32 0.044715, %v926_v53  ;;  %v7809_v9 = vadd.f32 %v894_v43, %v871_v4  ;;  %v7811_v60 = vadd.f32 %v890_v34, %v868_v10 }
 0x268   :  { %v7813_v13 = vadd.f32 %v890_v34, %v869_v11  ;;  %v817_v62 = vmul.f32 %v815_v8, %v777_v7  ;;  %v7816_v25 = vadd.f32 %v7759_v51, %v872_v30  ;;  %v867_v39 = vmul.f32 %v838_v19, %v819_v31 }
 0x269   :  { %v974_v52 = vmul.f32 %v958_v57, %v926_v53  ;;  %v959_v12 = vmul.f32 0.044715, %v927_v46  ;;  %v7819_v42 = vadd.f32 %v7759_v51, %v873_v44  ;;  %v866_v48 = vmul.f32 %v838_v19, %v818_v18 }
 0x26a   :  { %v7821_v45 = vmul.f32 0.5, %v926_v53  ;;  %v828_v43 = vmul.f32 %v814_v54, %v788_v24  ;;  %v864_v22 = vmul.f32 %v834_v26, %v816_v41  ;;  %v829_v59 = vmul.f32 %v815_v8, %v789_v20 }
 0x26b   :  { %v990_v16 = vmul.f32 %v974_v52, %v926_v53  ;;  %v975_v23 = vmul.f32 %v959_v12, %v927_v46  ;;  %v865_v5 = vmul.f32 %v834_v26, %v817_v62  ;;  %v954_v2 = vmul.f32 0.044715, %v922_v32  ;;  %v882_v55 = vpop.permute.xlu2 %881 }
 0x26c   :  { %v876_v61 = vmul.f32 %v7751_v35, %v828_v43  ;;  %v955_v27 = vmul.f32 0.044715, %v7805_v56  ;;  %v7825_v37 = vadd.f32 %v886_v33, %v867_v39  ;;  %v877_v19 = vmul.f32 %v7751_v35, %v829_v59 }
 0x26d   :  { %v1006_v51 = vadd.f32 %v990_v16, %v926_v53  ;;  %v991_v0 = vmul.f32 %v975_v23, %v927_v46  ;;  %v970_v54 = vmul.f32 %v954_v2, %v922_v32  ;;  %v952_v8 = vmul.f32 0.044715, %v7816_v25 }
 0x26e   :  { %v7829_v6 = vadd.f32 %v7757_v17, %v876_v61  ;;  %v971_v7 = vmul.f32 %v955_v27, %v7805_v56  ;;  %v943_v63 = vmul.f32 0.5, %v927_v46  ;;  %v925_v10 = vadd.f32 %v7757_v17, %v877_v19 }
 0x26f   :  { %v1022_v21 = vmul.f32 0.7978846, %v1006_v51  ;;  %v1007_v4 = vadd.f32 %v991_v0, %v927_v46  ;;  %v7834_v11 = vadd.f32 %v882_v55, %v864_v22  ;;  %v986_v50 = vmul.f32 %v970_v54, %v922_v32 }
 0x270   :  { %v956_v53 = vmul.f32 0.044715, %v7829_v6  ;;  %v987_v35 = vmul.f32 %v971_v7, %v7805_v56  ;;  %v7838_v30 = vadd.f32 %v882_v55, %v865_v5  ;;  %v957_v31 = vmul.f32 0.044715, %v925_v10 }
 0x271   :  { %6421 = vtanh.f32 %v1022_v21  ;;  %v1023_v34 = vmul.f32 0.7978846, %v1007_v4  ;;  %v1002_v44 = vadd.f32 %v986_v50, %v922_v32  ;;  %v968_v46 = vmul.f32 %v952_v8, %v7816_v25 }
 0x272   :  { %v972_v24 = vmul.f32 %v956_v53, %v7829_v6  ;;  %v1003_v18 = vadd.f32 %v987_v35, %v7805_v56  ;;  %v7843_v17 = vadd.f32 %v886_v33, %v866_v48  ;;  %v973_v20 = vmul.f32 %v957_v31, %v925_v10 }
 0x273   :  { %6423 = vtanh.f32 %v1023_v34  ;;  %v953_v41 = vmul.f32 0.044715, %v7819_v42  ;;  %v7847_v62 = vmul.f32 0.5, %v922_v32  ;;  %v1018_v39 = vmul.f32 0.7978846, %v1002_v44 }
 0x274   :  { %v988_v57 = vmul.f32 %v972_v24, %v7829_v6  ;;  %v984_v52 = vmul.f32 %v968_v46, %v7816_v25  ;;  %v989_v12 = vmul.f32 %v973_v20, %v925_v10  ;;  %v1019_v26 = vmul.f32 0.7978846, %v1003_v18 }
 0x275   :  { %v969_v43 = vmul.f32 %v953_v41, %v7819_v42  ;;  %v950_v22 = vmul.f32 0.044715, %v7807_v38  ;;  %v7854_v33 = vmul.f32 0.5, %v7805_v56  ;;  %v951_v23 = vmul.f32 0.044715, %v7809_v9 }
 0x276   :  { %v1004_v48 = vadd.f32 %v988_v57, %v7829_v6  ;;  %v1000_v16 = vadd.f32 %v984_v52, %v7816_v25  ;;  %v1005_v59 = vadd.f32 %v989_v12, %v925_v10  ;;  %6425 = vtanh.f32 %v1018_v39 }
 0x277   :  { %v6422_v32 = vpop.eup %6421  ;;  %v985_v5 = vmul.f32 %v969_v43, %v7819_v42  ;;  %v966_v61 = vmul.f32 %v950_v22, %v7807_v38  ;;  %v967_v0 = vmul.f32 %v951_v23, %v7809_v9  ;;  %6427 = vtanh.f32 %v1019_v26 }
 0x278   :  { %v1054_v2 = vadd.f32 1.0, %v6422_v32  ;;  %v1020_v27 = vmul.f32 0.7978846, %v1004_v48  ;;  %v1016_v51 = vmul.f32 0.7978846, %v1000_v16  ;;  %v936_v34 = vmul.f32 0.5, %v7816_v25 }
 0x279   :  { %v6424_v19 = vpop.eup %6423  ;;  %v1021_v54 = vmul.f32 0.7978846, %v1005_v59  ;;  %v1001_v56 = vadd.f32 %v985_v5, %v7819_v42  ;;  %v982_v7 = vmul.f32 %v966_v61, %v7807_v38  ;;  %v983_v21 = vmul.f32 %v967_v0, %v7809_v9 }
 0x27a   :  { %v1070_v8 = vmul.f32 %v1054_v2, %v7821_v45  ;;  %v1055_v55 = vadd.f32 1.0, %v6424_v19  ;;  %6429 = vtanh.f32 %v1020_v27  ;;  %v948_v50 = vmul.f32 0.044715, %v7811_v60 }
 0x27b   :  { %6431 = vtanh.f32 %v1021_v54  ;;  %v1017_v4 = vmul.f32 0.7978846, %v1001_v56  ;;  %v998_v53 = vadd.f32 %v982_v7, %v7807_v38  ;;  %v999_v31 = vadd.f32 %v983_v21, %v7809_v9 }
 0x27c   :  { %1144 = vmatpush.msrb.mxu0 %v1070_v8  ;;  %v1071_v35 = vmul.f32 %v1055_v55, %v943_v63  ;;  %6433 = vtanh.f32 %v1016_v51  ;;  %v6426_v24 = vpop.eup %6425  ;;  %v937_v45 = vmul.f32 0.5, %v7819_v42  ;;  %v964_v18 = vmul.f32 %v948_v50, %v7811_v60 }
 0x27d   :  { %6435 = vtanh.f32 %v1017_v4  ;;  %v1014_v44 = vmul.f32 0.7978846, %v998_v53  ;;  %v940_v46 = vmul.f32 0.5, %v7829_v6  ;;  %v941_v20 = vmul.f32 0.5, %v925_v10  ;;  %v6428_v63 = vpop.eup %6427 }
 0x27e   :  { %1185 = vmatpush.msrb.mxu1 %v1071_v35  ;;  %v1015_v41 = vmul.f32 0.7978846, %v999_v31  ;;  %v949_v57 = vmul.f32 0.044715, %v7813_v13  ;;  %v934_v25 = vmul.f32 0.5, %v7807_v38  ;;  %v980_v39 = vmul.f32 %v964_v18, %v7811_v60 }
 0x27f   :  { %6437 = vtanh.f32 %v1014_v44  ;;  %v946_v52 = vmul.f32 0.044715, %v7843_v17  ;;  %v1050_v12 = vadd.f32 1.0, %v6426_v24  ;;  %v935_v26 = vmul.f32 0.5, %v7809_v9 }
 0x280   :  { %v6430_v42 = vpop.eup %6429  ;;  %6439 = vtanh.f32 %v1015_v41  ;;  %v965_v43 = vmul.f32 %v949_v57, %v7813_v13  ;;  %v996_v22 = vadd.f32 %v980_v39, %v7811_v60  ;;  %v947_v38 = vmul.f32 0.044715, %v7825_v37 }
 0x281   :  { %v6432_v6 = vpop.eup %6431  ;;  %v1052_v10 = vadd.f32 1.0, %v6430_v42  ;;  %v962_v48 = vmul.f32 %v946_v52, %v7843_v17  ;;  %v1051_v32 = vadd.f32 1.0, %v6428_v63  ;;  %v944_v5 = vmul.f32 0.044715, %v7834_v11 }
 0x282   :  { %v6434_v16 = vpop.eup %6433  ;;  %v1053_v23 = vadd.f32 1.0, %v6432_v6  ;;  %v981_v59 = vmul.f32 %v965_v43, %v7813_v13  ;;  %v1012_v27 = vmul.f32 0.7978846, %v996_v22  ;;  %v963_v56 = vmul.f32 %v947_v38, %v7825_v37 }
 0x283   :  { %v6436_v61 = vpop.eup %6435  ;;  %v1068_v9 = vmul.f32 %v1052_v10, %v940_v46  ;;  %v1048_v2 = vadd.f32 1.0, %v6434_v16  ;;  %v978_v51 = vmul.f32 %v962_v48, %v7843_v17  ;;  %v1066_v8 = vmul.f32 %v1050_v12, %v7847_v62 }
 0x284   :  { %v1069_v0 = vmul.f32 %v1053_v23, %v941_v20  ;;  %v1049_v19 = vadd.f32 1.0, %v6436_v61  ;;  %v997_v54 = vadd.f32 %v981_v59, %v7813_v13  ;;  %6441 = vtanh.f32 %v1012_v27 }
 0x285   :  { %v6438_v7 = vpop.eup %6437  ;;  %1145 = vmatpush.msrb.mxu0 %v1068_v9  ;;  %v994_v55 = vadd.f32 %v978_v51, %v7843_v17  ;;  %v960_v21 = vmul.f32 %v944_v5, %v7834_v11  ;;  %v1067_v53 = vmul.f32 %v1051_v32, %v7854_v33  ;;  %v979_v31 = vmul.f32 %v963_v56, %v7825_v37  ;;  %v1073_v56 = vld [vmem:[%s11936_s4 + $0x8] sm:$0xff] }
 0x286   :  { %v6440_v4 = vpop.eup %6439  ;;  %1186 = vmatpush.msrb.mxu1 %v1069_v0  ;;  %v1046_v50 = vadd.f32 1.0, %v6438_v7  ;;  %v1013_v35 = vmul.f32 0.7978846, %v997_v54  ;;  %v1064_v24 = vmul.f32 %v1048_v2, %v936_v34  ;;  %v1065_v62 = vmul.f32 %v1049_v19, %v937_v45  ;;  %v1072_v0 = vld [vmem:[%s11936_s4] sm:$0xff]  ;;  %v1075_v7 = vld [vmem:[%s11936_s4 + $0x18] sm:$0xff] }
 0x287   :  { %1146 = vmatpush.msrb.mxu0 %v1066_v8  ;;  %v1047_v44 = vadd.f32 1.0, %v6440_v4  ;;  %v1010_v18 = vmul.f32 0.7978846, %v994_v55  ;;  %v976_v46 = vmul.f32 %v960_v21, %v7834_v11  ;;  %v995_v20 = vadd.f32 %v979_v31, %v7825_v37  ;;  %v1076_v8 = vld [vmem:[%s11936_s4 + $0x20] sm:$0xff]  ;;  %v1077_v55 = vld [vmem:[%s11936_s4 + $0x28] sm:$0xff]  ;;  %v1078_v21 = vld [vmem:[%s11936_s4 + $0x30] sm:$0xff] }
 0x288   :  { %1187 = vmatpush.msrb.mxu1 %v1067_v53  ;;  %6443 = vtanh.f32 %v1013_v35  ;;  %v945_v41 = vmul.f32 0.044715, %v7838_v30  ;;  %v1062_v57 = vmul.f32 %v1046_v50, %v934_v25  ;;  %v6823_v52 = vmov 15   ;;  %v1079_v4 = vld [vmem:[%s11936_s4 + $0x38] sm:$0xff] }
 0x289   :  { %1147 = vmatpush.msrb.mxu0 %v1064_v24  ;;  %6445 = vtanh.f32 %v1010_v18  ;;  %v992_v33 = vadd.f32 %v976_v46, %v7834_v11  ;;  %v1063_v63 = vmul.f32 %v1047_v44, %v935_v26  ;;  %v1011_v39 = vmul.f32 0.7978846, %v995_v20  ;;  %6320 = vset.pattern.permute.xlu0 %v6823_v52 }
 0x28a   :  { %1188 = vmatpush.msrb.mxu1 %v1065_v62  ;;  %v961_v34 = vmul.f32 %v945_v41, %v7838_v30  ;;  %v6442_v42 = vpop.eup %6441  ;;  %1101 = vperm.xlu0 %6320, %v7637_v1   ;;  %v932_v12 = vmul.f32 0.5, %v7811_v60  ;;  %v933_v48 = vmul.f32 0.5, %v7813_v13  ;;  %v930_v60 = vmul.f32 0.5, %v7843_v17 }
 0x28b   :  { %1148 = vmatpush.msrb.mxu0 %v1062_v57  ;;  %v1008_v45 = vmul.f32 0.7978846, %v992_v33  ;;  %v1044_v43 = vadd.f32 1.0, %v6442_v42  ;;  %6447 = vtanh.f32 %v1011_v39  ;;  %6318 = vset.pattern.permute.xlu1 %v6823_v52  ;;  %v931_v9 = vmul.f32 0.5, %v7825_v37 }
 0x28c   :  { %1189 = vmatpush.msrb.mxu1 %v1063_v63  ;;  %v977_v25 = vmul.f32 %v961_v34, %v7838_v30  ;;  %1109 = vperm.xlu1 %6318, %v7650_v40   ;;  %v928_v13 = vmul.f32 0.5, %v7834_v11  ;;  %v929_v37 = vmul.f32 0.5, %v7838_v30  ;;  %v6824_v57 = vmov 16  }
 0x28d   :  { %6449 = vtanh.f32 %v1008_v45  ;;  %6319 = vset.pattern.permute.xlu2 %v6823_v52  ;;  %v1060_v6 = vmul.f32 %v1044_v43, %v932_v12  ;;  %v6825_v42 = vmov 17  }
 0x28e   :  { %v6444_v26 = vpop.eup %6443  ;;  %v993_v10 = vadd.f32 %v977_v25, %v7838_v30  ;;  %1105 = vperm.xlu2 %6319, %v7656_v15   ;;  %v1074_v30 = vld [vmem:[%s11936_s4 + $0x10] sm:$0xff] }
 0x28f   :  { %v6446_v22 = vpop.eup %6445  ;;  %v1045_v38 = vadd.f32 1.0, %v6444_v26  ;;  %1149 = vmatpush.msrb.mxu0 %v1060_v6 }
 0x290   :  { %v1042_v16 = vadd.f32 1.0, %v6446_v22  ;;  %v1009_v23 = vmul.f32 0.7978846, %v993_v10 }
 0x291   :  { %v1061_v32 = vmul.f32 %v1045_v38, %v933_v48  ;;  %v6448_v59 = vpop.eup %6447 }
 0x292   :  { %v1058_v5 = vmul.f32 %v1042_v16, %v930_v60  ;;  %6451 = vtanh.f32 %v1009_v23  ;;  %v1043_v2 = vadd.f32 1.0, %v6448_v59  ;;  %1081 = vperm.xlu0 %6320, %v7730_v28  }
 0x293   :  { %v6450_v61 = vpop.eup %6449  ;;  %1190 = vmatpush.msrb.mxu1 %v1061_v32 }
 0x294   :  { %1150 = vmatpush.msrb.mxu0 %v1058_v5  ;;  %v1040_v27 = vadd.f32 1.0, %v6450_v61  ;;  %v1059_v51 = vmul.f32 %v1043_v2, %v931_v9  ;;  %1097 = vperm.xlu1 %6318, %v7688_v3   ;;  %v6826_v2 = vmov 8  }
 0x296   :  { %v1056_v17 = vmul.f32 %v1040_v27, %v928_v13  ;;  %1093 = vperm.xlu2 %6319, %v7695_v47   ;;  %1191 = vmatpush.msrb.mxu1 %v1059_v51 }
 0x298   :  { %v6452_v19 = vpop.eup %6451  ;;  %1151 = vmatpush.msrb.mxu0 %v1056_v17 }
 0x299   :  { %v1041_v54 = vadd.f32 1.0, %v6452_v19  ;;  %6090 = vmatmul.msk.f32.vlgmr.msrb.gmra.mxu0 %vm666_vm5, %v1072_v0 }
 0x29a   :  { %6324 = vset.pattern.permute.xlu0 %v6824_v57 }
 0x29b   :  { %v1057_v11 = vmul.f32 %v1041_v54, %v929_v37  ;;  %1393 = vperm.xlu0 %6324, %v7695_v47  }
 0x29c   :  { %1089 = vperm.xlu1 %6318, %v7736_v14  }
 0x29d   :  { %1192 = vmatpush.msrb.mxu1 %v1057_v11 }
 0x29e   :  { %6098 = vmatmul.msk.f32.vlgmr.msrb.gmra.mxu1 %vm666_vm5, %v1072_v0  ;;  %1085 = vperm.xlu2 %6319, %v7744_v49  }
 0x2a1   :  { %6091 = vmatmul.msk.f32.gmra.mxu0 %vm666_vm5, %v1073_v56 }
 0x2a3   :  { %6325 = vset.pattern.permute.xlu0 %v6825_v42 }
 0x2a4   :  { %6321 = vset.pattern.permute.xlu1 %v6824_v57  ;;  %1457 = vperm.xlu0 %6325, %v7650_v40  }
 0x2a5   :  { %1409 = vperm.xlu1 %6321, %v7650_v40  }
 0x2a6   :  { %6099 = vmatmul.msk.f32.gmra.mxu1 %vm666_vm5, %v1073_v56  ;;  %6322 = vset.pattern.permute.xlu2 %v6824_v57  ;;  %v6827_v56 = vmov 6  }
 0x2a7   :  { %1405 = vperm.xlu2 %6322, %v7656_v15  }
 0x2a9   :  { %6092 = vmatmul.msk.f32.gmra.mxu0 %vm666_vm5, %v1074_v30 }
 0x2ac   :  { %1437 = vperm.xlu0 %6325, %v7736_v14  }
 0x2ad   :  { %1401 = vperm.xlu1 %6321, %v7637_v1  }
 0x2ae   :  { %6100 = vmatmul.msk.f32.gmra.mxu1 %vm666_vm5, %v1074_v30 }
 0x2af   :  { %6323 = vset.pattern.permute.xlu2 %v6825_v42 }
 0x2b0   :  { %1453 = vperm.xlu2 %6323, %v7656_v15  }
 0x2b1   :  { %6093 = vmatmul.msk.f32.gmra.mxu0 %vm666_vm5, %v1075_v7 }
 0x2b4   :  { %6342 = vset.pattern.permute.xlu0 %v6826_v2 }
 0x2b5   :  { %1397 = vperm.xlu1 %6321, %v7688_v3   ;;  %1959 = vperm.xlu0 %6342, %v7688_v3  }
 0x2b6   :  { %6101 = vmatmul.msk.f32.gmra.mxu1 %vm666_vm5, %v1075_v7 }
 0x2b8   :  { %1449 = vperm.xlu2 %6323, %v7637_v1  }
 0x2b9   :  { %6094 = vmatmul.msk.f32.gmra.mxu0 %vm666_vm5, %v1076_v8 }
 0x2bd   :  { %6326 = vset.pattern.permute.xlu1 %v6825_v42  ;;  %6343 = vset.pattern.permute.xlu0 %v6827_v56 }
 0x2be   :  { %6102 = vmatmul.msk.f32.gmra.mxu1 %vm666_vm5, %v1076_v8  ;;  %1445 = vperm.xlu1 %6326, %v7688_v3  }
 0x2bf   :  { %1746 = vperm.xlu0 %6343, %v7650_v40  }
 0x2c0   :  { %6327 = vset.pattern.permute.xlu2 %v6824_v57 }
 0x2c1   :  { %6095 = vmatmul.msk.f32.gmra.mxu0 %vm666_vm5, %v1077_v55  ;;  %1389 = vperm.xlu2 %6327, %v7736_v14  }
 0x2c6   :  { %6103 = vmatmul.msk.f32.gmra.mxu1 %vm666_vm5, %v1077_v55  ;;  %1441 = vperm.xlu1 %6326, %v7695_v47  }
 0x2c9   :  { %6096 = vmatmul.msk.f32.gmra.mxu0 %vm666_vm5, %v1078_v21  ;;  %1385 = vperm.xlu2 %6327, %v7744_v49  }
 0x2ce   :  { %6104 = vmatmul.msk.f32.gmra.mxu1 %vm666_vm5, %v1078_v21  ;;  %6328 = vset.pattern.permute.xlu1 %v6824_v57 }
 0x2cf   :  { %1381 = vperm.xlu1 %6328, %v7730_v28  }
 0x2d1   :  { %6097 = vmatmul.msk.f32.gmra.mxu0 %vm666_vm5, %v1079_v4  ;;  %6329 = vset.pattern.permute.xlu2 %v6825_v42 }
 0x2d2   :  { %1433 = vperm.xlu2 %6329, %v7744_v49  }
 0x2d6   :  { %6105 = vmatmul.msk.f32.gmra.mxu1 %vm666_vm5, %v1079_v4 }
 0x2d7   :  { %6330 = vset.pattern.permute.xlu1 %v6825_v42 }
 0x2d8   :  { %1429 = vperm.xlu1 %6330, %v7730_v28  }
 0x2e8   :  { %v1106_v39 = vpop.permute.xlu2 %1105 }
 0x2f0   :  { %v1094_v12 = vpop.permute.xlu2 %1093 }
 0x2f8   :  { %v1086_v23 = vpop.permute.xlu2 %1085 }
 0x2fc   :  { %v1102_v26 = vpop.permute.xlu0 %1101 }
 0x2fe   :  { %v1110_v33 = vpop.permute.xlu1 %1109 }
 0x304   :  { %v1082_v5 = vpop.permute.xlu0 %1081 }
 0x306   :  { %v1098_v45 = vpop.permute.xlu1 %1097 }
 0x30e   :  { %v1090_v38 = vpop.permute.xlu1 %1089 }
 0x316   :  { %v7952_v53 = vpop.f32.mrf.mxu0 }
 0x317   :  { %v8012_v13 = vadd.f32 %v7952_v53, %v1082_v5  ;;  %v1410_v57 = vpop.permute.xlu1 %1409 }
 0x319   :  { %v1258_v4 = vmul.f32 %v8012_v13, %v8012_v13 }
 0x31b   :  { %v7954_v50 = vpop.f32.mrf.mxu1 }
 0x31c   :  { %v8034_v0 = vadd.f32 %v7954_v50, %v1082_v5  ;;  %v6753_v50 = vld [vmem:[%s11935_s3 + $0x30] sm:$0xff] }
 0x31d   :  { %1742 = vperm.xlu0 %6343, %v6753_v50  }
 0x31e   :  { %v1156_v35 = vpop.f32.mrf.mxu0 }
 0x31f   :  { %v8003_v61 = vadd.f32 %v1156_v35, %v1086_v23 }
 0x321   :  { %v1260_v21 = vmul.f32 %v8003_v61, %v8003_v61 }
 0x323   :  { %v7956_v31 = vpop.f32.mrf.mxu1 }
 0x324   :  { %v8026_v17 = vadd.f32 %v7956_v31, %v1086_v23  ;;  %v1259_v31 = vmul.f32 %v8034_v0, %v8034_v0 }
 0x325   :  { %1730 = vperm.xlu0 %6343, %v7695_v47   ;;  %v6755_v47 = vld [vmem:[%s11935_s3 + $0x28] sm:$0xff] }
 0x326   :  { %v1159_v24 = vpop.f32.mrf.mxu0  ;;  %v1261_v35 = vmul.f32 %v8026_v17, %v8026_v17 }
 0x327   :  { %v7996_v59 = vadd.f32 %v1159_v24, %v1090_v38  ;;  %v6828_v24 = vmov 7  }
 0x328   :  { %6332 = vset.pattern.permute.xlu2 %v6828_v24 }
 0x329   :  { %v1262_v8 = vmul.f32 %v7996_v59, %v7996_v59 }
 0x32b   :  { %v7958_v44 = vpop.f32.mrf.mxu1 }
 0x32c   :  { %v8017_v27 = vadd.f32 %v7958_v44, %v1090_v38  ;;  %v6754_v44 = vld [vmem:[%s11935_s3 + $0x38] sm:$0xff] }
 0x32d   :  { %1842 = vperm.xlu2 %6332, %v6754_v44   ;;  %1726 = vperm.xlu0 %6343, %v7736_v14  }
 0x32e   :  { %v1162_v18 = vpop.f32.mrf.mxu0  ;;  %v1263_v53 = vmul.f32 %v8017_v27, %v8017_v27 }
 0x32f   :  { %v7990_v16 = vadd.f32 %v1162_v18, %v1094_v12  ;;  %v6829_v18 = vmov 18  }
 0x330   :  { %6331 = vset.pattern.permute.xlu1 %v6829_v18 }
 0x331   :  { %v1264_v30 = vmul.f32 %v7990_v16, %v7990_v16  ;;  %1794 = vperm.xlu1 %6331, %v6754_v44  }
 0x333   :  { %v1203_v46 = vpop.f32.mrf.mxu1 }
 0x334   :  { %v8007_v9 = vadd.f32 %v1203_v46, %v1094_v12  ;;  %v6756_v46 = vld [vmem:[%s11935_s3 + $0x20] sm:$0xff] }
 0x335   :  { %6334 = vset.pattern.permute.xlu2 %v6829_v18  ;;  %1722 = vperm.xlu0 %6343, %v7744_v49  }
 0x336   :  { %v1165_v62 = vpop.f32.mrf.mxu0  ;;  %v1265_v40 = vmul.f32 %v8007_v9, %v8007_v9  ;;  %1790 = vperm.xlu2 %6334, %v6753_v50  }
 0x337   :  { %v7983_v15 = vadd.f32 %v1165_v62, %v1098_v45  ;;  %v6757_v62 = vld [vmem:[%s11935_s3 + $0x18] sm:$0xff] }
 0x339   :  { %v1266_v54 = vmul.f32 %v7983_v15, %v7983_v15  ;;  %6333 = vset.pattern.permute.xlu1 %v6827_v56 }
 0x33a   :  { %1738 = vperm.xlu1 %6333, %v6755_v47  }
 0x33b   :  { %v1206_v20 = vpop.f32.mrf.mxu1 }
 0x33c   :  { %v7999_v1 = vadd.f32 %v1206_v20, %v1098_v45 }
 0x33d   :  { %6344 = vset.pattern.permute.xlu0 %v6828_v24 }
 0x33e   :  { %v1168_v41 = vpop.f32.mrf.mxu0  ;;  %v1267_v55 = vmul.f32 %v7999_v1, %v7999_v1  ;;  %1786 = vperm.xlu2 %6334, %v6755_v47   ;;  %1838 = vperm.xlu0 %6344, %v6753_v50  }
 0x33f   :  { %v7977_v10 = vadd.f32 %v1168_v41, %v1102_v26 }
 0x341   :  { %v1268_v19 = vmul.f32 %v7977_v10, %v7977_v10 }
 0x342   :  { %6335 = vset.pattern.permute.xlu1 %v6826_v2 }
 0x343   :  { %v1209_v63 = vpop.f32.mrf.mxu1  ;;  %1971 = vperm.xlu1 %6335, %v6754_v44  }
 0x344   :  { %v7993_v32 = vadd.f32 %v1209_v63, %v1102_v26  ;;  %v8116_v26 = vpop.permute.xlu2 %1405 }
 0x346   :  { %v1171_v34 = vpop.f32.mrf.mxu0  ;;  %v1269_v7 = vmul.f32 %v7993_v32, %v7993_v32  ;;  %6339 = vset.pattern.permute.xlu2 %v6828_v24  ;;  %1834 = vperm.xlu0 %6344, %v6755_v47  }
 0x347   :  { %v7973_v6 = vadd.f32 %v1171_v34, %v1106_v39  ;;  %1830 = vperm.xlu2 %6339, %v6756_v46  }
 0x349   :  { %v1270_v3 = vmul.f32 %v7973_v6, %v7973_v6 }
 0x34b   :  { %v1212_v52 = vpop.f32.mrf.mxu1  ;;  %6336 = vset.pattern.permute.xlu1 %v6827_v56 }
 0x34c   :  { %v7987_v60 = vadd.f32 %v1212_v52, %v1106_v39  ;;  %1734 = vperm.xlu1 %6336, %v6756_v46  }
 0x34e   :  { %v1174_v43 = vpop.f32.mrf.mxu0  ;;  %v1271_v11 = vmul.f32 %v7987_v60, %v7987_v60  ;;  %1818 = vperm.xlu0 %6344, %v7744_v49  }
 0x34f   :  { %v7971_v25 = vadd.f32 %v1174_v43, %v1110_v33  ;;  %1826 = vperm.xlu2 %6339, %v6757_v62  }
 0x351   :  { %1226 = vmatpush.msrb.mxu2 %v7971_v25  ;;  %v1272_v51 = vmul.f32 %v7971_v25, %v7971_v25 }
 0x353   :  { %v1215_v22 = vpop.f32.mrf.mxu1  ;;  %1227 = vmatpush.msrb.mxu2 %v7973_v6 }
 0x354   :  { %v7980_v48 = vadd.f32 %v1215_v22, %v1110_v33  ;;  %6337 = vset.pattern.permute.xlu1 %v6826_v2  ;;  %v8118_v22 = vpop.permute.xlu1 %1401 }
 0x355   :  { %1228 = vmatpush.msrb.mxu2 %v7977_v10  ;;  %1967 = vperm.xlu1 %6337, %v6753_v50  }
 0x356   :  { %1246 = vmatpush.msrb.mxu3 %v7980_v48  ;;  %v1273_v37 = vmul.f32 %v7980_v48, %v7980_v48 }
 0x357   :  { %1229 = vmatpush.msrb.mxu2 %v7983_v15  ;;  %1822 = vperm.xlu2 %6339, %v7736_v14  }
 0x358   :  { %1247 = vmatpush.msrb.mxu3 %v7987_v60 }
 0x359   :  { %1230 = vmatpush.msrb.mxu2 %v7990_v16 }
 0x35a   :  { %1248 = vmatpush.msrb.mxu3 %v7993_v32 }
 0x35b   :  { %1231 = vmatpush.msrb.mxu2 %v7996_v59 }
 0x35c   :  { %1249 = vmatpush.msrb.mxu3 %v7999_v1 }
 0x35d   :  { %1232 = vmatpush.msrb.mxu2 %v8003_v61  ;;  %6338 = vset.pattern.permute.xlu1 %v6829_v18 }
 0x35e   :  { %1250 = vmatpush.msrb.mxu3 %v8007_v9  ;;  %1782 = vperm.xlu1 %6338, %v6756_v46  }
 0x35f   :  { %1233 = vmatpush.msrb.mxu2 %v8012_v13  ;;  %6347 = vset.pattern.permute.xlu2 %v6829_v18 }
 0x360   :  { %1251 = vmatpush.msrb.mxu3 %v8017_v27  ;;  %6106 = vmatmul.msk.f32.vlgmr.msrb.gmra.mxu2 %vm666_vm5, %v11975_v36 }
 0x361   :  { %1282 = vmatpush.msra.mxu2 %v1272_v51  ;;  %1770 = vperm.xlu2 %6347, %v7744_v49   ;;  %v8120_v51 = vpop.permute.xlu2 %1453 }
 0x362   :  { %1252 = vmatpush.msrb.mxu3 %v8026_v17 }
 0x363   :  { %1283 = vmatpush.msra.mxu2 %v1270_v3 }
 0x364   :  { %1253 = vmatpush.msrb.mxu3 %v8034_v0 }
 0x365   :  { %6107 = vmatmul.msk.f32.vlgmr.msrb.gmra.mxu3 %vm666_vm5, %v11975_v36  ;;  %1284 = vmatpush.msra.mxu2 %v1268_v19 }
 0x366   :  { %1302 = vmatpush.msra.mxu3 %v1273_v37  ;;  %6340 = vset.pattern.permute.xlu1 %v6826_v2 }
 0x367   :  { %1285 = vmatpush.msra.mxu2 %v1266_v54  ;;  %1963 = vperm.xlu1 %6340, %v6755_v47   ;;  %v1398_v54 = vpop.permute.xlu1 %1397 }
 0x368   :  { %1303 = vmatpush.msra.mxu3 %v1271_v11 }
 0x369   :  { %1286 = vmatpush.msra.mxu2 %v1264_v30  ;;  %1766 = vperm.xlu2 %6347, %v7730_v28   ;;  %v8124_v30 = vpop.permute.xlu0 %1393 }
 0x36a   :  { %1304 = vmatpush.msra.mxu3 %v1269_v7 }
 0x36b   :  { %1287 = vmatpush.msra.mxu2 %v1262_v8 }
 0x36c   :  { %1305 = vmatpush.msra.mxu3 %v1267_v55 }
 0x36d   :  { %1288 = vmatpush.msra.mxu2 %v1260_v21 }
 0x36e   :  { %1306 = vmatpush.msra.mxu3 %v1265_v40 }
 0x36f   :  { %1289 = vmatpush.msra.mxu2 %v1258_v4  ;;  %6341 = vset.pattern.permute.xlu1 %v6829_v18  ;;  %v8142_v18 = vpop.permute.xlu2 %1449 }
 0x370   :  { %1307 = vmatpush.msra.mxu3 %v1263_v53  ;;  %6108 = vmatmul.msk.f32.vlgmr.msra.gmra.mxu2 %vm666_vm5, %v11975_v36 }
 0x371   :  { %1778 = vperm.xlu1 %6341, %v6757_v62   ;;  %6349 = vset.pattern.permute.xlu2 %v6826_v2 }
 0x372   :  { %1308 = vmatpush.msra.mxu3 %v1261_v35 }
 0x374   :  { %1309 = vmatpush.msra.mxu3 %v1259_v31 }
 0x375   :  { %6109 = vmatmul.msk.f32.vlgmr.msra.gmra.mxu3 %vm666_vm5, %v11975_v36 }
 0x379   :  { %1774 = vperm.xlu1 %6341, %v7736_v14  }
 0x381   :  { %6345 = vset.pattern.permute.xlu1 %v6826_v2 }
 0x382   :  { %1955 = vperm.xlu1 %6345, %v6757_v62  }
 0x38a   :  { %6346 = vset.pattern.permute.xlu1 %v6827_v56 }
 0x38b   :  { %1718 = vperm.xlu1 %6346, %v7730_v28  }
 0x393   :  { %6348 = vset.pattern.permute.xlu1 %v6826_v2 }
 0x394   :  { %1951 = vperm.xlu1 %6348, %v7736_v14  }
 0x3e3   :  { %v1235_v49 = vpop.f32.mrf.mxu2 }
 0x3e4   :  { %v1314_v41 = vmul.f32 0.015625, %v1235_v49 }
 0x3e6   :  { %v1318_v63 = vmul.f32 %v1314_v41, %v1314_v41  ;;  %v8122_v37 = vperm.slane %v1314_v41, 0 }
 0x3e8   :  { %v1255_v20 = vpop.f32.mrf.mxu3  ;;  %v1326_v21 = vsub.f32 %v8003_v61, %v8122_v37  ;;  %v1332_v53 = vsub.f32 %v7983_v15, %v8122_v37  ;;  %v1338_v35 = vsub.f32 %v7971_v25, %v8122_v37  ;;  %v1324_v31 = vsub.f32 %v8012_v13, %v8122_v37  ;;  %v1446_v13 = vpop.permute.xlu1 %1445 }
 0x3e9   :  { %v1315_v34 = vmul.f32 0.015625, %v1255_v20 }
 0x3eb   :  { %v1319_v42 = vmul.f32 %v1315_v34, %v1315_v34  ;;  %v8132_v50 = vperm.slane %v1315_v34, 0 }
 0x3ed   :  { %v1339_v49 = vsub.f32 %v7980_v48, %v8132_v50 }
 0x3f3   :  { %v1291_v33 = vpop.f32.mrf.mxu2 }
 0x3f4   :  { %v1316_v39 = vmul.f32 0.015625, %v1291_v33  ;;  %v1458_v33 = vpop.permute.xlu0 %1457 }
 0x3f6   :  { %v1320_v52 = vsub.f32 %v1316_v39, %v1318_v63 }
 0x3f8   :  { %v1340_v45 = vadd.f32 1e-05, %v1320_v52  ;;  %v1311_v12 = vpop.f32.mrf.mxu3 }
 0x3f9   :  { %v1317_v43 = vmul.f32 0.015625, %v1311_v12  ;;  %v1325_v12 = vsub.f32 %v8034_v0, %v8132_v50 }
 0x3fa   :  { %6453 = vrsqrt.f32 %v1340_v45  ;;  %vm1348_vm13 = vweird.f32 %v1340_v45 }
 0x3fb   :  { %v1321_v28 = vsub.f32 %v1317_v43, %v1319_v42  ;;  %v1336_v42 = vsub.f32 %v7973_v6, %v8122_v37 }
 0x3fd   :  { %v1341_v14 = vadd.f32 1e-05, %v1321_v28 }
 0x3ff   :  { %6455 = vrsqrt.f32 %v1341_v14  ;;  %vm1358_vm0 = vweird.f32 %v1341_v14 }
 0x400   :  { %v6454_v38 = vpop.eup %6453 }
 0x401   :  { %v1343_v23 = vmul.f32 %v6454_v38, %v1340_v45  ;;  %vm1349_vm12 = vweird.f32 %v6454_v38 }
 0x402   :  { %vm1350_vm14 = vmor %vm1348_vm13, %vm1349_vm12 }
 0x403   :  { %v1344_v5 = vmul.f32 %v6454_v38, %v1343_v23  ;;  %v1337_v23 = vsub.f32 %v7987_v60, %v8132_v50 }
 0x405   :  { %v6456_v2 = vpop.eup %6455  ;;  %v1345_v3 = vmul.f32 0.5, %v1344_v5  ;;  %v8178_v5 = vpop.permute.xlu1 %1441 }
 0x406   :  { %v1353_v19 = vmul.f32 %v6456_v2, %v1341_v14  ;;  %vm1359_vm15 = vweird.f32 %v6456_v2  ;;  %v8167_v14 = vpop.permute.xlu2 %1389 }
 0x407   :  { %v1346_v11 = vsub.f32 1.5, %v1345_v3  ;;  %vm1360_vm1 = vmor %vm1358_vm0, %vm1359_vm15 }
 0x408   :  { %v1354_v56 = vmul.f32 %v6456_v2, %v1353_v19 }
 0x409   :  { %v1347_v7 = vmul.f32 %v6454_v38, %v1346_v11 }
 0x40a   :  { %v1355_v8 = vmul.f32 0.5, %v1354_v56  ;;  %v1334_v56 = vsub.f32 %v7977_v10, %v8122_v37 }
 0x40b   :  { %v1351_v55 = vsel %vm1350_vm14, %v6454_v38, %v1347_v7  ;;  %v1333_v38 = vsub.f32 %v7999_v1, %v8132_v50 }
 0x40c   :  { %v8128_v40 = vperm.slane %v1351_v55, 0  ;;  %v1356_v4 = vsub.f32 1.5, %v1355_v8 }
 0x40e   :  { %v1357_v24 = vmul.f32 %v6456_v2, %v1356_v4  ;;  %v8139_v44 = vmul.f32 %v8128_v40, %v1326_v21  ;;  %v1372_v61 = vmul.f32 %v8128_v40, %v1332_v53  ;;  %v1378_v15 = vmul.f32 %v8128_v40, %v1338_v35 }
 0x40f   :  { %v8146_v47 = vmul.f32 %v8128_v40, %v1324_v31  ;;  %v1376_v48 = vmul.f32 %v8128_v40, %v1336_v42  ;;  %v1374_v55 = vmul.f32 %v8128_v40, %v1334_v56  ;;  %v1331_v31 = vsub.f32 %v8007_v9, %v8132_v50 }
 0x410   :  { %v1361_v46 = vsel %vm1360_vm1, %v6456_v2, %v1357_v24  ;;  %v1420_v25 = vmul.f32 %v1398_v54, %v1372_v61  ;;  %v1426_v20 = vmul.f32 %v1410_v57, %v1378_v15  ;;  %v1335_v9 = vsub.f32 %v7993_v32, %v8132_v50 }
 0x411   :  { %v8148_v62 = vperm.slane %v1361_v46, 0  ;;  %v1424_v3 = vmul.f32 %v8116_v26, %v1376_v48 }
 0x412   :  { %v8152_v41 = vadd.f32 %v1446_v13, %v1420_v25  ;;  %v8156_v34 = vadd.f32 %v1458_v33, %v1426_v20  ;;  %v8211_v20 = vpop.permute.xlu2 %1385 }
 0x413   :  { %v1379_v63 = vmul.f32 %v8148_v62, %v1339_v49  ;;  %v1373_v0 = vmul.f32 %v8148_v62, %v1333_v38  ;;  %v1377_v11 = vmul.f32 %v8148_v62, %v1337_v23  ;;  %v8193_v53 = vadd.f32 %v8120_v51, %v1424_v3 }
 0x414   :  { %v1500_v39 = vmul.f32 0.044715, %v8152_v41  ;;  %v1506_v28 = vmul.f32 0.044715, %v8156_v34  ;;  %v1371_v46 = vmul.f32 %v8148_v62, %v1331_v31  ;;  %v1422_v49 = vmul.f32 %v8118_v22, %v1374_v55 }
 0x415   :  { %v1427_v52 = vmul.f32 %v1410_v57, %v1379_v63  ;;  %v8172_v57 = vmul.f32 %v8148_v62, %v1325_v12  ;;  %v1425_v8 = vmul.f32 %v8116_v26, %v1377_v11  ;;  %v1421_v21 = vmul.f32 %v1398_v54, %v1373_v0 }
 0x416   :  { %v1516_v43 = vmul.f32 %v1500_v39, %v8152_v41  ;;  %v1522_v2 = vmul.f32 %v1506_v28, %v8156_v34  ;;  %v1327_v26 = vsub.f32 %v8026_v17, %v8132_v50  ;;  %v1330_v54 = vsub.f32 %v7990_v16, %v8122_v37 }
 0x417   :  { %v8160_v45 = vadd.f32 %v1458_v33, %v1427_v52  ;;  %v8200_v24 = vadd.f32 %v8120_v51, %v1425_v8  ;;  %v1504_v15 = vmul.f32 0.044715, %v8193_v53  ;;  %v8213_v51 = vadd.f32 %v1446_v13, %v1421_v21  ;;  %v8219_v52 = vpop.permute.xlu1 %1381 }
 0x418   :  { %v1532_v19 = vmul.f32 %v1516_v43, %v8152_v41  ;;  %v1538_v7 = vmul.f32 %v1522_v2, %v8156_v34  ;;  %v1367_v33 = vmul.f32 %v8148_v62, %v1327_v26  ;;  %v1370_v63 = vmul.f32 %v8128_v40, %v1330_v54 }
 0x419   :  { %v1507_v6 = vmul.f32 0.044715, %v8160_v45  ;;  %v1505_v17 = vmul.f32 0.044715, %v8200_v24  ;;  %v1520_v16 = vmul.f32 %v1504_v15, %v8193_v53  ;;  %v1375_v13 = vmul.f32 %v8148_v62, %v1335_v9  ;;  %v12075_v15 = vld [vmem:[#allocation9_spill] sm:$0xff] }
 0x41a   :  { %v1554_v4 = vadd.f32 %v1538_v7, %v8156_v34  ;;  %v1548_v35 = vadd.f32 %v1532_v19, %v8152_v41  ;;  %v1419_v12 = vmul.f32 %v8124_v30, %v1371_v46  ;;  %v8226_v48 = vadd.f32 %v8142_v18, %v1422_v49 }
 0x41b   :  { %v1523_v1 = vmul.f32 %v1507_v6, %v8160_v45  ;;  %v1521_v32 = vmul.f32 %v1505_v17, %v8200_v24  ;;  %v1536_v42 = vmul.f32 %v1520_v16, %v8193_v53  ;;  %v1501_v43 = vmul.f32 0.044715, %v8213_v51  ;;  %v12077_v16 = vld [vmem:[#allocation8_spill] sm:$0xff] }
 0x41c   :  { %v1570_v61 = vmul.f32 0.7978846, %v1554_v4  ;;  %v1564_v39 = vmul.f32 0.7978846, %v1548_v35  ;;  %v1423_v6 = vmul.f32 %v8118_v22, %v1375_v13  ;;  %v1415_v23 = vmul.f32 %v8211_v20, %v1367_v33 }
 0x41d   :  { %v1539_v60 = vmul.f32 %v1523_v1, %v8160_v45  ;;  %v1537_v28 = vmul.f32 %v1521_v32, %v8200_v24  ;;  %v1552_v38 = vadd.f32 %v1536_v42, %v8193_v53  ;;  %v1418_v0 = vmul.f32 %v8124_v30, %v1370_v63 }
 0x41e   :  { %6457 = vtanh.f32 %v1570_v61  ;;  %v1502_v2 = vmul.f32 0.044715, %v8226_v48  ;;  %v1490_v19 = vmul.f32 0.5, %v8156_v34  ;;  %v8238_v56 = vadd.f32 %v8142_v18, %v1423_v6 }
 0x41f   :  { %v1555_v10 = vadd.f32 %v1539_v60, %v8160_v45  ;;  %v1553_v1 = vadd.f32 %v1537_v28, %v8200_v24  ;;  %v1568_v11 = vmul.f32 0.7978846, %v1552_v38  ;;  %v8241_v60 = vadd.f32 %v8178_v5, %v1419_v12  ;;  %v8266_v33 = vpop.permute.xlu1 %1429  ;;  %v12080_v28 = vld [vmem:[#allocation6_spill] sm:$0xff] }
 0x420   :  { %v1491_v22 = vmul.f32 0.5, %v8160_v45  ;;  %v1518_v30 = vmul.f32 %v1502_v2, %v8226_v48  ;;  %v1517_v55 = vmul.f32 %v1501_v43, %v8213_v51  ;;  %v1503_v31 = vmul.f32 0.044715, %v8238_v56 }
 0x421   :  { %v1571_v25 = vmul.f32 0.7978846, %v1555_v10  ;;  %v1569_v4 = vmul.f32 0.7978846, %v1553_v1  ;;  %v8248_v10 = vpop.permute.xlu2 %1433  ;;  %v8251_v26 = vadd.f32 %v8178_v5, %v1418_v0  ;;  %v1499_v17 = vmul.f32 0.044715, %v8241_v60 }
 0x422   :  { %v1534_v18 = vmul.f32 %v1518_v30, %v8226_v48  ;;  %v8254_v61 = vadd.f32 %v8248_v10, %v1415_v23  ;;  %v1533_v49 = vmul.f32 %v1517_v55, %v8213_v51  ;;  %v1484_v63 = vmul.f32 0.5, %v8152_v41  ;;  %v12081_v30 = vld [vmem:[#allocation16_spill] sm:$0xff] }
 0x423   :  { %6459 = vtanh.f32 %v1571_v25  ;;  %v1519_v25 = vmul.f32 %v1503_v31, %v8238_v56  ;;  %v1498_v43 = vmul.f32 0.044715, %v8251_v26  ;;  %v1488_v23 = vmul.f32 0.5, %v8193_v53 }
 0x424   :  { %6461 = vtanh.f32 %v1564_v39  ;;  %v6458_v3 = vpop.eup %6457  ;;  %v1550_v9 = vadd.f32 %v1534_v18, %v8226_v48  ;;  %v12079_v39 = vld [vmem:[#allocation7_spill] sm:$0xff]  ;;  %v1515_v1 = vmul.f32 %v1499_v17, %v8241_v60  ;;  %v1489_v53 = vmul.f32 0.5, %v8200_v24 }
 0x425   :  { %v1602_v8 = vadd.f32 1.0, %v6458_v3  ;;  %6463 = vtanh.f32 %v1568_v11  ;;  %v1535_v42 = vmul.f32 %v1519_v25, %v8238_v56  ;;  %v1549_v3 = vadd.f32 %v1533_v49, %v8213_v51  ;;  %v12085_v25 = vld [vmem:[#allocation10_spill] sm:$0xff] }
 0x426   :  { %6465 = vtanh.f32 %v1569_v4  ;;  %v1566_v13 = vmul.f32 0.7978846, %v1550_v9  ;;  %v1329_v31 = vsub.f32 %v8017_v27, %v8132_v50  ;;  %v1531_v18 = vmul.f32 %v1515_v1, %v8241_v60 }
 0x427   :  { %v1618_v35 = vmul.f32 %v1602_v8, %v1490_v19  ;;  %v1551_v41 = vadd.f32 %v1535_v42, %v8238_v56  ;;  %v1495_v19 = vmul.f32 0.044715, %v8254_v61  ;;  %v1514_v8 = vmul.f32 %v1498_v43, %v8251_v26 }
 0x428   :  { %6467 = vtanh.f32 %v1566_v13  ;;  %v1412_v1 = vmul.f32 %v8219_v52, %v8146_v47 }
 0x429   :  { %v6460_v7 = vpop.eup %6459  ;;  %v8257_v46 = vadd.f32 %v1618_v35, %v12075_v15  ;;  %v1511_v24 = vmul.f32 %v1495_v19, %v8254_v61  ;;  %v8303_v15 = vpop.permute.xlu1 %1794  ;;  %v1530_v27 = vmul.f32 %v1514_v8, %v8251_v26 }
 0x42a   :  { %v1603_v21 = vadd.f32 1.0, %v6460_v7  ;;  %v6462_v34 = vpop.eup %6461  ;;  %v8345_v8 = vpop.permute.xlu2 %1842 }
 0x42b   :  { %v1596_v54 = vadd.f32 1.0, %v6462_v34  ;;  %12076 = vst [vmem:[#allocation21_spill] sm:$0xff] %v8257_v46  ;;  %v8271_v32 = vmul.f32 %v8257_v46, %v12079_v39  ;;  %v6464_v12 = vpop.eup %6463  ;;  %v12083_v34 = vld [vmem:[#allocation11_spill] sm:$0xff]  ;;  %v1527_v13 = vmul.f32 %v1511_v24, %v8254_v61 }
 0x42c   :  { %v1619_v45 = vmul.f32 %v1603_v21, %v1491_v22  ;;  %v1600_v0 = vadd.f32 1.0, %v6464_v12  ;;  %v6466_v2 = vpop.eup %6465  ;;  %v1567_v22 = vmul.f32 0.7978846, %v1551_v41  ;;  %v1328_v21 = vsub.f32 %v7996_v59, %v8122_v37  ;;  %v12087_v41 = vld [vmem:[#allocation14_spill] sm:$0xff] }
 0x42d   :  { %v1612_v6 = vmul.f32 %v1596_v54, %v1484_v63  ;;  %1666 = vrot.lane.b32.xlu2 %v8271_v32, %s6830_s23  ;;  %v1601_v11 = vadd.f32 1.0, %v6466_v2  ;;  %v1369_v37 = vmul.f32 %v8148_v62, %v1329_v31  ;;  %v1438_v62 = vpop.permute.xlu0 %1437  ;;  %v1547_v12 = vadd.f32 %v1531_v18, %v8241_v60 }
 0x42e   :  { %v8264_v5 = vadd.f32 %v1619_v45, %v12077_v16  ;;  %v1616_v7 = vmul.f32 %v1600_v0, %v1488_v23  ;;  %6469 = vtanh.f32 %v1567_v22  ;;  %v1565_v45 = vmul.f32 0.7978846, %v1549_v3  ;;  %v6468_v49 = vpop.eup %6467 }
 0x42f   :  { %v8291_v55 = vadd.f32 %v1612_v6, %v12081_v30  ;;  %v1617_v4 = vmul.f32 %v1601_v11, %v1489_v53  ;;  %v1368_v54 = vmul.f32 %v8128_v40, %v1328_v21  ;;  %v1486_v40 = vmul.f32 0.5, %v8226_v48 }
 0x430   :  { %12078 = vst [vmem:[#allocation5_spill] sm:$0xff] %v8264_v5  ;;  %v8277_v38 = vmul.f32 %v8264_v5, %v12080_v28  ;;  %v8296_v35 = vadd.f32 %v1616_v7, %v12083_v34  ;;  %v1598_v16 = vadd.f32 1.0, %v6468_v49  ;;  %v1417_v42 = vmul.f32 %v8167_v14, %v1369_v37 }
 0x431   :  { %12082 = vst [vmem:[#allocation30_spill] sm:$0xff] %v8291_v55  ;;  %v8306_v9 = vadd.f32 %v1617_v4, %v12085_v25  ;;  %v8316_v50 = vmul.f32 %v8291_v55, %v12079_v39  ;;  %v1416_v63 = vmul.f32 %v8167_v14, %v1368_v54  ;;  %6471 = vtanh.f32 %v1565_v45  ;;  %v8343_v22 = vpop.permute.xlu1 %1738  ;;  %v12089_v4 = vld [vmem:[#allocation13_spill] sm:$0xff] }
 0x432   :  { %1682 = vrot.lane.b32.xlu0 %v8277_v38, %s6830_s23  ;;  %12084 = vst [vmem:[#allocation29_spill] sm:$0xff] %v8296_v35  ;;  %v8310_v59 = vmul.f32 %v8296_v35, %v12079_v39  ;;  %v1614_v43 = vmul.f32 %v1598_v16, %v1486_v40  ;;  %v1465_v6 = vadd.f32 %v1438_v62, %v1417_v42  ;;  %v1487_v14 = vmul.f32 0.5, %v8238_v56 }
 0x433   :  { %12086 = vst [vmem:[#allocation24_spill] sm:$0xff] %v8306_v9  ;;  %v8321_v17 = vmul.f32 %v8306_v9, %v12080_v28  ;;  %v1546_v0 = vadd.f32 %v1530_v27, %v8251_v26  ;;  %v8338_v3 = vadd.f32 %v1438_v62, %v1416_v63  ;;  %v1563_v11 = vmul.f32 0.7978846, %v1547_v12  ;;  %v8375_v12 = vpop.permute.xlu2 %1790 }
 0x434   :  { %1664 = vrot.lane.b32.xlu1 %v8310_v59, %s6830_s23  ;;  %v6470_v48 = vpop.eup %6469  ;;  %v8336_v2 = vadd.f32 %v1614_v43, %v12087_v41  ;;  %v1497_v19 = vmul.f32 0.044715, %v1465_v6  ;;  %v1543_v7 = vadd.f32 %v1527_v13, %v8254_v61  ;;  %v8358_v18 = vadd.f32 %v8266_v33, %v1412_v1 }
 0x435   :  { %1680 = vrot.lane.b32.xlu2 %v8321_v17, %s6830_s23  ;;  %v1599_v23 = vadd.f32 1.0, %v6470_v48  ;;  %v1562_v31 = vmul.f32 0.7978846, %v1546_v0  ;;  %v1496_v47 = vmul.f32 0.044715, %v8338_v3  ;;  %6473 = vtanh.f32 %v1563_v11 }
 0x436   :  { %12088 = vst [vmem:[#allocation20_spill] sm:$0xff] %v8336_v2  ;;  %v8349_v56 = vmul.f32 %v8336_v2, %v12079_v39  ;;  %v1513_v30 = vmul.f32 %v1497_v19, %v1465_v6  ;;  %v1559_v54 = vmul.f32 0.7978846, %v1543_v7  ;;  %v1485_v49 = vmul.f32 0.5, %v8213_v51  ;;  %v8386_v19 = vpop.permute.xlu0 %1959 }
 0x437   :  { %v1615_v53 = vmul.f32 %v1599_v23, %v1487_v14  ;;  %v6472_v21 = vpop.eup %6471  ;;  %6475 = vtanh.f32 %v1562_v31  ;;  %v1512_v27 = vmul.f32 %v1496_v47, %v8338_v3  ;;  %v1492_v16 = vmul.f32 0.044715, %v8358_v18  ;;  %v12091_v14 = vld [vmem:[#allocation12_spill] sm:$0xff] }
 0x438   :  { %v1529_v24 = vmul.f32 %v1513_v30, %v1465_v6  ;;  %v1597_v25 = vadd.f32 1.0, %v6472_v21  ;;  %6477 = vtanh.f32 %v1559_v54  ;;  %v1414_v13 = vmul.f32 %v8211_v20, %v8139_v44 }
 0x439   :  { %v8352_v34 = vadd.f32 %v1615_v53, %v12089_v4  ;;  %v8371_v42 = vpop.permute.xlu1 %1971  ;;  %v1528_v48 = vmul.f32 %v1512_v27, %v8338_v3  ;;  %v1508_v51 = vmul.f32 %v1492_v16, %v8358_v18  ;;  %v1413_v1 = vmul.f32 %v8219_v52, %v8172_v57  ;;  %v12093_v27 = vld [vmem:[#allocation19_spill] sm:$0xff]  ;;  %v12095_v16 = vld [vmem:[#allocation17_spill] sm:$0xff] }
 0x43a   :  { %1660 = vrot.lane.b32.xlu0 %v8316_v50, %s6830_s23  ;;  %v1545_v37 = vadd.f32 %v1529_v24, %v1465_v6  ;;  %v1613_v63 = vmul.f32 %v1597_v25, %v1485_v49  ;;  %v8391_v20 = vadd.f32 %v8248_v10, %v1414_v13  ;;  %v1483_v53 = vmul.f32 0.5, %v8241_v60 }
 0x43b   :  { %12090 = vst [vmem:[#allocation28_spill] sm:$0xff] %v8352_v34  ;;  %v8362_v45 = vmul.f32 %v8352_v34, %v12080_v28  ;;  %v6474_v62 = vpop.eup %6473  ;;  %v1544_v11 = vadd.f32 %v1528_v48, %v8338_v3  ;;  %v1524_v7 = vmul.f32 %v1508_v51, %v8358_v18  ;;  %v1481_v21 = vmul.f32 0.5, %v1465_v6  ;;  %v12097_v51 = vld [vmem:[#allocation15_spill] sm:$0xff] }
 0x43c   :  { %1662 = vrot.lane.b32.xlu1 %v8349_v56, %s6830_s23  ;;  %v1561_v40 = vmul.f32 0.7978846, %v1545_v37  ;;  %v8384_v23 = vadd.f32 %v1613_v63, %v12091_v14  ;;  %v1595_v0 = vadd.f32 1.0, %v6474_v62  ;;  %v1482_v10 = vmul.f32 0.5, %v8251_v26 }
 0x43d   :  { %1678 = vrot.lane.b32.xlu2 %v8362_v45, %s6830_s23  ;;  %v6476_v43 = vpop.eup %6475  ;;  %v1494_v57 = vmul.f32 0.044715, %v8391_v20  ;;  %v8405_v52 = vadd.f32 %v8266_v33, %v1413_v1  ;;  %v1560_v60 = vmul.f32 0.7978846, %v1544_v11  ;;  %v1540_v25 = vadd.f32 %v1524_v7, %v8358_v18 }
 0x43e   :  { %6479 = vtanh.f32 %v1561_v40  ;;  %12092 = vst [vmem:[#allocation26_spill] sm:$0xff] %v8384_v23  ;;  %v6478_v41 = vpop.eup %6477  ;;  %v1594_v30 = vadd.f32 1.0, %v6476_v43  ;;  %v8400_v31 = vmul.f32 %v8384_v23, %v12080_v28  ;;  %v1611_v47 = vmul.f32 %v1595_v0, %v1483_v53  ;;  %v8416_v40 = vpop.permute.xlu2 %1786 }
 0x43f   :  { %v1591_v24 = vadd.f32 1.0, %v6478_v41  ;;  %v1479_v49 = vmul.f32 0.5, %v8254_v61  ;;  %v1510_v13 = vmul.f32 %v1494_v57, %v8391_v20  ;;  %6481 = vtanh.f32 %v1560_v60  ;;  %v8428_v61 = vpop.permute.xlu0 %1746  ;;  %v12099_v41 = vld [vmem:[#allocation18_spill] sm:$0xff] }
 0x440   :  { %v1610_v37 = vmul.f32 %v1594_v30, %v1482_v10  ;;  %v8419_v63 = vadd.f32 %v1611_v47, %v12095_v16  ;;  %v1493_v48 = vmul.f32 0.044715, %v8405_v52  ;;  %v1556_v14 = vmul.f32 0.7978846, %v1540_v25 }
 0x441   :  { %v8409_v6 = vpop.permute.xlu1 %1734  ;;  %v1607_v33 = vmul.f32 %v1591_v24, %v1479_v49  ;;  %v1526_v1 = vmul.f32 %v1510_v13, %v8391_v20  ;;  %v1480_v60 = vmul.f32 0.5, %v8338_v3  ;;  %v1476_v16 = vmul.f32 0.5, %v8358_v18  ;;  %v12102_v13 = vld [vmem:[#allocation22_spill] sm:$0xff] }
 0x442   :  { %1905 = vrot.lane.b32.xlu0 %v8321_v17, %s6831_s24  ;;  %12096 = vst [vmem:[#allocation8_spill] sm:$0xff] %v8419_v63  ;;  %v8432_v43 = vadd.f32 %v1610_v37, %v12097_v51  ;;  %v8438_v0 = vmul.f32 %v8419_v63, %v12080_v28  ;;  %v1509_v53 = vmul.f32 %v1493_v48, %v8405_v52  ;;  %6483 = vtanh.f32 %v1556_v14 }
 0x443   :  { %v1542_v47 = vadd.f32 %v1526_v1, %v8391_v20 }
 0x444   :  { %1891 = vrot.lane.b32.xlu1 %v8271_v32, %s6831_s24  ;;  %v6480_v44 = vpop.eup %6479  ;;  %12098 = vst [vmem:[#allocation16_spill] sm:$0xff] %v8432_v43  ;;  %v8449_v11 = vmul.f32 %v8432_v43, %v12079_v39  ;;  %v1525_v10 = vmul.f32 %v1509_v53, %v8405_v52  ;;  %v12104_v53 = vld [vmem:[#allocation27_spill] sm:$0xff]  ;;  %v12118_v43 = vmov 0.0  }
 0x445   :  { %1907 = vrot.lane.b32.xlu2 %v8277_v38, %s6831_s24  ;;  %v1593_v4 = vadd.f32 1.0, %v6480_v44  ;;  %v8441_v44 = vadd.f32 %v1607_v33, %v12099_v41  ;;  %v6482_v7 = vpop.eup %6481  ;;  %v1558_v25 = vmul.f32 0.7978846, %v1542_v47  ;;  %v8581_v9 = vsel %vm52_vm2, 1.0, %v12118_v43 }
 0x446   :  { %v1592_v24 = vadd.f32 1.0, %v6482_v7  ;;  %v1541_v37 = vadd.f32 %v1525_v10, %v8405_v52  ;;  %v8499_v10 = vld [vmem:[%s11935_s3] sm:$0xff]  ;;  %v8584_v35 = vsel %vm53_vm3, 1.0, %v12118_v43 }
 0x447   :  { %v1609_v54 = vmul.f32 %v1593_v4, %v1481_v21  ;;  %12100 = vst [vmem:[#allocation11_spill] sm:$0xff] %v8441_v44  ;;  %v8455_v21 = vmul.f32 %v8441_v44, %v12080_v28  ;;  %v8459_v4 = vpop.permute.xlu2 %1830  ;;  %v8465_v57 = vpop.permute.xlu0 %1742  ;;  %6485 = vtanh.f32 %v1558_v25  ;;  %v1478_v25 = vmul.f32 0.5, %v8391_v20 }
 0x448   :  { %v1608_v49 = vmul.f32 %v1592_v24, %v1480_v60  ;;  %v1557_v3 = vmul.f32 0.7978846, %v1541_v37  ;;  %12106 = vst [vmem:[#allocation12_spill] sm:$0xff] %v8499_v10 }
 0x449   :  { %v8414_v26 = vadd.f32 %v1609_v54, %v12093_v27  ;;  %v8451_v30 = vpop.permute.xlu1 %1967  ;;  %12101 = vst [vmem:[#allocation10_spill] sm:$0xff] %v8455_v21  ;;  %v6484_v54 = vpop.eup %6483 }
 0x44a   :  { %1903 = vrot.lane.b32.xlu0 %v8362_v45, %s6831_s24  ;;  %v1588_v27 = vadd.f32 1.0, %v6484_v54  ;;  %v8477_v48 = vadd.f32 %v1608_v49, %v12102_v13  ;;  %6487 = vtanh.f32 %v1557_v3  ;;  %v1477_v13 = vmul.f32 0.5, %v8405_v52  ;;  %v12108_v3 = vld [vmem:[#allocation23_spill] sm:$0xff] }
 0x44b   :  { %12094 = vst [vmem:[#allocation9_spill] sm:$0xff] %v8414_v26  ;;  %v8423_v62 = vmul.f32 %v8414_v26, %v12080_v28 }
 0x44c   :  { %1676 = vrot.lane.b32.xlu1 %v8400_v31, %s6830_s23  ;;  %12103 = vst [vmem:[#allocation14_spill] sm:$0xff] %v8477_v48  ;;  %v1604_v14 = vmul.f32 %v1588_v27, %v1476_v16  ;;  %v8489_v18 = vmul.f32 %v8477_v48, %v12079_v39 }
 0x44d   :  { %1889 = vrot.lane.b32.xlu2 %v8310_v59, %s6831_s24  ;;  %v6486_v1 = vpop.eup %6485 }
 0x44e   :  { %v8492_v7 = vadd.f32 %v1604_v14, %v12104_v53  ;;  %v1590_v47 = vadd.f32 1.0, %v6486_v1 }
 0x44f   :  { %v8481_v51 = vpop.permute.xlu2 %1826  ;;  %v8485_v41 = vpop.permute.xlu0 %1730 }
 0x450   :  { %12105 = vst [vmem:[#allocation13_spill] sm:$0xff] %v8492_v7  ;;  %v8504_v24 = vmul.f32 %v8492_v7, %v12079_v39  ;;  %v6488_v60 = vpop.eup %6487  ;;  %v1606_v49 = vmul.f32 %v1590_v47, %v1478_v25 }
 0x451   :  { %v8474_v33 = vpop.permute.xlu1 %1782  ;;  %v1589_v27 = vadd.f32 1.0, %v6488_v60  ;;  %v12111_v60 = vld [vmem:[#allocation25_spill] sm:$0xff] }
 0x452   :  { %1672 = vrot.lane.b32.xlu0 %v8423_v62, %s6830_s23  ;;  %12107 = vst [vmem:[#allocation19_spill] sm:$0xff] %v8504_v24  ;;  %v8519_v14 = vadd.f32 %v1606_v49, %v12108_v3 }
 0x453   :  { %v1605_v1 = vmul.f32 %v1589_v27, %v1477_v13 }
 0x454   :  { %1674 = vrot.lane.b32.xlu1 %v8438_v0, %s6830_s23  ;;  %12109 = vst [vmem:[#allocation17_spill] sm:$0xff] %v8519_v14  ;;  %v8529_v47 = vmul.f32 %v8519_v14, %v12079_v39 }
 0x455   :  { %1658 = vrot.lane.b32.xlu2 %v8449_v11, %s6830_s23  ;;  %v8532_v25 = vadd.f32 %v1605_v1, %v12111_v60  ;;  %v8553_v1 = vld [vmem:[%s11935_s3 + $0x8] sm:$0xff] }
 0x456   :  { %12110 = vst [vmem:[#allocation15_spill] sm:$0xff] %v8529_v47 }
 0x457   :  { %v8509_v37 = vpop.permute.xlu2 %1822  ;;  %v8513_v16 = vpop.permute.xlu0 %1726  ;;  %12112 = vst [vmem:[#allocation18_spill] sm:$0xff] %v8532_v25  ;;  %v8540_v49 = vmul.f32 %v8532_v25, %v12080_v28 }
 0x458   :  { %12115 = vst [vmem:[#allocation23_spill] sm:$0xff] %v8553_v1 }
 0x459   :  { %v8506_v54 = vpop.permute.xlu1 %1963  ;;  %12113 = vst [vmem:[#allocation22_spill] sm:$0xff] %v8540_v49 }
 0x45a   :  { %1670 = vrot.lane.b32.xlu0 %v8455_v21, %s6830_s23 }
 0x45c   :  { %1885 = vrot.lane.b32.xlu1 %v8316_v50, %s6831_s24 }
 0x45d   :  { %1887 = vrot.lane.b32.xlu2 %v8349_v56, %s6831_s24 }
 0x45f   :  { %v8523_v20 = vpop.permute.xlu2 %1770  ;;  %v8536_v52 = vpop.permute.xlu0 %1722 }
 0x461   :  { %v8525_v53 = vpop.permute.xlu1 %1778 }
 0x462   :  { %1895 = vrot.lane.b32.xlu0 %v8455_v21, %s6831_s24 }
 0x464   :  { %1883 = vrot.lane.b32.xlu1 %v8449_v11, %s6831_s24 }
 0x465   :  { %1656 = vrot.lane.b32.xlu2 %v8489_v18, %s6830_s23 }
 0x467   :  { %v8544_v27 = vpop.permute.xlu2 %1766  ;;  %v1839_v3 = vpop.permute.xlu0 %1838 }
 0x468   :  { %12114 = vst [vmem:[#allocation27_spill] sm:$0xff] %v8544_v27 }
 0x469   :  { %v8546_v13 = vpop.permute.xlu1 %1774 }
 0x46a   :  { %1814 = vperm.xlu0 %6344, %v8499_v10  }
 0x46c   :  { %1652 = vrot.lane.b32.xlu1 %v8504_v24, %s6830_s23 }
 0x46d   :  { %1901 = vrot.lane.b32.xlu2 %v8400_v31, %s6831_s24 }
 0x46f   :  { %v8560_v25 = vpop.permute.xlu0 %1834 }
 0x471   :  { %v8558_v36 = vpop.permute.xlu1 %1955 }
 0x474   :  { %1881 = vrot.lane.b32.xlu1 %v8489_v18, %s6831_s24 }
 0x475   :  { %1654 = vrot.lane.b32.xlu2 %v8529_v47, %s6830_s23 }
 0x477   :  { %v8566_v44 = vpop.permute.xlu0 %1818 }
 0x478   :  { %12117 = vst [vmem:[#allocation32_spill] sm:$0xff] %v8566_v44 }
 0x479   :  { %v8564_v7 = vpop.permute.xlu1 %1718 }
 0x47a   :  { %12116 = vst [vmem:[#allocation25_spill] sm:$0xff] %v8564_v7 }
 0x47c   :  { %1893 = vrot.lane.b32.xlu1 %v8540_v49, %s6831_s24 }
 0x47d   :  { %1899 = vrot.lane.b32.xlu2 %v8438_v0, %s6831_s24 }
 0x481   :  { %v8570_v26 = vpop.permute.xlu1 %1951 }
 0x484   :  { %1947 = vperm.xlu1 %6348, %v8553_v1  }
 0x485   :  { %1668 = vrot.lane.b32.xlu2 %v8540_v49, %s6830_s23  ;;  %s6841_s23 = smov 9  }
 0x487   :  { %v1667_v60 = vpop.permute.xlu2 %1666 }
 0x48d   :  { %1897 = vrot.lane.b32.xlu2 %v8423_v62, %s6831_s24 }
 0x48f   :  { %v1681_v14 = vpop.permute.xlu2 %1680 }
 0x495   :  { %1879 = vrot.lane.b32.xlu2 %v8529_v47, %s6831_s24 }
 0x497   :  { %v1679_v63 = vpop.permute.xlu2 %1678 }
 0x49d   :  { %1877 = vrot.lane.b32.xlu2 %v8504_v24, %s6831_s24  ;;  %s6842_s24 = smov 119  }
 0x49f   :  { %v1908_v23 = vpop.permute.xlu2 %1907 }
 0x4a4   :  { %v1683_v48 = vpop.permute.xlu0 %1682 }
 0x4a5   :  { %1943 = vperm.xlu2 %6349, %v8499_v10   ;;  %v1692_v28 = vsel %vm1684_vm4, %v1667_v60, %v1683_v48  ;;  %v1700_v39 = vsel %vm1684_vm4, %v1683_v48, %v1667_v60 }
 0x4a6   :  { %v1665_v34 = vpop.permute.xlu1 %1664  ;;  %v1715_v46 = vmul.f32 %v8581_v9, %v1700_v39  ;;  %v1716_v55 = vmul.f32 %v8584_v35, %v1692_v28 }
 0x4a7   :  { %v1890_v5 = vpop.permute.xlu2 %1889  ;;  %v1691_v1 = vsel %vm1684_vm4, %v1665_v34, %v1681_v14  ;;  %v1699_v10 = vsel %vm1684_vm4, %v1681_v14, %v1665_v34 }
 0x4a8   :  { %v1763_v24 = vmul.f32 %v8428_v61, %v1715_v46  ;;  %v1764_v48 = vmul.f32 %v8428_v61, %v1716_v55  ;;  %v1713_v27 = vmul.f32 %v8581_v9, %v1699_v10  ;;  %v1714_v34 = vmul.f32 %v8584_v35, %v1691_v1 }
 0x4a9   :  { %v8613_v46 = vsel %vm46_vm6, 1.0, %v12118_v43  ;;  %v8616_v55 = vsel %vm47_vm7, 1.0, %v12118_v43  ;;  %v1859_v1 = vmul.f32 %v8345_v8, %v8271_v32  ;;  %vm3021_vm7 = vcmp.lt.s32.totalorder %v7334_v58, 9 }
 0x4aa   :  { %v1811_v10 = vadd.f32 %v8303_v15, %v1763_v24  ;;  %v1762_v43 = vmul.f32 %v8465_v57, %v1714_v34 }
 0x4ac   :  { %v8578_v2 = vpop.permute.xlu0 %1660 }
 0x4ae   :  { %v1663_v49 = vpop.permute.xlu1 %1662 }
 0x4af   :  { %v1690_v39 = vsel %vm1684_vm4, %v1663_v49, %v1679_v63  ;;  %v1698_v28 = vsel %vm1684_vm4, %v1679_v63, %v1663_v49  ;;  %v8608_v29 = vpop.permute.xlu2 %1658  ;;  %v1812_v49 = vadd.f32 %v8303_v15, %v1764_v48  ;;  %v1857_v15 = vmul.f32 %v1839_v3, %v8310_v59 }
 0x4b0   :  { %v1711_v14 = vmul.f32 %v8581_v9, %v1698_v28  ;;  %v1712_v7 = vmul.f32 %v8584_v35, %v1690_v39  ;;  %v1860_v39 = vmul.f32 %v8345_v8, %v8277_v38  ;;  %v1761_v28 = vmul.f32 %v8465_v57, %v1713_v27 }
 0x4b1   :  { %v1858_v48 = vmul.f32 %v1839_v3, %v8321_v17  ;;  %v1810_v59 = vadd.f32 %v8375_v12, %v1762_v43  ;;  %v1856_v43 = vmul.f32 %v8560_v25, %v8362_v45 }
 0x4b2   :  { %v1759_v21 = vmul.f32 %v8343_v22, %v1711_v14  ;;  %v1760_v44 = vmul.f32 %v8343_v22, %v1712_v7  ;;  %v1876_v47 = vadd.f32 %v1860_v39, %v1812_v49  ;;  %v1809_v27 = vadd.f32 %v8375_v12, %v1761_v28 }
 0x4b3   :  { %v1855_v12 = vmul.f32 %v8560_v25, %v8349_v56 }
 0x4b4   :  { %v1906_v60 = vpop.permute.xlu0 %1905  ;;  %v1807_v14 = vadd.f32 %v8416_v40, %v1759_v21 }
 0x4b5   :  { %v1916_v63 = vsel %vm46_vm6, %v1890_v5, %v1906_v60  ;;  %v1924_v61 = vsel %vm46_vm6, %v1906_v60, %v1890_v5  ;;  %v1875_v60 = vadd.f32 %v1859_v1, %v1811_v10  ;;  %v1874_v1 = vadd.f32 %v1858_v48, %v1810_v59 }
 0x4b6   :  { %v1938_v5 = vmul.f32 %v8613_v46, %v1916_v63  ;;  %v1939_v24 = vmul.f32 %v8616_v55, %v1924_v61  ;;  %v1892_v32 = vpop.permute.xlu1 %1891  ;;  %v1808_v63 = vadd.f32 %v8416_v40, %v1760_v44  ;;  %v1871_v39 = vadd.f32 %v1855_v12, %v1807_v14 }
 0x4b7   :  { %v1917_v38 = vsel %vm46_vm6, %v1892_v32, %v1908_v23  ;;  %v1925_v8 = vsel %vm46_vm6, %v1908_v23, %v1892_v32  ;;  %v1888_v34 = vpop.permute.xlu2 %1887 }
 0x4b8   :  { %v1940_v22 = vmul.f32 %v8613_v46, %v1917_v38  ;;  %v1941_v7 = vmul.f32 %v8616_v55, %v1925_v8  ;;  %v1986_v17 = vmul.f32 %v8451_v30, %v1938_v5  ;;  %v1987_v3 = vmul.f32 %v8451_v30, %v1939_v24 }
 0x4b9   :  { %v1872_v5 = vadd.f32 %v1856_v43, %v1808_v63  ;;  %v1854_v63 = vmul.f32 %v8459_v4, %v8400_v31 }
 0x4ba   :  { %v1988_v23 = vmul.f32 %v8371_v42, %v1940_v22  ;;  %v1989_v61 = vmul.f32 %v8371_v42, %v1941_v7  ;;  %v1873_v42 = vadd.f32 %v1857_v15, %v1809_v27  ;;  %v8670_v25 = vadd.f32 %v1987_v3, %v1874_v1 }
 0x4bc   :  { %v1904_v57 = vpop.permute.xlu0 %1903  ;;  %v8660_v44 = vadd.f32 %v1988_v23, %v1875_v60  ;;  %v8662_v21 = vadd.f32 %v1989_v61, %v1876_v47  ;;  %v8668_v45 = vadd.f32 %v1986_v17, %v1873_v42 }
 0x4bd   :  { %v1915_v10 = vsel %vm46_vm6, %v1888_v34, %v1904_v57  ;;  %v1923_v49 = vsel %vm46_vm6, %v1904_v57, %v1888_v34 }
 0x4be   :  { %v1936_v30 = vmul.f32 %v8613_v46, %v1915_v10  ;;  %v1937_v40 = vmul.f32 %v8616_v55, %v1923_v49  ;;  %2014 = vmatpush.msrb.mxu2 %v8660_v44  ;;  %2034 = vmatpush.msrb.mxu3 %v8662_v21  ;;  %v1677_v56 = vpop.permute.xlu1 %1676 }
 0x4bf   :  { %v1657_v15 = vpop.permute.xlu2 %1656  ;;  %v1697_v48 = vsel %vm1684_vm4, %v1677_v56, %v8578_v2 }
 0x4c0   :  { %v1984_v28 = vmul.f32 %v8506_v54, %v1936_v30  ;;  %v1985_v24 = vmul.f32 %v8506_v54, %v1937_v40  ;;  %2015 = vmatpush.msrb.mxu2 %v8668_v45  ;;  %2035 = vmatpush.msrb.mxu3 %v8670_v25  ;;  %v1689_v54 = vsel %vm1684_vm4, %v8578_v2, %v1677_v56 }
 0x4c1   :  { %v1709_v60 = vmul.f32 %v8581_v9, %v1697_v48  ;;  %v1710_v38 = vmul.f32 %v8584_v35, %v1689_v54 }
 0x4c2   :  { %v8672_v32 = vadd.f32 %v1984_v28, %v1871_v39  ;;  %v8674_v47 = vadd.f32 %v1985_v24, %v1872_v5  ;;  %v1851_v24 = vmul.f32 %v8481_v51, %v8449_v11 }
 0x4c3   :  { %v1757_v22 = vmul.f32 %v8409_v6, %v1709_v60  ;;  %v1758_v7 = vmul.f32 %v8409_v6, %v1710_v38  ;;  %v1853_v6 = vmul.f32 %v8459_v4, %v8316_v50 }
 0x4c4   :  { %2016 = vmatpush.msrb.mxu2 %v8672_v32  ;;  %2036 = vmatpush.msrb.mxu3 %v8674_v47  ;;  %v1673_v56 = vpop.permute.xlu0 %1672 }
 0x4c5   :  { %v1805_v2 = vadd.f32 %v8474_v33, %v1757_v22  ;;  %v1806_v3 = vadd.f32 %v8474_v33, %v1758_v7  ;;  %v1695_v11 = vsel %vm1684_vm4, %v1673_v56, %v1657_v15 }
 0x4c6   :  { %v1675_v8 = vpop.permute.xlu1 %1674 }
 0x4c7   :  { %v1902_v57 = vpop.permute.xlu2 %1901  ;;  %v1688_v27 = vsel %vm1684_vm4, %v8608_v29, %v1675_v8  ;;  %v1696_v59 = vsel %vm1684_vm4, %v1675_v8, %v8608_v29  ;;  %v1869_v49 = vadd.f32 %v1853_v6, %v1805_v2  ;;  %v1870_v43 = vadd.f32 %v1854_v63, %v1806_v3 }
 0x4c8   :  { %v1707_v61 = vmul.f32 %v8581_v9, %v1696_v59  ;;  %v1708_v33 = vmul.f32 %v8584_v35, %v1688_v27 }
 0x4ca   :  { %v1755_v31 = vmul.f32 %v8485_v41, %v1707_v61  ;;  %v1756_v4 = vmul.f32 %v8485_v41, %v1708_v33  ;;  %v1852_v41 = vmul.f32 %v8481_v51, %v8438_v0  ;;  %v1705_v51 = vmul.f32 %v8581_v9, %v1695_v11 }
 0x4cb   :  { %v1849_v33 = vmul.f32 %v8509_v37, %v8489_v18 }
 0x4cc   :  { %v1803_v39 = vadd.f32 %v8525_v53, %v1755_v31  ;;  %v1804_v28 = vadd.f32 %v8525_v53, %v1756_v4  ;;  %v1753_v59 = vmul.f32 %v8513_v16, %v1705_v51  ;;  %v1671_v2 = vpop.permute.xlu0 %1670 }
 0x4ce   :  { %v1886_v17 = vpop.permute.xlu1 %1885  ;;  %v1867_v60 = vadd.f32 %v1851_v24, %v1803_v39  ;;  %v1868_v38 = vadd.f32 %v1852_v41, %v1804_v28  ;;  %v1801_v6 = vadd.f32 %v8546_v13, %v1753_v59 }
 0x4cf   :  { %v1914_v34 = vsel %vm46_vm6, %v1886_v17, %v1902_v57  ;;  %v1922_v14 = vsel %vm46_vm6, %v1902_v57, %v1886_v17  ;;  %v1655_v10 = vpop.permute.xlu2 %1654  ;;  %v1687_v57 = vsel %vm1684_vm4, %v1657_v15, %v1673_v56 }
 0x4d0   :  { %v1934_v23 = vmul.f32 %v8613_v46, %v1914_v34  ;;  %v1935_v29 = vmul.f32 %v8616_v55, %v1922_v14  ;;  %v1706_v27 = vmul.f32 %v8584_v35, %v1687_v57  ;;  %v1686_v3 = vsel %vm1684_vm4, %v1655_v10, %v1671_v2 }
 0x4d1   :  { %v1694_v34 = vsel %vm1684_vm4, %v1671_v2, %v1655_v10  ;;  %v1850_v10 = vmul.f32 %v8509_v37, %v8423_v62 }
 0x4d2   :  { %v1982_v12 = vmul.f32 %v8386_v19, %v1934_v23  ;;  %v1983_v30 = vmul.f32 %v8386_v19, %v1935_v29  ;;  %v1754_v17 = vmul.f32 %v8513_v16, %v1706_v27  ;;  %v1703_v23 = vmul.f32 %v8581_v9, %v1694_v34 }
 0x4d3   :  { %v1704_v29 = vmul.f32 %v8584_v35, %v1686_v3  ;;  %v12122_v3 = vld [vmem:[#allocation25_spill] sm:$0xff] }
 0x4d4   :  { %v8712_v40 = vadd.f32 %v1982_v12, %v1869_v49  ;;  %v8714_v50 = vadd.f32 %v1983_v30, %v1870_v43  ;;  %v1802_v63 = vadd.f32 %v8546_v13, %v1754_v17  ;;  %v1865_v12 = vadd.f32 %v1849_v33, %v1801_v6  ;;  %v1896_v62 = vpop.permute.xlu0 %1895  ;;  %v8820_v6 = vld [vmem:[%s11935_s3 + $0x38] sm:$0xff] }
 0x4d5   :  { %v1751_v4 = vmul.f32 %v8536_v52, %v1703_v23 }
 0x4d6   :  { %v1884_v42 = vpop.permute.xlu1 %1883  ;;  %2017 = vmatpush.msrb.mxu2 %v8712_v40  ;;  %2037 = vmatpush.msrb.mxu3 %v8714_v50  ;;  %v1866_v30 = vadd.f32 %v1850_v10, %v1802_v63  ;;  %v12124_v10 = vld [vmem:[#allocation19_spill] sm:$0xff] }
 0x4d7   :  { %v1900_v1 = vpop.permute.xlu2 %1899 }
 0x4d8   :  { %v1913_v19 = vsel %vm46_vm6, %v1884_v42, %v1900_v1  ;;  %v1921_v5 = vsel %vm46_vm6, %v1900_v1, %v1884_v42  ;;  %v1752_v42 = vmul.f32 %v8536_v52, %v1704_v29 }
 0x4d9   :  { %v1932_v54 = vmul.f32 %v8613_v46, %v1913_v19  ;;  %v1933_v48 = vmul.f32 %v8616_v55, %v1921_v5  ;;  %v1799_v19 = vadd.f32 %v8523_v20, %v1751_v4  ;;  %v8836_v4 = vld [vmem:[%s11935_s3 + $0x28] sm:$0xff] }
 0x4da   :  { %v1800_v52 = vadd.f32 %v8523_v20, %v1752_v42 }
 0x4db   :  { %v1980_v53 = vmul.f32 %v8558_v36, %v1932_v54  ;;  %v1981_v8 = vmul.f32 %v8558_v36, %v1933_v48  ;;  %v12119_v54 = vld [vmem:[#allocation15_spill] sm:$0xff]  ;;  %v12120_v48 = vld [vmem:[#allocation32_spill] sm:$0xff] }
 0x4dc   :  { %v1815_v63 = vpop.permute.xlu0 %1814 }
 0x4dd   :  { %v8738_v7 = vadd.f32 %v1980_v53, %v1867_v60  ;;  %v8740_v0 = vadd.f32 %v1981_v8, %v1868_v38  ;;  %v1847_v60 = vmul.f32 %v12120_v48, %v12119_v54  ;;  %v12121_v53 = vld [vmem:[#allocation10_spill] sm:$0xff]  ;;  %v2055_v54 = vmul.f32 %v8714_v50, %v8714_v50 }
 0x4de   :  { %v1653_v22 = vpop.permute.xlu1 %1652  ;;  %v1848_v38 = vmul.f32 %v12120_v48, %v12121_v53  ;;  %v8879_v53 = vld [vmem:[%s11935_s3 + $0x18] sm:$0xff] }
 0x4df   :  { %2018 = vmatpush.msrb.mxu2 %v8738_v7  ;;  %2038 = vmatpush.msrb.mxu3 %v8740_v0  ;;  %v1669_v36 = vpop.permute.xlu2 %1668  ;;  %v1863_v11 = vadd.f32 %v1847_v60, %v1799_v19  ;;  %v12126_v19 = vmov 1.0   ;;  %v2052_v48 = vmul.f32 %v8738_v7, %v8738_v7  ;;  %v2053_v60 = vmul.f32 %v8740_v0, %v8740_v0 }
 0x4e0   :  { %v1685_v5 = vsel %vm1684_vm4, %v1653_v22, %v1669_v36  ;;  %v1693_v24 = vsel %vm1684_vm4, %v1669_v36, %v1653_v22  ;;  %v1864_v51 = vadd.f32 %v1848_v38, %v1800_v52  ;;  %v6832_v22 = vmov 19  }
 0x4e1   :  { %v1701_v8 = vmul.f32 %v8581_v9, %v1693_v24  ;;  %v1702_v20 = vmul.f32 %v8584_v35, %v1685_v5  ;;  %6350 = vset.pattern.permute.xlu1 %v6832_v22  ;;  %v6833_v36 = vmov 20   ;;  %v8803_v35 = vld [vmem:[%s11935_s3 + $0x30] sm:$0xff]  ;;  %v8809_v9 = vld [vmem:[%s11935_s3 + $0x20] sm:$0xff]  ;;  %v2058_v52 = vmul.f32 %v8668_v45, %v8668_v45 }
 0x4e2   :  { %6354 = vset.pattern.permute.xlu0 %v6833_v36  ;;  %2193 = vperm.xlu1 %6350, %v8803_v35   ;;  %v2059_v5 = vmul.f32 %v8670_v25, %v8670_v25  ;;  %v2056_v24 = vmul.f32 %v8672_v32, %v8672_v32  ;;  %vm64_vm4 = vcmp.ge.s32.totalorder %v7334_v58, 9 }
 0x4e3   :  { %2233 = vperm.xlu0 %6354, %v8809_v9   ;;  %v1749_v34 = vmul.f32 %v12122_v3, %v1701_v8  ;;  %6351 = vset.pattern.permute.xlu2 %v6833_v36 }
 0x4e4   :  { %2245 = vperm.xlu2 %6351, %v8820_v6  }
 0x4e6   :  { %v1882_v15 = vpop.permute.xlu1 %1881 }
 0x4e7   :  { %v1898_v14 = vpop.permute.xlu2 %1897 }
 0x4e8   :  { %v1912_v16 = vsel %vm46_vm6, %v1882_v15, %v1898_v14  ;;  %v1920_v61 = vsel %vm46_vm6, %v1898_v14, %v1882_v15  ;;  %v1750_v14 = vmul.f32 %v12122_v3, %v1702_v20 }
 0x4e9   :  { %v1930_v49 = vmul.f32 %v8613_v46, %v1912_v16  ;;  %v1931_v13 = vmul.f32 %v8616_v55, %v1920_v61  ;;  %v12123_v16 = vld [vmem:[#allocation27_spill] sm:$0xff] }
 0x4ea   :  { %v1797_v61 = vadd.f32 %v12123_v16, %v1749_v34  ;;  %v1798_v33 = vadd.f32 %v12123_v16, %v1750_v14  ;;  %2189 = vperm.xlu1 %6350, %v8836_v4  }
 0x4eb   :  { %v1978_v43 = vmul.f32 %v8570_v26, %v1930_v49  ;;  %v1979_v31 = vmul.f32 %v8570_v26, %v1931_v13  ;;  %v1845_v49 = vmul.f32 %v1815_v63, %v12124_v10  ;;  %v12125_v13 = vld [vmem:[#allocation22_spill] sm:$0xff]  ;;  %6355 = vset.pattern.permute.xlu0 %v6832_v22 }
 0x4ec   :  { %2197 = vperm.xlu0 %6355, %v8820_v6   ;;  %2241 = vperm.xlu2 %6351, %v8803_v35  }
 0x4ed   :  { %v8770_v39 = vadd.f32 %v1978_v43, %v1865_v12  ;;  %v8772_v18 = vadd.f32 %v1979_v31, %v1866_v30  ;;  %v1846_v12 = vmul.f32 %v1815_v63, %v12125_v13 }
 0x4ee   :  { %v1894_v1 = vpop.permute.xlu1 %1893 }
 0x4ef   :  { %v1880_v37 = vpop.permute.xlu2 %1879  ;;  %2019 = vmatpush.msrb.mxu2 %v8770_v39  ;;  %2039 = vmatpush.msrb.mxu3 %v8772_v18  ;;  %v2050_v38 = vmul.f32 %v8770_v39, %v8770_v39  ;;  %v2051_v8 = vmul.f32 %v8772_v18, %v8772_v18 }
 0x4f0   :  { %v1911_v28 = vsel %vm46_vm6, %v1880_v37, %v1896_v62  ;;  %v1919_v26 = vsel %vm46_vm6, %v1896_v62, %v1880_v37  ;;  %v1861_v62 = vadd.f32 %v1845_v49, %v1797_v61  ;;  %v1862_v37 = vadd.f32 %v1846_v12, %v1798_v33 }
 0x4f1   :  { %v1928_v41 = vmul.f32 %v8613_v46, %v1911_v28  ;;  %v1929_v56 = vmul.f32 %v8616_v55, %v1919_v26  ;;  %v2061_v26 = vmul.f32 %v8662_v21, %v8662_v21 }
 0x4f2   :  { %6352 = vset.pattern.permute.xlu1 %v6833_v36 }
 0x4f3   :  { %2237 = vperm.xlu1 %6352, %v8836_v4  }
 0x4f4   :  { %2185 = vperm.xlu0 %6355, %v8809_v9   ;;  %6353 = vset.pattern.permute.xlu2 %v6832_v22 }
 0x4f5   :  { %2181 = vperm.xlu2 %6353, %v8879_v53  }
 0x4f6   :  { %v1948_v57 = vpop.permute.xlu1 %1947 }
 0x4f7   :  { %v1976_v27 = vmul.f32 %v1948_v57, %v1928_v41  ;;  %v1977_v59 = vmul.f32 %v1948_v57, %v1929_v56  ;;  %v1878_v17 = vpop.permute.xlu2 %1877  ;;  %v2057_v41 = vmul.f32 %v8674_v47, %v8674_v47  ;;  %v2054_v56 = vmul.f32 %v8712_v40, %v8712_v40 }
 0x4f8   :  { %v1910_v23 = vsel %vm46_vm6, %v1878_v17, %v1894_v1  ;;  %v1918_v29 = vsel %vm46_vm6, %v1894_v1, %v1878_v17 }
 0x4f9   :  { %v8796_v2 = vadd.f32 %v1976_v27, %v1863_v11  ;;  %v8798_v15 = vadd.f32 %v1977_v59, %v1864_v51  ;;  %v1926_v43 = vmul.f32 %v8613_v46, %v1910_v23  ;;  %v1927_v30 = vmul.f32 %v8616_v55, %v1918_v29  ;;  %v12127_v11 = vld [vmem:[#allocation12_spill] sm:$0xff]  ;;  %v8899_v59 = vld [vmem:[%s11935_s3 + $0x10] sm:$0xff] }
 0x4fa   :  { %v2060_v55 = vmul.f32 %v8660_v44, %v8660_v44 }
 0x4fb   :  { %2020 = vmatpush.msrb.mxu2 %v8796_v2  ;;  %2040 = vmatpush.msrb.mxu3 %v8798_v15  ;;  %v2048_v20 = vmul.f32 %v8796_v2, %v8796_v2  ;;  %v2049_v57 = vmul.f32 %v8798_v15, %v8798_v15 }
 0x4fc   :  { %6356 = vset.pattern.permute.xlu1 %v6832_v22  ;;  %2169 = vperm.xlu0 %6355, %v12127_v11   ;;  %v12128_v22 = vld [vmem:[#allocation23_spill] sm:$0xff] }
 0x4fd   :  { %2177 = vperm.xlu1 %6356, %v8899_v59   ;;  %6357 = vset.pattern.permute.xlu2 %v6833_v36 }
 0x4fe   :  { %2229 = vperm.xlu2 %6357, %v8879_v53  }
 0x4ff   :  { %v1944_v31 = vpop.permute.xlu2 %1943 }
 0x500   :  { %v1974_v42 = vmul.f32 %v1944_v31, %v1926_v43  ;;  %v1975_v1 = vmul.f32 %v1944_v31, %v1927_v30 }
 0x502   :  { %v8841_v28 = vadd.f32 %v1974_v42, %v1861_v62  ;;  %v8843_v46 = vadd.f32 %v1975_v1, %v1862_v37 }
 0x504   :  { %2021 = vmatpush.msrb.mxu2 %v8841_v28  ;;  %2041 = vmatpush.msrb.mxu3 %v8843_v46  ;;  %v2046_v51 = vmul.f32 %v8841_v28, %v8841_v28  ;;  %v2047_v27 = vmul.f32 %v8843_v46, %v8843_v46 }
 0x505   :  { %6110 = vmatmul.msk.f32.vlgmr.msrb.gmra.mxu2 %vm666_vm5, %v12126_v19  ;;  %6111 = vmatmul.msk.f32.vlgmr.msrb.gmra.mxu3 %vm666_vm5, %v12126_v19 }
 0x506   :  { %2070 = vmatpush.msra.mxu2 %v2060_v55  ;;  %2090 = vmatpush.msra.mxu3 %v2061_v26 }
 0x507   :  { %2173 = vperm.xlu1 %6356, %v12128_v22   ;;  %2225 = vperm.xlu2 %6357, %v8899_v59  }
 0x508   :  { %2071 = vmatpush.msra.mxu2 %v2058_v52  ;;  %2091 = vmatpush.msra.mxu3 %v2059_v5 }
 0x50a   :  { %2072 = vmatpush.msra.mxu2 %v2056_v24  ;;  %2092 = vmatpush.msra.mxu3 %v2057_v41 }
 0x50c   :  { %2073 = vmatpush.msra.mxu2 %v2054_v56  ;;  %2093 = vmatpush.msra.mxu3 %v2055_v54 }
 0x50e   :  { %2074 = vmatpush.msra.mxu2 %v2052_v48  ;;  %2094 = vmatpush.msra.mxu3 %v2053_v60 }
 0x50f   :  { %6358 = vset.pattern.permute.xlu1 %v6833_v36  ;;  %2217 = vperm.xlu2 %6357, %v12127_v11  }
 0x510   :  { %2075 = vmatpush.msra.mxu2 %v2050_v38  ;;  %2095 = vmatpush.msra.mxu3 %v2051_v8 }
 0x511   :  { %2221 = vperm.xlu1 %6358, %v12128_v22  }
 0x512   :  { %2076 = vmatpush.msra.mxu2 %v2048_v20  ;;  %2096 = vmatpush.msra.mxu3 %v2049_v57 }
 0x514   :  { %2077 = vmatpush.msra.mxu2 %v2046_v51  ;;  %2097 = vmatpush.msra.mxu3 %v2047_v27 }
 0x515   :  { %6112 = vmatmul.msk.f32.vlgmr.msra.gmra.mxu2 %vm666_vm5, %v12126_v19  ;;  %6113 = vmatmul.msk.f32.vlgmr.msra.gmra.mxu3 %vm666_vm5, %v12126_v19 }
 0x53e   :  { %v8915_v14 = vpop.permute.xlu2 %2245 }
 0x546   :  { %v8917_v43 = vpop.permute.xlu2 %2241 }
 0x54f   :  { %v2182_v52 = vpop.permute.xlu2 %2181 }
 0x554   :  { %v8913_v34 = vpop.permute.xlu1 %2193 }
 0x555   :  { %v8919_v42 = vpop.permute.xlu0 %2233 }
 0x55c   :  { %v2190_v13 = vpop.permute.xlu1 %2189 }
 0x55e   :  { %v2198_v8 = vpop.permute.xlu0 %2197 }
 0x565   :  { %v8921_v62 = vpop.permute.xlu1 %2237 }
 0x56f   :  { %v2178_v11 = vpop.permute.xlu1 %2177 }
 0x588   :  { %v2023_v17 = vpop.f32.mrf.mxu2  ;;  %v2043_v3 = vpop.f32.mrf.mxu3 }
 0x589   :  { %v2103_v63 = vmul.f32 0.015625, %v2043_v3  ;;  %v2102_v23 = vmul.f32 0.015625, %v2023_v17 }
 0x58b   :  { %v2107_v29 = vmul.f32 %v2103_v63, %v2103_v63  ;;  %v2106_v33 = vmul.f32 %v2102_v23, %v2102_v23  ;;  %v8923_v54 = vperm.slane %v2102_v23, 0  ;;  %v8925_v48 = vperm.slane %v2103_v63, 0 }
 0x58d   :  { %v2118_v27 = vsub.f32 %v8738_v7, %v8923_v54  ;;  %v2119_v22 = vsub.f32 %v8740_v0, %v8925_v48  ;;  %v2122_v63 = vsub.f32 %v8672_v32, %v8923_v54  ;;  %v2126_v23 = vsub.f32 %v8660_v44, %v8923_v54 }
 0x58e   :  { %v2116_v7 = vsub.f32 %v8770_v39, %v8923_v54  ;;  %v2117_v32 = vsub.f32 %v8772_v18, %v8925_v48  ;;  %v2114_v18 = vsub.f32 %v8796_v2, %v8923_v54  ;;  %v2113_v2 = vsub.f32 %v8843_v46, %v8925_v48 }
 0x598   :  { %v2079_v16 = vpop.f32.mrf.mxu2  ;;  %v2099_v61 = vpop.f32.mrf.mxu3 }
 0x599   :  { %v2104_v10 = vmul.f32 0.015625, %v2079_v16  ;;  %v2105_v49 = vmul.f32 0.015625, %v2099_v61  ;;  %v2123_v61 = vsub.f32 %v8674_v47, %v8925_v48  ;;  %v2120_v47 = vsub.f32 %v8712_v40, %v8923_v54 }
 0x59b   :  { %v2108_v36 = vsub.f32 %v2104_v10, %v2106_v33  ;;  %v2109_v12 = vsub.f32 %v2105_v49, %v2107_v29  ;;  %v2230_v29 = vpop.permute.xlu2 %2229  ;;  %v2127_v33 = vsub.f32 %v8662_v21, %v8925_v48  ;;  %v2121_v21 = vsub.f32 %v8714_v50, %v8925_v48 }
 0x59d   :  { %v2128_v30 = vadd.f32 1e-05, %v2108_v36  ;;  %v2129_v31 = vadd.f32 1e-05, %v2109_v12 }
 0x59f   :  { %6489 = vrsqrt.f32 %v2128_v30  ;;  %vm2136_vm10 = vweird.f32 %v2128_v30  ;;  %vm2146_vm12 = vweird.f32 %v2129_v31 }
 0x5a0   :  { %6491 = vrsqrt.f32 %v2129_v31 }
 0x5a5   :  { %v6490_v1 = vpop.eup %6489 }
 0x5a6   :  { %v6492_v37 = vpop.eup %6491  ;;  %v2131_v55 = vmul.f32 %v6490_v1, %v2128_v30  ;;  %vm2137_vm8 = vweird.f32 %v6490_v1 }
 0x5a7   :  { %v2141_v26 = vmul.f32 %v6492_v37, %v2129_v31  ;;  %vm2147_vm9 = vweird.f32 %v6492_v37  ;;  %vm2138_vm11 = vmor %vm2136_vm10, %vm2137_vm8  ;;  %vm58_vm8 = vcmp.lt.s32.totalorder %v7334_v58, 119 }
 0x5a8   :  { %v2132_v5 = vmul.f32 %v6490_v1, %v2131_v55  ;;  %vm2148_vm13 = vmor %vm2146_vm12, %vm2147_vm9  ;;  %v2115_v55 = vsub.f32 %v8798_v15, %v8925_v48  ;;  %v2112_v15 = vsub.f32 %v8841_v28, %v8923_v54  ;;  %v2226_v28 = vpop.permute.xlu2 %2225 }
 0x5a9   :  { %v2142_v24 = vmul.f32 %v6492_v37, %v2141_v26 }
 0x5aa   :  { %v2133_v41 = vmul.f32 0.5, %v2132_v5 }
 0x5ab   :  { %v2143_v56 = vmul.f32 0.5, %v2142_v24 }
 0x5ac   :  { %v2134_v60 = vsub.f32 1.5, %v2133_v41  ;;  %v2186_v41 = vpop.permute.xlu0 %2185 }
 0x5ad   :  { %v2144_v38 = vsub.f32 1.5, %v2143_v56 }
 0x5ae   :  { %v2135_v20 = vmul.f32 %v6490_v1, %v2134_v60 }
 0x5af   :  { %v2145_v57 = vmul.f32 %v6492_v37, %v2144_v38 }
 0x5b0   :  { %v2139_v51 = vsel %vm2138_vm11, %v6490_v1, %v2135_v20 }
 0x5b1   :  { %v2150_v17 = vperm.slane %v2139_v51, 0  ;;  %v2149_v3 = vsel %vm2148_vm13, %v6492_v37, %v2145_v57  ;;  %v2174_v51 = vpop.permute.xlu1 %2173 }
 0x5b2   :  { %v2151_v16 = vperm.slane %v2149_v3, 0 }
 0x5b3   :  { %v2158_v0 = vmul.f32 %v2150_v17, %v2118_v27  ;;  %v2162_v10 = vmul.f32 %v2150_v17, %v2122_v63  ;;  %v2166_v49 = vmul.f32 %v2150_v17, %v2126_v23  ;;  %v2156_v30 = vmul.f32 %v2150_v17, %v2116_v7 }
 0x5b4   :  { %v2159_v36 = vmul.f32 %v2151_v16, %v2119_v22  ;;  %v2163_v12 = vmul.f32 %v2151_v16, %v2123_v61  ;;  %v2167_v44 = vmul.f32 %v2151_v16, %v2127_v33  ;;  %v2157_v1 = vmul.f32 %v2151_v16, %v2117_v32 }
 0x5b5   :  { %v2214_v31 = vmul.f32 %v2198_v8, %v2166_v49  ;;  %v2206_v37 = vmul.f32 %v2182_v52, %v2158_v0  ;;  %v2210_v5 = vmul.f32 %v2190_v13, %v2162_v10  ;;  %v2160_v56 = vmul.f32 %v2150_v17, %v2120_v47 }
 0x5b6   :  { %v2215_v39 = vmul.f32 %v2198_v8, %v2167_v44  ;;  %v2211_v26 = vmul.f32 %v2190_v13, %v2163_v12  ;;  %v2207_v60 = vmul.f32 %v2182_v52, %v2159_v36  ;;  %v2204_v38 = vmul.f32 %v2178_v11, %v2156_v30 }
 0x5b7   :  { %v2262_v24 = vadd.f32 %v8915_v14, %v2214_v31  ;;  %v2161_v20 = vmul.f32 %v2151_v16, %v2121_v21  ;;  %v2205_v57 = vmul.f32 %v2178_v11, %v2157_v1  ;;  %v2208_v8 = vmul.f32 %v2186_v41, %v2160_v56  ;;  %v2170_v1 = vpop.permute.xlu0 %2169 }
 0x5b8   :  { %v2263_v40 = vadd.f32 %v8915_v14, %v2215_v39  ;;  %v2124_v13 = vsub.f32 %v8668_v45, %v8923_v54  ;;  %v2125_v52 = vsub.f32 %v8670_v25, %v8925_v48  ;;  %v8962_v14 = vadd.f32 %v8921_v62, %v2210_v5 }
 0x5b9   :  { %v2294_v50 = vmul.f32 0.044715, %v2262_v24  ;;  %v8965_v11 = vadd.f32 %v8921_v62, %v2211_v26  ;;  %v8967_v22 = vadd.f32 %v2230_v29, %v2206_v37  ;;  %v2209_v3 = vmul.f32 %v2186_v41, %v2161_v20 }
 0x5ba   :  { %v2295_v27 = vmul.f32 0.044715, %v2263_v40  ;;  %v8969_v63 = vadd.f32 %v2230_v29, %v2207_v60  ;;  %v8971_v23 = vadd.f32 %v2226_v28, %v2204_v38  ;;  %v2154_v46 = vmul.f32 %v2150_v17, %v2114_v18 }
 0x5bb   :  { %v2310_v61 = vmul.f32 %v2294_v50, %v2262_v24  ;;  %v8974_v45 = vadd.f32 %v8919_v42, %v2208_v8  ;;  %v8976_v25 = vadd.f32 %v2226_v28, %v2205_v57  ;;  %v2155_v54 = vmul.f32 %v2151_v16, %v2115_v55  ;;  %v2222_v55 = vpop.permute.xlu1 %2221 }
 0x5bc   :  { %v2311_v48 = vmul.f32 %v2295_v27, %v2263_v40  ;;  %v2152_v33 = vmul.f32 %v2150_v17, %v2112_v15  ;;  %v2153_v62 = vmul.f32 %v2151_v16, %v2113_v2  ;;  %v2164_v0 = vmul.f32 %v2150_v17, %v2124_v13  ;;  %v2218_v2 = vpop.permute.xlu2 %2217 }
 0x5bd   :  { %v2326_v7 = vmul.f32 %v2310_v61, %v2262_v24  ;;  %v8979_v10 = vadd.f32 %v8919_v42, %v2209_v3  ;;  %v2278_v29 = vmul.f32 0.5, %v2262_v24  ;;  %v2165_v32 = vmul.f32 %v2151_v16, %v2125_v52 }
 0x5be   :  { %v2327_v49 = vmul.f32 %v2311_v48, %v2263_v40  ;;  %v2202_v36 = vmul.f32 %v2174_v51, %v2154_v46  ;;  %v2212_v44 = vmul.f32 %v8913_v34, %v2164_v0  ;;  %v2290_v30 = vmul.f32 0.044715, %v8962_v14 }
 0x5bf   :  { %v2342_v12 = vadd.f32 %v2326_v7, %v2262_v24  ;;  %v2203_v31 = vmul.f32 %v2174_v51, %v2155_v54  ;;  %v2213_v21 = vmul.f32 %v8913_v34, %v2165_v32  ;;  %v2291_v37 = vmul.f32 0.044715, %v8965_v11 }
 0x5c0   :  { %v2343_v47 = vadd.f32 %v2327_v49, %v2263_v40  ;;  %v2200_v17 = vmul.f32 %v2170_v1, %v2152_v33  ;;  %v8986_v42 = vadd.f32 %v8917_v43, %v2212_v44  ;;  %v2306_v16 = vmul.f32 %v2290_v30, %v8962_v14 }
 0x5c1   :  { %v2358_v39 = vmul.f32 0.7978846, %v2342_v12  ;;  %v8990_v26 = vadd.f32 %v8917_v43, %v2213_v21  ;;  %v2307_v5 = vmul.f32 %v2291_v37, %v8965_v11  ;;  %v2288_v24 = vmul.f32 0.044715, %v8974_v45 }
 0x5c2   :  { %v2359_v18 = vmul.f32 0.7978846, %v2343_v47  ;;  %v2201_v41 = vmul.f32 %v2170_v1, %v2153_v62  ;;  %v2292_v34 = vmul.f32 0.044715, %v8986_v42  ;;  %v2322_v56 = vmul.f32 %v2306_v16, %v8962_v14 }
 0x5c3   :  { %6493 = vtanh.f32 %v2358_v39  ;;  %v2279_v60 = vmul.f32 0.5, %v2263_v40  ;;  %v2293_v38 = vmul.f32 0.044715, %v8990_v26  ;;  %v2323_v20 = vmul.f32 %v2307_v5, %v8965_v11 }
 0x5c4   :  { %6495 = vtanh.f32 %v2359_v18  ;;  %v8998_v50 = vadd.f32 %v2222_v55, %v2202_v36  ;;  %v2308_v43 = vmul.f32 %v2292_v34, %v8986_v42  ;;  %v2338_v57 = vadd.f32 %v2322_v56, %v8962_v14 }
 0x5c5   :  { %v2304_v8 = vmul.f32 %v2288_v24, %v8974_v45  ;;  %v9003_v51 = vadd.f32 %v2222_v55, %v2203_v31  ;;  %v2309_v15 = vmul.f32 %v2293_v38, %v8990_v26  ;;  %v2339_v27 = vadd.f32 %v2323_v20, %v8965_v11 }
 0x5c6   :  { %v2289_v40 = vmul.f32 0.044715, %v8979_v10  ;;  %v2324_v13 = vmul.f32 %v2308_v43, %v8986_v42  ;;  %v2354_v52 = vmul.f32 0.7978846, %v2338_v57  ;;  %v2286_v28 = vmul.f32 0.044715, %v8967_v22 }
 0x5c7   :  { %v2320_v3 = vmul.f32 %v2304_v8, %v8974_v45  ;;  %v9011_v46 = vadd.f32 %v2218_v2, %v2200_v17  ;;  %v2325_v61 = vmul.f32 %v2309_v15, %v8990_v26  ;;  %v2355_v54 = vmul.f32 0.7978846, %v2339_v27 }
 0x5c8   :  { %v2305_v48 = vmul.f32 %v2289_v40, %v8979_v10  ;;  %v2340_v62 = vadd.f32 %v2324_v13, %v8986_v42  ;;  %6497 = vtanh.f32 %v2354_v52  ;;  %v2302_v0 = vmul.f32 %v2286_v28, %v8967_v22 }
 0x5c9   :  { %v6494_v33 = vpop.eup %6493  ;;  %v2336_v7 = vadd.f32 %v2320_v3, %v8974_v45  ;;  %v2341_v36 = vadd.f32 %v2325_v61, %v8990_v26  ;;  %6499 = vtanh.f32 %v2355_v54  ;;  %v2287_v17 = vmul.f32 0.044715, %v8969_v63 }
 0x5ca   :  { %v6496_v49 = vpop.eup %6495  ;;  %v2390_v32 = vadd.f32 1.0, %v6494_v33  ;;  %v2321_v12 = vmul.f32 %v2305_v48, %v8979_v10  ;;  %v2356_v30 = vmul.f32 0.7978846, %v2340_v62  ;;  %v2318_v1 = vmul.f32 %v2302_v0, %v8967_v22 }
 0x5cb   :  { %v2391_v44 = vadd.f32 1.0, %v6496_v49  ;;  %v2352_v31 = vmul.f32 0.7978846, %v2336_v7  ;;  %v2357_v21 = vmul.f32 0.7978846, %v2341_v36  ;;  %v9023_v39 = vadd.f32 %v2218_v2, %v2201_v41 }
 0x5cc   :  { %v2406_v47 = vmul.f32 %v2390_v32, %v2278_v29  ;;  %v2337_v37 = vadd.f32 %v2321_v12, %v8979_v10  ;;  %6501 = vtanh.f32 %v2356_v30  ;;  %v2334_v55 = vadd.f32 %v2318_v1, %v8967_v22 }
 0x5cd   :  { %v2407_v16 = vmul.f32 %v2391_v44, %v2279_v60  ;;  %6503 = vtanh.f32 %v2357_v21  ;;  %v2303_v5 = vmul.f32 %v2287_v17, %v8969_v63  ;;  %v2284_v24 = vmul.f32 0.044715, %v8971_v23 }
 0x5ce   :  { %2481 = vmatpush.msra.mxu0 %v2406_v47  ;;  %v2353_v18 = vmul.f32 0.7978846, %v2337_v37  ;;  %v6498_v34 = vpop.eup %6497  ;;  %v2274_v29 = vmul.f32 0.5, %v8962_v14  ;;  %6505 = vtanh.f32 %v2352_v31  ;;  %v2350_v56 = vmul.f32 0.7978846, %v2334_v55 }
 0x5cf   :  { %2522 = vmatpush.msra.mxu1 %v2407_v16  ;;  %v2285_v41 = vmul.f32 0.044715, %v8976_v25  ;;  %v6500_v38 = vpop.eup %6499  ;;  %v2275_v60 = vmul.f32 0.5, %v8965_v11  ;;  %v2319_v20 = vmul.f32 %v2303_v5, %v8969_v63  ;;  %v2300_v43 = vmul.f32 %v2284_v24, %v8971_v23 }
 0x5d0   :  { %6507 = vtanh.f32 %v2353_v18  ;;  %v2276_v57 = vmul.f32 0.5, %v8986_v42  ;;  %v2272_v8 = vmul.f32 0.5, %v8974_v45  ;;  %v2277_v14 = vmul.f32 0.5, %v8990_v26 }
 0x5d1   :  { %6509 = vtanh.f32 %v2350_v56  ;;  %v2301_v15 = vmul.f32 %v2285_v41, %v8976_v25  ;;  %v2335_v27 = vadd.f32 %v2319_v20, %v8969_v63  ;;  %v2316_v40 = vmul.f32 %v2300_v43, %v8971_v23 }
 0x5d2   :  { %v2282_v11 = vmul.f32 0.044715, %v8998_v50  ;;  %v6502_v2 = vpop.eup %6501  ;;  %v2386_v13 = vadd.f32 1.0, %v6498_v34  ;;  %v2273_v52 = vmul.f32 0.5, %v8979_v10  ;;  %v2283_v42 = vmul.f32 0.044715, %v9003_v51 }
 0x5d3   :  { %v2317_v3 = vmul.f32 %v2301_v15, %v8976_v25  ;;  %v6504_v45 = vpop.eup %6503  ;;  %v2388_v28 = vadd.f32 1.0, %v6502_v2  ;;  %v2351_v61 = vmul.f32 0.7978846, %v2335_v27  ;;  %v2332_v54 = vadd.f32 %v2316_v40, %v8971_v23 }
 0x5d4   :  { %v2298_v26 = vmul.f32 %v2282_v11, %v8998_v50  ;;  %v6506_v48 = vpop.eup %6505  ;;  %v2389_v33 = vadd.f32 1.0, %v6504_v45  ;;  %v2387_v62 = vadd.f32 1.0, %v6500_v38  ;;  %v2299_v0 = vmul.f32 %v2283_v42, %v9003_v51 }
 0x5d5   :  { %v2333_v7 = vadd.f32 %v2317_v3, %v8976_v25  ;;  %v2404_v10 = vmul.f32 %v2388_v28, %v2276_v57  ;;  %v2384_v32 = vadd.f32 1.0, %v6506_v48  ;;  %6511 = vtanh.f32 %v2351_v61 }
 0x5d6   :  { %v6508_v49 = vpop.eup %6507  ;;  %v2348_v36 = vmul.f32 0.7978846, %v2332_v54  ;;  %v2405_v44 = vmul.f32 %v2389_v33, %v2277_v14  ;;  %v2314_v1 = vmul.f32 %v2298_v26, %v8998_v50  ;;  %v2402_v47 = vmul.f32 %v2386_v13, %v2274_v29 }
 0x5d7   :  { %v6510_v12 = vpop.eup %6509  ;;  %v2385_v30 = vadd.f32 1.0, %v6508_v49  ;;  %v2349_v31 = vmul.f32 0.7978846, %v2333_v7  ;;  %2482 = vmatpush.msra.mxu0 %v2404_v10  ;;  %v2315_v37 = vmul.f32 %v2299_v0, %v9003_v51  ;;  %v2403_v17 = vmul.f32 %v2387_v62, %v2275_v60  ;;  %v9071_v7 = vld [vmem:[%s11935_s3] sm:$0xff] }
 0x5d8   :  { %v2382_v21 = vadd.f32 1.0, %v6510_v12  ;;  %6513 = vtanh.f32 %v2348_v36  ;;  %2523 = vmatpush.msra.mxu1 %v2405_v44  ;;  %v2330_v16 = vadd.f32 %v2314_v1, %v8998_v50  ;;  %v2280_v55 = vmul.f32 0.044715, %v9011_v46  ;;  %v6116_v1 = vld [vmem:[%s11936_s4 + $0x50] sm:$0xff] }
 0x5d9   :  { %6515 = vtanh.f32 %v2349_v31  ;;  %2483 = vmatpush.msra.mxu0 %v2402_v47  ;;  %v2400_v18 = vmul.f32 %v2384_v32, %v2272_v8  ;;  %v2270_v5 = vmul.f32 0.5, %v8967_v22  ;;  %v2331_v24 = vadd.f32 %v2315_v37, %v9003_v51  ;;  %v6117_v47 = vld [vmem:[%s11936_s4 + $0x58] sm:$0xff]  ;;  %v6119_v37 = vld [vmem:[%s11936_s4 + $0x68] sm:$0xff] }
 0x5da   :  { %v2281_v34 = vmul.f32 0.044715, %v9023_v39  ;;  %2524 = vmatpush.msra.mxu1 %v2403_v17  ;;  %v2401_v29 = vmul.f32 %v2385_v30, %v2273_v52  ;;  %v2346_v56 = vmul.f32 0.7978846, %v2330_v16  ;;  %v2296_v41 = vmul.f32 %v2280_v55, %v9011_v46  ;;  %v6114_v30 = vld [vmem:[%s11936_s4 + $0x40] sm:$0xff]  ;;  %v6120_v17 = vld [vmem:[%s11936_s4 + $0x70] sm:$0xff] }
 0x5db   :  { %v6512_v38 = vpop.eup %6511  ;;  %2484 = vmatpush.msra.mxu0 %v2400_v18  ;;  %v2398_v60 = vmul.f32 %v2382_v21, %v2270_v5  ;;  %v2347_v20 = vmul.f32 0.7978846, %v2331_v24  ;;  %v6834_v57 = vmov 21   ;;  %v2271_v22 = vmul.f32 0.5, %v8969_v63  ;;  %v6118_v21 = vld [vmem:[%s11936_s4 + $0x60] sm:$0xff]  ;;  %v6121_v16 = vld [vmem:[%s11936_s4 + $0x78] sm:$0xff] }
 0x5dc   :  { %v2297_v43 = vmul.f32 %v2281_v34, %v9023_v39  ;;  %6361 = vset.pattern.permute.xlu0 %v6834_v57  ;;  %2525 = vmatpush.msra.mxu1 %v2401_v29  ;;  %v2383_v8 = vadd.f32 1.0, %v6512_v38  ;;  %6517 = vtanh.f32 %v2346_v56  ;;  %v2312_v15 = vmul.f32 %v2296_v41, %v9011_v46 }
 0x5dd   :  { %2438 = vperm.xlu0 %6361, %v8836_v4   ;;  %2485 = vmatpush.msra.mxu0 %v2398_v60  ;;  %6519 = vtanh.f32 %v2347_v20  ;;  %v2268_v2 = vmul.f32 0.5, %v8971_v23  ;;  %v2269_v63 = vmul.f32 0.5, %v8976_v25  ;;  %v2266_v48 = vmul.f32 0.5, %v8998_v50 }
 0x5de   :  { %v6514_v14 = vpop.eup %6513  ;;  %v2313_v27 = vmul.f32 %v2297_v43, %v9023_v39  ;;  %6359 = vset.pattern.permute.xlu1 %v6834_v57  ;;  %v2399_v11 = vmul.f32 %v2383_v8, %v2271_v22  ;;  %v2328_v52 = vadd.f32 %v2312_v15, %v9011_v46  ;;  %6360 = vset.pattern.permute.xlu2 %v6834_v57  ;;  %v2267_v25 = vmul.f32 0.5, %v9003_v51 }
 0x5df   :  { %v6516_v40 = vpop.eup %6515  ;;  %v2380_v13 = vadd.f32 1.0, %v6514_v14  ;;  %2446 = vperm.xlu1 %6359, %v8820_v6   ;;  %2442 = vperm.xlu2 %6360, %v8803_v35   ;;  %v2264_v51 = vmul.f32 0.5, %v9011_v46  ;;  %v2265_v36 = vmul.f32 0.5, %v9023_v39  ;;  %v9087_v46 = vld [vmem:[%s11935_s3 + $0x8] sm:$0xff]  ;;  %v6835_v20 = vmov 22  }
 0x5e0   :  { %v2381_v3 = vadd.f32 1.0, %v6516_v40  ;;  %v2329_v42 = vadd.f32 %v2313_v27, %v9023_v39  ;;  %2526 = vmatpush.msra.mxu1 %v2399_v11  ;;  %v2344_v28 = vmul.f32 0.7978846, %v2328_v52  ;;  %v6115_v39 = vld [vmem:[%s11936_s4 + $0x48] sm:$0xff]  ;;  %v6836_v27 = vmov 23  }
 0x5e1   :  { %v2396_v45 = vmul.f32 %v2380_v13, %v2268_v2 }
 0x5e2   :  { %v2397_v61 = vmul.f32 %v2381_v3, %v2269_v63  ;;  %v2345_v54 = vmul.f32 0.7978846, %v2329_v42  ;;  %v6518_v26 = vpop.eup %6517  ;;  %6521 = vtanh.f32 %v2344_v28 }
 0x5e3   :  { %2486 = vmatpush.msra.mxu0 %v2396_v45  ;;  %v6520_v23 = vpop.eup %6519  ;;  %v2378_v33 = vadd.f32 1.0, %v6518_v26 }
 0x5e4   :  { %2527 = vmatpush.msra.mxu1 %v2397_v61  ;;  %6523 = vtanh.f32 %v2345_v54  ;;  %v2379_v62 = vadd.f32 1.0, %v6520_v23 }
 0x5e5   :  { %2418 = vperm.xlu0 %6361, %v9071_v7   ;;  %v2394_v0 = vmul.f32 %v2378_v33, %v2266_v48  ;;  %v6837_v33 = vmov 11  }
 0x5e6   :  { %v2395_v49 = vmul.f32 %v2379_v62, %v2267_v25 }
 0x5e7   :  { %2434 = vperm.xlu1 %6359, %v8809_v9   ;;  %2487 = vmatpush.msra.mxu0 %v2394_v0 }
 0x5e8   :  { %2430 = vperm.xlu2 %6360, %v8879_v53   ;;  %v6522_v50 = vpop.eup %6521  ;;  %2528 = vmatpush.msra.mxu1 %v2395_v49 }
 0x5e9   :  { %v2376_v32 = vadd.f32 1.0, %v6522_v50 }
 0x5ea   :  { %v6524_v10 = vpop.eup %6523 }
 0x5eb   :  { %v2377_v12 = vadd.f32 1.0, %v6524_v10  ;;  %v2392_v44 = vmul.f32 %v2376_v32, %v2264_v51 }
 0x5ed   :  { %v2393_v31 = vmul.f32 %v2377_v12, %v2265_v36  ;;  %2488 = vmatpush.msra.mxu0 %v2392_v44  ;;  %6365 = vset.pattern.permute.xlu0 %v6835_v20  ;;  %v6838_v44 = vmov 9  }
 0x5ee   :  { %6122 = vmatmul.msk.f32.vlgmr.msra.gmra.mxu0 %vm666_vm5, %v6114_v30  ;;  %2730 = vperm.xlu0 %6365, %v8879_v53  }
 0x5ef   :  { %2529 = vmatpush.msra.mxu1 %v2393_v31  ;;  %2426 = vperm.xlu1 %6359, %v8899_v59  }
 0x5f0   :  { %6130 = vmatmul.msk.f32.vlgmr.msra.gmra.mxu1 %vm666_vm5, %v6114_v30  ;;  %2422 = vperm.xlu2 %6360, %v9087_v46  }
 0x5f6   :  { %6123 = vmatmul.msk.f32.gmra.mxu0 %vm666_vm5, %v6115_v39  ;;  %6366 = vset.pattern.permute.xlu0 %v6836_v27 }
 0x5f7   :  { %6362 = vset.pattern.permute.xlu1 %v6835_v20  ;;  %2794 = vperm.xlu0 %6366, %v8820_v6  }
 0x5f8   :  { %6131 = vmatmul.msk.f32.gmra.mxu1 %vm666_vm5, %v6115_v39  ;;  %2746 = vperm.xlu1 %6362, %v8820_v6  }
 0x5f9   :  { %6363 = vset.pattern.permute.xlu2 %v6835_v20 }
 0x5fa   :  { %2742 = vperm.xlu2 %6363, %v8803_v35  }
 0x5fe   :  { %6124 = vmatmul.msk.f32.gmra.mxu0 %vm666_vm5, %v6116_v1 }
 0x5ff   :  { %2774 = vperm.xlu0 %6366, %v8899_v59  }
 0x600   :  { %6132 = vmatmul.msk.f32.gmra.mxu1 %vm666_vm5, %v6116_v1  ;;  %2738 = vperm.xlu1 %6362, %v8836_v4  }
 0x602   :  { %6364 = vset.pattern.permute.xlu2 %v6836_v27 }
 0x603   :  { %2790 = vperm.xlu2 %6364, %v8803_v35  }
 0x606   :  { %6125 = vmatmul.msk.f32.gmra.mxu0 %vm666_vm5, %v6117_v47 }
 0x607   :  { %6383 = vset.pattern.permute.xlu0 %v6837_v33 }
 0x608   :  { %6133 = vmatmul.msk.f32.gmra.mxu1 %vm666_vm5, %v6117_v47  ;;  %2734 = vperm.xlu1 %6362, %v8809_v9  }
 0x609   :  { %3296 = vperm.xlu0 %6383, %v8809_v9  }
 0x60b   :  { %2786 = vperm.xlu2 %6364, %v8836_v4  }
 0x60e   :  { %6126 = vmatmul.msk.f32.gmra.mxu0 %vm666_vm5, %v6118_v21 }
 0x610   :  { %6134 = vmatmul.msk.f32.gmra.mxu1 %vm666_vm5, %v6118_v21  ;;  %6367 = vset.pattern.permute.xlu1 %v6836_v27 }
 0x611   :  { %2782 = vperm.xlu1 %6367, %v8809_v9   ;;  %6384 = vset.pattern.permute.xlu0 %v6838_v44 }
 0x612   :  { %3083 = vperm.xlu0 %6384, %v8820_v6  }
 0x613   :  { %6368 = vset.pattern.permute.xlu2 %v6835_v20 }
 0x614   :  { %2726 = vperm.xlu2 %6368, %v8899_v59  }
 0x616   :  { %6127 = vmatmul.msk.f32.gmra.mxu0 %vm666_vm5, %v6119_v37 }
 0x618   :  { %6135 = vmatmul.msk.f32.gmra.mxu1 %vm666_vm5, %v6119_v37 }
 0x619   :  { %2778 = vperm.xlu1 %6367, %v8879_v53  }
 0x61c   :  { %2722 = vperm.xlu2 %6368, %v9087_v46  }
 0x61e   :  { %6128 = vmatmul.msk.f32.gmra.mxu0 %vm666_vm5, %v6120_v17 }
 0x620   :  { %6136 = vmatmul.msk.f32.gmra.mxu1 %vm666_vm5, %v6120_v17 }
 0x621   :  { %6369 = vset.pattern.permute.xlu1 %v6835_v20 }
 0x622   :  { %2718 = vperm.xlu1 %6369, %v9071_v7  }
 0x624   :  { %6370 = vset.pattern.permute.xlu2 %v6836_v27 }
 0x625   :  { %2770 = vperm.xlu2 %6370, %v9087_v46  }
 0x626   :  { %6129 = vmatmul.msk.f32.gmra.mxu0 %vm666_vm5, %v6121_v16 }
 0x628   :  { %6137 = vmatmul.msk.f32.gmra.mxu1 %vm666_vm5, %v6121_v16  ;;  %v6768_v16 = vld [vmem:[%s11935_s3 + $0x30] sm:$0xff] }
 0x629   :  { %3079 = vperm.xlu0 %6384, %v6768_v16  }
 0x62a   :  { %6371 = vset.pattern.permute.xlu1 %v6836_v27 }
 0x62b   :  { %2766 = vperm.xlu1 %6371, %v9071_v7  }
 0x631   :  { %3067 = vperm.xlu0 %6384, %v8879_v53  }
 0x639   :  { %v2443_v8 = vpop.permute.xlu2 %2442  ;;  %3063 = vperm.xlu0 %6384, %v8899_v59  }
 0x641   :  { %3059 = vperm.xlu0 %6384, %v9087_v46  }
 0x642   :  { %v2431_v11 = vpop.permute.xlu2 %2430 }
 0x64a   :  { %v2423_v23 = vpop.permute.xlu2 %2422 }
 0x64f   :  { %v2439_v63 = vpop.permute.xlu0 %2438 }
 0x651   :  { %v2447_v22 = vpop.permute.xlu1 %2446 }
 0x657   :  { %v2419_v62 = vpop.permute.xlu0 %2418 }
 0x659   :  { %v2435_v40 = vpop.permute.xlu1 %2434 }
 0x661   :  { %v2427_v54 = vpop.permute.xlu1 %2426 }
 0x66b   :  { %v9125_v55 = vpop.f32.mrf.mxu0 }
 0x66c   :  { %v9196_v9 = vadd.f32 %v9125_v55, %v2419_v62 }
 0x66d   :  { %v9127_v18 = vpop.f32.mrf.mxu1 }
 0x66e   :  { %v9200_v10 = vadd.f32 %v9127_v18, %v2419_v62  ;;  %v2595_v18 = vmul.f32 %v9196_v9, %v9196_v9 }
 0x673   :  { %v9129_v5 = vpop.f32.mrf.mxu0 }
 0x674   :  { %v9187_v49 = vadd.f32 %v9129_v5, %v2423_v23  ;;  %v2596_v5 = vmul.f32 %v9200_v10, %v9200_v10 }
 0x675   :  { %v9131_v24 = vpop.f32.mrf.mxu1 }
 0x676   :  { %v9192_v50 = vadd.f32 %v9131_v24, %v2423_v23  ;;  %v2597_v17 = vmul.f32 %v9187_v49, %v9187_v49  ;;  %v6839_v24 = vmov 10  }
 0x677   :  { %6373 = vset.pattern.permute.xlu2 %v6839_v24  ;;  %6385 = vset.pattern.permute.xlu0 %v6839_v24 }
 0x678   :  { %v2598_v55 = vmul.f32 %v9192_v50, %v9192_v50  ;;  %3175 = vperm.xlu0 %6385, %v6768_v16  }
 0x67b   :  { %v2496_v34 = vpop.f32.mrf.mxu0 }
 0x67c   :  { %v9178_v25 = vadd.f32 %v2496_v34, %v2427_v54  ;;  %v6769_v34 = vld [vmem:[%s11935_s3 + $0x38] sm:$0xff] }
 0x67d   :  { %v2537_v29 = vpop.f32.mrf.mxu1  ;;  %3179 = vperm.xlu2 %6373, %v6769_v34  }
 0x67e   :  { %v9182_v0 = vadd.f32 %v2537_v29, %v2427_v54  ;;  %v2599_v21 = vmul.f32 %v9178_v25, %v9178_v25  ;;  %v6840_v29 = vmov 24  }
 0x67f   :  { %6372 = vset.pattern.permute.xlu1 %v6840_v29 }
 0x680   :  { %v2600_v37 = vmul.f32 %v9182_v0, %v9182_v0  ;;  %3131 = vperm.xlu1 %6372, %v6769_v34  }
 0x683   :  { %v2499_v56 = vpop.f32.mrf.mxu0 }
 0x684   :  { %v9170_v4 = vadd.f32 %v2499_v56, %v2431_v11  ;;  %v6770_v56 = vld [vmem:[%s11935_s3 + $0x28] sm:$0xff] }
 0x685   :  { %v2540_v41 = vpop.f32.mrf.mxu1  ;;  %6375 = vset.pattern.permute.xlu2 %v6840_v29  ;;  %3171 = vperm.xlu0 %6385, %v6770_v56  }
 0x686   :  { %v9174_v48 = vadd.f32 %v2540_v41, %v2431_v11  ;;  %v2601_v47 = vmul.f32 %v9170_v4, %v9170_v4  ;;  %3127 = vperm.xlu2 %6375, %v6768_v16   ;;  %v6771_v41 = vld [vmem:[%s11935_s3 + $0x20] sm:$0xff] }
 0x688   :  { %v2602_v6 = vmul.f32 %v9174_v48, %v9174_v48  ;;  %6374 = vset.pattern.permute.xlu1 %v6838_v44 }
 0x689   :  { %3075 = vperm.xlu1 %6374, %v6770_v56  }
 0x68b   :  { %v2502_v38 = vpop.f32.mrf.mxu0 }
 0x68c   :  { %v9163_v61 = vadd.f32 %v2502_v38, %v2435_v40  ;;  %v6773_v38 = vld [vmem:[%s11935_s3 + $0x10] sm:$0xff] }
 0x68d   :  { %v2543_v60 = vpop.f32.mrf.mxu1  ;;  %3155 = vperm.xlu0 %6385, %v9087_v46  }
 0x68e   :  { %v9166_v26 = vadd.f32 %v2543_v60, %v2435_v40  ;;  %v2603_v39 = vmul.f32 %v9163_v61, %v9163_v61  ;;  %3123 = vperm.xlu2 %6375, %v6770_v56  }
 0x690   :  { %v2604_v1 = vmul.f32 %v9166_v26, %v9166_v26 }
 0x691   :  { %6376 = vset.pattern.permute.xlu1 %v6837_v33 }
 0x692   :  { %3308 = vperm.xlu1 %6376, %v6769_v34  }
 0x693   :  { %v2505_v43 = vpop.f32.mrf.mxu0 }
 0x694   :  { %v9157_v45 = vadd.f32 %v2505_v43, %v2439_v63 }
 0x695   :  { %v2546_v57 = vpop.f32.mrf.mxu1 }
 0x696   :  { %v9160_v28 = vadd.f32 %v2546_v57, %v2439_v63  ;;  %v2605_v30 = vmul.f32 %v9157_v45, %v9157_v45  ;;  %6380 = vset.pattern.permute.xlu2 %v6839_v24  ;;  %v2747_v57 = vpop.permute.xlu1 %2746 }
 0x697   :  { %3167 = vperm.xlu2 %6380, %v6771_v41  }
 0x698   :  { %v2606_v31 = vmul.f32 %v9160_v28, %v9160_v28 }
 0x69a   :  { %6377 = vset.pattern.permute.xlu1 %v6838_v44 }
 0x69b   :  { %v2508_v15 = vpop.f32.mrf.mxu0  ;;  %3071 = vperm.xlu1 %6377, %v6771_v41  }
 0x69c   :  { %v9150_v42 = vadd.f32 %v2508_v15, %v2443_v8 }
 0x69d   :  { %v2549_v14 = vpop.f32.mrf.mxu1 }
 0x69e   :  { %v9154_v35 = vadd.f32 %v2549_v14, %v2443_v8  ;;  %v2607_v36 = vmul.f32 %v9150_v42, %v9150_v42  ;;  %v9300_v54 = vpop.permute.xlu1 %2738 }
 0x69f   :  { %3163 = vperm.xlu2 %6380, %v8879_v53   ;;  %v6772_v53 = vld [vmem:[%s11935_s3 + $0x18] sm:$0xff] }
 0x6a0   :  { %v2608_v12 = vmul.f32 %v9154_v35, %v9154_v35 }
 0x6a3   :  { %v2511_v2 = vpop.f32.mrf.mxu0  ;;  %6378 = vset.pattern.permute.xlu1 %v6837_v33 }
 0x6a4   :  { %v9145_v13 = vadd.f32 %v2511_v2, %v2447_v22  ;;  %3304 = vperm.xlu1 %6378, %v6768_v16  }
 0x6a5   :  { %v2552_v52 = vpop.f32.mrf.mxu1 }
 0x6a6   :  { %v9147_v3 = vadd.f32 %v2552_v52, %v2447_v22  ;;  %2563 = vmatpush.msrb.mxu2 %v9145_v13  ;;  %v2609_v51 = vmul.f32 %v9145_v13, %v9145_v13 }
 0x6a7   :  { %3159 = vperm.xlu2 %6380, %v8899_v59  }
 0x6a8   :  { %2583 = vmatpush.msrb.mxu3 %v9147_v3  ;;  %2564 = vmatpush.msrb.mxu2 %v9150_v42  ;;  %v2610_v32 = vmul.f32 %v9147_v3, %v9147_v3 }
 0x6aa   :  { %2584 = vmatpush.msrb.mxu3 %v9154_v35  ;;  %2565 = vmatpush.msrb.mxu2 %v9157_v45 }
 0x6ac   :  { %2585 = vmatpush.msrb.mxu3 %v9160_v28  ;;  %2566 = vmatpush.msrb.mxu2 %v9163_v61 }
 0x6ad   :  { %6379 = vset.pattern.permute.xlu1 %v6840_v29 }
 0x6ae   :  { %2586 = vmatpush.msrb.mxu3 %v9166_v26  ;;  %2567 = vmatpush.msrb.mxu2 %v9170_v4 }
 0x6af   :  { %3119 = vperm.xlu1 %6379, %v6771_v41   ;;  %6388 = vset.pattern.permute.xlu2 %v6840_v29 }
 0x6b0   :  { %2587 = vmatpush.msrb.mxu3 %v9174_v48  ;;  %2568 = vmatpush.msrb.mxu2 %v9178_v25 }
 0x6b1   :  { %3107 = vperm.xlu2 %6388, %v9087_v46   ;;  %v9288_v46 = vpop.permute.xlu2 %2742 }
 0x6b2   :  { %2588 = vmatpush.msrb.mxu3 %v9182_v0  ;;  %2569 = vmatpush.msrb.mxu2 %v9187_v49 }
 0x6b4   :  { %2589 = vmatpush.msrb.mxu3 %v9192_v50  ;;  %2570 = vmatpush.msrb.mxu2 %v9196_v9 }
 0x6b5   :  { %6138 = vmatmul.msk.f32.vlgmr.msrb.gmra.mxu2 %vm666_vm5, %v12126_v19 }
 0x6b6   :  { %2590 = vmatpush.msrb.mxu3 %v9200_v10  ;;  %2619 = vmatpush.msra.mxu2 %v2609_v51 }
 0x6b7   :  { %6139 = vmatmul.msk.f32.vlgmr.msrb.gmra.mxu3 %vm666_vm5, %v12126_v19  ;;  %6381 = vset.pattern.permute.xlu1 %v6837_v33 }
 0x6b8   :  { %2639 = vmatpush.msra.mxu3 %v2610_v32  ;;  %2620 = vmatpush.msra.mxu2 %v2607_v36 }
 0x6b9   :  { %3300 = vperm.xlu1 %6381, %v6770_v56   ;;  %3103 = vperm.xlu2 %6388, %v9071_v7   ;;  %v9294_v60 = vpop.permute.xlu2 %2790 }
 0x6ba   :  { %2640 = vmatpush.msra.mxu3 %v2608_v12  ;;  %2621 = vmatpush.msra.mxu2 %v2605_v30  ;;  %v9304_v12 = vpop.permute.xlu1 %2734 }
 0x6bc   :  { %2641 = vmatpush.msra.mxu3 %v2606_v31  ;;  %2622 = vmatpush.msra.mxu2 %v2603_v39 }
 0x6be   :  { %2642 = vmatpush.msra.mxu3 %v2604_v1  ;;  %2623 = vmatpush.msra.mxu2 %v2601_v47 }
 0x6c0   :  { %2643 = vmatpush.msra.mxu3 %v2602_v6  ;;  %2624 = vmatpush.msra.mxu2 %v2599_v21 }
 0x6c1   :  { %6382 = vset.pattern.permute.xlu1 %v6840_v29  ;;  %6390 = vset.pattern.permute.xlu2 %v6837_v33  ;;  %v9296_v20 = vpop.permute.xlu2 %2786 }
 0x6c2   :  { %2644 = vmatpush.msra.mxu3 %v2600_v37  ;;  %2625 = vmatpush.msra.mxu2 %v2597_v17  ;;  %v2731_v17 = vpop.permute.xlu0 %2730  ;;  %v2783_v56 = vpop.permute.xlu1 %2782 }
 0x6c3   :  { %3115 = vperm.xlu1 %6382, %v6772_v53  }
 0x6c4   :  { %2645 = vmatpush.msra.mxu3 %v2598_v55  ;;  %2626 = vmatpush.msra.mxu2 %v2595_v18 }
 0x6c5   :  { %6140 = vmatmul.msk.f32.vlgmr.msra.gmra.mxu2 %vm666_vm5, %v12126_v19 }
 0x6c6   :  { %2646 = vmatpush.msra.mxu3 %v2596_v5 }
 0x6c7   :  { %6141 = vmatmul.msk.f32.vlgmr.msra.gmra.mxu3 %vm666_vm5, %v12126_v19 }
 0x6cb   :  { %3111 = vperm.xlu1 %6382, %v8899_v59  }
 0x6d3   :  { %6386 = vset.pattern.permute.xlu1 %v6837_v33 }
 0x6d4   :  { %3292 = vperm.xlu1 %6386, %v6772_v53  }
 0x6dc   :  { %6387 = vset.pattern.permute.xlu1 %v6838_v44 }
 0x6dd   :  { %3055 = vperm.xlu1 %6387, %v9071_v7   ;;  %v9298_v7 = vpop.permute.xlu2 %2726 }
 0x6e5   :  { %6389 = vset.pattern.permute.xlu1 %v6837_v33  ;;  %v9302_v62 = vpop.permute.xlu2 %2722 }
 0x6e6   :  { %3288 = vperm.xlu1 %6389, %v6773_v38  }
 0x6ed   :  { %v9308_v21 = vpop.permute.xlu2 %2770 }
 0x738   :  { %v2572_v59 = vpop.f32.mrf.mxu2 }
 0x739   :  { %v2651_v8 = vmul.f32 0.015625, %v2572_v59 }
 0x73a   :  { %v2592_v43 = vpop.f32.mrf.mxu3 }
 0x73b   :  { %v2652_v22 = vmul.f32 0.015625, %v2592_v43  ;;  %v2655_v27 = vmul.f32 %v2651_v8, %v2651_v8  ;;  %v9306_v47 = vperm.slane %v2651_v8, 0 }
 0x73d   :  { %v2656_v15 = vmul.f32 %v2652_v22, %v2652_v22  ;;  %v9310_v16 = vperm.slane %v2652_v22, 0  ;;  %v2663_v24 = vsub.f32 %v9187_v49, %v9306_v47  ;;  %v2669_v41 = vsub.f32 %v9163_v61, %v9306_v47 }
 0x73e   :  { %v2675_v53 = vsub.f32 %v9145_v13, %v9306_v47  ;;  %v2667_v59 = vsub.f32 %v9170_v4, %v9306_v47 }
 0x73f   :  { %v2676_v43 = vsub.f32 %v9147_v3, %v9310_v16  ;;  %v2662_v3 = vsub.f32 %v9200_v10, %v9310_v16  ;;  %v2670_v10 = vsub.f32 %v9166_v26, %v9310_v16 }
 0x748   :  { %v2628_v14 = vpop.f32.mrf.mxu2 }
 0x749   :  { %v2653_v40 = vmul.f32 0.015625, %v2628_v14 }
 0x74a   :  { %v2648_v11 = vpop.f32.mrf.mxu3 }
 0x74b   :  { %v2654_v2 = vmul.f32 0.015625, %v2648_v11  ;;  %v2657_v52 = vsub.f32 %v2653_v40, %v2655_v27  ;;  %v9334_v27 = vpop.permute.xlu2 %3179  ;;  %v2795_v11 = vpop.permute.xlu0 %2794 }
 0x74d   :  { %v2658_v63 = vsub.f32 %v2654_v2, %v2656_v15  ;;  %v2677_v23 = vadd.f32 1e-05, %v2657_v52  ;;  %v2661_v52 = vsub.f32 %v9196_v9, %v9306_v47 }
 0x74f   :  { %v2678_v33 = vadd.f32 1e-05, %v2658_v63  ;;  %6525 = vrsqrt.f32 %v2677_v23  ;;  %vm2685_vm0 = vweird.f32 %v2677_v23 }
 0x751   :  { %6527 = vrsqrt.f32 %v2678_v33  ;;  %vm2695_vm2 = vweird.f32 %v2678_v33 }
 0x755   :  { %v6526_v51 = vpop.eup %6525 }
 0x756   :  { %v2680_v36 = vmul.f32 %v6526_v51, %v2677_v23  ;;  %vm2686_vm14 = vweird.f32 %v6526_v51 }
 0x757   :  { %v6528_v32 = vpop.eup %6527  ;;  %vm2687_vm1 = vmor %vm2685_vm0, %vm2686_vm14 }
 0x758   :  { %v2690_v44 = vmul.f32 %v6528_v32, %v2678_v33  ;;  %v2681_v30 = vmul.f32 %v6526_v51, %v2680_v36  ;;  %vm2696_vm15 = vweird.f32 %v6528_v32  ;;  %v2779_v36 = vpop.permute.xlu1 %2778 }
 0x759   :  { %vm2697_vm3 = vmor %vm2695_vm2, %vm2696_vm15 }
 0x75a   :  { %v2691_v31 = vmul.f32 %v6528_v32, %v2690_v44  ;;  %v2682_v39 = vmul.f32 0.5, %v2681_v30 }
 0x75c   :  { %v2692_v1 = vmul.f32 0.5, %v2691_v31  ;;  %v2683_v6 = vsub.f32 1.5, %v2682_v39  ;;  %v2668_v31 = vsub.f32 %v9174_v48, %v9310_v16  ;;  %v2674_v48 = vsub.f32 %v9154_v35, %v9310_v16 }
 0x75e   :  { %v2693_v37 = vsub.f32 1.5, %v2692_v1  ;;  %v2684_v55 = vmul.f32 %v6526_v51, %v2683_v6 }
 0x760   :  { %v2694_v18 = vmul.f32 %v6528_v32, %v2693_v37  ;;  %v2688_v5 = vsel %vm2687_vm1, %v6526_v51, %v2684_v55  ;;  %v2673_v37 = vsub.f32 %v9150_v42, %v9306_v47 }
 0x761   :  { %v9314_v34 = vperm.slane %v2688_v5, 0 }
 0x762   :  { %v2698_v29 = vsel %vm2697_vm3, %v6528_v32, %v2694_v18 }
 0x763   :  { %v9320_v38 = vperm.slane %v2698_v29, 0  ;;  %v9327_v49 = vmul.f32 %v9314_v34, %v2663_v24  ;;  %v2709_v22 = vmul.f32 %v9314_v34, %v2669_v41  ;;  %v2715_v8 = vmul.f32 %v9314_v34, %v2675_v53  ;;  %v9371_v24 = vpop.permute.xlu2 %3127 }
 0x764   :  { %v2707_v61 = vmul.f32 %v9314_v34, %v2667_v59  ;;  %v2664_v29 = vsub.f32 %v9192_v50, %v9310_v16  ;;  %v2713_v42 = vmul.f32 %v9314_v34, %v2673_v37 }
 0x765   :  { %v2716_v15 = vmul.f32 %v9320_v38, %v2676_v43  ;;  %v2757_v13 = vmul.f32 %v9304_v12, %v2709_v22  ;;  %v2763_v14 = vmul.f32 %v2747_v57, %v2715_v8  ;;  %v9346_v33 = vmul.f32 %v9320_v38, %v2662_v3 }
 0x766   :  { %v2755_v2 = vmul.f32 %v2731_v17, %v2707_v61  ;;  %v2710_v9 = vmul.f32 %v9320_v38, %v2670_v10  ;;  %v2708_v6 = vmul.f32 %v9320_v38, %v2668_v31  ;;  %v2714_v43 = vmul.f32 %v9320_v38, %v2674_v48 }
 0x767   :  { %v2764_v4 = vmul.f32 %v2747_v57, %v2716_v15  ;;  %v9336_v40 = vadd.f32 %v2783_v56, %v2757_v13  ;;  %v9343_v23 = vadd.f32 %v2795_v11, %v2763_v14  ;;  %v9351_v57 = vmul.f32 %v9314_v34, %v2661_v52 }
 0x768   :  { %v9356_v44 = vadd.f32 %v2779_v36, %v2755_v2  ;;  %v2758_v41 = vmul.f32 %v9304_v12, %v2710_v9  ;;  %v2671_v22 = vsub.f32 %v9157_v45, %v9306_v47  ;;  %v2704_v8 = vmul.f32 %v9320_v38, %v2664_v29 }
 0x769   :  { %v2837_v63 = vmul.f32 0.044715, %v9336_v40  ;;  %v9348_v51 = vadd.f32 %v2795_v11, %v2764_v4  ;;  %v2843_v39 = vmul.f32 0.044715, %v9343_v23  ;;  %v2756_v61 = vmul.f32 %v2731_v17, %v2708_v6 }
 0x76a   :  { %v2835_v18 = vmul.f32 0.044715, %v9356_v44  ;;  %v2761_v50 = vmul.f32 %v9288_v46, %v2713_v42  ;;  %v2762_v13 = vmul.f32 %v9288_v46, %v2714_v43  ;;  %v9390_v4 = vadd.f32 %v2783_v56, %v2758_v41 }
 0x76b   :  { %v2853_v32 = vmul.f32 %v2837_v63, %v9336_v40  ;;  %v2844_v1 = vmul.f32 0.044715, %v9348_v51  ;;  %v2859_v26 = vmul.f32 %v2843_v39, %v9343_v23  ;;  %v2711_v2 = vmul.f32 %v9314_v34, %v2671_v22  ;;  %v9411_v31 = vpop.permute.xlu2 %3123 }
 0x76c   :  { %v2851_v12 = vmul.f32 %v2835_v18, %v9356_v44  ;;  %v9393_v11 = vadd.f32 %v9294_v60, %v2761_v50  ;;  %v9396_v17 = vadd.f32 %v9294_v60, %v2762_v13  ;;  %v2752_v52 = vmul.f32 %v9302_v62, %v2704_v8  ;;  %v9407_v60 = vpop.permute.xlu1 %2718 }
 0x76d   :  { %v2869_v30 = vmul.f32 %v2853_v32, %v9336_v40  ;;  %v2860_v5 = vmul.f32 %v2844_v1, %v9348_v51  ;;  %v2875_v53 = vmul.f32 %v2859_v26, %v9343_v23  ;;  %v9400_v63 = vadd.f32 %v2779_v36, %v2756_v61 }
 0x76e   :  { %v2672_v46 = vsub.f32 %v9160_v28, %v9310_v16  ;;  %v2867_v56 = vmul.f32 %v2851_v12, %v9356_v44  ;;  %v2841_v10 = vmul.f32 0.044715, %v9393_v11  ;;  %v2842_v32 = vmul.f32 0.044715, %v9396_v17 }
 0x76f   :  { %v2885_v55 = vadd.f32 %v2869_v30, %v9336_v40  ;;  %v2876_v59 = vmul.f32 %v2860_v5, %v9348_v51  ;;  %v2891_v35 = vadd.f32 %v2875_v53, %v9343_v23  ;;  %v2838_v30 = vmul.f32 0.044715, %v9390_v4 }
 0x770   :  { %v2712_v9 = vmul.f32 %v9320_v38, %v2672_v46  ;;  %v2857_v36 = vmul.f32 %v2841_v10, %v9393_v11  ;;  %v2858_v39 = vmul.f32 %v2842_v32, %v9396_v17  ;;  %v2759_v28 = vmul.f32 %v9300_v54, %v2711_v2  ;;  %v12133_v32 = vld [vmem:[#allocation5_spill] sm:$0xff] }
 0x771   :  { %v2892_v15 = vadd.f32 %v2876_v59, %v9348_v51  ;;  %v2901_v14 = vmul.f32 0.7978846, %v2885_v55  ;;  %v2907_v3 = vmul.f32 0.7978846, %v2891_v35  ;;  %v9417_v1 = vadd.f32 %v9308_v21, %v2752_v52 }
 0x772   :  { %v2836_v6 = vmul.f32 0.044715, %v9400_v63  ;;  %v2760_v26 = vmul.f32 %v9300_v54, %v2712_v9  ;;  %v2883_v55 = vadd.f32 %v2867_v56, %v9356_v44  ;;  %v2873_v18 = vmul.f32 %v2857_v36, %v9393_v11  ;;  %v12131_v56 = vld [vmem:[#allocation21_spill] sm:$0xff]  ;;  %v12135_v36 = vld [vmem:[#allocation7_spill] sm:$0xff] }
 0x773   :  { %v2908_v45 = vmul.f32 0.7978846, %v2892_v15  ;;  %6529 = vtanh.f32 %v2901_v14  ;;  %v2874_v5 = vmul.f32 %v2858_v39, %v9396_v17  ;;  %v9425_v48 = vadd.f32 %v9296_v20, %v2759_v28 }
 0x774   :  { %6531 = vtanh.f32 %v2907_v3  ;;  %v2827_v41 = vmul.f32 0.5, %v9343_v23  ;;  %v2821_v53 = vmul.f32 0.5, %v9336_v40  ;;  %v9430_v59 = vadd.f32 %v9296_v20, %v2760_v26  ;;  %v12129_v3 = vld [vmem:[#allocation30_spill] sm:$0xff] }
 0x775   :  { %6533 = vtanh.f32 %v2908_v45  ;;  %v2854_v43 = vmul.f32 %v2838_v30, %v9390_v4  ;;  %v2889_v8 = vadd.f32 %v2873_v18, %v9393_v11  ;;  %v2890_v61 = vadd.f32 %v2874_v5, %v9396_v17  ;;  %v9450_v30 = vpop.permute.xlu1 %2766  ;;  %v12136_v18 = vld [vmem:[#allocation6_spill] sm:$0xff] }
 0x776   :  { %v2828_v35 = vmul.f32 0.5, %v9348_v51  ;;  %v2839_v23 = vmul.f32 0.044715, %v9425_v48  ;;  %v2899_v14 = vmul.f32 0.7978846, %v2883_v55  ;;  %v2852_v51 = vmul.f32 %v2836_v6, %v9400_v63 }
 0x777   :  { %v2905_v40 = vmul.f32 0.7978846, %v2889_v8  ;;  %v2906_v13 = vmul.f32 0.7978846, %v2890_v61  ;;  %v2840_v2 = vmul.f32 0.044715, %v9430_v59  ;;  %v2870_v26 = vmul.f32 %v2854_v43, %v9390_v4 }
 0x778   :  { %v2855_v52 = vmul.f32 %v2839_v23, %v9425_v48  ;;  %v2832_v46 = vmul.f32 0.044715, %v9417_v1  ;;  %v2666_v43 = vsub.f32 %v9182_v0, %v9310_v16  ;;  %v2868_v8 = vmul.f32 %v2852_v51, %v9400_v63 }
 0x779   :  { %v6530_v37 = vpop.eup %6529  ;;  %6535 = vtanh.f32 %v2905_v40  ;;  %v2856_v28 = vmul.f32 %v2840_v2, %v9430_v59  ;;  %v2886_v0 = vadd.f32 %v2870_v26, %v9390_v4  ;;  %v2826_v23 = vmul.f32 0.5, %v9396_v17  ;;  %v2775_v2 = vpop.permute.xlu0 %2774  ;;  %v12139_v26 = vld [vmem:[#allocation24_spill] sm:$0xff] }
 0x77a   :  { %v6532_v29 = vpop.eup %6531  ;;  %v2933_v42 = vadd.f32 1.0, %v6530_v37  ;;  %6537 = vtanh.f32 %v2906_v13  ;;  %v9462_v37 = vpop.permute.xlu2 %3167  ;;  %v2871_v55 = vmul.f32 %v2855_v52, %v9425_v48 }
 0x77b   :  { %v6534_v54 = vpop.eup %6533  ;;  %v2939_v22 = vadd.f32 1.0, %v6532_v29  ;;  %6539 = vtanh.f32 %v2899_v14 }
 0x77c   :  { %v2940_v50 = vadd.f32 1.0, %v6534_v54  ;;  %v2949_v12 = vmul.f32 %v2933_v42, %v2821_v53  ;;  %v2887_v42 = vadd.f32 %v2871_v55, %v9425_v48  ;;  %v2665_v54 = vsub.f32 %v9178_v25, %v9306_v47 }
 0x77d   :  { %v2955_v15 = vmul.f32 %v2939_v22, %v2827_v41  ;;  %v2872_v41 = vmul.f32 %v2856_v28, %v9430_v59  ;;  %v2848_v22 = vmul.f32 %v2832_v46, %v9417_v1  ;;  %v2825_v47 = vmul.f32 0.5, %v9393_v11  ;;  %v9502_v46 = vpop.permute.xlu1 %3131 }
 0x77e   :  { %v2956_v20 = vmul.f32 %v2940_v50, %v2828_v35  ;;  %v9438_v45 = vadd.f32 %v2949_v12, %v12129_v3  ;;  %v2903_v16 = vmul.f32 0.7978846, %v2887_v42  ;;  %v2705_v50 = vmul.f32 %v9314_v34, %v2665_v54 }
 0x77f   :  { %v9445_v10 = vadd.f32 %v2955_v15, %v12131_v56  ;;  %v2888_v35 = vadd.f32 %v2872_v41, %v9430_v59  ;;  %v6536_v25 = vpop.eup %6535  ;;  %v2864_v17 = vmul.f32 %v2848_v22, %v9417_v1  ;;  %v2902_v41 = vmul.f32 0.7978846, %v2886_v0 }
 0x780   :  { %12130 = vst [vmem:[#allocation15_spill] sm:$0xff] %v9438_v45  ;;  %v9448_v9 = vadd.f32 %v2956_v20, %v12133_v32  ;;  %v9454_v39 = vmul.f32 %v9438_v45, %v12135_v36  ;;  %v6538_v12 = vpop.eup %6537  ;;  %v2937_v15 = vadd.f32 1.0, %v6536_v25  ;;  %6541 = vtanh.f32 %v2903_v16  ;;  %v12170_v45 = vld [vmem:[#allocation31_spill] sm:$0xff] }
 0x781   :  { %12132 = vst [vmem:[#allocation32_spill] sm:$0xff] %v9445_v10  ;;  %v9460_v6 = vmul.f32 %v9445_v10, %v12135_v36  ;;  %v2904_v40 = vmul.f32 0.7978846, %v2888_v35  ;;  %v6540_v13 = vpop.eup %6539  ;;  %v2938_v14 = vadd.f32 1.0, %v6538_v12  ;;  %v2819_v20 = vmul.f32 0.5, %v9356_v44 }
 0x782   :  { %12134 = vst [vmem:[#allocation10_spill] sm:$0xff] %v9448_v9  ;;  %v9467_v5 = vmul.f32 %v9448_v9, %v12136_v18  ;;  %v9471_v29 = vmul.f32 %v9462_v37, %v9454_v39  ;;  %v2753_v3 = vmul.f32 %v9298_v7, %v2705_v50  ;;  %v2953_v52 = vmul.f32 %v2937_v15, %v2825_v47 }
 0x783   :  { %v9476_v53 = vmul.f32 %v9334_v27, %v9460_v6  ;;  %3003 = vrot.lane.b32.xlu2 %v9460_v6, %s6841_s23  ;;  %6543 = vtanh.f32 %v2904_v40  ;;  %v2931_v11 = vadd.f32 1.0, %v6540_v13  ;;  %v2954_v51 = vmul.f32 %v2938_v14, %v2826_v23  ;;  %v9542_v13 = vpop.permute.xlu2 %3163 }
 0x784   :  { %v9489_v61 = vmul.f32 %v9334_v27, %v9467_v5  ;;  %3019 = vrot.lane.b32.xlu0 %v9467_v5, %s6841_s23  ;;  %v2706_v27 = vmul.f32 %v9320_v38, %v2666_v43  ;;  %v9505_v56 = vadd.f32 %v2775_v2, %v2753_v3  ;;  %v12137_v38 = vld [vmem:[#allocation29_spill] sm:$0xff]  ;;  %v12141_v43 = vld [vmem:[#allocation16_spill] sm:$0xff]  ;;  %v2880_v47 = vadd.f32 %v2864_v17, %v9417_v1 }
 0x785   :  { %v9508_v32 = vadd.f32 %v2953_v52, %v12137_v38  ;;  %v2947_v28 = vmul.f32 %v2931_v11, %v2819_v20  ;;  %v9513_v55 = vadd.f32 %v2954_v51, %v12139_v26  ;;  %v2823_v50 = vmul.f32 0.5, %v9425_v48  ;;  %v9556_v51 = vpop.permute.xlu1 %3075 }
 0x786   :  { %v2754_v34 = vmul.f32 %v9298_v7, %v2706_v27  ;;  %v2833_v42 = vmul.f32 0.044715, %v9505_v56  ;;  %v2884_v7 = vadd.f32 %v2868_v8, %v9400_v63  ;;  %v6542_v25 = vpop.eup %6541  ;;  %6545 = vtanh.f32 %v2902_v41 }
 0x787   :  { %12138 = vst [vmem:[#allocation25_spill] sm:$0xff] %v9508_v32  ;;  %v9519_v54 = vmul.f32 %v9508_v32, %v12135_v36  ;;  %v9522_v22 = vadd.f32 %v2947_v28, %v12141_v43  ;;  %v9530_v0 = vmul.f32 %v9513_v55, %v12136_v18  ;;  %v2935_v12 = vadd.f32 1.0, %v6542_v25  ;;  %v12145_v28 = vld [vmem:[#allocation28_spill] sm:$0xff] }
 0x788   :  { %v9510_v44 = vadd.f32 %v2775_v2, %v2754_v34  ;;  %12140 = vst [vmem:[#allocation27_spill] sm:$0xff] %v9513_v55  ;;  %v2849_v8 = vmul.f32 %v2833_v42, %v9505_v56  ;;  %v2824_v40 = vmul.f32 0.5, %v9430_v59  ;;  %v2900_v14 = vmul.f32 0.7978846, %v2884_v7  ;;  %v12143_v34 = vld [vmem:[#allocation20_spill] sm:$0xff] }
 0x789   :  { %12142 = vst [vmem:[#allocation19_spill] sm:$0xff] %v9522_v22  ;;  %v6544_v16 = vpop.eup %6543  ;;  %v9536_v23 = vmul.f32 %v9522_v22, %v12135_v36  ;;  %3001 = vrot.lane.b32.xlu1 %v9519_v54, %s6841_s23  ;;  %v2951_v48 = vmul.f32 %v2935_v12, %v2823_v50  ;;  %v2896_v52 = vmul.f32 0.7978846, %v2880_v47  ;;  %v2749_v38 = vmul.f32 %v9407_v60, %v9351_v57 }
 0x78a   :  { %v2834_v35 = vmul.f32 0.044715, %v9510_v44  ;;  %v2936_v27 = vadd.f32 1.0, %v6544_v16  ;;  %v2865_v3 = vmul.f32 %v2849_v8, %v9505_v56  ;;  %6547 = vtanh.f32 %v2900_v14 }
 0x78b   :  { %3017 = vrot.lane.b32.xlu2 %v9530_v0, %s6841_s23  ;;  %v9548_v20 = vmul.f32 %v9542_v13, %v9536_v23  ;;  %v9553_v59 = vadd.f32 %v2951_v48, %v12143_v34  ;;  %6549 = vtanh.f32 %v2896_v52  ;;  %v9577_v25 = vadd.f32 %v9450_v30, %v2749_v38  ;;  %v9590_v52 = vpop.permute.xlu0 %3296 }
 0x78c   :  { %2997 = vrot.lane.b32.xlu0 %v9454_v39, %s6841_s23  ;;  %v2850_v15 = vmul.f32 %v2834_v35, %v9510_v44  ;;  %v2952_v2 = vmul.f32 %v2936_v27, %v2824_v40  ;;  %v2881_v17 = vadd.f32 %v2865_v3, %v9505_v56  ;;  %v6546_v43 = vpop.eup %6545  ;;  %v2822_v16 = vmul.f32 0.5, %v9390_v4 }
 0x78d   :  { %12144 = vst [vmem:[#allocation22_spill] sm:$0xff] %v9553_v59  ;;  %v9566_v42 = vmul.f32 %v9553_v59, %v12135_v36  ;;  %v2934_v47 = vadd.f32 1.0, %v6546_v43  ;;  %v2751_v12 = vmul.f32 %v9302_v62, %v9327_v49  ;;  %v9587_v48 = vpop.permute.xlu1 %3308  ;;  %v2817_v3 = vmul.f32 0.5, %v9505_v56  ;;  %v9609_v43 = vpop.permute.xlu2 %3159 }
 0x78e   :  { %v2866_v11 = vmul.f32 %v2850_v15, %v9510_v44  ;;  %v9561_v26 = vadd.f32 %v2952_v2, %v12145_v28  ;;  %v2897_v7 = vmul.f32 0.7978846, %v2881_v17  ;;  %v2829_v15 = vmul.f32 0.044715, %v9577_v25  ;;  %v12147_v17 = vld [vmem:[#allocation26_spill] sm:$0xff] }
 0x78f   :  { %v2950_v27 = vmul.f32 %v2934_v47, %v2822_v16  ;;  %v2818_v4 = vmul.f32 0.5, %v9510_v44  ;;  %v9596_v62 = vadd.f32 %v9308_v21, %v2751_v12  ;;  %v2816_v21 = vmul.f32 0.5, %v9417_v1 }
 0x790   :  { %12146 = vst [vmem:[#allocation12_spill] sm:$0xff] %v9561_v26  ;;  %v2882_v41 = vadd.f32 %v2866_v11, %v9510_v44  ;;  %v9572_v35 = vmul.f32 %v9561_v26, %v12136_v18  ;;  %6551 = vtanh.f32 %v2897_v7  ;;  %v6548_v8 = vpop.eup %6547  ;;  %v2845_v49 = vmul.f32 %v2829_v15, %v9577_v25  ;;  %v12149_v44 = vld [vmem:[#allocation14_spill] sm:$0xff] }
 0x791   :  { %2999 = vrot.lane.b32.xlu1 %v9566_v42, %s6841_s23  ;;  %v6550_v50 = vpop.eup %6549  ;;  %v9602_v56 = vadd.f32 %v2950_v27, %v12147_v17  ;;  %v2932_v38 = vadd.f32 1.0, %v6548_v8  ;;  %v2750_v16 = vmul.f32 %v9407_v60, %v9346_v33  ;;  %vm65_vm6 = vcmp.ge.s32.totalorder %v12170_v45, 9 }
 0x792   :  { %v2898_v57 = vmul.f32 0.7978846, %v2882_v41  ;;  %v2928_v28 = vadd.f32 1.0, %v6550_v50  ;;  %v2861_v8 = vmul.f32 %v2845_v49, %v9577_v25  ;;  %v12171_v32 = vmov 0.0  }
 0x793   :  { %3015 = vrot.lane.b32.xlu2 %v9572_v35, %s6841_s23  ;;  %12148 = vst [vmem:[#allocation23_spill] sm:$0xff] %v9602_v56  ;;  %v2798_v60 = vadd.f32 %v9450_v30, %v2750_v16  ;;  %v9771_v26 = vsel %vm64_vm4, 1.0, %v12171_v32  ;;  %v9774_v59 = vsel %vm65_vm6, 1.0, %v12171_v32  ;;  %vm59_vm9 = vcmp.lt.s32.totalorder %v12170_v45, 119 }
 0x794   :  { %3242 = vrot.lane.b32.xlu0 %v9530_v0, %s6842_s24  ;;  %6553 = vtanh.f32 %v2898_v57  ;;  %v12151_v57 = vld [vmem:[#allocation9_spill] sm:$0xff]  ;;  %v2944_v12 = vmul.f32 %v2928_v28, %v2816_v21  ;;  %v2877_v27 = vadd.f32 %v2861_v8, %v9577_v25  ;;  %v9808_v45 = vsel %vm59_vm9, 1.0, %v12171_v32 }
 0x795   :  { %v9638_v33 = vpop.permute.xlu1 %3071  ;;  %vm5342_vm9 = vcmask 1040384  }
 0x796   :  { %v6552_v40 = vpop.eup %6551  ;;  %v2893_v17 = vmul.f32 0.7978846, %v2877_v27 }
 0x797   :  { %v2929_v2 = vadd.f32 1.0, %v6552_v40 }
 0x798   :  { %6555 = vtanh.f32 %v2893_v17 }
 0x799   :  { %3228 = vrot.lane.b32.xlu1 %v9460_v6, %s6842_s24  ;;  %v2945_v34 = vmul.f32 %v2929_v2, %v2817_v3  ;;  %v2820_v6 = vmul.f32 0.5, %v9400_v63  ;;  %v9624_v63 = vmul.f32 %v9602_v56, %v12136_v18  ;;  %v12153_v2 = vld [vmem:[#allocation8_spill] sm:$0xff] }
 0x79a   :  { %v6554_v14 = vpop.eup %6553 }
 0x79b   :  { %v2930_v11 = vadd.f32 1.0, %v6554_v14  ;;  %3244 = vrot.lane.b32.xlu2 %v9467_v5, %s6842_s24  ;;  %v9605_v7 = vadd.f32 %v2945_v34, %v12149_v44  ;;  %v2831_v5 = vmul.f32 0.044715, %v9596_v62  ;;  %v2948_v1 = vmul.f32 %v2932_v38, %v2820_v6  ;;  %v9644_v14 = vpop.permute.xlu0 %3083 }
 0x79c   :  { %3240 = vrot.lane.b32.xlu0 %v9572_v35, %s6842_s24  ;;  %v2830_v34 = vmul.f32 0.044715, %v2798_v60 }
 0x79d   :  { %v2946_v41 = vmul.f32 %v2930_v11, %v2818_v4  ;;  %12150 = vst [vmem:[#allocation30_spill] sm:$0xff] %v9605_v7  ;;  %v9620_v50 = vmul.f32 %v9605_v7, %v12135_v36  ;;  %v2847_v3 = vmul.f32 %v2831_v5, %v9596_v62  ;;  %v9648_v4 = vadd.f32 %v2948_v1, %v12153_v2  ;;  %v12155_v11 = vld [vmem:[#allocation11_spill] sm:$0xff]  ;;  %v9669_v6 = vpop.permute.xlu1 %3304 }
 0x79e   :  { %v9651_v49 = vadd.f32 %v2944_v12, %v12155_v11  ;;  %v6556_v16 = vpop.eup %6555  ;;  %v2813_v12 = vmul.f32 0.5, %v9577_v25  ;;  %v12159_v25 = vld [vmem:[#allocation13_spill] sm:$0xff] }
 0x79f   :  { %v9612_v47 = vadd.f32 %v2946_v41, %v12151_v57  ;;  %v9632_v40 = vmul.f32 %v9609_v43, %v9620_v50  ;;  %12154 = vst [vmem:[#allocation5_spill] sm:$0xff] %v9648_v4  ;;  %v2863_v38 = vmul.f32 %v2847_v3, %v9596_v62  ;;  %v9656_v30 = vmul.f32 %v9648_v4, %v12136_v18 }
 0x7a0   :  { %12156 = vst [vmem:[#allocation29_spill] sm:$0xff] %v9651_v49  ;;  %v9660_v28 = vmul.f32 %v9651_v49, %v12136_v18  ;;  %v2846_v41 = vmul.f32 %v2830_v34, %v2798_v60  ;;  %v2925_v1 = vadd.f32 1.0, %v6556_v16 }
 0x7a1   :  { %12152 = vst [vmem:[#allocation21_spill] sm:$0xff] %v9612_v47  ;;  %v9628_v15 = vmul.f32 %v9612_v47, %v12136_v18  ;;  %3013 = vrot.lane.b32.xlu1 %v9624_v63, %s6841_s23  ;;  %v2879_v44 = vadd.f32 %v2863_v38, %v9596_v62 }
 0x7a2   :  { %12157 = vst [vmem:[#allocation24_spill] sm:$0xff] %v9660_v28  ;;  %v2862_v57 = vmul.f32 %v2846_v41, %v2798_v60  ;;  %v2941_v11 = vmul.f32 %v2925_v1, %v2813_v12  ;;  %v2815_v41 = vmul.f32 0.5, %v9596_v62  ;;  %v12162_v1 = vld [vmem:[#allocation17_spill] sm:$0xff]  ;;  %v2814_v62 = vmul.f32 0.5, %v2798_v60 }
 0x7a3   :  { %3226 = vrot.lane.b32.xlu2 %v9519_v54, %s6842_s24  ;;  %v9671_v21 = vpop.permute.xlu0 %3079  ;;  %v2895_v5 = vmul.f32 0.7978846, %v2879_v44 }
 0x7a4   :  { %3009 = vrot.lane.b32.xlu0 %v9628_v15, %s6841_s23  ;;  %v2878_v8 = vadd.f32 %v2862_v57, %v2798_v60  ;;  %v9695_v17 = vadd.f32 %v2941_v11, %v12159_v25 }
 0x7a5   :  { %6557 = vtanh.f32 %v2895_v5  ;;  %v9680_v27 = vpop.permute.xlu1 %3119 }
 0x7a6   :  { %v2894_v3 = vmul.f32 0.7978846, %v2878_v8  ;;  %12160 = vst [vmem:[#allocation20_spill] sm:$0xff] %v9695_v17 }
 0x7a8   :  { %6559 = vtanh.f32 %v2894_v3 }
 0x7a9   :  { %3011 = vrot.lane.b32.xlu1 %v9656_v30, %s6841_s23 }
 0x7ab   :  { %2995 = vrot.lane.b32.xlu2 %v9536_v23, %s6841_s23  ;;  %v9682_v2 = vpop.permute.xlu0 %3067  ;;  %v6558_v34 = vpop.eup %6557 }
 0x7ac   :  { %3007 = vrot.lane.b32.xlu0 %v9660_v28, %s6841_s23  ;;  %v2927_v38 = vadd.f32 1.0, %v6558_v34  ;;  %v9717_v34 = vpop.permute.xlu2 %3107 }
 0x7ad   :  { %v9702_v44 = vpop.permute.xlu1 %3300 }
 0x7ae   :  { %v6560_v57 = vpop.eup %6559  ;;  %v2943_v5 = vmul.f32 %v2927_v38, %v2815_v41  ;;  %v12164_v41 = vld [vmem:[#allocation18_spill] sm:$0xff] }
 0x7af   :  { %v2926_v8 = vadd.f32 1.0, %v6560_v57 }
 0x7b0   :  { %v9711_v12 = vadd.f32 %v2943_v5, %v12162_v1  ;;  %v9745_v1 = vld [vmem:[%s11935_s3 + $0x8] sm:$0xff] }
 0x7b1   :  { %3222 = vrot.lane.b32.xlu1 %v9454_v39, %s6842_s24  ;;  %v9689_v39 = vld [vmem:[%s11935_s3] sm:$0xff]  ;;  %v2942_v3 = vmul.f32 %v2926_v8, %v2814_v62  ;;  %12168 = vst [vmem:[#allocation11_spill] sm:$0xff] %v9745_v1 }
 0x7b2   :  { %12158 = vst [vmem:[#allocation16_spill] sm:$0xff] %v9689_v39  ;;  %v9715_v11 = vmul.f32 %v9711_v12, %v12135_v36 }
 0x7b3   :  { %3224 = vrot.lane.b32.xlu2 %v9566_v42, %s6842_s24  ;;  %v9704_v16 = vpop.permute.xlu0 %3063  ;;  %12163 = vst [vmem:[#allocation26_spill] sm:$0xff] %v9711_v12  ;;  %v9728_v57 = vadd.f32 %v2942_v3, %v12164_v41 }
 0x7b4   :  { %3232 = vrot.lane.b32.xlu0 %v9660_v28, %s6842_s24  ;;  %v9736_v5 = vpop.permute.xlu2 %3103 }
 0x7b5   :  { %v9721_v25 = vpop.permute.xlu1 %3115  ;;  %12165 = vst [vmem:[#allocation14_spill] sm:$0xff] %v9728_v57  ;;  %v9732_v60 = vmul.f32 %v9728_v57, %v12136_v18 }
 0x7b6   :  { %12167 = vst [vmem:[#allocation8_spill] sm:$0xff] %v9736_v5 }
 0x7b7   :  { %12166 = vst [vmem:[#allocation9_spill] sm:$0xff] %v9732_v60 }
 0x7b9   :  { %3220 = vrot.lane.b32.xlu1 %v9536_v23, %s6842_s24  ;;  %v9700_v23 = vmul.f32 %v9695_v17, %v12135_v36 }
 0x7bb   :  { %2993 = vrot.lane.b32.xlu2 %v9620_v50, %s6841_s23  ;;  %12161 = vst [vmem:[#allocation28_spill] sm:$0xff] %v9700_v23  ;;  %v9725_v38 = vpop.permute.xlu0 %3059 }
 0x7bc   :  { %3151 = vperm.xlu0 %6385, %v9689_v39  }
 0x7c1   :  { %2989 = vrot.lane.b32.xlu1 %v9700_v23, %s6841_s23 }
 0x7c3   :  { %3238 = vrot.lane.b32.xlu2 %v9624_v63, %s6842_s24  ;;  %v3176_v8 = vpop.permute.xlu0 %3175 }
 0x7c9   :  { %3218 = vrot.lane.b32.xlu1 %v9620_v50, %s6842_s24  ;;  %v9740_v50 = vpop.permute.xlu1 %3111 }
 0x7cb   :  { %2991 = vrot.lane.b32.xlu2 %v9715_v11, %s6841_s23  ;;  %v3172_v41 = vpop.permute.xlu0 %3171 }
 0x7d1   :  { %3230 = vrot.lane.b32.xlu1 %v9732_v60, %s6842_s24  ;;  %v9750_v3 = vpop.permute.xlu1 %3292 }
 0x7d3   :  { %3236 = vrot.lane.b32.xlu2 %v9656_v30, %s6842_s24  ;;  %v9756_v49 = vpop.permute.xlu0 %3155 }
 0x7d9   :  { %3284 = vperm.xlu1 %6389, %v9745_v1   ;;  %v9754_v17 = vpop.permute.xlu1 %3055 }
 0x7da   :  { %12169 = vst [vmem:[#allocation13_spill] sm:$0xff] %v9754_v17 }
 0x7db   :  { %3005 = vrot.lane.b32.xlu2 %v9732_v60, %s6841_s23 }
 0x7dd   :  { %v3004_v62 = vpop.permute.xlu2 %3003 }
 0x7e1   :  { %v9760_v47 = vpop.permute.xlu1 %3288 }
 0x7e3   :  { %3234 = vrot.lane.b32.xlu2 %v9628_v15, %s6842_s24 }
 0x7e5   :  { %v3018_v57 = vpop.permute.xlu2 %3017 }
 0x7eb   :  { %3216 = vrot.lane.b32.xlu2 %v9715_v11, %s6842_s24 }
 0x7ed   :  { %v3016_v12 = vpop.permute.xlu2 %3015 }
 0x7f3   :  { %3214 = vrot.lane.b32.xlu2 %v9700_v23, %s6842_s24 }
 0x7f5   :  { %v3245_v4 = vpop.permute.xlu2 %3244 }
 0x7f6   :  { %v3020_v7 = vpop.permute.xlu0 %3019 }
 0x7f7   :  { %v3029_v18 = vsel %vm3021_vm7, %v3004_v62, %v3020_v7  ;;  %v3037_v9 = vsel %vm3021_vm7, %v3020_v7, %v3004_v62 }
 0x7f8   :  { %v3053_v19 = vmul.f32 %v9774_v59, %v3029_v18 }
 0x7fb   :  { %3280 = vperm.xlu2 %6390, %v9689_v39   ;;  %v3002_v56 = vpop.permute.xlu1 %3001  ;;  %v3052_v39 = vmul.f32 %v9771_v26, %v3037_v9 }
 0x7fc   :  { %v3028_v36 = vsel %vm3021_vm7, %v3002_v56, %v3018_v57  ;;  %v3036_v10 = vsel %vm3021_vm7, %v3018_v57, %v3002_v56 }
 0x7fd   :  { %v3227_v55 = vpop.permute.xlu2 %3226  ;;  %v3050_v60 = vmul.f32 %v9771_v26, %v3036_v10  ;;  %v3051_v23 = vmul.f32 %v9774_v59, %v3028_v36  ;;  %v3100_v10 = vmul.f32 %v9644_v14, %v3052_v39  ;;  %v3101_v36 = vmul.f32 %v9644_v14, %v3053_v19 }
 0x7fe   :  { %v9764_v22 = vpop.permute.xlu0 %2997  ;;  %v3194_v14 = vmul.f32 %v3176_v8, %v9519_v54 }
 0x7ff   :  { %v3098_v57 = vmul.f32 %v9671_v21, %v3050_v60  ;;  %v3099_v62 = vmul.f32 %v9671_v21, %v3051_v23  ;;  %v3195_v21 = vmul.f32 %v3176_v8, %v9530_v0  ;;  %v3192_v23 = vmul.f32 %v3172_v41, %v9566_v42 }
 0x800   :  { %v3193_v60 = vmul.f32 %v3172_v41, %v9572_v35 }
 0x803   :  { %v3000_v5 = vpop.permute.xlu1 %2999 }
 0x804   :  { %v3027_v17 = vsel %vm3021_vm7, %v3000_v5, %v3016_v12  ;;  %v3035_v7 = vsel %vm3021_vm7, %v3016_v12, %v3000_v5  ;;  %v9805_v12 = vsel %vm58_vm8, 1.0, %v12171_v32 }
 0x805   :  { %v9794_v56 = vpop.permute.xlu2 %2995  ;;  %v3048_v9 = vmul.f32 %v9771_v26, %v3035_v7  ;;  %v3049_v18 = vmul.f32 %v9774_v59, %v3027_v17  ;;  %v3148_v7 = vadd.f32 %v9502_v46, %v3100_v10 }
 0x806   :  { %v3243_v1 = vpop.permute.xlu0 %3242 }
 0x807   :  { %v3096_v5 = vmul.f32 %v9556_v51, %v3048_v9  ;;  %v3097_v17 = vmul.f32 %v9556_v51, %v3049_v18  ;;  %v3253_v39 = vsel %vm58_vm8, %v3227_v55, %v3243_v1  ;;  %v3261_v19 = vsel %vm58_vm8, %v3243_v1, %v3227_v55 }
 0x808   :  { %v3149_v9 = vadd.f32 %v9502_v46, %v3101_v36  ;;  %v3146_v51 = vadd.f32 %v9371_v24, %v3098_v57  ;;  %v3147_v18 = vadd.f32 %v9371_v24, %v3099_v62  ;;  %v3275_v55 = vmul.f32 %v9805_v12, %v3253_v39 }
 0x809   :  { %v3276_v54 = vmul.f32 %v9808_v45, %v3261_v19  ;;  %v3144_v0 = vadd.f32 %v9411_v31, %v3096_v5  ;;  %v3145_v42 = vadd.f32 %v9411_v31, %v3097_v17  ;;  %v3212_v36 = vadd.f32 %v9476_v53, %v3148_v7 }
 0x80a   :  { %v3213_v31 = vadd.f32 %v9489_v61, %v3149_v9  ;;  %v3323_v5 = vmul.f32 %v9669_v6, %v3275_v55  ;;  %v3210_v9 = vadd.f32 %v3194_v14, %v3146_v51 }
 0x80b   :  { %v3229_v28 = vpop.permute.xlu1 %3228  ;;  %v3324_v17 = vmul.f32 %v9669_v6, %v3276_v54  ;;  %v3208_v19 = vadd.f32 %v3192_v23, %v3144_v0  ;;  %v3209_v53 = vadd.f32 %v3193_v60, %v3145_v42 }
 0x80c   :  { %v3254_v35 = vsel %vm58_vm8, %v3229_v28, %v3245_v4  ;;  %v3262_v46 = vsel %vm58_vm8, %v3245_v4, %v3229_v28  ;;  %v9858_v6 = vadd.f32 %v3323_v5, %v3210_v9 }
 0x80d   :  { %v3225_v8 = vpop.permute.xlu2 %3224  ;;  %v3277_v1 = vmul.f32 %v9805_v12, %v3254_v35  ;;  %v3278_v24 = vmul.f32 %v9808_v45, %v3262_v46  ;;  %v3211_v35 = vadd.f32 %v3195_v21, %v3147_v18 }
 0x80e   :  { %v3241_v32 = vpop.permute.xlu0 %3240 }
 0x80f   :  { %v3252_v41 = vsel %vm58_vm8, %v3225_v8, %v3241_v32  ;;  %v3260_v10 = vsel %vm58_vm8, %v3241_v32, %v3225_v8  ;;  %v3325_v4 = vmul.f32 %v9587_v48, %v3277_v1  ;;  %v3326_v28 = vmul.f32 %v9587_v48, %v3278_v24 }
 0x810   :  { %v3273_v57 = vmul.f32 %v9805_v12, %v3252_v41  ;;  %v3274_v62 = vmul.f32 %v9808_v45, %v3260_v10 }
 0x811   :  { %v9848_v7 = vadd.f32 %v3325_v4, %v3212_v36  ;;  %v9850_v61 = vadd.f32 %v3326_v28, %v3213_v31 }
 0x812   :  { %v3321_v39 = vmul.f32 %v9702_v44, %v3273_v57  ;;  %v3322_v32 = vmul.f32 %v9702_v44, %v3274_v62  ;;  %v9860_v44 = vadd.f32 %v3324_v17, %v3211_v35  ;;  %v3191_v62 = vmul.f32 %v9462_v37, %v9624_v63 }
 0x813   :  { %3351 = vmatpush.msrb.mxu2 %v9848_v7  ;;  %3371 = vmatpush.msrb.mxu3 %v9850_v61  ;;  %v3014_v48 = vpop.permute.xlu1 %3013 }
 0x814   :  { %v9852_v46 = vadd.f32 %v3321_v39, %v3208_v19  ;;  %v9854_v8 = vadd.f32 %v3322_v32, %v3209_v53  ;;  %v3026_v14 = vsel %vm3021_vm7, %v9764_v22, %v3014_v48  ;;  %v3034_v21 = vsel %vm3021_vm7, %v3014_v48, %v9764_v22 }
 0x815   :  { %v2994_v23 = vpop.permute.xlu2 %2993  ;;  %3352 = vmatpush.msrb.mxu2 %v9858_v6  ;;  %3372 = vmatpush.msrb.mxu3 %v9860_v44  ;;  %v3046_v60 = vmul.f32 %v9771_v26, %v3034_v21  ;;  %v3047_v51 = vmul.f32 %v9774_v59, %v3026_v14  ;;  %v3189_v48 = vmul.f32 %v9542_v13, %v9656_v30 }
 0x816   :  { %v3010_v9 = vpop.permute.xlu0 %3009 }
 0x817   :  { %3353 = vmatpush.msrb.mxu2 %v9852_v46  ;;  %3373 = vmatpush.msrb.mxu3 %v9854_v8  ;;  %v3094_v54 = vmul.f32 %v9638_v33, %v3046_v60  ;;  %v3095_v0 = vmul.f32 %v9638_v33, %v3047_v51  ;;  %v3032_v60 = vsel %vm3021_vm7, %v3010_v9, %v2994_v23 }
 0x818   :  { %v3042_v30 = vmul.f32 %v9771_v26, %v3032_v60 }
 0x819   :  { %v3142_v22 = vadd.f32 %v9680_v27, %v3094_v54  ;;  %v3143_v24 = vadd.f32 %v9680_v27, %v3095_v0  ;;  %v3024_v54 = vsel %vm3021_vm7, %v2994_v23, %v3010_v9 }
 0x81b   :  { %v3012_v18 = vpop.permute.xlu1 %3011  ;;  %v3206_v5 = vadd.f32 %v9471_v29, %v3142_v22  ;;  %v3207_v17 = vadd.f32 %v3191_v62, %v3143_v24 }
 0x81c   :  { %v3025_v42 = vsel %vm3021_vm7, %v9794_v56, %v3012_v18  ;;  %v3033_v1 = vsel %vm3021_vm7, %v3012_v18, %v9794_v56 }
 0x81d   :  { %v3239_v55 = vpop.permute.xlu2 %3238  ;;  %v3044_v10 = vmul.f32 %v9771_v26, %v3033_v1  ;;  %v3045_v36 = vmul.f32 %v9774_v59, %v3025_v42  ;;  %v3043_v1 = vmul.f32 %v9774_v59, %v3024_v54 }
 0x81e   :  { %v3008_v24 = vpop.permute.xlu0 %3007 }
 0x81f   :  { %v3092_v39 = vmul.f32 %v9682_v2, %v3044_v10  ;;  %v3093_v32 = vmul.f32 %v9682_v2, %v3045_v36  ;;  %v3091_v22 = vmul.f32 %v9704_v16, %v3043_v1 }
 0x821   :  { %v3140_v63 = vadd.f32 %v9721_v25, %v3092_v39  ;;  %v3139_v10 = vadd.f32 %v9740_v50, %v3091_v22 }
 0x823   :  { %v3223_v41 = vpop.permute.xlu1 %3222  ;;  %v3204_v18 = vadd.f32 %v9548_v20, %v3140_v63  ;;  %v3090_v20 = vmul.f32 %v9704_v16, %v3042_v30  ;;  %v3187_v16 = vmul.f32 %v9609_v43, %v9628_v15  ;;  %v6843_v30 = vmov 25  }
 0x824   :  { %v3251_v33 = vsel %vm58_vm8, %v3223_v41, %v3239_v55  ;;  %v3259_v31 = vsel %vm58_vm8, %v3239_v55, %v3223_v41  ;;  %6391 = vset.pattern.permute.xlu1 %v6843_v30 }
 0x825   :  { %v2992_v57 = vpop.permute.xlu2 %2991  ;;  %v3271_v56 = vmul.f32 %v9805_v12, %v3251_v33  ;;  %v3272_v4 = vmul.f32 %v9808_v45, %v3259_v31  ;;  %v3138_v23 = vadd.f32 %v9740_v50, %v3090_v20  ;;  %v3203_v39 = vadd.f32 %v3187_v16, %v3139_v10  ;;  %v12175_v16 = vld [vmem:[#allocation28_spill] sm:$0xff] }
 0x826   :  { %v3031_v36 = vsel %vm3021_vm7, %v3008_v24, %v2992_v57  ;;  %v3023_v31 = vsel %vm3021_vm7, %v2992_v57, %v3008_v24  ;;  %v3233_v63 = vpop.permute.xlu0 %3232 }
 0x827   :  { %v3319_v27 = vmul.f32 %v9590_v52, %v3271_v56  ;;  %v3320_v28 = vmul.f32 %v9590_v52, %v3272_v4  ;;  %v3141_v52 = vadd.f32 %v9721_v25, %v3093_v32 }
 0x829   :  { %v9899_v19 = vadd.f32 %v3319_v27, %v3206_v5  ;;  %v9901_v53 = vadd.f32 %v3320_v28, %v3207_v17  ;;  %v3205_v55 = vadd.f32 %v3189_v48, %v3141_v52  ;;  %v3040_v27 = vmul.f32 %v9771_v26, %v3031_v36 }
 0x82a   :  { %v3202_v28 = vadd.f32 %v9632_v40, %v3138_v23  ;;  %v3041_v5 = vmul.f32 %v9774_v59, %v3023_v31  ;;  %v12174_v31 = vld [vmem:[#allocation8_spill] sm:$0xff] }
 0x82b   :  { %v3221_v37 = vpop.permute.xlu1 %3220  ;;  %3354 = vmatpush.msrb.mxu2 %v9899_v19  ;;  %3374 = vmatpush.msrb.mxu3 %v9901_v53  ;;  %v3088_v43 = vmul.f32 %v9725_v38, %v3040_v27 }
 0x82c   :  { %v3089_v52 = vmul.f32 %v9725_v38, %v3041_v5 }
 0x82d   :  { %v3237_v29 = vpop.permute.xlu2 %3236 }
 0x82e   :  { %v3250_v35 = vsel %vm58_vm8, %v3221_v37, %v3237_v29  ;;  %v3258_v2 = vsel %vm58_vm8, %v3237_v29, %v3221_v37  ;;  %v3137_v38 = vadd.f32 %v9717_v34, %v3089_v52  ;;  %v3152_v10 = vpop.permute.xlu0 %3151  ;;  %v3397_v52 = vmul.f32 %v9848_v7, %v9848_v7 }
 0x82f   :  { %v3269_v14 = vmul.f32 %v9805_v12, %v3250_v35  ;;  %v3270_v21 = vmul.f32 %v9808_v45, %v3258_v2  ;;  %v3136_v2 = vadd.f32 %v9717_v34, %v3088_v43  ;;  %v6844_v34 = vmov 26  }
 0x830   :  { %6395 = vset.pattern.permute.xlu0 %v6844_v34  ;;  %6392 = vset.pattern.permute.xlu2 %v6844_v34 }
 0x831   :  { %v3317_v25 = vmul.f32 %v9750_v3, %v3269_v14  ;;  %v3318_v51 = vmul.f32 %v9750_v3, %v3270_v21  ;;  %v3184_v21 = vmul.f32 %v9756_v49, %v9715_v11 }
 0x833   :  { %v9922_v0 = vadd.f32 %v3317_v25, %v3204_v18  ;;  %v9924_v13 = vadd.f32 %v3318_v51, %v3205_v55  ;;  %v2990_v42 = vpop.permute.xlu1 %2989  ;;  %v12172_v51 = vld [vmem:[#allocation24_spill] sm:$0xff]  ;;  %v3200_v55 = vadd.f32 %v3184_v21, %v3136_v2  ;;  %v3394_v2 = vmul.f32 %v9854_v8, %v9854_v8 }
 0x834   :  { %v3185_v18 = vmul.f32 %v9756_v49, %v12172_v51  ;;  %v12173_v49 = vld [vmem:[#allocation13_spill] sm:$0xff] }
 0x835   :  { %3355 = vmatpush.msrb.mxu2 %v9922_v0  ;;  %3375 = vmatpush.msrb.mxu3 %v9924_v13  ;;  %v3006_v3 = vpop.permute.xlu2 %3005  ;;  %v3390_v21 = vmul.f32 %v9924_v13, %v9924_v13 }
 0x836   :  { %v3022_v29 = vsel %vm3021_vm7, %v2990_v42, %v3006_v3  ;;  %v3030_v35 = vsel %vm3021_vm7, %v3006_v3, %v2990_v42  ;;  %v3201_v42 = vadd.f32 %v3185_v18, %v3137_v38  ;;  %v3391_v38 = vmul.f32 %v9899_v19, %v9899_v19 }
 0x837   :  { %v3038_v60 = vmul.f32 %v9771_v26, %v3030_v35  ;;  %v3039_v25 = vmul.f32 %v9774_v59, %v3022_v29  ;;  %v9982_v26 = vld [vmem:[%s11935_s3 + $0x30] sm:$0xff]  ;;  %v9988_v59 = vld [vmem:[%s11935_s3 + $0x20] sm:$0xff]  ;;  %v3396_v29 = vmul.f32 %v9860_v44, %v9860_v44  ;;  %v3393_v35 = vmul.f32 %v9852_v46, %v9852_v46 }
 0x838   :  { %3530 = vperm.xlu1 %6391, %v9982_v26   ;;  %3570 = vperm.xlu0 %6395, %v9988_v59   ;;  %vm4592_vm7 = vcmask 1041408  }
 0x839   :  { %v3086_v11 = vmul.f32 %v12173_v49, %v3038_v60  ;;  %v3087_v22 = vmul.f32 %v12173_v49, %v3039_v25  ;;  %v10062_v60 = vld [vmem:[%s11935_s3 + $0x18] sm:$0xff] }
 0x83b   :  { %v3219_v41 = vpop.permute.xlu1 %3218 }
 0x83d   :  { %v3235_v33 = vpop.permute.xlu2 %3234 }
 0x83e   :  { %v3249_v62 = vsel %vm58_vm8, %v3219_v41, %v3235_v33  ;;  %v3257_v56 = vsel %vm58_vm8, %v3235_v33, %v3219_v41  ;;  %v10001_v41 = vld [vmem:[%s11935_s3 + $0x38] sm:$0xff] }
 0x83f   :  { %v3267_v4 = vmul.f32 %v9805_v12, %v3249_v62  ;;  %v3268_v50 = vmul.f32 %v9808_v45, %v3257_v56  ;;  %3582 = vperm.xlu2 %6392, %v10001_v41   ;;  %v3134_v62 = vadd.f32 %v12174_v31, %v3086_v11  ;;  %v3135_v56 = vadd.f32 %v12174_v31, %v3087_v22 }
 0x840   :  { %6396 = vset.pattern.permute.xlu0 %v6843_v30 }
 0x841   :  { %v3315_v57 = vmul.f32 %v9760_v47, %v3267_v4  ;;  %v3316_v17 = vmul.f32 %v9760_v47, %v3268_v50  ;;  %v3182_v4 = vmul.f32 %v3152_v10, %v12175_v16  ;;  %v12176_v50 = vld [vmem:[#allocation9_spill] sm:$0xff]  ;;  %3534 = vperm.xlu0 %6396, %v10001_v41  }
 0x842   :  { %v3183_v27 = vmul.f32 %v3152_v10, %v12176_v50 }
 0x843   :  { %v9951_v32 = vadd.f32 %v3315_v57, %v3202_v28  ;;  %v9953_v37 = vadd.f32 %v3316_v17, %v3203_v39  ;;  %v3231_v15 = vpop.permute.xlu1 %3230  ;;  %v10019_v17 = vld [vmem:[%s11935_s3 + $0x28] sm:$0xff]  ;;  %v3198_v39 = vadd.f32 %v3182_v4, %v3134_v62 }
 0x844   :  { %3526 = vperm.xlu1 %6391, %v10019_v17   ;;  %v3199_v43 = vadd.f32 %v3183_v27, %v3135_v56 }
 0x845   :  { %v3217_v9 = vpop.permute.xlu2 %3216  ;;  %3356 = vmatpush.msrb.mxu2 %v9951_v32  ;;  %3376 = vmatpush.msrb.mxu3 %v9953_v37  ;;  %v3387_v25 = vmul.f32 %v9951_v32, %v9951_v32  ;;  %v3388_v51 = vmul.f32 %v9953_v37, %v9953_v37 }
 0x846   :  { %v3248_v40 = vsel %vm58_vm8, %v3217_v9, %v3233_v63  ;;  %v3256_v47 = vsel %vm58_vm8, %v3233_v63, %v3217_v9  ;;  %v3398_v9 = vmul.f32 %v9850_v61, %v9850_v61 }
 0x847   :  { %v3265_v48 = vmul.f32 %v9805_v12, %v3248_v40  ;;  %v3266_v14 = vmul.f32 %v9808_v45, %v3256_v47  ;;  %3578 = vperm.xlu2 %6392, %v9982_v26   ;;  %v12177_v40 = vmov 1.0   ;;  %v3395_v47 = vmul.f32 %v9858_v6, %v9858_v6 }
 0x849   :  { %3522 = vperm.xlu0 %6396, %v9988_v59  }
 0x84b   :  { %v3285_v54 = vpop.permute.xlu1 %3284 }
 0x84c   :  { %v3313_v1 = vmul.f32 %v3285_v54, %v3265_v48  ;;  %v3314_v3 = vmul.f32 %v3285_v54, %v3266_v14  ;;  %6393 = vset.pattern.permute.xlu1 %v6844_v34  ;;  %v3392_v48 = vmul.f32 %v9901_v53, %v9901_v53  ;;  %v3389_v14 = vmul.f32 %v9922_v0, %v9922_v0  ;;  %v12178_v54 = vld [vmem:[#allocation16_spill] sm:$0xff] }
 0x84d   :  { %v3215_v20 = vpop.permute.xlu2 %3214  ;;  %3574 = vperm.xlu1 %6393, %v10019_v17  }
 0x84e   :  { %v9994_v24 = vadd.f32 %v3313_v1, %v3200_v55  ;;  %v9996_v23 = vadd.f32 %v3314_v3, %v3201_v42  ;;  %v3247_v36 = vsel %vm58_vm8, %v3215_v20, %v3231_v15  ;;  %v3255_v33 = vsel %vm58_vm8, %v3231_v15, %v3215_v20  ;;  %v10082_v3 = vld [vmem:[%s11935_s3 + $0x10] sm:$0xff] }
 0x84f   :  { %v3263_v28 = vmul.f32 %v9805_v12, %v3247_v36  ;;  %v3264_v5 = vmul.f32 %v9808_v45, %v3255_v33  ;;  %6394 = vset.pattern.permute.xlu2 %v6843_v30 }
 0x850   :  { %3357 = vmatpush.msrb.mxu2 %v9994_v24  ;;  %3377 = vmatpush.msrb.mxu3 %v9996_v23  ;;  %v3385_v18 = vmul.f32 %v9994_v24, %v9994_v24  ;;  %v3386_v55 = vmul.f32 %v9996_v23, %v9996_v23 }
 0x851   :  { %3518 = vperm.xlu2 %6394, %v10062_v60   ;;  %3506 = vperm.xlu0 %6396, %v12178_v54  }
 0x855   :  { %v3281_v57 = vpop.permute.xlu2 %3280  ;;  %6397 = vset.pattern.permute.xlu1 %v6843_v30  ;;  %v12179_v30 = vld [vmem:[#allocation11_spill] sm:$0xff] }
 0x856   :  { %v3311_v15 = vmul.f32 %v3281_v57, %v3263_v28  ;;  %v3312_v63 = vmul.f32 %v3281_v57, %v3264_v5  ;;  %3514 = vperm.xlu1 %6397, %v10082_v3  }
 0x858   :  { %v10025_v12 = vadd.f32 %v3311_v15, %v3198_v39  ;;  %v10027_v45 = vadd.f32 %v3312_v63, %v3199_v43 }
 0x859   :  { %6398 = vset.pattern.permute.xlu2 %v6844_v34 }
 0x85a   :  { %3358 = vmatpush.msrb.mxu2 %v10025_v12  ;;  %3378 = vmatpush.msrb.mxu3 %v10027_v45  ;;  %v3383_v42 = vmul.f32 %v10025_v12, %v10025_v12  ;;  %v3384_v1 = vmul.f32 %v10027_v45, %v10027_v45 }
 0x85b   :  { %6142 = vmatmul.msk.f32.vlgmr.msrb.gmra.mxu2 %vm666_vm5, %v12177_v40  ;;  %6143 = vmatmul.msk.f32.vlgmr.msrb.gmra.mxu3 %vm666_vm5, %v12177_v40 }
 0x85c   :  { %3407 = vmatpush.msra.mxu2 %v3397_v52  ;;  %3427 = vmatpush.msra.mxu3 %v3398_v9 }
 0x85d   :  { %3566 = vperm.xlu2 %6398, %v10062_v60  }
 0x85e   :  { %3408 = vmatpush.msra.mxu2 %v3395_v47  ;;  %3428 = vmatpush.msra.mxu3 %v3396_v29 }
 0x85f   :  { %3510 = vperm.xlu1 %6397, %v12179_v30  }
 0x860   :  { %3409 = vmatpush.msra.mxu2 %v3393_v35  ;;  %3429 = vmatpush.msra.mxu3 %v3394_v2 }
 0x862   :  { %3410 = vmatpush.msra.mxu2 %v3391_v38  ;;  %3430 = vmatpush.msra.mxu3 %v3392_v48 }
 0x864   :  { %3411 = vmatpush.msra.mxu2 %v3389_v14  ;;  %3431 = vmatpush.msra.mxu3 %v3390_v21 }
 0x865   :  { %3562 = vperm.xlu2 %6398, %v10082_v3  }
 0x866   :  { %3412 = vmatpush.msra.mxu2 %v3387_v25  ;;  %3432 = vmatpush.msra.mxu3 %v3388_v51 }
 0x867   :  { %6399 = vset.pattern.permute.xlu1 %v6844_v34 }
 0x868   :  { %3413 = vmatpush.msra.mxu2 %v3385_v18  ;;  %3433 = vmatpush.msra.mxu3 %v3386_v55 }
 0x869   :  { %3558 = vperm.xlu1 %6399, %v12179_v30  }
 0x86a   :  { %3414 = vmatpush.msra.mxu2 %v3383_v42  ;;  %3434 = vmatpush.msra.mxu3 %v3384_v1 }
 0x86b   :  { %6144 = vmatmul.msk.f32.vlgmr.msra.gmra.mxu2 %vm666_vm5, %v12177_v40  ;;  %6145 = vmatmul.msk.f32.vlgmr.msra.gmra.mxu3 %vm666_vm5, %v12177_v40 }
 0x86d   :  { %3554 = vperm.xlu2 %6398, %v12178_v54  }
 0x899   :  { %v10098_v22 = vpop.permute.xlu2 %3582 }
 0x8a1   :  { %v10102_v50 = vpop.permute.xlu2 %3578 }
 0x8aa   :  { %v10096_v20 = vpop.permute.xlu1 %3530  ;;  %v10104_v39 = vpop.permute.xlu0 %3570 }
 0x8ab   :  { %v3519_v63 = vpop.permute.xlu2 %3518 }
 0x8b3   :  { %v3535_v48 = vpop.permute.xlu0 %3534 }
 0x8b6   :  { %v10100_v33 = vpop.permute.xlu1 %3526 }
 0x8b7   :  { %v3567_v42 = vpop.permute.xlu2 %3566 }
 0x8bf   :  { %v10106_v43 = vpop.permute.xlu1 %3574 }
 0x8c8   :  { %v3515_v14 = vpop.permute.xlu1 %3514 }
 0x8de   :  { %v3360_v49 = vpop.f32.mrf.mxu2  ;;  %v3380_v11 = vpop.f32.mrf.mxu3 }
 0x8df   :  { %v3439_v10 = vmul.f32 0.015625, %v3360_v49  ;;  %v3440_v36 = vmul.f32 0.015625, %v3380_v11 }
 0x8e1   :  { %v3443_v56 = vmul.f32 %v3439_v10, %v3439_v10  ;;  %v3444_v16 = vmul.f32 %v3440_v36, %v3440_v36  ;;  %v10108_v21 = vperm.slane %v3439_v10, 0  ;;  %v10110_v25 = vperm.slane %v3440_v36, 0 }
 0x8e3   :  { %v3455_v30 = vsub.f32 %v9922_v0, %v10108_v21  ;;  %v3456_v49 = vsub.f32 %v9924_v13, %v10110_v25  ;;  %v3459_v11 = vsub.f32 %v9852_v46, %v10108_v21  ;;  %v3460_v0 = vsub.f32 %v9854_v8, %v10110_v25 }
 0x8e4   :  { %v3464_v13 = vsub.f32 %v9850_v61, %v10110_v25  ;;  %v3454_v46 = vsub.f32 %v9953_v37, %v10110_v25 }
 0x8ee   :  { %v3416_v31 = vpop.f32.mrf.mxu2  ;;  %v3436_v62 = vpop.f32.mrf.mxu3 }
 0x8ef   :  { %v3441_v4 = vmul.f32 0.015625, %v3416_v31  ;;  %v3442_v34 = vmul.f32 0.015625, %v3436_v62  ;;  %v3463_v31 = vsub.f32 %v9848_v7, %v10108_v21  ;;  %v3453_v62 = vsub.f32 %v9951_v32, %v10108_v21 }
 0x8f1   :  { %v3445_v27 = vsub.f32 %v3441_v4, %v3443_v56  ;;  %v3446_v28 = vsub.f32 %v3442_v34, %v3444_v16 }
 0x8f3   :  { %v3465_v5 = vadd.f32 1e-05, %v3445_v27  ;;  %v3466_v57 = vadd.f32 1e-05, %v3446_v28 }
 0x8f5   :  { %6561 = vrsqrt.f32 %v3465_v5  ;;  %vm3473_vm12 = vweird.f32 %v3465_v5  ;;  %vm3483_vm14 = vweird.f32 %v3466_v57 }
 0x8f6   :  { %6563 = vrsqrt.f32 %v3466_v57 }
 0x8fb   :  { %v6562_v15 = vpop.eup %6561 }
 0x8fc   :  { %v6564_v52 = vpop.eup %6563  ;;  %v3468_v9 = vmul.f32 %v6562_v15, %v3465_v5  ;;  %vm3474_vm10 = vweird.f32 %v6562_v15 }
 0x8fd   :  { %v3478_v47 = vmul.f32 %v6564_v52, %v3466_v57  ;;  %vm3484_vm11 = vweird.f32 %v6564_v52  ;;  %vm3475_vm13 = vmor %vm3473_vm12, %vm3474_vm10  ;;  %v3523_v57 = vpop.permute.xlu0 %3522 }
 0x8fe   :  { %v3469_v29 = vmul.f32 %v6562_v15, %v3468_v9  ;;  %vm3485_vm15 = vmor %vm3483_vm14, %vm3484_vm11 }
 0x8ff   :  { %v3479_v35 = vmul.f32 %v6564_v52, %v3478_v47 }
 0x900   :  { %v3470_v2 = vmul.f32 0.5, %v3469_v29 }
 0x901   :  { %v3480_v38 = vmul.f32 0.5, %v3479_v35  ;;  %v3458_v35 = vsub.f32 %v9901_v53, %v10110_v25 }
 0x902   :  { %v3471_v51 = vsub.f32 1.5, %v3470_v2 }
 0x903   :  { %v3481_v18 = vsub.f32 1.5, %v3480_v38 }
 0x904   :  { %v3472_v55 = vmul.f32 %v6562_v15, %v3471_v51  ;;  %v3452_v51 = vsub.f32 %v9996_v23, %v10110_v25  ;;  %v3449_v23 = vsub.f32 %v10025_v12, %v10108_v21 }
 0x905   :  { %v3482_v54 = vmul.f32 %v6564_v52, %v3481_v18  ;;  %v3451_v18 = vsub.f32 %v9994_v24, %v10108_v21 }
 0x906   :  { %v3476_v1 = vsel %vm3475_vm13, %v6562_v15, %v3472_v55  ;;  %v3457_v15 = vsub.f32 %v9899_v19, %v10108_v21 }
 0x907   :  { %v10118_v10 = vperm.slane %v3476_v1, 0  ;;  %v3486_v36 = vsel %vm3485_vm15, %v6564_v52, %v3482_v54  ;;  %v3511_v52 = vpop.permute.xlu1 %3510  ;;  %v3563_v1 = vpop.permute.xlu2 %3562 }
 0x908   :  { %v10124_v56 = vperm.slane %v3486_v36, 0 }
 0x909   :  { %v3495_v16 = vmul.f32 %v10118_v10, %v3455_v30  ;;  %v3499_v4 = vmul.f32 %v10118_v10, %v3459_v11  ;;  %v3503_v7 = vmul.f32 %v10118_v10, %v3463_v31  ;;  %v3493_v34 = vmul.f32 %v10118_v10, %v3453_v62 }
 0x90a   :  { %v3496_v32 = vmul.f32 %v10124_v56, %v3456_v49  ;;  %v3500_v27 = vmul.f32 %v10124_v56, %v3460_v0  ;;  %v3504_v8 = vmul.f32 %v10124_v56, %v3464_v13  ;;  %v3494_v28 = vmul.f32 %v10124_v56, %v3454_v46 }
 0x90b   :  { %v3543_v61 = vmul.f32 %v3519_v63, %v3495_v16  ;;  %v3547_v5 = vmul.f32 %v10100_v33, %v3499_v4  ;;  %v3551_v37 = vmul.f32 %v3535_v48, %v3503_v7  ;;  %v3497_v38 = vmul.f32 %v10118_v10, %v3457_v15 }
 0x90c   :  { %v3544_v9 = vmul.f32 %v3519_v63, %v3496_v32  ;;  %v3548_v47 = vmul.f32 %v10100_v33, %v3500_v27  ;;  %v3552_v29 = vmul.f32 %v3535_v48, %v3504_v8  ;;  %v3541_v55 = vmul.f32 %v3515_v14, %v3493_v34 }
 0x90d   :  { %v3599_v2 = vadd.f32 %v10098_v22, %v3551_v37  ;;  %v3542_v63 = vmul.f32 %v3515_v14, %v3494_v28  ;;  %v3498_v33 = vmul.f32 %v10124_v56, %v3458_v35  ;;  %v10155_v48 = vadd.f32 %v10106_v43, %v3547_v5 }
 0x90e   :  { %v3600_v19 = vadd.f32 %v10098_v22, %v3552_v29  ;;  %v10158_v53 = vadd.f32 %v10106_v43, %v3548_v47  ;;  %v10160_v54 = vadd.f32 %v3567_v42, %v3543_v61  ;;  %v10164_v24 = vadd.f32 %v3567_v42, %v3544_v9 }
 0x90f   :  { %v3631_v30 = vmul.f32 0.044715, %v3599_v2  ;;  %v3450_v22 = vsub.f32 %v10027_v45, %v10110_v25  ;;  %v3461_v14 = vsub.f32 %v9858_v6, %v10108_v21  ;;  %v3545_v11 = vmul.f32 %v3523_v57, %v3497_v38  ;;  %v3559_v34 = vpop.permute.xlu1 %3558 }
 0x910   :  { %v3632_v49 = vmul.f32 0.044715, %v3600_v19  ;;  %v3546_v36 = vmul.f32 %v3523_v57, %v3498_v33  ;;  %v3492_v43 = vmul.f32 %v10124_v56, %v3452_v51  ;;  %v10171_v31 = vadd.f32 %v3563_v1, %v3541_v55 }
 0x911   :  { %v10173_v62 = vadd.f32 %v3563_v1, %v3542_v63  ;;  %v3489_v12 = vmul.f32 %v10118_v10, %v3449_v23  ;;  %v3462_v42 = vsub.f32 %v9860_v44, %v10110_v25  ;;  %v3627_v0 = vmul.f32 0.044715, %v10155_v48  ;;  %v3507_v25 = vpop.permute.xlu0 %3506 }
 0x912   :  { %v3628_v45 = vmul.f32 0.044715, %v10158_v53  ;;  %v3623_v6 = vmul.f32 0.044715, %v10160_v54  ;;  %v3490_v21 = vmul.f32 %v10124_v56, %v3450_v22  ;;  %v10183_v13 = vmul.f32 0.044715, %v10164_v24 }
 0x913   :  { %v3491_v46 = vmul.f32 %v10118_v10, %v3451_v18  ;;  %v3540_v16 = vmul.f32 %v3511_v52, %v3492_v43  ;;  %v3647_v4 = vmul.f32 %v3631_v30, %v3599_v2  ;;  %v10187_v7 = vadd.f32 %v10104_v39, %v3545_v11 }
 0x914   :  { %v10190_v44 = vadd.f32 %v10104_v39, %v3546_v36  ;;  %v3648_v32 = vmul.f32 %v3632_v49, %v3600_v19  ;;  %v3501_v27 = vmul.f32 %v10118_v10, %v3461_v14  ;;  %v10194_v8 = vmul.f32 0.044715, %v10171_v31  ;;  %v3555_v10 = vpop.permute.xlu2 %3554 }
 0x915   :  { %v10197_v28 = vmul.f32 0.044715, %v10173_v62  ;;  %v3537_v61 = vmul.f32 %v3507_v25, %v3489_v12  ;;  %v3663_v5 = vmul.f32 %v3647_v4, %v3599_v2  ;;  %v3538_v37 = vmul.f32 %v3507_v25, %v3490_v21 }
 0x916   :  { %v3664_v57 = vmul.f32 %v3648_v32, %v3600_v19  ;;  %v3549_v15 = vmul.f32 %v10096_v20, %v3501_v27  ;;  %v3502_v39 = vmul.f32 %v10124_v56, %v3462_v42  ;;  %v3539_v9 = vmul.f32 %v3511_v52, %v3491_v46 }
 0x917   :  { %v10201_v47 = vadd.f32 %v3559_v34, %v3540_v16  ;;  %v3615_v29 = vmul.f32 0.5, %v3599_v2  ;;  %v3679_v35 = vadd.f32 %v3663_v5, %v3599_v2  ;;  %v3616_v38 = vmul.f32 0.5, %v3600_v19 }
 0x918   :  { %v3680_v51 = vadd.f32 %v3664_v57, %v3600_v19  ;;  %v10204_v18 = vadd.f32 %v10102_v50, %v3549_v15  ;;  %v3550_v55 = vmul.f32 %v10096_v20, %v3502_v39  ;;  %v10207_v63 = vadd.f32 %v3555_v10, %v3537_v61 }
 0x919   :  { %v3695_v33 = vmul.f32 0.7978846, %v3679_v35  ;;  %v3643_v1 = vmul.f32 %v3627_v0, %v10155_v48  ;;  %v3644_v56 = vmul.f32 %v3628_v45, %v10158_v53  ;;  %v10211_v52 = vadd.f32 %v3555_v10, %v3538_v37 }
 0x91a   :  { %v3696_v23 = vmul.f32 0.7978846, %v3680_v51  ;;  %v3629_v2 = vmul.f32 0.044715, %v10204_v18  ;;  %v10215_v30 = vadd.f32 %v10102_v50, %v3550_v55  ;;  %v10217_v19 = vadd.f32 %v3559_v34, %v3539_v9 }
 0x91b   :  { %6565 = vtanh.f32 %v3695_v33  ;;  %v3659_v20 = vmul.f32 %v3643_v1, %v10155_v48  ;;  %v3660_v22 = vmul.f32 %v3644_v56, %v10158_v53  ;;  %v10222_v14 = vmul.f32 0.044715, %v10201_v47 }
 0x91c   :  { %6567 = vtanh.f32 %v3696_v23  ;;  %v3645_v49 = vmul.f32 %v3629_v2, %v10204_v18  ;;  %v3630_v11 = vmul.f32 0.044715, %v10215_v30  ;;  %v10227_v36 = vmul.f32 0.044715, %v10207_v63 }
 0x91d   :  { %v3675_v50 = vadd.f32 %v3659_v20, %v10155_v48  ;;  %v3676_v43 = vadd.f32 %v3660_v22, %v10158_v53  ;;  %v3625_v12 = vmul.f32 0.044715, %v10187_v7  ;;  %v10233_v42 = vmul.f32 0.044715, %v10211_v52 }
 0x91e   :  { %v3661_v0 = vmul.f32 %v3645_v49, %v10204_v18  ;;  %v3646_v45 = vmul.f32 %v3630_v11, %v10215_v30  ;;  %v3626_v21 = vmul.f32 0.044715, %v10190_v44  ;;  %v3639_v25 = vmul.f32 %v3623_v6, %v10160_v54 }
 0x91f   :  { %v3691_v46 = vmul.f32 0.7978846, %v3675_v50  ;;  %v3692_v16 = vmul.f32 0.7978846, %v3676_v43  ;;  %v3641_v4 = vmul.f32 %v3625_v12, %v10187_v7  ;;  %v3619_v34 = vmul.f32 0.044715, %v10217_v19 }
 0x920   :  { %v3677_v32 = vadd.f32 %v3661_v0, %v10204_v18  ;;  %v3662_v27 = vmul.f32 %v3646_v45, %v10215_v30  ;;  %v3642_v61 = vmul.f32 %v3626_v21, %v10190_v44  ;;  %v3655_v57 = vmul.f32 %v3639_v25, %v10160_v54 }
 0x921   :  { %v6566_v5 = vpop.eup %6565  ;;  %6569 = vtanh.f32 %v3691_v46  ;;  %v3657_v37 = vmul.f32 %v3641_v4, %v10187_v7  ;;  %v3640_v15 = vmul.f32 %v10183_v13, %v10164_v24  ;;  %v3611_v49 = vmul.f32 0.5, %v10155_v48 }
 0x922   :  { %v6568_v39 = vpop.eup %6567  ;;  %v3727_v9 = vadd.f32 1.0, %v6566_v5  ;;  %v3693_v6 = vmul.f32 0.7978846, %v3677_v32  ;;  %v3678_v35 = vadd.f32 %v3662_v27, %v10215_v30  ;;  %6571 = vtanh.f32 %v3692_v16 }
 0x923   :  { %v3728_v10 = vadd.f32 1.0, %v6568_v39  ;;  %v3673_v51 = vadd.f32 %v3657_v37, %v10187_v7  ;;  %v3658_v55 = vmul.f32 %v3642_v61, %v10190_v44  ;;  %v3671_v33 = vadd.f32 %v3655_v57, %v10160_v54 }
 0x924   :  { %v3743_v1 = vmul.f32 %v3727_v9, %v3615_v29  ;;  %6573 = vtanh.f32 %v3693_v6  ;;  %v3694_v56 = vmul.f32 0.7978846, %v3678_v35  ;;  %v3656_v23 = vmul.f32 %v3640_v15, %v10164_v24 }
 0x925   :  { %v3744_v2 = vmul.f32 %v3728_v10, %v3616_v38  ;;  %v3689_v13 = vmul.f32 0.7978846, %v3673_v51  ;;  %v3674_v20 = vadd.f32 %v3658_v55, %v10190_v44  ;;  %v3687_v22 = vmul.f32 0.7978846, %v3671_v33 }
 0x926   :  { %3818 = vmatpush.msrb.mxu0 %v3743_v1  ;;  %6575 = vtanh.f32 %v3694_v56  ;;  %v3672_v11 = vadd.f32 %v3656_v23, %v10164_v24  ;;  %v3637_v50 = vmul.f32 %v10194_v8, %v10171_v31  ;;  %v3612_v29 = vmul.f32 0.5, %v10158_v53 }
 0x927   :  { %v6570_v43 = vpop.eup %6569  ;;  %3859 = vmatpush.msrb.mxu1 %v3744_v2  ;;  %6577 = vtanh.f32 %v3689_v13  ;;  %v3690_v12 = vmul.f32 0.7978846, %v3674_v20  ;;  %v3638_v38 = vmul.f32 %v10197_v28, %v10173_v62  ;;  %v3613_v46 = vmul.f32 0.5, %v10204_v18 }
 0x928   :  { %v6572_v0 = vpop.eup %6571  ;;  %v3723_v45 = vadd.f32 1.0, %v6570_v43  ;;  %6579 = vtanh.f32 %v3687_v22  ;;  %v3688_v21 = vmul.f32 0.7978846, %v3672_v11  ;;  %v3653_v48 = vmul.f32 %v3637_v50, %v10171_v31 }
 0x929   :  { %v3609_v16 = vmul.f32 0.5, %v10187_v7  ;;  %6581 = vtanh.f32 %v3690_v12  ;;  %v3654_v8 = vmul.f32 %v3638_v38, %v10173_v62  ;;  %v3614_v53 = vmul.f32 0.5, %v10215_v30 }
 0x92a   :  { %v6574_v4 = vpop.eup %6573  ;;  %6583 = vtanh.f32 %v3688_v21  ;;  %v3669_v25 = vadd.f32 %v3653_v48, %v10171_v31  ;;  %v3635_v28 = vmul.f32 %v3619_v34, %v10217_v19  ;;  %v3724_v27 = vadd.f32 1.0, %v6572_v0 }
 0x92b   :  { %v3725_v32 = vadd.f32 1.0, %v6574_v4  ;;  %v3610_v61 = vmul.f32 0.5, %v10190_v44  ;;  %v3670_v5 = vadd.f32 %v3654_v8, %v10173_v62  ;;  %v3739_v37 = vmul.f32 %v3723_v45, %v3611_v49 }
 0x92c   :  { %v6576_v18 = vpop.eup %6575  ;;  %v3685_v7 = vmul.f32 0.7978846, %v3669_v25  ;;  %v3651_v57 = vmul.f32 %v3635_v28, %v10217_v19  ;;  %v3636_v15 = vmul.f32 %v10222_v14, %v10201_v47  ;;  %v3633_v34 = vmul.f32 %v10227_v36, %v10207_v63 }
 0x92d   :  { %v6578_v30 = vpop.eup %6577  ;;  %v3741_v39 = vmul.f32 %v3725_v32, %v3613_v46  ;;  %v3726_v9 = vadd.f32 1.0, %v6576_v18  ;;  %v3686_v6 = vmul.f32 0.7978846, %v3670_v5  ;;  %v3607_v2 = vmul.f32 0.5, %v10160_v54 }
 0x92e   :  { %v6580_v35 = vpop.eup %6579  ;;  %v3721_v10 = vadd.f32 1.0, %v6578_v30  ;;  %6585 = vtanh.f32 %v3685_v7  ;;  %v3667_v44 = vadd.f32 %v3651_v57, %v10217_v19  ;;  %v3652_v51 = vmul.f32 %v3636_v15, %v10201_v47 }
 0x92f   :  { %v6582_v55 = vpop.eup %6581  ;;  %3819 = vmatpush.msrb.mxu0 %v3741_v39  ;;  %v3742_v33 = vmul.f32 %v3726_v9, %v3614_v53  ;;  %v3719_v1 = vadd.f32 1.0, %v6580_v35  ;;  %6587 = vtanh.f32 %v3686_v6  ;;  %v3649_v14 = vmul.f32 %v3633_v34, %v10207_v63  ;;  %v6146_v39 = vld [vmem:[%s11936_s4 + $0x80] sm:$0xff]  ;;  %v6147_v34 = vld [vmem:[%s11936_s4 + $0x88] sm:$0xff] }
 0x930   :  { %v6584_v56 = vpop.eup %6583  ;;  %v3722_v23 = vadd.f32 1.0, %v6582_v55  ;;  %v3683_v13 = vmul.f32 0.7978846, %v3667_v44  ;;  %v3668_v36 = vadd.f32 %v3652_v51, %v10201_v47  ;;  %v3740_v20 = vmul.f32 %v3724_v27, %v3612_v29  ;;  %v10315_v35 = vld [vmem:[%s11935_s3 + $0x8] sm:$0xff]  ;;  %v6150_v44 = vld [vmem:[%s11936_s4 + $0xa0] sm:$0xff]  ;;  %v6152_v55 = vld [vmem:[%s11936_s4 + $0xb0] sm:$0xff] }
 0x931   :  { %3860 = vmatpush.msrb.mxu1 %v3742_v33  ;;  %3820 = vmatpush.msrb.mxu0 %v3739_v37  ;;  %v3737_v22 = vmul.f32 %v3721_v10, %v3609_v16  ;;  %v3720_v49 = vadd.f32 1.0, %v6584_v56  ;;  %v3665_v11 = vadd.f32 %v3649_v14, %v10207_v63  ;;  %v3608_v50 = vmul.f32 0.5, %v10164_v24  ;;  %v6149_v10 = vld [vmem:[%s11936_s4 + $0x98] sm:$0xff]  ;;  %v6151_v51 = vld [vmem:[%s11936_s4 + $0xa8] sm:$0xff] }
 0x932   :  { %6589 = vtanh.f32 %v3683_v13  ;;  %v3684_v43 = vmul.f32 0.7978846, %v3668_v36  ;;  %v3634_v12 = vmul.f32 %v10233_v42, %v10211_v52  ;;  %v3738_v54 = vmul.f32 %v3722_v23, %v3610_v61  ;;  %v6153_v33 = vld [vmem:[%s11936_s4 + $0xb8] sm:$0xff] }
 0x933   :  { %3861 = vmatpush.msrb.mxu1 %v3740_v20  ;;  %3821 = vmatpush.msrb.mxu0 %v3737_v22  ;;  %v3735_v38 = vmul.f32 %v3719_v1, %v3607_v2  ;;  %v3681_v0 = vmul.f32 0.7978846, %v3665_v11  ;;  %v6845_v21 = vmov 27   ;;  %v3736_v24 = vmul.f32 %v3720_v49, %v3608_v50 }
 0x934   :  { %v6586_v45 = vpop.eup %6585  ;;  %6591 = vtanh.f32 %v3684_v43  ;;  %v3650_v29 = vmul.f32 %v3634_v12, %v10211_v52  ;;  %6402 = vset.pattern.permute.xlu0 %v6845_v21  ;;  %6400 = vset.pattern.permute.xlu1 %v6845_v21  ;;  %v3605_v46 = vmul.f32 0.5, %v10171_v31  ;;  %v3606_v42 = vmul.f32 0.5, %v10173_v62 }
 0x935   :  { %v6588_v48 = vpop.eup %6587  ;;  %3862 = vmatpush.msrb.mxu1 %v3738_v54  ;;  %3822 = vmatpush.msrb.mxu0 %v3735_v38  ;;  %v3717_v16 = vadd.f32 1.0, %v6586_v45  ;;  %6593 = vtanh.f32 %v3681_v0  ;;  %v3603_v31 = vmul.f32 0.5, %v10217_v19  ;;  %v3604_v18 = vmul.f32 0.5, %v10201_v47  ;;  %v10300_v19 = vld [vmem:[%s11935_s3] sm:$0xff] }
 0x936   :  { %v3718_v8 = vadd.f32 1.0, %v6588_v48  ;;  %v3666_v4 = vadd.f32 %v3650_v29, %v10211_v52  ;;  %3775 = vperm.xlu0 %6402, %v10019_v17   ;;  %3783 = vperm.xlu1 %6400, %v10001_v41   ;;  %v3601_v7 = vmul.f32 0.5, %v10207_v63  ;;  %v3602_v63 = vmul.f32 0.5, %v10211_v52  ;;  %v6148_v52 = vld [vmem:[%s11936_s4 + $0x90] sm:$0xff] }
 0x937   :  { %3863 = vmatpush.msrb.mxu1 %v3736_v24  ;;  %v3733_v53 = vmul.f32 %v3717_v16, %v3605_v46  ;;  %6401 = vset.pattern.permute.xlu2 %v6845_v21  ;;  %v6846_v21 = vmov 28  }
 0x938   :  { %v6590_v25 = vpop.eup %6589  ;;  %v3734_v28 = vmul.f32 %v3718_v8, %v3606_v42  ;;  %v3682_v32 = vmul.f32 0.7978846, %v3666_v4  ;;  %3779 = vperm.xlu2 %6401, %v9982_v26  }
 0x939   :  { %3823 = vmatpush.msrb.mxu0 %v3733_v53  ;;  %v3715_v27 = vadd.f32 1.0, %v6590_v25  ;;  %v6847_v25 = vmov 29  }
 0x93a   :  { %v6592_v62 = vpop.eup %6591  ;;  %3864 = vmatpush.msrb.mxu1 %v3734_v28  ;;  %6595 = vtanh.f32 %v3682_v32 }
 0x93b   :  { %v6594_v61 = vpop.eup %6593  ;;  %v3731_v5 = vmul.f32 %v3715_v27, %v3603_v31  ;;  %v3716_v37 = vadd.f32 1.0, %v6592_v62 }
 0x93c   :  { %v3713_v57 = vadd.f32 1.0, %v6594_v61 }
 0x93d   :  { %3824 = vmatpush.msrb.mxu0 %v3731_v5  ;;  %v3732_v15 = vmul.f32 %v3716_v37, %v3604_v18 }
 0x93e   :  { %v3729_v30 = vmul.f32 %v3713_v57, %v3601_v7  ;;  %3755 = vperm.xlu0 %6402, %v10300_v19   ;;  %3771 = vperm.xlu1 %6400, %v9988_v59  }
 0x93f   :  { %3865 = vmatpush.msrb.mxu1 %v3732_v15 }
 0x940   :  { %v6596_v47 = vpop.eup %6595  ;;  %3825 = vmatpush.msrb.mxu0 %v3729_v30  ;;  %3767 = vperm.xlu2 %6401, %v10062_v60  }
 0x941   :  { %v3714_v9 = vadd.f32 1.0, %v6596_v47  ;;  %6154 = vmatmul.msk.f32.vlgmr.msrb.gmra.mxu0 %vm666_vm5, %v6146_v39 }
 0x943   :  { %v3730_v6 = vmul.f32 %v3714_v9, %v3602_v63 }
 0x945   :  { %3866 = vmatpush.msrb.mxu1 %v3730_v6 }
 0x946   :  { %6162 = vmatmul.msk.f32.vlgmr.msrb.gmra.mxu1 %vm666_vm5, %v6146_v39  ;;  %3763 = vperm.xlu1 %6400, %v10082_v3  }
 0x947   :  { %6405 = vset.pattern.permute.xlu0 %v6847_v25 }
 0x948   :  { %3759 = vperm.xlu2 %6401, %v10315_v35   ;;  %4131 = vperm.xlu0 %6405, %v10001_v41  }
 0x949   :  { %6155 = vmatmul.msk.f32.gmra.mxu0 %vm666_vm5, %v6147_v34 }
 0x94e   :  { %6163 = vmatmul.msk.f32.gmra.mxu1 %vm666_vm5, %v6147_v34  ;;  %6403 = vset.pattern.permute.xlu1 %v6846_v21 }
 0x94f   :  { %4083 = vperm.xlu1 %6403, %v10001_v41  }
 0x950   :  { %6404 = vset.pattern.permute.xlu2 %v6846_v21  ;;  %6407 = vset.pattern.permute.xlu0 %v6846_v21 }
 0x951   :  { %6156 = vmatmul.msk.f32.gmra.mxu0 %vm666_vm5, %v6148_v52  ;;  %4079 = vperm.xlu2 %6404, %v9982_v26  }
 0x952   :  { %4067 = vperm.xlu0 %6407, %v10062_v60  }
 0x956   :  { %6164 = vmatmul.msk.f32.gmra.mxu1 %vm666_vm5, %v6148_v52 }
 0x957   :  { %4075 = vperm.xlu1 %6403, %v10019_v17  }
 0x959   :  { %6157 = vmatmul.msk.f32.gmra.mxu0 %vm666_vm5, %v6149_v10  ;;  %6406 = vset.pattern.permute.xlu2 %v6847_v25 }
 0x95a   :  { %4127 = vperm.xlu2 %6406, %v9982_v26   ;;  %6410 = vset.pattern.permute.xlu0 %v6847_v25 }
 0x95b   :  { %4111 = vperm.xlu0 %6410, %v10082_v3  }
 0x95e   :  { %6165 = vmatmul.msk.f32.gmra.mxu1 %vm666_vm5, %v6149_v10 }
 0x95f   :  { %4071 = vperm.xlu1 %6403, %v9988_v59  }
 0x961   :  { %6158 = vmatmul.msk.f32.gmra.mxu0 %vm666_vm5, %v6150_v44 }
 0x962   :  { %4123 = vperm.xlu2 %6406, %v10019_v17  }
 0x966   :  { %6166 = vmatmul.msk.f32.gmra.mxu1 %vm666_vm5, %v6150_v44 }
 0x967   :  { %6408 = vset.pattern.permute.xlu1 %v6847_v25 }
 0x968   :  { %4119 = vperm.xlu1 %6408, %v9988_v59  }
 0x969   :  { %6159 = vmatmul.msk.f32.gmra.mxu0 %vm666_vm5, %v6151_v51 }
 0x96a   :  { %6409 = vset.pattern.permute.xlu2 %v6846_v21 }
 0x96b   :  { %4063 = vperm.xlu2 %6409, %v10082_v3  }
 0x96e   :  { %6167 = vmatmul.msk.f32.gmra.mxu1 %vm666_vm5, %v6151_v51 }
 0x970   :  { %4115 = vperm.xlu1 %6408, %v10062_v60  }
 0x971   :  { %6160 = vmatmul.msk.f32.gmra.mxu0 %vm666_vm5, %v6152_v55 }
 0x973   :  { %4059 = vperm.xlu2 %6409, %v10315_v35  }
 0x976   :  { %6168 = vmatmul.msk.f32.gmra.mxu1 %vm666_vm5, %v6152_v55 }
 0x978   :  { %6411 = vset.pattern.permute.xlu1 %v6846_v21 }
 0x979   :  { %6161 = vmatmul.msk.f32.gmra.mxu0 %vm666_vm5, %v6153_v33  ;;  %4055 = vperm.xlu1 %6411, %v10300_v19  }
 0x97b   :  { %6412 = vset.pattern.permute.xlu2 %v6847_v25 }
 0x97c   :  { %4107 = vperm.xlu2 %6412, %v10315_v35  }
 0x97e   :  { %6169 = vmatmul.msk.f32.gmra.mxu1 %vm666_vm5, %v6153_v33 }
 0x981   :  { %6413 = vset.pattern.permute.xlu1 %v6847_v25 }
 0x982   :  { %4103 = vperm.xlu1 %6413, %v10300_v19  }
 0x992   :  { %v3780_v12 = vpop.permute.xlu2 %3779 }
 0x99a   :  { %v3768_v48 = vpop.permute.xlu2 %3767 }
 0x9a2   :  { %v3760_v62 = vpop.permute.xlu2 %3759 }
 0x9a8   :  { %v3784_v43 = vpop.permute.xlu1 %3783  ;;  %v3776_v46 = vpop.permute.xlu0 %3775 }
 0x9ab   :  { %v10470_v60 = vpop.permute.xlu2 %4079 }
 0x9b0   :  { %v3772_v0 = vpop.permute.xlu1 %3771  ;;  %v3756_v5 = vpop.permute.xlu0 %3755 }
 0x9b8   :  { %v3764_v32 = vpop.permute.xlu1 %3763 }
 0x9ba   :  { %v4132_v25 = vpop.permute.xlu0 %4131 }
 0x9be   :  { %v3827_v1 = vpop.f32.mrf.mxu0 }
 0x9bf   :  { %v10395_v37 = vadd.f32 %v3827_v1, %v3756_v5 }
 0x9c1   :  { %v3932_v51 = vmul.f32 %v10395_v37, %v10395_v37  ;;  %v10468_v3 = vpop.permute.xlu1 %4083 }
 0x9c3   :  { %v10350_v14 = vpop.f32.mrf.mxu1 }
 0x9c4   :  { %v10414_v30 = vadd.f32 %v10350_v14, %v3756_v5 }
 0x9c6   :  { %v3830_v56 = vpop.f32.mrf.mxu0  ;;  %v3933_v33 = vmul.f32 %v10414_v30, %v10414_v30 }
 0x9c7   :  { %v10389_v41 = vadd.f32 %v3830_v56, %v3760_v62 }
 0x9c9   :  { %v3934_v10 = vmul.f32 %v10389_v41, %v10389_v41 }
 0x9cb   :  { %v3871_v23 = vpop.f32.mrf.mxu1 }
 0x9cc   :  { %v10405_v57 = vadd.f32 %v3871_v23, %v3760_v62 }
 0x9ce   :  { %v3833_v2 = vpop.f32.mrf.mxu0  ;;  %v3935_v55 = vmul.f32 %v10405_v57, %v10405_v57 }
 0x9cf   :  { %v10381_v27 = vadd.f32 %v3833_v2, %v3764_v32 }
 0x9d1   :  { %v3936_v34 = vmul.f32 %v10381_v27, %v10381_v27 }
 0x9d3   :  { %v3874_v13 = vpop.f32.mrf.mxu1 }
 0x9d4   :  { %v10398_v7 = vadd.f32 %v3874_v13, %v3764_v32  ;;  %v10474_v13 = vpop.permute.xlu2 %4127 }
 0x9d6   :  { %v3836_v36 = vpop.f32.mrf.mxu0  ;;  %v3937_v59 = vmul.f32 %v10398_v7, %v10398_v7 }
 0x9d7   :  { %v10373_v28 = vadd.f32 %v3836_v36, %v3768_v48 }
 0x9d9   :  { %v3938_v17 = vmul.f32 %v10373_v28, %v10373_v28 }
 0x9db   :  { %v3877_v20 = vpop.f32.mrf.mxu1 }
 0x9dc   :  { %v10392_v18 = vadd.f32 %v3877_v20, %v3768_v48 }
 0x9de   :  { %v3839_v22 = vpop.f32.mrf.mxu0  ;;  %v3939_v44 = vmul.f32 %v10392_v18, %v10392_v18 }
 0x9df   :  { %v10366_v4 = vadd.f32 %v3839_v22, %v3772_v0 }
 0x9e1   :  { %v3940_v63 = vmul.f32 %v10366_v4, %v10366_v4 }
 0x9e3   :  { %v3880_v49 = vpop.f32.mrf.mxu1 }
 0x9e4   :  { %v10385_v61 = vadd.f32 %v3880_v49, %v3772_v0 }
 0x9e6   :  { %v3842_v11 = vpop.f32.mrf.mxu0  ;;  %v3941_v52 = vmul.f32 %v10385_v61, %v10385_v61 }
 0x9e7   :  { %v10361_v16 = vadd.f32 %v3842_v11, %v3776_v46 }
 0x9e9   :  { %v3942_v39 = vmul.f32 %v10361_v16, %v10361_v16 }
 0x9eb   :  { %v3883_v50 = vpop.f32.mrf.mxu1 }
 0x9ec   :  { %v10377_v31 = vadd.f32 %v3883_v50, %v3776_v46 }
 0x9ee   :  { %v3845_v54 = vpop.f32.mrf.mxu0  ;;  %v3943_v6 = vmul.f32 %v10377_v31, %v10377_v31 }
 0x9ef   :  { %v10358_v24 = vadd.f32 %v3845_v54, %v3780_v12  ;;  %v10478_v54 = vpop.permute.xlu2 %4123 }
 0x9f1   :  { %v3944_v15 = vmul.f32 %v10358_v24, %v10358_v24 }
 0x9f3   :  { %v3886_v38 = vpop.f32.mrf.mxu1 }
 0x9f4   :  { %v10369_v53 = vadd.f32 %v3886_v38, %v3780_v12 }
 0x9f6   :  { %v3848_v45 = vpop.f32.mrf.mxu0  ;;  %v3945_v9 = vmul.f32 %v10369_v53, %v10369_v53 }
 0x9f7   :  { %v10352_v29 = vadd.f32 %v3848_v45, %v3784_v43 }
 0x9f9   :  { %3900 = vmatpush.msrb.mxu2 %v10352_v29  ;;  %v3946_v26 = vmul.f32 %v10352_v29, %v10352_v29 }
 0x9fb   :  { %v3889_v42 = vpop.f32.mrf.mxu1  ;;  %3901 = vmatpush.msrb.mxu2 %v10358_v24 }
 0x9fc   :  { %v10364_v8 = vadd.f32 %v3889_v42, %v3784_v43 }
 0x9fd   :  { %3902 = vmatpush.msrb.mxu2 %v10361_v16 }
 0x9fe   :  { %3920 = vmatpush.msrb.mxu3 %v10364_v8  ;;  %v3947_v47 = vmul.f32 %v10364_v8, %v10364_v8 }
 0x9ff   :  { %3903 = vmatpush.msrb.mxu2 %v10366_v4 }
 0xa00   :  { %3921 = vmatpush.msrb.mxu3 %v10369_v53 }
 0xa01   :  { %3904 = vmatpush.msrb.mxu2 %v10373_v28 }
 0xa02   :  { %3922 = vmatpush.msrb.mxu3 %v10377_v31 }
 0xa03   :  { %3905 = vmatpush.msrb.mxu2 %v10381_v27 }
 0xa04   :  { %3923 = vmatpush.msrb.mxu3 %v10385_v61 }
 0xa05   :  { %3906 = vmatpush.msrb.mxu2 %v10389_v41 }
 0xa06   :  { %3924 = vmatpush.msrb.mxu3 %v10392_v18 }
 0xa07   :  { %3907 = vmatpush.msrb.mxu2 %v10395_v37 }
 0xa08   :  { %3925 = vmatpush.msrb.mxu3 %v10398_v7  ;;  %6170 = vmatmul.msk.f32.vlgmr.msrb.gmra.mxu2 %vm666_vm5, %v12177_v40 }
 0xa09   :  { %3956 = vmatpush.msra.mxu2 %v3946_v26  ;;  %v10484_v26 = vpop.permute.xlu2 %4063 }
 0xa0a   :  { %3926 = vmatpush.msrb.mxu3 %v10405_v57 }
 0xa0b   :  { %3957 = vmatpush.msra.mxu2 %v3944_v15 }
 0xa0c   :  { %3927 = vmatpush.msrb.mxu3 %v10414_v30 }
 0xa0d   :  { %6171 = vmatmul.msk.f32.vlgmr.msrb.gmra.mxu3 %vm666_vm5, %v12177_v40  ;;  %3958 = vmatpush.msra.mxu2 %v3942_v39 }
 0xa0e   :  { %3976 = vmatpush.msra.mxu3 %v3947_v47 }
 0xa0f   :  { %3959 = vmatpush.msra.mxu2 %v3940_v63 }
 0xa10   :  { %3977 = vmatpush.msra.mxu3 %v3945_v9 }
 0xa11   :  { %3960 = vmatpush.msra.mxu2 %v3938_v17 }
 0xa12   :  { %3978 = vmatpush.msra.mxu3 %v3943_v6 }
 0xa13   :  { %3961 = vmatpush.msra.mxu2 %v3936_v34 }
 0xa14   :  { %3979 = vmatpush.msra.mxu3 %v3941_v52 }
 0xa15   :  { %3962 = vmatpush.msra.mxu2 %v3934_v10 }
 0xa16   :  { %3980 = vmatpush.msra.mxu3 %v3939_v44 }
 0xa17   :  { %3963 = vmatpush.msra.mxu2 %v3932_v51 }
 0xa18   :  { %3981 = vmatpush.msra.mxu3 %v3937_v59  ;;  %6172 = vmatmul.msk.f32.vlgmr.msra.gmra.mxu2 %vm666_vm5, %v12177_v40 }
 0xa1a   :  { %3982 = vmatpush.msra.mxu3 %v3935_v55 }
 0xa1c   :  { %3983 = vmatpush.msra.mxu3 %v3933_v33 }
 0xa1d   :  { %6173 = vmatmul.msk.f32.vlgmr.msra.gmra.mxu3 %vm666_vm5, %v12177_v40  ;;  %v10472_v40 = vpop.permute.xlu1 %4075 }
 0xa25   :  { %v10476_v22 = vpop.permute.xlu1 %4071 }
 0xa2d   :  { %v10480_v0 = vpop.permute.xlu1 %4119 }
 0xa35   :  { %v10486_v47 = vpop.permute.xlu1 %4115 }
 0xa8b   :  { %v3909_v1 = vpop.f32.mrf.mxu2 }
 0xa8c   :  { %v3988_v56 = vmul.f32 0.015625, %v3909_v1 }
 0xa8e   :  { %v3992_v2 = vmul.f32 %v3988_v56, %v3988_v56  ;;  %v10482_v32 = vperm.slane %v3988_v56, 0 }
 0xa90   :  { %v3929_v14 = vpop.f32.mrf.mxu3  ;;  %v4008_v9 = vsub.f32 %v10361_v16, %v10482_v32  ;;  %v4006_v17 = vsub.f32 %v10366_v4, %v10482_v32  ;;  %v4012_v6 = vsub.f32 %v10352_v29, %v10482_v32  ;;  %v4002_v4 = vsub.f32 %v10381_v27, %v10482_v32 }
 0xa91   :  { %v3989_v35 = vmul.f32 0.015625, %v3929_v14  ;;  %v4004_v29 = vsub.f32 %v10373_v28, %v10482_v32  ;;  %v4000_v55 = vsub.f32 %v10389_v41, %v10482_v32  ;;  %v3998_v33 = vsub.f32 %v10395_v37, %v10482_v32 }
 0xa93   :  { %v3993_v11 = vmul.f32 %v3989_v35, %v3989_v35  ;;  %v10494_v34 = vperm.slane %v3989_v35, 0  ;;  %v4060_v35 = vpop.permute.xlu2 %4059 }
 0xa95   :  { %v4009_v14 = vsub.f32 %v10377_v31, %v10494_v34  ;;  %v4007_v28 = vsub.f32 %v10385_v61, %v10494_v34  ;;  %v4013_v41 = vsub.f32 %v10364_v8, %v10494_v34  ;;  %v4003_v31 = vsub.f32 %v10398_v7, %v10494_v34 }
 0xa9b   :  { %v3965_v23 = vpop.f32.mrf.mxu2 }
 0xa9c   :  { %v3990_v36 = vmul.f32 0.015625, %v3965_v23 }
 0xa9e   :  { %v3994_v20 = vsub.f32 %v3990_v36, %v3992_v2  ;;  %v4068_v2 = vpop.permute.xlu0 %4067 }
 0xaa0   :  { %v4014_v49 = vadd.f32 1e-05, %v3994_v20  ;;  %v3985_v19 = vpop.f32.mrf.mxu3  ;;  %v4005_v20 = vsub.f32 %v10392_v18, %v10494_v34 }
 0xaa1   :  { %v3991_v50 = vmul.f32 0.015625, %v3985_v19 }
 0xaa2   :  { %6597 = vrsqrt.f32 %v4014_v49  ;;  %vm4022_vm1 = vweird.f32 %v4014_v49 }
 0xaa3   :  { %v3995_v43 = vsub.f32 %v3991_v50, %v3993_v11 }
 0xaa5   :  { %v4015_v12 = vadd.f32 1e-05, %v3995_v43 }
 0xaa7   :  { %6599 = vrsqrt.f32 %v4015_v12  ;;  %vm4032_vm4 = vweird.f32 %v4015_v12 }
 0xaa8   :  { %v6598_v38 = vpop.eup %6597 }
 0xaa9   :  { %v4017_v45 = vmul.f32 %v6598_v38, %v4014_v49  ;;  %vm4023_vm0 = vweird.f32 %v6598_v38  ;;  %v4001_v49 = vsub.f32 %v10405_v57, %v10494_v34 }
 0xaaa   :  { %vm4024_vm2 = vmor %vm4022_vm1, %vm4023_vm0 }
 0xaab   :  { %v4018_v21 = vmul.f32 %v6598_v38, %v4017_v45 }
 0xaad   :  { %v6600_v48 = vpop.eup %6599  ;;  %v4019_v46 = vmul.f32 0.5, %v4018_v21 }
 0xaae   :  { %v4027_v42 = vmul.f32 %v6600_v48, %v4015_v12  ;;  %vm4033_vm3 = vweird.f32 %v6600_v48  ;;  %v4056_v12 = vpop.permute.xlu1 %4055 }
 0xaaf   :  { %v4020_v62 = vsub.f32 1.5, %v4019_v46  ;;  %vm4034_vm6 = vmor %vm4032_vm4, %vm4033_vm3 }
 0xab0   :  { %v4028_v5 = vmul.f32 %v6600_v48, %v4027_v42 }
 0xab1   :  { %v4021_v15 = vmul.f32 %v6598_v38, %v4020_v62  ;;  %v3999_v62 = vsub.f32 %v10414_v30, %v10494_v34 }
 0xab2   :  { %v4029_v39 = vmul.f32 0.5, %v4028_v5 }
 0xab3   :  { %v4025_v63 = vsel %vm4024_vm2, %v6598_v38, %v4021_v15 }
 0xab4   :  { %v10496_v52 = vperm.slane %v4025_v63, 0  ;;  %v4030_v10 = vsub.f32 1.5, %v4029_v39 }
 0xab6   :  { %v4031_v44 = vmul.f32 %v6600_v48, %v4030_v10  ;;  %v4048_v51 = vmul.f32 %v10496_v52, %v4008_v9  ;;  %v4046_v59 = vmul.f32 %v10496_v52, %v4006_v17  ;;  %v4052_v16 = vmul.f32 %v10496_v52, %v4012_v6 }
 0xab7   :  { %v4044_v8 = vmul.f32 %v10496_v52, %v4004_v29  ;;  %v4042_v43 = vmul.f32 %v10496_v52, %v4002_v4  ;;  %v4040_v42 = vmul.f32 %v10496_v52, %v4000_v55  ;;  %v4038_v9 = vmul.f32 %v10496_v52, %v3998_v33 }
 0xab8   :  { %v4035_v1 = vsel %vm4034_vm6, %v6600_v48, %v4031_v44  ;;  %v4096_v56 = vmul.f32 %v10472_v40, %v4048_v51  ;;  %v4100_v23 = vmul.f32 %v10468_v3, %v4052_v16  ;;  %v4094_v27 = vmul.f32 %v10476_v22, %v4046_v59  ;;  %v4112_v51 = vpop.permute.xlu0 %4111 }
 0xab9   :  { %v10513_v36 = vperm.slane %v4035_v1, 0  ;;  %v4090_v63 = vmul.f32 %v10484_v26, %v4042_v43  ;;  %v4088_v29 = vmul.f32 %v4060_v35, %v4040_v42  ;;  %vm5066_vm6 = vcmask 80896  }
 0xaba   :  { %v10520_v37 = vadd.f32 %v4132_v25, %v4100_v23  ;;  %v10533_v50 = vadd.f32 %v10478_v54, %v4096_v56  ;;  %v10541_v45 = vadd.f32 %v10480_v0, %v4094_v27  ;;  %v4086_v23 = vmul.f32 %v4056_v12, %v4038_v9 }
 0xabb   :  { %v4049_v19 = vmul.f32 %v10513_v36, %v4009_v14  ;;  %v4047_v61 = vmul.f32 %v10513_v36, %v4007_v28  ;;  %v4053_v11 = vmul.f32 %v10513_v36, %v4013_v41  ;;  %v4045_v18 = vmul.f32 %v10513_v36, %v4005_v20  ;;  %v4108_v14 = vpop.permute.xlu2 %4107  ;;  %v4104_v20 = vpop.permute.xlu1 %4103 }
 0xabc   :  { %v4180_v7 = vmul.f32 0.044715, %v10520_v37  ;;  %v4043_v46 = vmul.f32 %v10513_v36, %v4003_v31  ;;  %v4176_v17 = vmul.f32 0.044715, %v10533_v50  ;;  %v4174_v30 = vmul.f32 0.044715, %v10541_v45 }
 0xabd   :  { %v4097_v57 = vmul.f32 %v10472_v40, %v4049_v19  ;;  %v4095_v38 = vmul.f32 %v10476_v22, %v4047_v61  ;;  %v4101_v21 = vmul.f32 %v10468_v3, %v4053_v11  ;;  %v4092_v22 = vmul.f32 %v4068_v2, %v4044_v8 }
 0xabe   :  { %v4196_v48 = vmul.f32 %v4180_v7, %v10520_v37  ;;  %v4093_v15 = vmul.f32 %v4068_v2, %v4045_v18  ;;  %v4039_v44 = vmul.f32 %v10513_v36, %v3999_v62  ;;  %v10579_v28 = vadd.f32 %v4112_v51, %v4090_v63 }
 0xabf   :  { %v10550_v5 = vadd.f32 %v10478_v54, %v4097_v57  ;;  %v10552_v40 = vadd.f32 %v4132_v25, %v4101_v21  ;;  %v10555_v39 = vadd.f32 %v10480_v0, %v4095_v38  ;;  %v4041_v25 = vmul.f32 %v10513_v36, %v4001_v49 }
 0xac0   :  { %v4212_v3 = vmul.f32 %v4196_v48, %v10520_v37  ;;  %v4091_v0 = vmul.f32 %v10484_v26, %v4043_v46  ;;  %v10570_v16 = vadd.f32 %v10486_v47, %v4092_v22  ;;  %v10573_v4 = vadd.f32 %v10486_v47, %v4093_v15 }
 0xac1   :  { %v4181_v54 = vmul.f32 0.044715, %v10552_v40  ;;  %v4177_v6 = vmul.f32 0.044715, %v10550_v5  ;;  %v4175_v55 = vmul.f32 0.044715, %v10555_v39  ;;  %v4089_v1 = vmul.f32 %v4060_v35, %v4041_v25 }
 0xac2   :  { %v4228_v10 = vadd.f32 %v4212_v3, %v10520_v37  ;;  %v4010_v26 = vsub.f32 %v10358_v24, %v10482_v32  ;;  %v4087_v2 = vmul.f32 %v4056_v12, %v4039_v44  ;;  %v4192_v27 = vmul.f32 %v4176_v17, %v10533_v50 }
 0xac3   :  { %v4197_v59 = vmul.f32 %v4181_v54, %v10552_v40  ;;  %v4193_v47 = vmul.f32 %v4177_v6, %v10550_v5  ;;  %v4190_v41 = vmul.f32 %v4174_v30, %v10541_v45  ;;  %v10584_v31 = vadd.f32 %v4112_v51, %v4091_v0 }
 0xac4   :  { %v4244_v33 = vmul.f32 0.7978846, %v4228_v10  ;;  %v4172_v49 = vmul.f32 0.044715, %v10570_v16  ;;  %v4173_v24 = vmul.f32 0.044715, %v10573_v4  ;;  %v10589_v32 = vadd.f32 %v4108_v14, %v4088_v29 }
 0xac5   :  { %v4213_v56 = vmul.f32 %v4197_v59, %v10552_v40  ;;  %v4191_v19 = vmul.f32 %v4175_v55, %v10555_v39  ;;  %v10592_v61 = vadd.f32 %v4108_v14, %v4089_v1  ;;  %v4011_v11 = vsub.f32 %v10369_v53, %v10494_v34 }
 0xac6   :  { %6601 = vtanh.f32 %v4244_v33  ;;  %v4170_v7 = vmul.f32 0.044715, %v10579_v28  ;;  %v10597_v43 = vadd.f32 %v4104_v20, %v4086_v23  ;;  %v10599_v18 = vadd.f32 %v4104_v20, %v4087_v2  ;;  %v12180_v23 = vld [vmem:[#allocation32_spill] sm:$0xff] }
 0xac7   :  { %v4229_v35 = vadd.f32 %v4213_v56, %v10552_v40  ;;  %v4208_v12 = vmul.f32 %v4192_v27, %v10533_v50  ;;  %v4209_v57 = vmul.f32 %v4193_v47, %v10550_v5  ;;  %v4206_v38 = vmul.f32 %v4190_v41, %v10541_v45 }
 0xac8   :  { %v4171_v21 = vmul.f32 0.044715, %v10584_v31  ;;  %v4188_v48 = vmul.f32 %v4172_v49, %v10570_v16  ;;  %v4189_v46 = vmul.f32 %v4173_v24, %v10573_v4  ;;  %v4168_v53 = vmul.f32 0.044715, %v10589_v32 }
 0xac9   :  { %v4245_v8 = vmul.f32 0.7978846, %v4229_v35  ;;  %v4207_v34 = vmul.f32 %v4191_v19, %v10555_v39  ;;  %v4169_v42 = vmul.f32 0.044715, %v10592_v61  ;;  %v4164_v62 = vmul.f32 0.5, %v10520_v37  ;;  %v12181_v35 = vld [vmem:[#allocation7_spill] sm:$0xff] }
 0xaca   :  { %v4050_v22 = vmul.f32 %v10496_v52, %v4010_v26  ;;  %v4186_v15 = vmul.f32 %v4170_v7, %v10579_v28  ;;  %v4166_v3 = vmul.f32 0.044715, %v10597_v43  ;;  %v4167_v63 = vmul.f32 0.044715, %v10599_v18 }
 0xacb   :  { %6603 = vtanh.f32 %v4245_v8  ;;  %v4051_v9 = vmul.f32 %v10513_v36, %v4011_v11  ;;  %v4187_v30 = vmul.f32 %v4171_v21, %v10584_v31  ;;  %v4224_v25 = vadd.f32 %v4208_v12, %v10533_v50  ;;  %v12182_v12 = vld [vmem:[#allocation10_spill] sm:$0xff] }
 0xacc   :  { %v6602_v17 = vpop.eup %6601  ;;  %v4098_v54 = vmul.f32 %v10470_v60, %v4050_v22  ;;  %v4225_v6 = vadd.f32 %v4209_v57, %v10550_v5  ;;  %v4184_v37 = vmul.f32 %v4168_v53, %v10589_v32  ;;  %v4222_v0 = vadd.f32 %v4206_v38, %v10541_v45  ;;  %v12183_v22 = vld [vmem:[#allocation6_spill] sm:$0xff] }
 0xacd   :  { %v4276_v52 = vadd.f32 1.0, %v6602_v17  ;;  %v4099_v10 = vmul.f32 %v10470_v60, %v4051_v9  ;;  %v4185_v44 = vmul.f32 %v4169_v42, %v10592_v61  ;;  %v4240_v51 = vmul.f32 0.7978846, %v4224_v25 }
 0xace   :  { %v10625_v36 = vadd.f32 %v10474_v13, %v4098_v54  ;;  %v4241_v59 = vmul.f32 0.7978846, %v4225_v6  ;;  %v4165_v33 = vmul.f32 0.5, %v10552_v40  ;;  %v4223_v14 = vadd.f32 %v4207_v34, %v10555_v39 }
 0xacf   :  { %v4292_v55 = vmul.f32 %v4276_v52, %v4164_v62  ;;  %v4147_v1 = vadd.f32 %v10474_v13, %v4099_v10  ;;  %v4202_v26 = vmul.f32 %v4186_v15, %v10579_v28  ;;  %6605 = vtanh.f32 %v4240_v51 }
 0xad0   :  { %v4178_v56 = vmul.f32 0.044715, %v10625_v36  ;;  %6607 = vtanh.f32 %v4241_v59  ;;  %v4238_v47 = vmul.f32 0.7978846, %v4222_v0  ;;  %v4182_v41 = vmul.f32 %v4166_v3, %v10597_v43 }
 0xad1   :  { %v6604_v29 = vpop.eup %6603  ;;  %v4308_v2 = vadd.f32 %v4292_v55, %v12180_v23  ;;  %v4179_v27 = vmul.f32 0.044715, %v4147_v1  ;;  %v4183_v20 = vmul.f32 %v4167_v63, %v10599_v18  ;;  %v4239_v19 = vmul.f32 0.7978846, %v4223_v14 }
 0xad2   :  { %v4277_v60 = vadd.f32 1.0, %v6604_v29  ;;  %v4194_v13 = vmul.f32 %v4178_v56, %v10625_v36  ;;  %v4204_v11 = vmul.f32 %v4188_v48, %v10570_v16  ;;  %v4203_v8 = vmul.f32 %v4187_v30, %v10584_v31 }
 0xad3   :  { %v4324_v49 = vmul.f32 %v4308_v2, %v12181_v35  ;;  %v4195_v24 = vmul.f32 %v4179_v27, %v4147_v1  ;;  %v4200_v7 = vmul.f32 %v4184_v37, %v10589_v32  ;;  %6609 = vtanh.f32 %v4238_v47 }
 0xad4   :  { %v4293_v40 = vmul.f32 %v4277_v60, %v4165_v33  ;;  %v4210_v38 = vmul.f32 %v4194_v13, %v10625_v36  ;;  %v4220_v53 = vadd.f32 %v4204_v11, %v10570_v16  ;;  %v4205_v34 = vmul.f32 %v4189_v46, %v10573_v4 }
 0xad5   :  { %4454 = vmatpush.msrb.mxu2 %v4324_v49  ;;  %v4211_v21 = vmul.f32 %v4195_v24, %v4147_v1  ;;  %v6606_v42 = vpop.eup %6605  ;;  %v4201_v62 = vmul.f32 %v4185_v44, %v10592_v61  ;;  %v4218_v3 = vadd.f32 %v4202_v26, %v10579_v28  ;;  %6611 = vtanh.f32 %v4239_v19  ;;  %v12184_v49 = vld [vmem:[#allocation22_spill] sm:$0xff] }
 0xad6   :  { %v4309_v57 = vadd.f32 %v4293_v40, %v12182_v12  ;;  %v4226_v15 = vadd.f32 %v4210_v38, %v10625_v36  ;;  %v6608_v63 = vpop.eup %6607  ;;  %v4236_v17 = vmul.f32 0.7978846, %v4220_v53  ;;  %v4221_v30 = vadd.f32 %v4205_v34, %v10573_v4 }
 0xad7   :  { %v4227_v9 = vadd.f32 %v4211_v21, %v4147_v1  ;;  %v4198_v54 = vmul.f32 %v4182_v41, %v10597_v43  ;;  %v4272_v46 = vadd.f32 1.0, %v6606_v42  ;;  %v4219_v6 = vadd.f32 %v4203_v8, %v10584_v31 }
 0xad8   :  { %v4325_v48 = vmul.f32 %v4309_v57, %v12183_v22  ;;  %v4242_v25 = vmul.f32 0.7978846, %v4226_v15  ;;  %v4160_v52 = vmul.f32 0.5, %v10533_v50  ;;  %6613 = vtanh.f32 %v4236_v17 }
 0xad9   :  { %v4243_v37 = vmul.f32 0.7978846, %v4227_v9  ;;  %v4234_v10 = vmul.f32 0.7978846, %v4218_v3  ;;  %v4273_v0 = vadd.f32 1.0, %v6608_v63  ;;  %v6610_v59 = vpop.eup %6609  ;;  %v4199_v29 = vmul.f32 %v4183_v20, %v10599_v18  ;;  %v12186_v63 = vld [vmem:[#allocation25_spill] sm:$0xff] }
 0xada   :  { %4507 = vmatpush.msrb.mxu3 %v4325_v48  ;;  %6615 = vtanh.f32 %v4242_v25  ;;  %v4237_v44 = vmul.f32 0.7978846, %v4221_v30  ;;  %v4235_v51 = vmul.f32 0.7978846, %v4219_v6  ;;  %v4161_v55 = vmul.f32 0.5, %v10550_v5  ;;  %v12187_v25 = vld [vmem:[#allocation27_spill] sm:$0xff] }
 0xadb   :  { %6617 = vtanh.f32 %v4243_v37  ;;  %v4158_v33 = vmul.f32 0.5, %v10541_v45  ;;  %v4288_v14 = vmul.f32 %v4272_v46, %v4160_v52  ;;  %v4159_v26 = vmul.f32 0.5, %v10555_v39  ;;  %v6612_v60 = vpop.eup %6611  ;;  %v12188_v6 = vld [vmem:[#allocation15_spill] sm:$0xff] }
 0xadc   :  { %6619 = vtanh.f32 %v4237_v44  ;;  %v4216_v50 = vadd.f32 %v4200_v7, %v10589_v32  ;;  %v4162_v56 = vmul.f32 0.5, %v10625_v36  ;;  %v4163_v23 = vmul.f32 0.5, %v4147_v1 }
 0xadd   :  { %v4156_v2 = vmul.f32 0.5, %v10570_v16  ;;  %6621 = vtanh.f32 %v4234_v10  ;;  %v4289_v27 = vmul.f32 %v4273_v0, %v4161_v55  ;;  %v4270_v47 = vadd.f32 1.0, %v6610_v59 }
 0xade   :  { %6623 = vtanh.f32 %v4235_v51  ;;  %v4232_v41 = vmul.f32 0.7978846, %v4216_v50  ;;  %v6614_v5 = vpop.eup %6613  ;;  %v4157_v45 = vmul.f32 0.5, %v10573_v4  ;;  %v4154_v20 = vmul.f32 0.5, %v10579_v28  ;;  %v12185_v28 = vld [vmem:[#allocation12_spill] sm:$0xff] }
 0xadf   :  { %v4155_v39 = vmul.f32 0.5, %v10584_v31  ;;  %v4217_v40 = vadd.f32 %v4201_v62, %v10592_v61  ;;  %v4304_v36 = vadd.f32 %v4288_v14, %v12184_v49  ;;  %v4271_v1 = vadd.f32 1.0, %v6612_v60 }
 0xae0   :  { %v6616_v13 = vpop.eup %6615  ;;  %6625 = vtanh.f32 %v4232_v41  ;;  %v4214_v16 = vadd.f32 %v4198_v54, %v10597_v43  ;;  %v4268_v11 = vadd.f32 1.0, %v6614_v5  ;;  %v4215_v7 = vadd.f32 %v4199_v29, %v10599_v18  ;;  %v4338_v29 = vld [vmem:[%s11935_s3] sm:$0xff]  ;;  %v12191_v41 = vld [vmem:[#allocation5_spill] sm:$0xff] }
 0xae1   :  { %v6618_v24 = vpop.eup %6617  ;;  %v4274_v19 = vadd.f32 1.0, %v6616_v13  ;;  %v4233_v8 = vmul.f32 0.7978846, %v4217_v40  ;;  %v4305_v57 = vadd.f32 %v4289_v27, %v12185_v28  ;;  %v4286_v31 = vmul.f32 %v4270_v47, %v4158_v33  ;;  %v12189_v33 = vld [vmem:[#allocation23_spill] sm:$0xff]  ;;  %v12192_v40 = vld [vmem:[#allocation30_spill] sm:$0xff]  ;;  %v12195_v28 = vld [vmem:[#allocation29_spill] sm:$0xff] }
 0xae2   :  { %v6620_v4 = vpop.eup %6619  ;;  %v4275_v12 = vadd.f32 1.0, %v6618_v24  ;;  %v4230_v38 = vmul.f32 0.7978846, %v4214_v16  ;;  %v4231_v42 = vmul.f32 0.7978846, %v4215_v7  ;;  %v4287_v15 = vmul.f32 %v4271_v1, %v4159_v26  ;;  %v12193_v24 = vld [vmem:[#allocation21_spill] sm:$0xff] }
 0xae3   :  { %v6622_v21 = vpop.eup %6621  ;;  %v4290_v53 = vmul.f32 %v4274_v19, %v4162_v56  ;;  %v4269_v34 = vadd.f32 1.0, %v6620_v4  ;;  %6627 = vtanh.f32 %v4233_v8  ;;  %v4284_v17 = vmul.f32 %v4268_v11, %v4156_v2  ;;  %v12194_v7 = vld [vmem:[#allocation26_spill] sm:$0xff] }
 0xae4   :  { %v6624_v62 = vpop.eup %6623  ;;  %v4291_v48 = vmul.f32 %v4275_v12, %v4163_v23  ;;  %v4266_v3 = vadd.f32 1.0, %v6622_v21  ;;  %6629 = vtanh.f32 %v4230_v38  ;;  %v4302_v37 = vadd.f32 %v4286_v31, %v12188_v6  ;;  %v12196_v38 = vld [vmem:[#allocation20_spill] sm:$0xff]  ;;  %v4341_v6 = vld [vmem:[%s11935_s3 + $0x18] sm:$0xff] }
 0xae5   :  { %v4306_v9 = vadd.f32 %v4290_v53, %v12186_v63  ;;  %v4267_v30 = vadd.f32 1.0, %v6624_v62  ;;  %6631 = vtanh.f32 %v4231_v42  ;;  %v4285_v52 = vmul.f32 %v4269_v34, %v4157_v45  ;;  %v4339_v53 = vld [vmem:[%s11935_s3 + $0x8] sm:$0xff]  ;;  %v12197_v62 = vld [vmem:[#allocation14_spill] sm:$0xff] }
 0xae6   :  { %v6626_v54 = vpop.eup %6625  ;;  %v4307_v46 = vadd.f32 %v4291_v48, %v12187_v25  ;;  %v4152_v10 = vmul.f32 0.5, %v10589_v32  ;;  %v4320_v44 = vmul.f32 %v4304_v36, %v12181_v35  ;;  %v4282_v51 = vmul.f32 %v4266_v3, %v4154_v20  ;;  %v12190_v32 = vld [vmem:[#allocation19_spill] sm:$0xff]  ;;  %v4347_v34 = vld [vmem:[%s11935_s3 + $0x48] sm:$0xff] }
 0xae7   :  { %v4322_v0 = vmul.f32 %v4306_v9, %v12181_v35  ;;  %v4264_v59 = vadd.f32 1.0, %v6626_v54  ;;  %v4303_v14 = vadd.f32 %v4287_v15, %v12189_v33  ;;  %v4283_v26 = vmul.f32 %v4267_v30, %v4155_v39  ;;  %v4326_v9 = vld [vmem:[%s11937_s5] sm:$0xff]  ;;  %v4345_v30 = vld [vmem:[%s11935_s3 + $0x38] sm:$0xff]  ;;  %v4344_v54 = vld [vmem:[%s11935_s3 + $0x30] sm:$0xff] }
 0xae8   :  { %v4323_v55 = vmul.f32 %v4307_v46, %v12183_v22  ;;  %v4321_v60 = vmul.f32 %v4305_v57, %v12183_v22  ;;  %v4300_v56 = vadd.f32 %v4284_v17, %v12190_v32  ;;  %v6848_v2 = vmov 30   ;;  %v4343_v25 = vld [vmem:[%s11935_s3 + $0x28] sm:$0xff]  ;;  %v4333_v33 = vld [vmem:[%s11937_s5 + $0x38] sm:$0xff] }
 0xae9   :  { %v6628_v50 = vpop.eup %6627  ;;  %4455 = vmatpush.msrb.mxu2 %v4322_v0  ;;  %v4280_v23 = vmul.f32 %v4264_v59, %v4152_v10  ;;  %6415 = vset.pattern.permute.xlu0 %v6848_v2  ;;  %v4318_v47 = vmul.f32 %v4302_v37, %v12181_v35  ;;  %v4301_v5 = vadd.f32 %v4285_v52, %v12191_v41  ;;  %v4153_v45 = vmul.f32 0.5, %v10592_v61  ;;  %v4327_v46 = vld [vmem:[%s11937_s5 + $0x8] sm:$0xff]  ;;  %v4340_v37 = vld [vmem:[%s11935_s3 + $0x10] sm:$0xff]  ;;  %v4342_v10 = vld [vmem:[%s11935_s3 + $0x20] sm:$0xff] }
 0xaea   :  { %v6630_v27 = vpop.eup %6629  ;;  %4508 = vmatpush.msrb.mxu3 %v4323_v55  ;;  %v4265_v20 = vadd.f32 1.0, %v6628_v50  ;;  %4352 = vperm.xlu0 %6415, %v4338_v29   ;;  %v4298_v13 = vadd.f32 %v4282_v51, %v12192_v40  ;;  %v4150_v49 = vmul.f32 0.5, %v10597_v43  ;;  %v4151_v1 = vmul.f32 0.5, %v10599_v18  ;;  %v4328_v52 = vld [vmem:[%s11937_s5 + $0x10] sm:$0xff]  ;;  %v4329_v0 = vld [vmem:[%s11937_s5 + $0x18] sm:$0xff]  ;;  %v4330_v51 = vld [vmem:[%s11937_s5 + $0x20] sm:$0xff] }
 0xaeb   :  { %v6632_v39 = vpop.eup %6631  ;;  %4456 = vmatpush.msrb.mxu2 %v4320_v44  ;;  %v4262_v36 = vadd.f32 1.0, %v6630_v27  ;;  %6414 = vset.pattern.permute.xlu2 %v6848_v2  ;;  %v4319_v16 = vmul.f32 %v4303_v14, %v12183_v22  ;;  %v4299_v19 = vadd.f32 %v4283_v26, %v12193_v24  ;;  %v4316_v61 = vmul.f32 %v4300_v56, %v12181_v35  ;;  %v4349_v44 = vld [vmem:[%s11935_s3 + $0x58] sm:$0xff]  ;;  %v4331_v59 = vld [vmem:[%s11937_s5 + $0x28] sm:$0xff]  ;;  %v4332_v29 = vld [vmem:[%s11937_s5 + $0x30] sm:$0xff] }
 0xaec   :  { %4509 = vmatpush.msrb.mxu3 %v4321_v60  ;;  %v4281_v11 = vmul.f32 %v4265_v20, %v4153_v45  ;;  %v4263_v8 = vadd.f32 1.0, %v6632_v39  ;;  %6416 = vset.pattern.permute.xlu1 %v6848_v2  ;;  %v4296_v4 = vadd.f32 %v4280_v23, %v12194_v7  ;;  %v4317_v43 = vmul.f32 %v4301_v5, %v12183_v22  ;;  %v4346_v55 = vld [vmem:[%s11935_s3 + $0x40] sm:$0xff]  ;;  %v4348_v14 = vld [vmem:[%s11935_s3 + $0x50] sm:$0xff]  ;;  %v4335_v50 = vld [vmem:[%s11937_s5 + $0x48] sm:$0xff] }
 0xaed   :  { %4457 = vmatpush.msrb.mxu2 %v4318_v47  ;;  %v4278_v12 = vmul.f32 %v4262_v36, %v4150_v49  ;;  %v4314_v31 = vmul.f32 %v4298_v13, %v12181_v35  ;;  %v4315_v42 = vmul.f32 %v4299_v19, %v12183_v22  ;;  %4357 = vperm.xlu2 %6414, %v4339_v53   ;;  %v4334_v26 = vld [vmem:[%s11937_s5 + $0x40] sm:$0xff]  ;;  %v4336_v60 = vld [vmem:[%s11937_s5 + $0x50] sm:$0xff]  ;;  %v4337_v32 = vld [vmem:[%s11937_s5 + $0x58] sm:$0xff] }
 0xaee   :  { %4510 = vmatpush.msrb.mxu3 %v4319_v16  ;;  %v4297_v18 = vadd.f32 %v4281_v11, %v12195_v28  ;;  %v4279_v57 = vmul.f32 %v4263_v8, %v4151_v1  ;;  %v4312_v15 = vmul.f32 %v4296_v4, %v12181_v35  ;;  %4387 = vperm.xlu1 %6416, %v4345_v30  }
 0xaef   :  { %4458 = vmatpush.msrb.mxu2 %v4316_v61  ;;  %v4294_v21 = vadd.f32 %v4278_v12, %v12196_v38 }
 0xaf0   :  { %4511 = vmatpush.msrb.mxu3 %v4317_v43  ;;  %v4295_v48 = vadd.f32 %v4279_v57, %v12197_v62  ;;  %v4313_v3 = vmul.f32 %v4297_v18, %v12183_v22 }
 0xaf1   :  { %4459 = vmatpush.msrb.mxu2 %v4314_v31  ;;  %v4310_v63 = vmul.f32 %v4294_v21, %v12181_v35 }
 0xaf2   :  { %4512 = vmatpush.msrb.mxu3 %v4315_v42  ;;  %4397 = vperm.xlu0 %6415, %v4347_v34   ;;  %v4311_v17 = vmul.f32 %v4295_v48, %v12183_v22 }
 0xaf3   :  { %4460 = vmatpush.msrb.mxu2 %v4312_v15 }
 0xaf4   :  { %4513 = vmatpush.msrb.mxu3 %v4313_v3 }
 0xaf5   :  { %4461 = vmatpush.msrb.mxu2 %v4310_v63  ;;  %4382 = vperm.xlu2 %6414, %v4344_v54  }
 0xaf6   :  { %4514 = vmatpush.msrb.mxu3 %v4311_v17  ;;  %6174 = vmatmul.msk.f32.vlgmr.msrb.gmra.mxu2 %vm666_vm5, %v4326_v9 }
 0xaf7   :  { %6186 = vmatmul.msk.f32.vlgmr.msrb.gmra.mxu3 %vm666_vm5, %v4326_v9  ;;  %4367 = vperm.xlu1 %6416, %v4341_v6  }
 0xafa   :  { %4377 = vperm.xlu0 %6415, %v4343_v25  }
 0xafd   :  { %4362 = vperm.xlu2 %6414, %v4340_v37  }
 0xafe   :  { %6175 = vmatmul.msk.f32.gmra.mxu2 %vm666_vm5, %v4327_v46 }
 0xaff   :  { %6187 = vmatmul.msk.f32.gmra.mxu3 %vm666_vm5, %v4327_v46  ;;  %4392 = vperm.xlu1 %6416, %v4346_v55  }
 0xb05   :  { %4372 = vperm.xlu2 %6414, %v4342_v10  }
 0xb06   :  { %6176 = vmatmul.msk.f32.gmra.mxu2 %vm666_vm5, %v4328_v52 }
 0xb07   :  { %6188 = vmatmul.msk.f32.gmra.mxu3 %vm666_vm5, %v4328_v52  ;;  %4402 = vperm.xlu1 %6416, %v4348_v14  }
 0xb0d   :  { %4407 = vperm.xlu2 %6414, %v4349_v44  }
 0xb0e   :  { %6177 = vmatmul.msk.f32.gmra.mxu2 %vm666_vm5, %v4329_v0 }
 0xb0f   :  { %6189 = vmatmul.msk.f32.gmra.mxu3 %vm666_vm5, %v4329_v0 }
 0xb16   :  { %6178 = vmatmul.msk.f32.gmra.mxu2 %vm666_vm5, %v4330_v51 }
 0xb17   :  { %6190 = vmatmul.msk.f32.gmra.mxu3 %vm666_vm5, %v4330_v51 }
 0xb1e   :  { %6179 = vmatmul.msk.f32.gmra.mxu2 %vm666_vm5, %v4331_v59 }
 0xb1f   :  { %6191 = vmatmul.msk.f32.gmra.mxu3 %vm666_vm5, %v4331_v59 }
 0xb26   :  { %6180 = vmatmul.msk.f32.gmra.mxu2 %vm666_vm5, %v4332_v29 }
 0xb27   :  { %6192 = vmatmul.msk.f32.gmra.mxu3 %vm666_vm5, %v4332_v29 }
 0xb2e   :  { %6181 = vmatmul.msk.f32.gmra.mxu2 %vm666_vm5, %v4333_v33 }
 0xb2f   :  { %6193 = vmatmul.msk.f32.gmra.mxu3 %vm666_vm5, %v4333_v33 }
 0xb36   :  { %6182 = vmatmul.msk.f32.gmra.mxu2 %vm666_vm5, %v4334_v26 }
 0xb37   :  { %6194 = vmatmul.msk.f32.gmra.mxu3 %vm666_vm5, %v4334_v26 }
 0xb3e   :  { %6183 = vmatmul.msk.f32.gmra.mxu2 %vm666_vm5, %v4335_v50 }
 0xb3f   :  { %6195 = vmatmul.msk.f32.gmra.mxu3 %vm666_vm5, %v4335_v50 }
 0xb46   :  { %6184 = vmatmul.msk.f32.gmra.mxu2 %vm666_vm5, %v4336_v60 }
 0xb47   :  { %6196 = vmatmul.msk.f32.gmra.mxu3 %vm666_vm5, %v4336_v60  ;;  %v4358_v56 = vpop.permute.xlu2 %4357 }
 0xb4e   :  { %6185 = vmatmul.msk.f32.gmra.mxu2 %vm666_vm5, %v4337_v32 }
 0xb4f   :  { %6197 = vmatmul.msk.f32.gmra.mxu3 %vm666_vm5, %v4337_v32  ;;  %v10793_v39 = vpop.permute.xlu2 %4382 }
 0xb57   :  { %v4363_v31 = vpop.permute.xlu2 %4362 }
 0xb5c   :  { %v4353_v27 = vpop.permute.xlu0 %4352 }
 0xb5f   :  { %v4373_v55 = vpop.permute.xlu2 %4372 }
 0xb60   :  { %v10799_v16 = vpop.permute.xlu1 %4387 }
 0xb64   :  { %v10806_v10 = vpop.permute.xlu0 %4397 }
 0xb69   :  { %v4368_v42 = vpop.permute.xlu1 %4367 }
 0xb79   :  { %v4463_v23 = vpop.f32.mrf.mxu2 }
 0xb7a   :  { %v4516_v2 = vpop.f32.mrf.mxu3  ;;  %v4464_v47 = vadd.f32 %v4463_v23, %v4353_v27 }
 0xb7b   :  { %v4517_v41 = vadd.f32 %v4516_v2, %v4353_v27 }
 0xb7c   :  { %v4552_v40 = vmul.f32 %v4464_v47, %v12181_v35 }
 0xb7d   :  { %v4553_v49 = vmul.f32 %v4517_v41, %v12183_v22 }
 0xb7e   :  { %v4576_v19 = vmul.f32 0.125, %v4552_v40 }
 0xb7f   :  { %v4577_v8 = vmul.f32 0.125, %v4553_v49 }
 0xb81   :  { %v4466_v5 = vpop.f32.mrf.mxu2 }
 0xb82   :  { %v4467_v45 = vadd.f32 %v4466_v5, %v4358_v56  ;;  %v4519_v20 = vpop.f32.mrf.mxu3 }
 0xb83   :  { %v4520_v13 = vadd.f32 %v4519_v20, %v4358_v56 }
 0xb84   :  { %v4554_v36 = vmul.f32 %v4467_v45, %v12181_v35 }
 0xb85   :  { %v4555_v1 = vmul.f32 %v4520_v13, %v12183_v22 }
 0xb86   :  { %v4580_v24 = vmul.f32 0.125, %v4554_v36 }
 0xb87   :  { %v4581_v11 = vmul.f32 0.125, %v4555_v1 }
 0xb88   :  { %v4593_v61 = vsel %vm4592_vm7, %v4580_v24, -inf }
 0xb89   :  { %v4594_v7 = vmax.f32 %v4576_v19, %v4593_v61  ;;  %v4601_v4 = vsel %vm4592_vm7, %v4581_v11, -inf  ;;  %v4469_v12 = vpop.f32.mrf.mxu2  ;;  %v4378_v61 = vpop.permute.xlu0 %4377 }
 0xb8a   :  { %v4602_v43 = vmax.f32 %v4577_v8, %v4601_v4  ;;  %v4522_v28 = vpop.f32.mrf.mxu3  ;;  %v4470_v34 = vadd.f32 %v4469_v12, %v4363_v31 }
 0xb8b   :  { %v4595_v18 = vrot.slane %v4594_v7, 4  ;;  %v4523_v48 = vadd.f32 %v4522_v28, %v4363_v31 }
 0xb8c   :  { %v4603_v57 = vrot.slane %v4602_v43, 4  ;;  %v4556_v54 = vmul.f32 %v4470_v34, %v12181_v35 }
 0xb8d   :  { %v4596_v38 = vmax.f32 %v4594_v7, %v4595_v18  ;;  %v4557_v6 = vmul.f32 %v4523_v48, %v12183_v22 }
 0xb8e   :  { %v4604_v21 = vmax.f32 %v4602_v43, %v4603_v57  ;;  %v10811_v33 = vmul.f32 0.125, %v4556_v54 }
 0xb8f   :  { %v4597_v53 = vrot.slane %v4596_v38, 2  ;;  %v10815_v60 = vmul.f32 0.125, %v4557_v6 }
 0xb90   :  { %v4605_v62 = vrot.slane %v4604_v21, 2 }
 0xb91   :  { %v4598_v15 = vmax.f32 %v4596_v38, %v4597_v53  ;;  %v4472_v3 = vpop.f32.mrf.mxu2 }
 0xb92   :  { %v4606_v63 = vmax.f32 %v4604_v21, %v4605_v62  ;;  %v4525_v9 = vpop.f32.mrf.mxu3  ;;  %v4473_v17 = vadd.f32 %v4472_v3, %v4368_v42 }
 0xb93   :  { %v4599_v30 = vrot.slane %v4598_v15, 1  ;;  %v4526_v25 = vadd.f32 %v4525_v9, %v4368_v42 }
 0xb94   :  { %v4607_v46 = vrot.slane %v4606_v63, 1  ;;  %v4558_v37 = vmul.f32 %v4473_v17, %v12181_v35 }
 0xb95   :  { %v4600_v52 = vmax.f32 %v4598_v15, %v4599_v30  ;;  %v4559_v0 = vmul.f32 %v4526_v25, %v12183_v22 }
 0xb96   :  { %v4608_v44 = vmax.f32 %v4606_v63, %v4607_v46  ;;  %v10809_v51 = vmul.f32 0.125, %v4558_v37 }
 0xb97   :  { %v4625_v59 = vsub.f32 %v4576_v19, %v4600_v52  ;;  %v4629_v29 = vsub.f32 %v4580_v24, %v4600_v52  ;;  %v10813_v14 = vmul.f32 0.125, %v4559_v0 }
 0xb98   :  { %v4626_v26 = vsub.f32 %v4577_v8, %v4608_v44  ;;  %v4630_v50 = vsub.f32 %v4581_v11, %v4608_v44  ;;  %v4761_v32 = vsel %vm4592_vm7, %v10809_v51, -inf }
 0xb99   :  { %v4633_v56 = vmul.f32 1.442695, %v4625_v59  ;;  %v4641_v23 = vmul.f32 1.442695, %v4629_v29  ;;  %v4769_v2 = vsel %vm4592_vm7, %v10813_v14, -inf  ;;  %v4762_v27 = vmax.f32 %v10811_v33, %v4761_v32  ;;  %v4475_v47 = vpop.f32.mrf.mxu2 }
 0xb9a   :  { %v4635_v41 = vmul.f32 1.442695, %v4626_v26  ;;  %v4643_v5 = vmul.f32 1.442695, %v4630_v50  ;;  %v4770_v45 = vmax.f32 %v10815_v60, %v4769_v2  ;;  %v4476_v20 = vadd.f32 %v4475_v47, %v4373_v55  ;;  %v4528_v40 = vpop.f32.mrf.mxu3 }
 0xb9b   :  { %6633 = vpow2.f32 %v4633_v56  ;;  %v4763_v13 = vrot.slane %v4762_v27, 4  ;;  %v4529_v49 = vadd.f32 %v4528_v40, %v4373_v55 }
 0xb9c   :  { %6635 = vpow2.f32 %v4641_v23  ;;  %v4771_v36 = vrot.slane %v4770_v45, 4  ;;  %v10824_v1 = vmul.f32 %v4476_v20, %v12181_v35 }
 0xb9d   :  { %6637 = vpow2.f32 %v4635_v41  ;;  %v4764_v24 = vmax.f32 %v4762_v27, %v4763_v13  ;;  %v10827_v19 = vmul.f32 %v4529_v49, %v12183_v22 }
 0xb9e   :  { %6639 = vpow2.f32 %v4643_v5  ;;  %v4772_v11 = vmax.f32 %v4770_v45, %v4771_v36  ;;  %v4937_v8 = vand.u32 2147483647, %v10824_v1  ;;  %v4929_v40 = vmax.f32 %v10824_v1, 0.0 }
 0xb9f   :  { %v4765_v7 = vrot.slane %v4764_v24, 2  ;;  %v4938_v4 = vand.u32 2147483647, %v10827_v19 }
 0xba0   :  { %v4773_v12 = vrot.slane %v4772_v11, 2  ;;  %v4945_v43 = vsub.f32 0.0, %v4937_v8 }
 0xba1   :  { %v10831_v28 = vpop.eup %6633  ;;  %v4766_v18 = vmax.f32 %v4764_v24, %v4765_v7  ;;  %v4946_v57 = vsub.f32 0.0, %v4938_v4  ;;  %v4478_v31 = vpop.f32.mrf.mxu2 }
 0xba2   :  { %v10833_v38 = vpop.eup %6635  ;;  %v4953_v21 = vmul.f32 1.442695, %v4945_v43  ;;  %v4479_v53 = vadd.f32 %v4478_v31, %v4378_v61  ;;  %v4531_v34 = vpop.f32.mrf.mxu3  ;;  %v4774_v48 = vmax.f32 %v4772_v11, %v4773_v12 }
 0xba3   :  { %v10835_v42 = vpop.eup %6637  ;;  %v4649_v62 = vsel %vm4592_vm7, %v10833_v38, 0.0  ;;  %v4955_v15 = vmul.f32 1.442695, %v4946_v57  ;;  %v4767_v9 = vrot.slane %v4766_v18, 1  ;;  %v4532_v44 = vadd.f32 %v4531_v34, %v4378_v61 }
 0xba4   :  { %v10839_v3 = vpop.eup %6639  ;;  %v4650_v63 = vadd.f32 %v10831_v28, %v4649_v62  ;;  %6641 = vpow2.f32 %v4953_v21  ;;  %v10845_v30 = vmul.f32 %v4479_v53, %v12181_v35  ;;  %v4775_v46 = vrot.slane %v4774_v48, 1 }
 0xba5   :  { %v4657_v17 = vsel %vm4592_vm7, %v10839_v3, 0.0  ;;  %6643 = vpow2.f32 %v4955_v15  ;;  %v4768_v52 = vmax.f32 %v4766_v18, %v4767_v9  ;;  %v10851_v5 = vmul.f32 %v4532_v44, %v12183_v22 }
 0xba6   :  { %v4651_v54 = vrot.slane %v4650_v63, 4  ;;  %v4658_v25 = vadd.f32 %v10835_v42, %v4657_v17  ;;  %v4941_v6 = vand.u32 2147483647, %v10845_v30  ;;  %v4776_v32 = vmax.f32 %v4774_v48, %v4775_v46 }
 0xba7   :  { %v4793_v2 = vsub.f32 %v10811_v33, %v4768_v52  ;;  %v4797_v20 = vsub.f32 %v10809_v51, %v4768_v52  ;;  %v4942_v7 = vand.u32 2147483647, %v10851_v5  ;;  %v4930_v51 = vmax.f32 %v10827_v19, 0.0 }
 0xba8   :  { %v4659_v37 = vrot.slane %v4658_v25, 4  ;;  %v4652_v0 = vadd.f32 %v4651_v54, %v4650_v63  ;;  %v4949_v23 = vsub.f32 0.0, %v4941_v6  ;;  %v4794_v13 = vsub.f32 %v10815_v60, %v4776_v32 }
 0xba9   :  { %v4481_v59 = vpop.f32.mrf.mxu2  ;;  %v4798_v24 = vsub.f32 %v10813_v14, %v4776_v32  ;;  %v4801_v11 = vmul.f32 1.442695, %v4793_v2  ;;  %v4809_v57 = vmul.f32 1.442695, %v4797_v20  ;;  %v4950_v31 = vsub.f32 0.0, %v4942_v7 }
 0xbaa   :  { %v6642_v29 = vpop.eup %6641  ;;  %v4660_v55 = vadd.f32 %v4659_v37, %v4658_v25  ;;  %v4534_v26 = vpop.f32.mrf.mxu3  ;;  %v4653_v47 = vrot.slane %v4652_v0, 2  ;;  %v4961_v36 = vmul.f32 1.442695, %v4949_v23  ;;  %v4482_v1 = vadd.f32 %v4481_v59, %v10793_v39 }
 0xbab   :  { %v6644_v50 = vpop.eup %6643  ;;  %v4969_v56 = vadd.f32 1.0, %v6642_v29  ;;  %v4972_v41 = vmul.f32 -0.5, %v6642_v29  ;;  %v4975_v33 = vand.u32 2147483647, %v6642_v29  ;;  %v4803_v18 = vmul.f32 1.442695, %v4794_v13 }
 0xbac   :  { %v4978_v27 = vadd.f32 1.0, %v6644_v50  ;;  %v4661_v45 = vrot.slane %v4660_v55, 2  ;;  %v4981_v49 = vmul.f32 -0.5, %v6644_v50  ;;  %v4654_v8 = vadd.f32 %v4653_v47, %v4652_v0 }
 0xbad   :  { %6645 = vlog2.f32 %v4969_v56  ;;  %v4973_v61 = vadd.f32 1.0, %v4972_v41  ;;  %v4811_v21 = vmul.f32 1.442695, %v4798_v24  ;;  %v4984_v53 = vand.u32 2147483647, %v6644_v50 }
 0xbae   :  { %6647 = vlog2.f32 %v4978_v27  ;;  %v4662_v12 = vadd.f32 %v4661_v45, %v4660_v55  ;;  %v4982_v14 = vadd.f32 1.0, %v4981_v49  ;;  %v4655_v48 = vrot.slane %v4654_v8, 1 }
 0xbaf   :  { %6649 = vpow2.f32 %v4961_v36  ;;  %v4974_v15 = vmul.f32 %v6642_v29, %v4973_v61  ;;  %vm10862_vm5 = vcmp.lt.f32.partialorder %v4975_v33, 0.0004427343  ;;  %v4963_v19 = vmul.f32 1.442695, %v4950_v31 }
 0xbb0   :  { %6651 = vpow2.f32 %v4801_v11  ;;  %v4663_v17 = vrot.slane %v4662_v12, 1  ;;  %v4564_v25 = vmul.f32 %v4482_v1, %v12181_v35  ;;  %v4983_v52 = vmul.f32 %v6644_v50, %v4982_v14 }
 0xbb1   :  { %v4484_v4 = vpop.f32.mrf.mxu2  ;;  %6653 = vpow2.f32 %v4963_v19  ;;  %vm10872_vm8 = vcmp.lt.f32.partialorder %v4984_v53, 0.0004427343  ;;  %v4535_v55 = vadd.f32 %v4534_v26, %v10793_v39  ;;  %v10877_v32 = vadd.f32 %v4655_v48, %v4654_v8 }
 0xbb2   :  { %v4485_v60 = vadd.f32 %v4484_v4, %v10799_v16  ;;  %v4537_v43 = vpop.f32.mrf.mxu3  ;;  %6655 = vpow2.f32 %v4803_v18  ;;  %v10883_v27 = vmul.f32 0.125, %v4564_v25  ;;  %v10886_v45 = vadd.f32 %v4663_v17, %v4662_v12 }
 0xbb3   :  { %v6646_v62 = vpop.eup %6645  ;;  %v4538_v46 = vadd.f32 %v4537_v43, %v10799_v16  ;;  %v4565_v20 = vmul.f32 %v4535_v55, %v12183_v22  ;;  %v4933_v7 = vmax.f32 %v10845_v30, 0.0  ;;  %v4934_v4 = vmax.f32 %v10851_v5, 0.0 }
 0xbb4   :  { %v4566_v34 = vmul.f32 %v4485_v60, %v12181_v35  ;;  %v6648_v9 = vpop.eup %6647  ;;  %v4971_v54 = vmul.f32 0.6931472, %v6646_v62  ;;  %vm4686_vm12 = vweird.f32 %v10877_v32  ;;  %vm4701_vm1 = vweird.f32 %v10886_v45 }
 0xbb5   :  { %v6650_v6 = vpop.eup %6649  ;;  %v4980_v37 = vmul.f32 0.6931472, %v6648_v9  ;;  %v4567_v47 = vmul.f32 %v4538_v46, %v12183_v22  ;;  %v10904_v43 = vmul.f32 0.125, %v4565_v20 }
 0xbb6   :  { %v10868_v0 = vmul.f32 0.125, %v4566_v34  ;;  %v4977_v44 = vsel %vm10862_vm5, %v4974_v15, %v4971_v54  ;;  %v5005_v29 = vadd.f32 1.0, %v6650_v6  ;;  %v5008_v50 = vmul.f32 -0.5, %v6650_v6  ;;  %v10881_v23 = vpop.eup %6651 }
 0xbb7   :  { %v4986_v16 = vsel %vm10872_vm8, %v4983_v52, %v4980_v37  ;;  %v5041_v2 = vadd.f32 %v4977_v44, %v4929_v40  ;;  %v6654_v49 = vpop.eup %6653  ;;  %v5011_v36 = vand.u32 2147483647, %v6650_v6  ;;  %v10895_v8 = vmul.f32 0.125, %v4567_v47 }
 0xbb8   :  { %6657 = vlog2.f32 %v5005_v29  ;;  %v4609_v39 = vsel %vm4592_vm7, %v10868_v0, -inf  ;;  %v5042_v26 = vadd.f32 %v4986_v16, %v4930_v51  ;;  %v5009_v40 = vadd.f32 1.0, %v5008_v50  ;;  %v10897_v61 = vpop.eup %6655 }
 0xbb9   :  { %v4487_v56 = vpop.f32.mrf.mxu2  ;;  %6659 = vpow2.f32 %v4811_v21  ;;  %v4610_v13 = vmax.f32 %v10883_v27, %v4609_v39  ;;  %v10893_v24 = vadd.f32 0.001, %v5041_v2  ;;  %v5014_v11 = vadd.f32 1.0, %v6654_v49  ;;  %v4393_v21 = vpop.permute.xlu1 %4392 }
 0xbba   :  { %v4540_v41 = vpop.f32.mrf.mxu3  ;;  %6661 = vpow2.f32 %v4809_v57  ;;  %v5017_v33 = vmul.f32 -0.5, %v6654_v49  ;;  %v10902_v1 = vadd.f32 0.001, %v5042_v26  ;;  %v5020_v60 = vand.u32 2147483647, %v6654_v49 }
 0xbbb   :  { %6663 = vrcp.f32 %v10877_v32  ;;  %v4611_v12 = vrot.slane %v4610_v13, 4  ;;  %v5010_v14 = vmul.f32 %v6650_v6, %v5009_v40  ;;  %vm10908_vm10 = vcmp.lt.f32.partialorder %v5011_v36, 0.0004427343 }
 0xbbc   :  { %6665 = vrcp.f32 %v10886_v45  ;;  %v5387_v53 = vrot.slane %v10893_v24, 7  ;;  %v5018_v34 = vadd.f32 1.0, %v5017_v33  ;;  %v4617_v62 = vsel %vm4592_vm7, %v10895_v8, -inf }
 0xbbd   :  { %6667 = vlog2.f32 %v5014_v11  ;;  %v4612_v30 = vmax.f32 %v4610_v13, %v4611_v12  ;;  %v4541_v15 = vadd.f32 %v4540_v41, %v4393_v21  ;;  %v4618_v54 = vmax.f32 %v10904_v43, %v4617_v62 }
 0xbbe   :  { %v6658_v51 = vpop.eup %6657  ;;  %v4488_v25 = vadd.f32 %v4487_v56, %v4393_v21  ;;  %v5388_v46 = vrot.slane %v10902_v1, 7  ;;  %vm10923_vm11 = vcmp.lt.f32.partialorder %v5020_v60, 0.0004427343  ;;  %v5019_v56 = vmul.f32 %v6654_v49, %v5018_v34 }
 0xbbf   :  { %v10906_v18 = vpop.eup %6659  ;;  %v5007_v57 = vmul.f32 0.6931472, %v6658_v51  ;;  %v4613_v17 = vrot.slane %v4612_v30, 2  ;;  %v4619_v29 = vrot.slane %v4618_v54, 4  ;;  %v4569_v55 = vmul.f32 %v4541_v15, %v12183_v22 }
 0xbc0   :  { %v10912_v5 = vpop.eup %6661  ;;  %v4568_v13 = vmul.f32 %v4488_v25, %v12181_v35 }
 0xbc1   :  { %v4490_v63 = vpop.f32.mrf.mxu2  ;;  %v10917_v19 = vpop.eup %6663  ;;  %v5013_v9 = vsel %vm10908_vm10, %v5010_v14, %v5007_v57  ;;  %v4614_v59 = vmax.f32 %v4612_v30, %v4613_v17  ;;  %v4620_v20 = vmax.f32 %v4618_v54, %v4619_v29  ;;  %v10941_v11 = vmul.f32 0.125, %v4569_v55 }
 0xbc2   :  { %v4543_v48 = vpop.f32.mrf.mxu3  ;;  %v5045_v6 = vadd.f32 %v5013_v9, %v4933_v7  ;;  %v10928_v44 = vpop.eup %6665  ;;  %v4491_v16 = vadd.f32 %v4490_v63, %v10806_v10  ;;  %v4682_v41 = vmul.f32 %v10917_v19, %v10877_v32  ;;  %vm4687_vm13 = vweird.f32 %v10917_v19 }
 0xbc3   :  { %v4544_v52 = vadd.f32 %v4543_v48, %v10806_v10  ;;  %v6668_v50 = vpop.eup %6667  ;;  %v4615_v26 = vrot.slane %v4614_v59, 1  ;;  %v4621_v7 = vrot.slane %v4620_v20, 2  ;;  %v10961_v48 = vmul.f32 0.125, %v4568_v13  ;;  %vm10986_vm14 = vmor %vm4686_vm12, %vm4687_vm13 }
 0xbc4   :  { %v10932_v2 = vadd.f32 0.001, %v5045_v6  ;;  %v5016_v39 = vmul.f32 0.6931472, %v6668_v50  ;;  %v4570_v10 = vmul.f32 %v4491_v16, %v12181_v35  ;;  %v4683_v12 = vsub.f32 1.0, %v4682_v41 }
 0xbc5   :  { %v4571_v47 = vmul.f32 %v4544_v52, %v12183_v22  ;;  %v4616_v33 = vmax.f32 %v4614_v59, %v4615_v26  ;;  %v4622_v21 = vmax.f32 %v4620_v20, %v4621_v7  ;;  %v4690_v52 = vand.u32 2147483647, %v10877_v32 }
 0xbc6   :  { %v5391_v40 = vrot.slane %v10932_v2, 7  ;;  %v5022_v49 = vsel %vm10923_vm11, %v5019_v56, %v5016_v39  ;;  %v10954_v14 = vmul.f32 0.125, %v4570_v10  ;;  %v10973_v59 = vsel %vm4592_vm7, %v10906_v18, 0.0 }
 0xbc7   :  { %v10939_v36 = vmul.f32 0.125, %v4571_v47  ;;  %v5046_v60 = vadd.f32 %v5022_v49, %v4934_v4  ;;  %v4627_v31 = vsub.f32 %v10883_v27, %v4616_v33  ;;  %v4631_v30 = vsub.f32 %v10868_v0, %v4616_v33 }
 0xbc8   :  { %v10950_v51 = vsel %vm5342_vm9, %v5387_v53, %v5391_v40  ;;  %v4777_v15 = vsel %vm4592_vm7, %v10954_v14, -inf  ;;  %v4684_v4 = vmul.f32 %v10917_v19, %v4683_v12  ;;  %v4623_v17 = vrot.slane %v4622_v21, 1 }
 0xbc9   :  { %v4785_v57 = vsel %vm4592_vm7, %v10939_v36, -inf  ;;  %v10959_v62 = vadd.f32 0.001, %v5046_v60  ;;  %v4637_v63 = vmul.f32 1.442695, %v4627_v31  ;;  %v4778_v0 = vmax.f32 %v10961_v48, %v4777_v15 }
 0xbca   :  { %v4786_v34 = vmax.f32 %v10941_v11, %v4785_v57  ;;  %v4645_v9 = vmul.f32 1.442695, %v4631_v30  ;;  %v4685_v25 = vadd.f32 %v10917_v19, %v4684_v4  ;;  %v4624_v6 = vmax.f32 %v4622_v21, %v4623_v17 }
 0xbcb   :  { %v5393_v27 = vrot.slane %v10959_v62, 7  ;;  %6669 = vpow2.f32 %v4637_v63  ;;  %v4779_v55 = vrot.slane %v4778_v0, 4  ;;  %v4817_v16 = vsel %vm4592_vm7, %v10912_v5, 0.0 }
 0xbcc   :  { %v4787_v54 = vrot.slane %v4786_v34, 4  ;;  %6671 = vpow2.f32 %v4645_v9  ;;  %v4628_v50 = vsub.f32 %v10904_v43, %v4624_v6  ;;  %v4632_v56 = vsub.f32 %v10895_v8, %v4624_v6 }
 0xbcd   :  { %v10978_v29 = vsel %vm5342_vm9, %v5388_v46, %v5393_v27  ;;  %v4780_v39 = vmax.f32 %v4778_v0, %v4779_v55  ;;  %v4689_v26 = vsel %vm10986_vm14, %v10917_v19, %v4685_v25  ;;  %v4692_v20 = vand.u32 2147483648, %v10877_v32 }
 0xbce   :  { %v4788_v37 = vmax.f32 %v4786_v34, %v4787_v54  ;;  %v4697_v13 = vmul.f32 %v10928_v44, %v10886_v45  ;;  %v4639_v43 = vmul.f32 1.442695, %v4628_v50  ;;  %v4647_v40 = vmul.f32 1.442695, %v4632_v56 }
 0xbcf   :  { %vm4691_vm15 = vcmp.eq.f32.partialorder %v4690_v52, 8.507059e+37  ;;  %v4781_v10 = vrot.slane %v4780_v39, 2  ;;  %v4693_v49 = vor.u32 1.1754944e-38, %v4692_v20  ;;  %vm4702_vm0 = vweird.f32 %v10928_v44 }
 0xbd0   :  { %v4789_v47 = vrot.slane %v4788_v37, 2  ;;  %v4698_v33 = vsub.f32 1.0, %v4697_v13  ;;  %6673 = vpow2.f32 %v4639_v43  ;;  %v4705_v19 = vand.u32 2147483647, %v10886_v45  ;;  %vm4703_vm2 = vmor %vm4701_vm1, %vm4702_vm0 }
 0xbd1   :  { %v10997_v7 = vpop.eup %6669  ;;  %v4707_v32 = vand.u32 2147483648, %v10886_v45  ;;  %6675 = vpow2.f32 %v4647_v40  ;;  %v4782_v57 = vmax.f32 %v4780_v39, %v4781_v10  ;;  %v4694_v31 = vsel %vm4691_vm15, %v4693_v49, %v4689_v26 }
 0xbd2   :  { %v4790_v8 = vmax.f32 %v4788_v37, %v4789_v47  ;;  %v11001_v60 = vpop.eup %6671  ;;  %v4699_v30 = vmul.f32 %v10928_v44, %v4698_v33  ;;  %v4818_v21 = vadd.f32 %v10881_v23, %v4817_v16  ;;  %v4741_v4 = vmul.f32 %v10833_v38, %v4694_v31 }
 0xbd3   :  { %v4665_v34 = vsel %vm4592_vm7, %v11001_v60, 0.0  ;;  %v4783_v9 = vrot.slane %v4782_v57, 1  ;;  %v4708_v25 = vor.u32 1.1754944e-38, %v4707_v32  ;;  %vm4706_vm3 = vcmp.eq.f32.partialorder %v4705_v19, 8.507059e+37 }
 0xbd4   :  { %v4791_v12 = vrot.slane %v4790_v8, 1  ;;  %v4666_v63 = vadd.f32 %v10997_v7, %v4665_v34  ;;  %v4700_v17 = vadd.f32 %v10928_v44, %v4699_v30  ;;  %v4749_v0 = vmul.f32 0.99, %v4741_v4 }
 0xbd5   :  { %v4784_v37 = vmax.f32 %v4782_v57, %v4783_v9  ;;  %v4819_v39 = vrot.slane %v4818_v21, 4  ;;  %v4826_v43 = vadd.f32 %v10897_v61, %v10973_v59  ;;  %v12208_v57 = vlaneseq }
 0xbd6   :  { %v4792_v15 = vmax.f32 %v4790_v8, %v4791_v12  ;;  %v4667_v6 = vrot.slane %v4666_v63, 4  ;;  %v4704_v38 = vsel %vm4703_vm2, %v10928_v44, %v4700_v17  ;;  %v11016_v52 = vpop.eup %6673  ;;  %v4757_v50 = vadd.f32 0.001, %v4749_v0 }
 0xbd7   :  { %v4709_v45 = vsel %vm4706_vm3, %v4708_v25, %v4704_v38  ;;  %v11018_v56 = vpop.eup %6675  ;;  %v4799_v47 = vsub.f32 %v10954_v14, %v4784_v37  ;;  %v4820_v49 = vadd.f32 %v4819_v39, %v4818_v21  ;;  %v5058_v59 = vshrl.u32 %v12208_v57, 7 }
 0xbd8   :  { %v4796_v54 = vsub.f32 %v10941_v11, %v4792_v15  ;;  %v4800_v27 = vsub.f32 %v10939_v36, %v4792_v15  ;;  %v4668_v11 = vadd.f32 %v4667_v6, %v4666_v63  ;;  %v4795_v36 = vsub.f32 %v10961_v48, %v4784_v37  ;;  %6200 = vmatpush.msk.msra.mxu0 %vm4592_vm7, %v4757_v50 }
 0xbd9   :  { %v4742_v41 = vmul.f32 %v10839_v3, %v4709_v45  ;;  %v4673_v44 = vsel %vm4592_vm7, %v11018_v56, 0.0  ;;  %v4813_v48 = vmul.f32 1.442695, %v4799_v47  ;;  %v4695_v3 = vmul.f32 %v10831_v28, %v4694_v31 }
 0xbda   :  { %v4807_v55 = vmul.f32 1.442695, %v4796_v54  ;;  %v4815_v16 = vmul.f32 1.442695, %v4800_v27  ;;  %v4669_v26 = vrot.slane %v4668_v11, 2  ;;  %v4674_v20 = vadd.f32 %v11016_v52, %v4673_v44 }
 0xbdb   :  { %v4805_v13 = vmul.f32 1.442695, %v4795_v36  ;;  %v4750_v40 = vmul.f32 0.99, %v4742_v41  ;;  %v4745_v19 = vmul.f32 0.99, %v4695_v3  ;;  %v4710_v32 = vmul.f32 %v10835_v42, %v4709_v45 }
 0xbdc   :  { %6677 = vpow2.f32 %v4815_v16  ;;  %v4670_v14 = vadd.f32 %v4669_v26, %v4668_v11  ;;  %v4675_v8 = vrot.slane %v4674_v20, 4  ;;  %v4827_v34 = vrot.slane %v4826_v43, 4 }
 0xbdd   :  { %6679 = vpow2.f32 %v4807_v55  ;;  %v4758_v10 = vadd.f32 0.001, %v4750_v40  ;;  %v4753_v4 = vadd.f32 0.001, %v4745_v19  ;;  %v4746_v31 = vmul.f32 0.99, %v4710_v32 }
 0xbde   :  { %6681 = vpow2.f32 %v4805_v13  ;;  %v4671_v33 = vrot.slane %v4670_v14, 1  ;;  %v4676_v12 = vadd.f32 %v4675_v8, %v4674_v20  ;;  %vm5060_vm4 = vcmp.lt.s32.totalorder %v7334_v58, %v5058_v59 }
 0xbdf   :  { %6683 = vpow2.f32 %v4813_v48  ;;  %6203 = vmatpush.msk.msra.mxu1 %vm4592_vm7, %v4758_v10  ;;  %v4821_v9 = vrot.slane %v4820_v49, 2  ;;  %5100 = vmatpush.msra.mxu0 %v4753_v4  ;;  %v4754_v27 = vadd.f32 0.001, %v4746_v31  ;;  %v12209_v0 = vmov 0.0  }
 0xbe0   :  { %v4677_v15 = vrot.slane %v4676_v12, 2  ;;  %v4672_v28 = vadd.f32 %v4671_v33, %v4670_v14  ;;  %v11045_v25 = vsel %vm5060_vm4, 1.0, %v12209_v0  ;;  %v4828_v38 = vadd.f32 %v4827_v34, %v4826_v43 }
 0xbe1   :  { %6201 = vmatmul.msk.f32.vlgmr.msra.gmra.mxu0 %vm5066_vm6, %v11045_v25  ;;  %5123 = vmatpush.msra.mxu1 %v4754_v27  ;;  %v4822_v50 = vadd.f32 %v4821_v9, %v4820_v49  ;;  %v11055_v39 = vadd.s32 8, %v5058_v59 }
 0xbe2   :  { %v11033_v30 = vpop.eup %6677  ;;  %v4678_v17 = vadd.f32 %v4677_v15, %v4676_v12  ;;  %6685 = vrcp.f32 %v4672_v28  ;;  %6204 = vmatmul.msk.f32.vlgmr.msra.gmra.mxu1 %vm5066_vm6, %v11045_v25  ;;  %v4829_v36 = vrot.slane %v4828_v38, 2  ;;  %v4722_v12 = vand.u32 2147483648, %v4672_v28 }
 0xbe3   :  { %v11035_v63 = vpop.eup %6679  ;;  %v4841_v42 = vsel %vm4592_vm7, %v11033_v30, 0.0  ;;  %v4823_v41 = vrot.slane %v4822_v50, 1  ;;  %vm5061_vm5 = vcmp.lt.s32.totalorder %v7334_v58, %v11055_v39  ;;  %v4720_v32 = vand.u32 2147483647, %v4672_v28 }
 0xbe4   :  { %v11038_v21 = vpop.eup %6681  ;;  %v4679_v6 = vrot.slane %v4678_v17, 1  ;;  %v4842_v55 = vadd.f32 %v11035_v63, %v4841_v42  ;;  %v4830_v20 = vadd.f32 %v4829_v36, %v4828_v38  ;;  %v11062_v48 = vsel %vm5061_vm5, 1.0, %v12209_v0 }
 0xbe5   :  { %v11042_v54 = vpop.eup %6683  ;;  %v11059_v43 = vadd.f32 %v4823_v41, %v4822_v50  ;;  %vm4716_vm10 = vweird.f32 %v4672_v28  ;;  %v4723_v31 = vor.u32 1.1754944e-38, %v4722_v12  ;;  %vm4721_vm12 = vcmp.eq.f32.partialorder %v4720_v32, 8.507059e+37 }
 0xbe6   :  { %v4833_v37 = vsel %vm4592_vm7, %v11042_v54, 0.0  ;;  %v4680_v45 = vadd.f32 %v4679_v6, %v4678_v17  ;;  %v4843_v47 = vrot.slane %v4842_v55, 4  ;;  %v4831_v10 = vrot.slane %v4830_v20, 1 }
 0xbe7   :  { %v4834_v16 = vadd.f32 %v11038_v21, %v4833_v37  ;;  %vm4854_vm2 = vweird.f32 %v11059_v43  ;;  %v4860_v12 = vand.u32 2147483648, %v11059_v43 }
 0xbe8   :  { %v6686_v44 = vpop.eup %6685  ;;  %6687 = vrcp.f32 %v4680_v45  ;;  %v4844_v13 = vadd.f32 %v4843_v47, %v4842_v55  ;;  %v11069_v34 = vadd.f32 %v4831_v10, %v4830_v20  ;;  %v4735_v55 = vand.u32 2147483647, %v4680_v45 }
 0xbe9   :  { %v4835_v11 = vrot.slane %v4834_v16, 4  ;;  %v4712_v40 = vmul.f32 %v6686_v44, %v4672_v28  ;;  %6202 = vmatmul.msk.f32.gmra.mxu0 %vm5066_vm6, %v11062_v48  ;;  %6689 = vrcp.f32 %v11059_v43  ;;  %vm4717_vm8 = vweird.f32 %v6686_v44 }
 0xbea   :  { %6205 = vmatmul.msk.f32.gmra.mxu1 %vm5066_vm6, %v11062_v48  ;;  %v4845_v49 = vrot.slane %v4844_v13, 2  ;;  %vm4718_vm11 = vmor %vm4716_vm10, %vm4717_vm8  ;;  %6691 = vrcp.f32 %v11069_v34  ;;  %vm4731_vm14 = vweird.f32 %v4680_v45  ;;  %vm4736_vm0 = vcmp.eq.f32.partialorder %v4735_v55, 8.507059e+37 }
 0xbeb   :  { %v4836_v26 = vadd.f32 %v4835_v11, %v4834_v16  ;;  %v4713_v8 = vsub.f32 1.0, %v4712_v40  ;;  %v4737_v16 = vand.u32 2147483648, %v4680_v45  ;;  %v4861_v32 = vor.u32 1.1754944e-38, %v4860_v12 }
 0xbec   :  { %v4846_v15 = vadd.f32 %v4845_v49, %v4844_v13  ;;  %vm4869_vm8 = vweird.f32 %v11069_v34 }
 0xbed   :  { %v4837_v14 = vrot.slane %v4836_v26, 2  ;;  %v4714_v58 = vmul.f32 %v6686_v44, %v4713_v8 }
 0xbee   :  { %v6688_v3 = vpop.eup %6687  ;;  %v4847_v27 = vrot.slane %v4846_v15, 1 }
 0xbef   :  { %v4838_v33 = vadd.f32 %v4837_v14, %v4836_v26  ;;  %v4715_v19 = vadd.f32 %v6686_v44, %v4714_v58  ;;  %v4727_v59 = vmul.f32 %v6688_v3, %v4680_v45  ;;  %v6690_v9 = vpop.eup %6689  ;;  %vm4732_vm13 = vweird.f32 %v6688_v3 }
 0xbf0   :  { %v4850_v11 = vmul.f32 %v6690_v9, %v11059_v43  ;;  %v11077_v41 = vadd.f32 %v4847_v27, %v4846_v15  ;;  %vm4733_vm15 = vmor %vm4731_vm14, %vm4732_vm13  ;;  %v6692_v40 = vpop.eup %6691  ;;  %vm4855_vm1 = vweird.f32 %v6690_v9 }
 0xbf1   :  { %v4839_v4 = vrot.slane %v4838_v33, 1  ;;  %v4719_v17 = vsel %vm4718_vm11, %v6686_v44, %v4715_v19  ;;  %v4728_v42 = vsub.f32 1.0, %v4727_v59  ;;  %v4738_v44 = vor.u32 1.1754944e-38, %v4737_v16  ;;  %vm4856_vm3 = vmor %vm4854_vm2, %vm4855_vm1 }
 0xbf2   :  { %v4724_v6 = vsel %vm4721_vm12, %v4723_v31, %v4719_v17  ;;  %v4851_v20 = vsub.f32 1.0, %v4850_v11  ;;  %v4865_v19 = vmul.f32 %v6692_v40, %v11069_v34  ;;  %v4873_v17 = vand.u32 2147483647, %v11069_v34 }
 0xbf3   :  { %v4743_v37 = vmul.f32 %v11001_v60, %v4724_v6  ;;  %v4729_v38 = vmul.f32 %v6688_v3, %v4728_v42  ;;  %v11073_v50 = vadd.f32 %v4839_v4, %v4838_v33  ;;  %v4725_v28 = vmul.f32 %v10997_v7, %v4724_v6 }
 0xbf4   :  { %v4852_v8 = vmul.f32 %v6690_v9, %v4851_v20  ;;  %v4866_v15 = vsub.f32 1.0, %v4865_v19  ;;  %vm4870_vm5 = vweird.f32 %v6692_v40  ;;  %v4875_v6 = vand.u32 2147483648, %v11069_v34 }
 0xbf5   :  { %v4751_v36 = vmul.f32 0.99, %v4743_v37  ;;  %v4730_v47 = vadd.f32 %v6688_v3, %v4729_v38  ;;  %v4747_v26 = vmul.f32 0.99, %v4725_v28  ;;  %6693 = vrcp.f32 %v11073_v50  ;;  %vm4871_vm11 = vmor %vm4869_vm8, %vm4870_vm5 }
 0xbf6   :  { %6695 = vrcp.f32 %v11077_v41  ;;  %v4853_v49 = vadd.f32 %v6690_v9, %v4852_v8  ;;  %v4867_v27 = vmul.f32 %v6692_v40, %v4866_v15  ;;  %vm4874_vm10 = vcmp.eq.f32.partialorder %v4873_v17, 8.507059e+37 }
 0xbf7   :  { %v4759_v13 = vadd.f32 0.001, %v4751_v36  ;;  %v4734_v60 = vsel %vm4733_vm15, %v6688_v3, %v4730_v47  ;;  %v4755_v10 = vadd.f32 0.001, %v4747_v26  ;;  %v4858_v3 = vand.u32 2147483647, %v11059_v43 }
 0xbf8   :  { %v4739_v14 = vsel %vm4736_vm0, %v4738_v44, %v4734_v60  ;;  %v4868_v55 = vadd.f32 %v6692_v40, %v4867_v27  ;;  %v4876_v16 = vor.u32 1.1754944e-38, %v4875_v6  ;;  %v4890_v11 = vand.u32 2147483648, %v11073_v50  ;;  %v4493_v6 = vpop.f32.mrf.mxu2 }
 0xbf9   :  { %6206 = vmatpush.msk.msrb.mxu0 %vm4592_vm7, %v4759_v13  ;;  %v4744_v7 = vmul.f32 %v11018_v56, %v4739_v14  ;;  %v4740_v45 = vmul.f32 %v11016_v52, %v4739_v14  ;;  %v4857_v52 = vsel %vm4856_vm3, %v6690_v9, %v4853_v49  ;;  %vm4859_vm4 = vcmp.eq.f32.partialorder %v4858_v3, 8.507059e+37 }
 0xbfa   :  { %v4862_v31 = vsel %vm4859_vm4, %v4861_v32, %v4857_v52  ;;  %v4872_v47 = vsel %vm4871_vm11, %v6692_v40, %v4868_v55  ;;  %vm4884_vm12 = vweird.f32 %v11073_v50  ;;  %v4888_v34 = vand.u32 2147483647, %v11073_v50 }
 0xbfb   :  { %v4752_v58 = vmul.f32 0.99, %v4744_v7  ;;  %5146 = vmatpush.msrb.mxu0 %v4755_v10  ;;  %v4748_v33 = vmul.f32 0.99, %v4740_v45  ;;  %v6694_v59 = vpop.eup %6693  ;;  %v4909_v43 = vmul.f32 %v10912_v5, %v4862_v31  ;;  %v4863_v9 = vmul.f32 %v10881_v23, %v4862_v31 }
 0xbfc   :  { %6207 = vmatmul.msk.f32.vlgmr.msrb.gmra.mxu0 %vm5066_vm6, %v11045_v25  ;;  %v6696_v42 = vpop.eup %6695  ;;  %v4880_v37 = vmul.f32 %v6694_v59, %v11073_v50  ;;  %v4877_v44 = vsel %vm4874_vm10, %v4876_v16, %v4872_v47  ;;  %vm4885_vm13 = vweird.f32 %v6694_v59  ;;  %v4891_v8 = vor.u32 1.1754944e-38, %v4890_v11 }
 0xbfd   :  { %v4760_v56 = vadd.f32 0.001, %v4752_v58  ;;  %v4756_v4 = vadd.f32 0.001, %v4748_v33  ;;  %v4917_v38 = vmul.f32 0.99, %v4909_v43  ;;  %v4895_v23 = vmul.f32 %v6696_v42, %v11077_v41  ;;  %vm4886_vm15 = vmor %vm4884_vm12, %vm4885_vm13 }
 0xbfe   :  { %v4913_v5 = vmul.f32 0.99, %v4863_v9  ;;  %v4881_v28 = vsub.f32 1.0, %v4880_v37  ;;  %v4910_v20 = vmul.f32 %v10906_v18, %v4877_v44  ;;  %v4878_v60 = vmul.f32 %v10897_v61, %v4877_v44 }
 0xbff   :  { %6209 = vmatpush.msk.msrb.mxu1 %vm4592_vm7, %v4760_v56  ;;  %v4925_v36 = vadd.f32 0.001, %v4917_v38  ;;  %v4896_v40 = vsub.f32 1.0, %v4895_v23  ;;  %vm4900_vm14 = vweird.f32 %v6696_v42  ;;  %v4905_v7 = vand.u32 2147483648, %v11077_v41 }
 0xc00   :  { %v4882_v26 = vmul.f32 %v6694_v59, %v4881_v28  ;;  %v4921_v13 = vadd.f32 0.001, %v4913_v5  ;;  %v4918_v10 = vmul.f32 0.99, %v4910_v20  ;;  %v4914_v45 = vmul.f32 0.99, %v4878_v60  ;;  %v4496_v5 = vpop.f32.mrf.mxu2  ;;  %v4408_v28 = vpop.permute.xlu2 %4407 }
 0xc01   :  { %5169 = vmatpush.msrb.mxu1 %v4756_v4  ;;  %6212 = vmatpush.msk.msra.mxu0 %vm4592_vm7, %v4925_v36  ;;  %v4897_v49 = vmul.f32 %v6696_v42, %v4896_v40  ;;  %v4903_v3 = vand.u32 2147483647, %v11077_v41  ;;  %vm4889_vm0 = vcmp.eq.f32.partialorder %v4888_v34, 8.507059e+37  ;;  %vm4899_vm1 = vweird.f32 %v11077_v41 }
 0xc02   :  { %6210 = vmatmul.msk.f32.vlgmr.msrb.gmra.mxu1 %vm5066_vm6, %v11045_v25  ;;  %v4883_v14 = vadd.f32 %v6694_v59, %v4882_v26  ;;  %v4926_v18 = vadd.f32 0.001, %v4918_v10  ;;  %vm4901_vm2 = vmor %vm4899_vm1, %vm4900_vm14  ;;  %v4906_v19 = vor.u32 1.1754944e-38, %v4905_v7  ;;  %v4922_v52 = vadd.f32 0.001, %v4914_v45 }
 0xc03   :  { %5220 = vmatpush.msra.mxu0 %v4921_v13  ;;  %v4898_v33 = vadd.f32 %v6696_v42, %v4897_v49  ;;  %vm4904_vm3 = vcmp.eq.f32.partialorder %v4903_v3, 8.507059e+37  ;;  %vm5445_vm4 = vcmp.eq.s32.totalorder %v11055_v39, 9 }
 0xc04   :  { %6208 = vmatmul.msk.f32.gmra.mxu0 %vm5066_vm6, %v11062_v48  ;;  %v4887_v58 = vsel %vm4886_vm15, %v6694_v59, %v4883_v14  ;;  %6215 = vmatpush.msk.msra.mxu1 %vm4592_vm7, %v4926_v18  ;;  %v11159_v14 = vld [vmem:[%s11932_s0] sm:$0xcc] }
 0xc05   :  { %v4892_v61 = vsel %vm4889_vm0, %v4891_v8, %v4887_v58  ;;  %v4902_v56 = vsel %vm4901_vm2, %v6696_v42, %v4898_v33  ;;  %v11164_v49 = vperm.slane %v11159_v14, 2  ;;  %v11169_v18 = vperm.slane %v11159_v14, 6 }
 0xc06   :  { %v4911_v12 = vmul.f32 %v11042_v54, %v4892_v61  ;;  %v4893_v50 = vmul.f32 %v11038_v21, %v4892_v61  ;;  %v4907_v59 = vsel %vm4904_vm3, %v4906_v19, %v4902_v56  ;;  %5243 = vmatpush.msra.mxu1 %v4922_v52  ;;  %v11182_v52 = vsel %vm5342_vm9, 1.0, %v5388_v46 }
 0xc07   :  { %v4912_v41 = vmul.f32 %v11033_v30, %v4907_v59  ;;  %v4908_v54 = vmul.f32 %v11035_v63, %v4907_v59  ;;  %v4546_v30 = vpop.f32.mrf.mxu3  ;;  %v4403_v63 = vpop.permute.xlu1 %4402  ;;  %v6224_v19 = vclamps-f32 %v11164_v49, 5.0 }
 0xc08   :  { %v4919_v32 = vmul.f32 0.99, %v4911_v12  ;;  %v4915_v15 = vmul.f32 0.99, %v4893_v50  ;;  %v4547_v27 = vadd.f32 %v4546_v30, %v4403_v63  ;;  %v4494_v37 = vadd.f32 %v4493_v6, %v4403_v63 }
 0xc09   :  { %v4920_v31 = vmul.f32 0.99, %v4912_v41  ;;  %v4916_v17 = vmul.f32 0.99, %v4908_v54  ;;  %v11177_v50 = vsel %vm5342_vm9, 1.0, %v5387_v53  ;;  %v6225_v41 = vclamps-f32 %v11169_v18, 5.0 }
 0xc0a   :  { %6211 = vmatmul.msk.f32.gmra.mxu1 %vm5066_vm6, %v11062_v48  ;;  %v4927_v4 = vadd.f32 0.001, %v4919_v32  ;;  %v4923_v21 = vadd.f32 0.001, %v4915_v15  ;;  %v11140_v9 = vmul.f32 %v4547_v27, %v12183_v22  ;;  %v11144_v55 = vmul.f32 %v4494_v37, %v12181_v35 }
 0xc0b   :  { %v4928_v43 = vadd.f32 0.001, %v4920_v31  ;;  %v4924_v42 = vadd.f32 0.001, %v4916_v17  ;;  %v5411_v31 = vsel %vm5342_vm9, %v10932_v2, 1.0  ;;  %v11200_v30 = vsel %vm5342_vm9, %v10959_v62, 1.0 }
 0xc0c   :  { %6213 = vmatmul.msk.f32.vlgmr.msra.gmra.mxu0 %vm5066_vm6, %v11045_v25  ;;  %v4940_v38 = vand.u32 2147483647, %v11140_v9  ;;  %v4939_v16 = vand.u32 2147483647, %v11144_v55  ;;  %v5447_v6 = vperm.slane %v6225_v41, 2 }
 0xc0d   :  { %6218 = vmatpush.msk.msrb.mxu0 %vm4592_vm7, %v4927_v4  ;;  %6221 = vmatpush.msk.msrb.mxu1 %vm4592_vm7, %v4928_v43 }
 0xc0e   :  { %v4947_v36 = vsub.f32 0.0, %v4939_v16 }
 0xc0f   :  { %5266 = vmatpush.msrb.mxu0 %v4923_v21  ;;  %5289 = vmatpush.msrb.mxu1 %v4924_v42  ;;  %v4549_v47 = vpop.f32.mrf.mxu3  ;;  %v5446_v21 = vperm.slane %v6224_v19, 2 }
 0xc10   :  { %v4550_v44 = vadd.f32 %v4549_v47, %v4408_v28  ;;  %v4957_v26 = vmul.f32 1.442695, %v4947_v36 }
 0xc12   :  { %6216 = vmatmul.msk.f32.vlgmr.msra.gmra.mxu1 %vm5066_vm6, %v11045_v25  ;;  %v11152_v20 = vmul.f32 %v4550_v44, %v12183_v22 }
 0xc14   :  { %6214 = vmatmul.msk.f32.gmra.mxu0 %vm5066_vm6, %v11062_v48  ;;  %v4944_v7 = vand.u32 2147483647, %v11152_v20 }
 0xc16   :  { %v4952_v33 = vsub.f32 0.0, %v4944_v7 }
 0xc18   :  { %v4967_v17 = vmul.f32 1.442695, %v4952_v33 }
 0xc1a   :  { %6217 = vmatmul.msk.f32.gmra.mxu1 %vm5066_vm6, %v11062_v48 }
 0xc1c   :  { %6219 = vmatmul.msk.f32.vlgmr.msrb.gmra.mxu0 %vm5066_vm6, %v11045_v25 }
 0xc22   :  { %6222 = vmatmul.msk.f32.vlgmr.msrb.gmra.mxu1 %vm5066_vm6, %v11045_v25  ;;  %v4948_v25 = vsub.f32 0.0, %v4940_v38 }
 0xc24   :  { %6220 = vmatmul.msk.f32.gmra.mxu0 %vm5066_vm6, %v11062_v48  ;;  %v4959_v11 = vmul.f32 1.442695, %v4948_v25 }
 0xc26   :  { %6697 = vpow2.f32 %v4959_v11 }
 0xc27   :  { %6699 = vpow2.f32 %v4957_v26 }
 0xc2a   :  { %6223 = vmatmul.msk.f32.gmra.mxu1 %vm5066_vm6, %v11062_v48  ;;  %v4497_v48 = vadd.f32 %v4496_v5, %v4408_v28  ;;  %vm5321_vm6 = vcmask 1046528  }
 0xc2c   :  { %v11148_v23 = vmul.f32 %v4497_v48, %v12181_v35  ;;  %v11154_v40 = vpop.eup %6697 }
 0xc2d   :  { %v4996_v10 = vadd.f32 1.0, %v11154_v40  ;;  %v11166_v3 = vpop.eup %6699  ;;  %v4999_v53 = vmul.f32 -0.5, %v11154_v40  ;;  %v5002_v16 = vand.u32 2147483647, %v11154_v40 }
 0xc2e   :  { %v4943_v34 = vand.u32 2147483647, %v11148_v23  ;;  %v4987_v56 = vadd.f32 1.0, %v11166_v3  ;;  %v4990_v2 = vmul.f32 -0.5, %v11166_v3  ;;  %v4993_v47 = vand.u32 2147483647, %v11166_v3 }
 0xc2f   :  { %6701 = vlog2.f32 %v4996_v10  ;;  %v5000_v25 = vadd.f32 1.0, %v4999_v53  ;;  %vm11235_vm15 = vcmp.lt.f32.partialorder %v5002_v16, 0.0004427343  ;;  %v4936_v10 = vmax.f32 %v11152_v20, 0.0 }
 0xc30   :  { %v4951_v8 = vsub.f32 0.0, %v4943_v34  ;;  %v4991_v36 = vadd.f32 1.0, %v4990_v2  ;;  %v4932_v34 = vmax.f32 %v11140_v9, 0.0 }
 0xc32   :  { %v4965_v61 = vmul.f32 1.442695, %v4951_v8  ;;  %v4935_v8 = vmax.f32 %v11148_v23, 0.0 }
 0xc34   :  { %6703 = vpow2.f32 %v4965_v61  ;;  %v4992_v61 = vmul.f32 %v11166_v3, %v4991_v36 }
 0xc35   :  { %6705 = vlog2.f32 %v4987_v56  ;;  %v6702_v63 = vpop.eup %6701 }
 0xc36   :  { %6707 = vpow2.f32 %v4967_v17  ;;  %v4998_v48 = vmul.f32 0.6931472, %v6702_v63 }
 0xc3a   :  { %v11218_v11 = vpop.eup %6703 }
 0xc3b   :  { %v6706_v26 = vpop.eup %6705  ;;  %v5026_v63 = vmul.f32 -0.5, %v11218_v11 }
 0xc5e   :  { %v5102_v13 = vpop.f32.mrf.mxu0 }
 0xc5f   :  { %v5125_v60 = vpop.f32.mrf.mxu1  ;;  %v5177_v45 = vmul.f32 10.0, %v5102_v13  ;;  %v5001_v13 = vmul.f32 %v11154_v40, %v5000_v25  ;;  %v11246_v40 = vpop.eup %6707 }
 0xc60   :  { %v5178_v58 = vmul.f32 10.0, %v5125_v60  ;;  %v4931_v60 = vmax.f32 %v11144_v55, 0.0  ;;  %v5032_v17 = vadd.f32 1.0, %v11246_v40 }
 0xc61   :  { %v11171_v12 = vadd.f32 -5.0, %v5177_v45  ;;  %v5004_v45 = vsel %vm11235_vm15, %v5001_v13, %v4998_v48 }
 0xc62   :  { %v11185_v15 = vadd.f32 -5.0, %v5178_v58  ;;  %v5044_v3 = vadd.f32 %v5004_v45, %v4932_v34 }
 0xc63   :  { %v5322_v46 = vrot.slane %v11171_v12, 1  ;;  %vm5450_vm5 = vcmp.ge.f32.partialorder %v5446_v21, %v11171_v12 }
 0xc64   :  { %v5325_v27 = vrot.slane %v11185_v15, 1  ;;  %vm5451_vm2 = vcmp.ge.f32.partialorder %v5447_v6, %v11185_v15 }
 0xc66   :  { %v5105_v32 = vpop.f32.mrf.mxu0 }
 0xc67   :  { %v5128_v59 = vpop.f32.mrf.mxu1  ;;  %v5181_v54 = vmul.f32 10.0, %v5105_v32 }
 0xc68   :  { %v5182_v4 = vmul.f32 10.0, %v5128_v59  ;;  %v4989_v59 = vmul.f32 0.6931472, %v6706_v26 }
 0xc69   :  { %v11194_v43 = vadd.f32 -5.0, %v5181_v54  ;;  %v5023_v54 = vadd.f32 1.0, %v11218_v11 }
 0xc6a   :  { %v11196_v42 = vadd.f32 -5.0, %v5182_v4 }
 0xc6b   :  { %v5323_v37 = vrot.slane %v11194_v43, 1  ;;  %vm5454_vm8 = vcmp.ge.f32.partialorder %v5446_v21, %v11194_v43  ;;  %6709 = vlog2.f32 %v5023_v54 }
 0xc6c   :  { %v5326_v38 = vrot.slane %v11196_v42, 1  ;;  %vm5455_vm1 = vcmp.ge.f32.partialorder %v5447_v6, %v11196_v42  ;;  %6711 = vlog2.f32 %v5032_v17  ;;  %v11324_v17 = vadd.f32 0.001, %v5044_v3 }
 0xc6d   :  { %v11212_v62 = vsel %vm5321_vm6, %v5322_v46, %v5323_v37  ;;  %v5343_v5 = vsel %vm5342_vm9, %v5323_v37, 5.0 }
 0xc6e   :  { %v11216_v28 = vsel %vm5342_vm9, %v5326_v38, 5.0  ;;  %vm5458_vm10 = vcmp.lt.f32.partialorder %v5446_v21, %v11212_v62  ;;  %vm5462_vm11 = vcmp.lt.f32.partialorder %v5446_v21, %v5343_v5  ;;  %v11226_v44 = vsel %vm5321_vm6, %v5325_v27, %v5326_v38 }
 0xc6f   :  { %vm5474_vm12 = vmor %vm5462_vm11, %vm5445_vm4  ;;  %vm5463_vm13 = vcmp.lt.f32.partialorder %v5447_v6, %v11216_v28  ;;  %vm5459_vm3 = vcmp.lt.f32.partialorder %v5447_v6, %v11226_v44  ;;  %v5546_v56 = vsub.f32 %v5343_v5, %v11194_v43  ;;  %v5029_v38 = vand.u32 2147483647, %v11218_v11 }
 0xc70   :  { %vm5478_vm14 = vmand %vm5450_vm5, %vm5458_vm10  ;;  %v5543_v33 = vsub.f32 %v11226_v44, %v11185_v15  ;;  %v5027_v44 = vadd.f32 1.0, %v5026_v63 }
 0xc71   :  { %vm5482_vm0 = vmand %vm5454_vm8, %vm5474_vm12  ;;  %v11243_v9 = vsel %vm5478_vm14, 1.0, %v12209_v0  ;;  %vm11260_vm8 = vcmp.lt.f32.partialorder %v4993_v47, 0.0004427343  ;;  %v5547_v47 = vsub.f32 %v11216_v28, %v11196_v42  ;;  %vm11331_vm12 = vcmp.lt.f32.partialorder %v5029_v38, 0.0004427343 }
 0xc72   :  { %v11252_v58 = vsel %vm5482_vm0, 1.0, %v12209_v0  ;;  %vm5475_vm5 = vmor %vm5463_vm13, %vm5445_vm4  ;;  %v5678_v4 = vmul.f32 %v11243_v9, %v11177_v50  ;;  %v5718_v21 = vmul.f32 %v11243_v9, %v10893_v24  ;;  %v4995_v6 = vsel %vm11260_vm8, %v4992_v61, %v4989_v59 }
 0xc73   :  { %v5682_v32 = vmul.f32 %v11252_v58, %v10950_v51  ;;  %v5722_v53 = vmul.f32 %v11252_v58, %v5411_v31  ;;  %vm5483_vm10 = vmand %vm5455_vm1, %vm5475_vm5  ;;  %v5542_v51 = vsub.f32 %v11212_v62, %v11171_v12  ;;  %v5506_v27 = vmul.f32 %v11252_v58, %v11194_v43 }
 0xc74   :  { %vm5479_vm11 = vmand %vm5451_vm2, %vm5459_vm3  ;;  %v11285_v2 = vsel %vm5483_vm10, 1.0, %v12209_v0  ;;  %v5554_v24 = vmul.f32 %v11252_v58, %v5546_v56  ;;  %v5502_v48 = vmul.f32 %v11243_v9, %v11171_v12 }
 0xc75   :  { %v5686_v46 = vsel %vm4592_vm7, %v5682_v32, 0.0  ;;  %v5726_v31 = vsel %vm4592_vm7, %v5722_v53, 0.0  ;;  %v11295_v25 = vsel %vm5479_vm11, 1.0, %v12209_v0  ;;  %v5507_v5 = vmul.f32 %v11285_v2, %v11196_v42 }
 0xc76   :  { %v5687_v50 = vadd.f32 %v5686_v46, %v5678_v4  ;;  %v5727_v37 = vadd.f32 %v5726_v31, %v5718_v21  ;;  %v5683_v43 = vmul.f32 %v11285_v2, %v10978_v29  ;;  %v5550_v36 = vmul.f32 %v11243_v9, %v5542_v51 }
 0xc77   :  { %v5510_v34 = vsel %vm4592_vm7, %v5506_v27, 0.0  ;;  %v5558_v13 = vsel %vm4592_vm7, %v5554_v24, 0.0  ;;  %v5679_v7 = vmul.f32 %v11295_v25, %v11182_v52  ;;  %v5035_v29 = vmul.f32 -0.5, %v11246_v40  ;;  %v6710_v52 = vpop.eup %6709 }
 0xc78   :  { %v5688_v16 = vrot.slane %v5687_v50, 4  ;;  %v5728_v62 = vrot.slane %v5727_v37, 4  ;;  %v5694_v45 = vsel %vm4592_vm7, %v5683_v43, 0.0  ;;  %v5503_v12 = vmul.f32 %v11295_v25, %v11185_v15  ;;  %v6712_v21 = vpop.eup %6711 }
 0xc79   :  { %v5148_v26 = vpop.f32.mrf.mxu0  ;;  %v5518_v28 = vsel %vm4592_vm7, %v5507_v5, 0.0  ;;  %v11317_v56 = vadd.f32 %v5694_v45, %v5679_v7  ;;  %v5723_v32 = vmul.f32 %v11285_v2, %v11200_v30  ;;  %v5511_v59 = vadd.f32 %v5510_v34, %v5502_v48 }
 0xc7a   :  { %v5729_v61 = vadd.f32 %v5728_v62, %v5727_v37  ;;  %v5689_v42 = vadd.f32 %v5688_v16, %v5687_v50  ;;  %v5559_v54 = vadd.f32 %v5558_v13, %v5550_v36  ;;  %v5555_v4 = vmul.f32 %v11285_v2, %v5547_v47 }
 0xc7b   :  { %v5719_v53 = vmul.f32 %v11295_v25, %v10902_v1  ;;  %v5043_v15 = vadd.f32 %v4995_v6, %v4931_v60  ;;  %v5734_v46 = vsel %vm4592_vm7, %v5723_v32, 0.0  ;;  %v5036_v51 = vadd.f32 1.0, %v5035_v29 }
 0xc7c   :  { %v5730_v50 = vrot.slane %v5729_v61, 2  ;;  %v5519_v30 = vadd.f32 %v5518_v28, %v5503_v12  ;;  %v5025_v24 = vmul.f32 0.6931472, %v6710_v52  ;;  %v5690_v1 = vrot.slane %v5689_v42, 2 }
 0xc7d   :  { %v11329_v31 = vadd.f32 %v5734_v46, %v5719_v53  ;;  %v5551_v3 = vmul.f32 %v11295_v25, %v5543_v33  ;;  %v5512_v55 = vrot.slane %v5511_v59, 4  ;;  %v5560_v60 = vrot.slane %v5559_v54, 4 }
 0xc7e   :  { %v5566_v63 = vsel %vm4592_vm7, %v5555_v4, 0.0  ;;  %v11338_v6 = vperm.slane %v11159_v14, 3  ;;  %v11340_v16 = vadd.f32 0.001, %v5043_v15  ;;  %v5028_v62 = vmul.f32 %v11218_v11, %v5027_v44 }
 0xc7f   :  { %v5171_v27 = vpop.f32.mrf.mxu1  ;;  %v5038_v5 = vand.u32 2147483647, %v11246_v40  ;;  %v5179_v38 = vmul.f32 10.0, %v5148_v26  ;;  %v5034_v48 = vmul.f32 0.6931472, %v6712_v21  ;;  %v5037_v36 = vmul.f32 %v11246_v40, %v5036_v51 }
 0xc80   :  { %v5731_v47 = vadd.f32 %v5730_v50, %v5729_v61  ;;  %v5520_v34 = vrot.slane %v5519_v30, 4  ;;  %v5031_v13 = vsel %vm11331_vm12, %v5028_v62, %v5025_v24  ;;  %v5691_v7 = vadd.f32 %v5690_v1, %v5689_v42 }
 0xc81   :  { %v5151_v43 = vpop.f32.mrf.mxu0  ;;  %v5567_v45 = vadd.f32 %v5566_v63, %v5551_v3  ;;  %v11348_v29 = vperm.slane %v11159_v14, 7  ;;  %v5513_v12 = vadd.f32 %v5512_v55, %v5511_v59  ;;  %v5561_v33 = vadd.f32 %v5560_v60, %v5559_v54 }
 0xc82   :  { %v6226_v11 = vclamps-f32 %v11338_v6, 5.0  ;;  %v5183_v28 = vmul.f32 10.0, %v5151_v43  ;;  %v5390_v26 = vrot.slane %v11324_v17, 7  ;;  %v5389_v32 = vrot.slane %v11340_v16, 7 }
 0xc83   :  { %vm11353_vm13 = vcmp.lt.f32.partialorder %v5038_v5, 0.0004427343  ;;  %v11357_v61 = vadd.f32 -5.0, %v5179_v38  ;;  %v5047_v42 = vadd.f32 %v5031_v13, %v4935_v8  ;;  %v5732_v52 = vrot.slane %v5731_v47, 1 }
 0xc84   :  { %v5040_v14 = vsel %vm11353_vm13, %v5037_v36, %v5034_v48  ;;  %v5521_v59 = vadd.f32 %v5520_v34, %v5519_v30  ;;  %v5568_v4 = vrot.slane %v5567_v45, 4  ;;  %v11363_v53 = vadd.f32 -5.0, %v5183_v28 }
 0xc85   :  { %v5692_v44 = vrot.slane %v5691_v7, 1  ;;  %v5514_v46 = vrot.slane %v5513_v12, 2  ;;  %v5562_v21 = vrot.slane %v5561_v33, 2  ;;  %v5448_v51 = vperm.slane %v6226_v11, 2 }
 0xc86   :  { %v6227_v50 = vclamps-f32 %v11348_v29, 5.0  ;;  %v5696_v23 = vrot.slane %v11317_v56, 4  ;;  %v5328_v8 = vrot.slane %v11357_v61, 1  ;;  %v5329_v24 = vrot.slane %v11363_v53, 1 }
 0xc87   :  { %v5174_v54 = vpop.f32.mrf.mxu1  ;;  %v5522_v37 = vrot.slane %v5521_v59, 2  ;;  %v5180_v1 = vmul.f32 10.0, %v5171_v27  ;;  %v11373_v3 = vadd.f32 %v5692_v44, %v5691_v7  ;;  %v11375_v55 = vadd.f32 %v5732_v52, %v5731_v47 }
 0xc88   :  { %v5184_v15 = vmul.f32 10.0, %v5174_v54  ;;  %v5569_v60 = vadd.f32 %v5568_v4, %v5567_v45  ;;  %v5330_v63 = vsel %vm5321_vm6, %v5328_v8, %v5329_v24  ;;  %v5345_v62 = vsel %vm5342_vm9, %v5329_v24, 5.0 }
 0xc89   :  { %v5055_v38 = vadd.f32 0.001, %v5047_v42  ;;  %v5048_v43 = vadd.f32 %v5040_v14, %v4936_v10  ;;  %v5736_v48 = vrot.slane %v11329_v31, 4  ;;  %vm5464_vm14 = vcmp.lt.f32.partialorder %v5448_v51, %v5345_v62  ;;  %v5222_v40 = vpop.f32.mrf.mxu0 }
 0xc8a   :  { %v11371_v30 = vadd.f32 -5.0, %v5184_v15  ;;  %v5515_v36 = vadd.f32 %v5514_v46, %v5513_v12  ;;  %v5449_v27 = vperm.slane %v6227_v50, 2  ;;  %vm5476_vm15 = vmor %vm5464_vm14, %vm5445_vm4  ;;  %v11392_v34 = vadd.f32 %v11375_v55, %v11373_v3 }
 0xc8b   :  { %v5563_v13 = vadd.f32 %v5562_v21, %v5561_v33  ;;  %v11394_v20 = vadd.f32 -5.0, %v5180_v1  ;;  %vm5456_vm0 = vcmp.ge.f32.partialorder %v5448_v51, %v11363_v53  ;;  %vm5460_vm1 = vcmp.lt.f32.partialorder %v5448_v51, %v5330_v63 }
 0xc8c   :  { %v5332_v5 = vrot.slane %v11371_v30, 1  ;;  %v5523_v10 = vadd.f32 %v5522_v37, %v5521_v59  ;;  %v5570_v7 = vrot.slane %v5569_v60, 2  ;;  %v5697_v45 = vadd.f32 %v5696_v23, %v11317_v56  ;;  %vm5484_vm2 = vmand %vm5456_vm0, %vm5476_vm15 }
 0xc8d   :  { %v5737_v12 = vadd.f32 %v5736_v48, %v11329_v31  ;;  %vm5452_vm5 = vcmp.ge.f32.partialorder %v5448_v51, %v11357_v61  ;;  %v11402_v28 = vsel %vm5484_vm2, 1.0, %v12209_v0  ;;  %v5548_v33 = vsub.f32 %v5345_v62, %v11363_v53 }
 0xc8e   :  { %v11388_v47 = vsel %vm5342_vm9, %v5332_v5, 5.0  ;;  %v11408_v42 = vsel %vm5342_vm9, 1.0, %v5390_v26  ;;  %v5409_v56 = vsel %vm5342_vm9, 1.0, %v5389_v32  ;;  %v5395_v14 = vrot.slane %v5055_v38, 7  ;;  %vm5480_vm8 = vmand %vm5452_vm5, %vm5460_vm1 }
 0xc8f   :  { %vm5465_vm3 = vcmp.lt.f32.partialorder %v5449_v27, %v11388_v47  ;;  %v5056_v52 = vadd.f32 0.001, %v5048_v43  ;;  %v5516_v31 = vrot.slane %v5515_v36, 1  ;;  %v5564_v59 = vrot.slane %v5563_v13, 1 }
 0xc90   :  { %v5331_v54 = vrot.slane %v11394_v20, 1  ;;  %v5556_v4 = vmul.f32 %v11402_v28, %v5548_v33  ;;  %vm5477_vm10 = vmor %vm5465_vm3, %vm5445_vm4  ;;  %v5524_v15 = vrot.slane %v5523_v10, 1  ;;  %v5571_v44 = vadd.f32 %v5570_v7, %v5569_v60 }
 0xc91   :  { %v5698_v46 = vrot.slane %v5697_v45, 2  ;;  %v5544_v21 = vsub.f32 %v5330_v63, %v11357_v61  ;;  %v5738_v23 = vrot.slane %v5737_v12, 2  ;;  %v11422_v51 = vsel %vm5480_vm8, 1.0, %v12209_v0 }
 0xc92   :  { %v11425_v8 = vsel %vm5321_vm6, %v5331_v54, %v5332_v5  ;;  %vm5457_vm11 = vcmp.ge.f32.partialorder %v5449_v27, %v11371_v30  ;;  %v5396_v39 = vsel %vm5342_vm9, %v5389_v32, %v5395_v14  ;;  %v5413_v24 = vsel %vm5342_vm9, %v5055_v38, 1.0 }
 0xc93   :  { %v5397_v37 = vrot.slane %v5056_v52, 7  ;;  %v5508_v1 = vmul.f32 %v11402_v28, %v11363_v53  ;;  %vm5485_vm4 = vmand %vm5457_vm11, %vm5477_vm10  ;;  %v5414_v60 = vsel %vm5342_vm9, %v5056_v52, 1.0  ;;  %v5517_v63 = vadd.f32 %v5516_v31, %v5515_v36  ;;  %v5225_v31 = vpop.f32.mrf.mxu0 }
 0xc94   :  { %v11435_v62 = vadd.f32 %v5564_v59, %v5563_v13  ;;  %v5574_v5 = vsel %vm4592_vm7, %v5556_v4, 0.0  ;;  %v5525_v43 = vadd.f32 %v5524_v15, %v5523_v10  ;;  %v5572_v48 = vrot.slane %v5571_v44, 1  ;;  %v5245_v4 = vpop.f32.mrf.mxu1 }
 0xc95   :  { %v5552_v7 = vmul.f32 %v11422_v51, %v5544_v21  ;;  %vm5461_vm12 = vcmp.lt.f32.partialorder %v5449_v27, %v11425_v8  ;;  %v5699_v32 = vadd.f32 %v5698_v46, %v5697_v45  ;;  %v11440_v38 = vadd.f32 %v5738_v23, %v5737_v12 }
 0xc96   :  { %v5684_v33 = vmul.f32 %v11402_v28, %v5396_v39  ;;  %v11444_v53 = vsel %vm5485_vm4, 1.0, %v12209_v0  ;;  %v5398_v36 = vsel %vm5342_vm9, %v5390_v26, %v5397_v37  ;;  %vm5453_vm13 = vcmp.ge.f32.partialorder %v5449_v27, %v11394_v20 }
 0xc97   :  { %v5526_v13 = vsel %vm4592_vm7, %v5508_v1, 0.0  ;;  %v5575_v10 = vadd.f32 %v5574_v5, %v5552_v7  ;;  %v11453_v14 = vsub.f32 %v6224_v19, %v5517_v63  ;;  %v5504_v45 = vmul.f32 %v11422_v51, %v11357_v61  ;;  %vm5481_vm14 = vmand %vm5453_vm13, %vm5461_vm12 }
 0xc98   :  { %v5724_v12 = vmul.f32 %v11402_v28, %v5413_v24  ;;  %v5297_v52 = vmul.f32 10.0, %v5222_v40  ;;  %6713 = vrcp.f32 %v11435_v62  ;;  %v11459_v26 = vadd.f32 %v5572_v48, %v5571_v44 }
 0xc99   :  { %v11463_v27 = vsub.f32 %v6225_v41, %v5525_v43  ;;  %v5509_v19 = vmul.f32 %v11444_v53, %v11371_v30  ;;  %v5740_v59 = vrot.slane %v11440_v38, 1  ;;  %v5527_v54 = vadd.f32 %v5526_v13, %v5504_v45 }
 0xc9a   :  { %v5702_v61 = vsel %vm4592_vm7, %v5684_v33, 0.0  ;;  %v5700_v15 = vrot.slane %v5699_v32, 1  ;;  %v5576_v40 = vrot.slane %v5575_v10, 4  ;;  %v5680_v46 = vmul.f32 %v11422_v51, %v5409_v56 }
 0xc9b   :  { %v11471_v44 = vsel %vm5481_vm14, 1.0, %v12209_v0  ;;  %v5301_v21 = vmul.f32 10.0, %v5225_v31  ;;  %v5742_v41 = vsel %vm4592_vm7, %v5724_v12, 0.0  ;;  %v5545_v23 = vsub.f32 %v11425_v8, %v11394_v20 }
 0xc9c   :  { %v5549_v39 = vsub.f32 %v11388_v47, %v11371_v30  ;;  %v5305_v24 = vadd.f32 -5.0, %v5297_v52  ;;  %v5703_v37 = vadd.f32 %v5702_v61, %v5680_v46  ;;  %v5720_v1 = vmul.f32 %v11422_v51, %v11340_v16 }
 0xc9d   :  { %v5534_v63 = vsel %vm4592_vm7, %v5509_v19, 0.0  ;;  %v5298_v56 = vmul.f32 10.0, %v5245_v4  ;;  %6715 = vrcp.f32 %v11459_v26  ;;  %v5528_v0 = vrot.slane %v5527_v54, 4 }
 0xc9e   :  { %v5505_v5 = vmul.f32 %v11471_v44, %v11394_v20  ;;  %v5557_v43 = vmul.f32 %v11444_v53, %v5549_v39  ;;  %v11485_v8 = vpop.eup %6713  ;;  %v5577_v48 = vadd.f32 %v5576_v40, %v5575_v10  ;;  %v5743_v30 = vadd.f32 %v5742_v41, %v5720_v1 }
 0xc9f   :  { %v11487_v47 = vadd.f32 -5.0, %v5301_v21  ;;  %v11489_v7 = vadd.f32 %v5700_v15, %v5699_v32  ;;  %v5685_v33 = vmul.f32 %v11444_v53, %v5398_v36  ;;  %v5355_v13 = vrot.slane %v5305_v24, 1 }
 0xca0   :  { %v5535_v16 = vadd.f32 %v5534_v63, %v5505_v5  ;;  %v11493_v45 = vmul.f32 %v11243_v9, %v5305_v24  ;;  %v5704_v12 = vrot.slane %v5703_v37, 4  ;;  %v5553_v20 = vmul.f32 %v11471_v44, %v5545_v23 }
 0xca1   :  { %v11496_v52 = vadd.f32 -5.0, %v5298_v56  ;;  %v5356_v31 = vrot.slane %v11487_v47, 1  ;;  %v5529_v10 = vadd.f32 %v5528_v0, %v5527_v54  ;;  %v5582_v19 = vsel %vm4592_vm7, %v5557_v43, 0.0 }
 0xca2   :  { %v5725_v32 = vmul.f32 %v11444_v53, %v5414_v60  ;;  %v5763_v61 = vmul.f32 %v11485_v8, %v11435_v62  ;;  %v5578_v36 = vrot.slane %v5577_v48, 2  ;;  %v5744_v4 = vrot.slane %v5743_v30, 4 }
 0xca3   :  { %v5357_v15 = vsel %vm5321_vm6, %v5355_v13, %v5356_v31  ;;  %v5375_v40 = vsel %vm5342_vm9, %v5356_v31, 5.0  ;;  %v11505_v46 = vpop.eup %6715  ;;  %v5536_v21 = vrot.slane %v5535_v16, 4  ;;  %v5681_v41 = vmul.f32 %v11471_v44, %v11408_v42 }
 0xca4   :  { %v5710_v54 = vsel %vm4592_vm7, %v5685_v33, 0.0  ;;  %v5630_v23 = vsub.f32 %v5357_v15, %v5305_v24  ;;  %v5705_v39 = vadd.f32 %v5704_v12, %v5703_v37  ;;  %v5583_v60 = vadd.f32 %v5582_v19, %v5553_v20 }
 0xca5   :  { %v5634_v1 = vsub.f32 %v5375_v40, %v11487_v47  ;;  %v5764_v63 = vsub.f32 1.0, %v5763_v61  ;;  %v5530_v56 = vrot.slane %v5529_v10, 2  ;;  %v5721_v0 = vmul.f32 %v11471_v44, %v11324_v17 }
 0xca6   :  { %v5750_v5 = vsel %vm4592_vm7, %v5725_v32, 0.0  ;;  %v5638_v43 = vmul.f32 %v11243_v9, %v5630_v23  ;;  %v5579_v13 = vadd.f32 %v5578_v36, %v5577_v48  ;;  %v5711_v31 = vadd.f32 %v5710_v54, %v5681_v41  ;;  %v5248_v23 = vpop.f32.mrf.mxu1 }
 0xca7   :  { %v5642_v42 = vmul.f32 %v11252_v58, %v5634_v1  ;;  %v5765_v33 = vmul.f32 %v11485_v8, %v5764_v63  ;;  %v5537_v24 = vadd.f32 %v5536_v21, %v5535_v16  ;;  %vm5767_vm15 = vweird.f32 %v11435_v62 }
 0xca8   :  { %vm5768_vm0 = vweird.f32 %v11485_v8  ;;  %v11520_v37 = vadd.f32 %v5740_v59, %v11440_v38  ;;  %v5584_v12 = vrot.slane %v5583_v60, 4  ;;  %v5751_v17 = vadd.f32 %v5750_v5, %v5721_v0 }
 0xca9   :  { %v5646_v20 = vsel %vm4592_vm7, %v5642_v42, 0.0  ;;  %v5773_v9 = vand.u32 2147483648, %v11435_v62  ;;  %v5766_v19 = vadd.f32 %v11485_v8, %v5765_v33  ;;  %v5771_v32 = vand.u32 2147483647, %v11435_v62  ;;  %vm11528_vm1 = vmor %vm5767_vm15, %vm5768_vm0 }
 0xcaa   :  { %v5647_v48 = vadd.f32 %v5646_v20, %v5638_v43  ;;  %v5778_v16 = vmul.f32 %v11505_v46, %v11459_v26  ;;  %v5531_v61 = vadd.f32 %v5530_v56, %v5529_v10  ;;  %v5706_v36 = vrot.slane %v5705_v39, 2 }
 0xcab   :  { %v5745_v15 = vadd.f32 %v5744_v4, %v5743_v30  ;;  %v11534_v59 = vadd.f32 %v11520_v37, %v11489_v7  ;;  %v5580_v40 = vrot.slane %v5579_v13, 1  ;;  %v5538_v21 = vrot.slane %v5537_v24, 2 }
 0xcac   :  { %v5712_v41 = vrot.slane %v5711_v31, 4  ;;  %v5648_v54 = vrot.slane %v5647_v48, 4  ;;  %v5585_v62 = vadd.f32 %v5584_v12, %v5583_v60  ;;  %v5752_v1 = vrot.slane %v5751_v17, 4 }
 0xcad   :  { %v5774_v63 = vor.u32 1.1754944e-38, %v5773_v9  ;;  %v5302_v0 = vmul.f32 10.0, %v5248_v23  ;;  %v5770_v30 = vsel %vm11528_vm1, %v11485_v8, %v5766_v19  ;;  %vm5772_vm2 = vcmp.eq.f32.partialorder %v5771_v32, 8.507059e+37 }
 0xcae   :  { %v5649_v10 = vadd.f32 %v5648_v54, %v5647_v48  ;;  %v5779_v4 = vsub.f32 1.0, %v5778_v16  ;;  %v5532_v56 = vrot.slane %v5531_v61, 1  ;;  %v11539_v5 = vadd.f32 %v5706_v36, %v5705_v39 }
 0xcaf   :  { %v5746_v43 = vrot.slane %v5745_v15, 2  ;;  %v5310_v42 = vadd.f32 -5.0, %v5302_v0  ;;  %v11541_v33 = vadd.f32 %v5580_v40, %v5579_v13  ;;  %v5713_v20 = vadd.f32 %v5712_v41, %v5711_v31  ;;  %v5268_v0 = vpop.f32.mrf.mxu0 }
 0xcb0   :  { %v5358_v60 = vrot.slane %v11496_v52, 1  ;;  %v5650_v12 = vrot.slane %v5649_v10, 2  ;;  %v5586_v9 = vrot.slane %v5585_v62, 2  ;;  %v5594_v48 = vmul.f32 %v11252_v58, %v11487_v47 }
 0xcb1   :  { %v5775_v54 = vsel %vm5772_vm2, %v5774_v63, %v5770_v30  ;;  %v5359_v38 = vrot.slane %v5310_v42, 1  ;;  %v5539_v8 = vadd.f32 %v5538_v21, %v5537_v24  ;;  %v5753_v19 = vadd.f32 %v5752_v1, %v5751_v17 }
 0xcb2   :  { %v5651_v32 = vadd.f32 %v5650_v12, %v5649_v10  ;;  %v5780_v39 = vmul.f32 %v11505_v46, %v5779_v4  ;;  %vm5782_vm3 = vweird.f32 %v11459_v26  ;;  %vm5783_vm5 = vweird.f32 %v11505_v46 }
 0xcb3   :  { %v5360_v16 = vsel %vm5321_vm6, %v5358_v60, %v5359_v38  ;;  %v5376_v13 = vsel %vm5342_vm9, %v5359_v38, 5.0  ;;  %v5776_v36 = vmul.f32 %v5775_v54, %v11453_v14  ;;  %v5587_v40 = vadd.f32 %v5586_v9, %v5585_v62  ;;  %vm11567_vm8 = vmor %vm5782_vm3, %vm5783_vm5 }
 0xcb4   :  { %v5652_v31 = vrot.slane %v5651_v32, 1  ;;  %v5631_v58 = vsub.f32 %v5360_v16, %v11496_v52  ;;  %v5635_v47 = vsub.f32 %v5376_v13, %v5310_v42  ;;  %v5598_v24 = vsel %vm4592_vm7, %v5594_v48, 0.0 }
 0xcb5   :  { %v5786_v17 = vand.u32 2147483647, %v11459_v26  ;;  %v5788_v21 = vand.u32 2147483648, %v11459_v26  ;;  %v5781_v63 = vadd.f32 %v11505_v46, %v5780_v39  ;;  %v5533_v14 = vadd.f32 %v5532_v56, %v5531_v61 }
 0xcb6   :  { %v11556_v41 = vadd.f32 %v5652_v31, %v5651_v32  ;;  %v5639_v23 = vmul.f32 %v11295_v25, %v5631_v58  ;;  %v5643_v1 = vmul.f32 %v11285_v2, %v5635_v47  ;;  %v11561_v10 = vadd.f32 %v5746_v43, %v5745_v15 }
 0xcb7   :  { %v5540_v30 = vrot.slane %v5539_v8, 1  ;;  %v5714_v62 = vrot.slane %v5713_v20, 2  ;;  %v5599_v60 = vadd.f32 %v5598_v24, %v11493_v45  ;;  %v11572_v12 = vsub.f32 1.0, %v5776_v36 }
 0xcb8   :  { %v11575_v9 = vmul.f32 %v5775_v54, %v11556_v41  ;;  %v5654_v61 = vsel %vm4592_vm7, %v5643_v1, 0.0  ;;  %6717 = vrcp.f32 %v11541_v33  ;;  %v5588_v15 = vrot.slane %v5587_v40, 1 }
 0xcb9   :  { %v5655_v56 = vadd.f32 %v5654_v61, %v5639_v23  ;;  %v5789_v43 = vor.u32 1.1754944e-38, %v5788_v21  ;;  %v5754_v48 = vrot.slane %v5753_v19, 2  ;;  %v5785_v45 = vsel %vm11567_vm8, %v11505_v46, %v5781_v63 }
 0xcba   :  { %v11580_v26 = vmul.f32 2.0, %v11575_v9  ;;  %vm5787_vm10 = vcmp.eq.f32.partialorder %v5786_v17, 8.507059e+37  ;;  %v5748_v38 = vrot.slane %v11561_v10, 1  ;;  %v5541_v54 = vadd.f32 %v5540_v30, %v5539_v8  ;;  %v5291_v30 = vpop.f32.mrf.mxu1 }
 0xcbb   :  { %v5595_v32 = vmul.f32 %v11285_v2, %v5310_v42  ;;  %v5656_v39 = vrot.slane %v5655_v56, 4  ;;  %v5591_v16 = vmul.f32 %v11295_v25, %v11496_v52  ;;  %v5600_v13 = vrot.slane %v5599_v60, 4  ;;  %v5271_v52 = vpop.f32.mrf.mxu0 }
 0xcbc   :  { %v11590_v31 = vmul.f32 %v11572_v12, %v5776_v36  ;;  %v5862_v58 = vsub.f32 %v11392_v34, %v11580_v26  ;;  %v11594_v47 = vadd.f32 %v5588_v15, %v5587_v40  ;;  %v5790_v24 = vsel %vm5787_vm10, %v5789_v43, %v5785_v45 }
 0xcbd   :  { %v5657_v46 = vadd.f32 %v5656_v39, %v5655_v56  ;;  %v5299_v17 = vmul.f32 10.0, %v5268_v0  ;;  %v11598_v8 = vsub.f32 %v6226_v11, %v5533_v14  ;;  %v11600_v2 = vadd.f32 %v5714_v62, %v5713_v20 }
 0xcbe   :  { %v11602_v42 = vadd.f32 %v5754_v48, %v5753_v19  ;;  %v5866_v25 = vmul.f32 %v5862_v58, %v11590_v31  ;;  %v11605_v21 = vpop.eup %6717  ;;  %v11609_v34 = vsub.f32 %v6227_v50, %v5541_v54  ;;  %v5606_v40 = vsel %vm4592_vm7, %v5595_v32, 0.0 }
 0xcbf   :  { %v5658_v23 = vrot.slane %v5657_v46, 2  ;;  %v5303_v1 = vmul.f32 10.0, %v5271_v52  ;;  %v11612_v63 = vadd.f32 %v5600_v13, %v5599_v60  ;;  %v5830_v11 = vmul.f32 %v5776_v36, %v5776_v36 }
 0xcc0   :  { %v11615_v20 = vadd.f32 %v5866_v25, %v11575_v9  ;;  %v5791_v19 = vmul.f32 %v5790_v24, %v11463_v27  ;;  %6719 = vrcp.f32 %v11594_v47  ;;  %v11619_v14 = vadd.f32 -5.0, %v5299_v17 }
 0xcc1   :  { %v5659_v0 = vadd.f32 %v5658_v23, %v5657_v46  ;;  %v5311_v50 = vadd.f32 -5.0, %v5303_v1  ;;  %v5838_v62 = vmul.f32 %v11575_v9, %v5830_v11  ;;  %v5954_v4 = vmul.f32 %v11572_v12, %v11373_v3 }
 0xcc2   :  { %6721 = vrcp.f32 %v11615_v20  ;;  %v11625_v36 = vadd.f32 %v5606_v40, %v5591_v16  ;;  %v5361_v61 = vrot.slane %v11619_v14, 1  ;;  %v5793_v15 = vmul.f32 %v11605_v21, %v11541_v33 }
 0xcc3   :  { %v5660_v60 = vrot.slane %v5659_v0, 1  ;;  %v5362_v27 = vrot.slane %v5311_v50, 1  ;;  %v5842_v43 = vmul.f32 %v11590_v31, %v11373_v3  ;;  %v11633_v48 = vsub.f32 1.0, %v5791_v19 }
 0xcc4   :  { %v5831_v45 = vmul.f32 %v5791_v19, %v5791_v19  ;;  %v5300_v32 = vmul.f32 10.0, %v5291_v30  ;;  %v5794_v17 = vsub.f32 1.0, %v5793_v15  ;;  %v11643_v52 = vmul.f32 %v5830_v11, %v11375_v55 }
 0xcc5   :  { %v11635_v54 = vadd.f32 %v5660_v60, %v5659_v0  ;;  %v5363_v39 = vsel %vm5321_vm6, %v5361_v61, %v5362_v27  ;;  %v5377_v16 = vsel %vm5342_vm9, %v5362_v27, 5.0  ;;  %v5846_v13 = vadd.f32 %v5842_v43, %v5838_v62 }
 0xcc6   :  { %v5632_v58 = vsub.f32 %v5363_v39, %v11619_v14  ;;  %v5636_v46 = vsub.f32 %v5377_v16, %v5311_v50  ;;  %v11640_v25 = vpop.eup %6719  ;;  %v11646_v3 = vmul.f32 %v5954_v4, %v11572_v12  ;;  %v5708_v62 = vrot.slane %v11539_v5, 1 }
 0xcc7   :  { %v11650_v23 = vmul.f32 %v5790_v24, %v11635_v54  ;;  %v5795_v60 = vmul.f32 %v11605_v21, %v5794_v17  ;;  %v5827_v11 = vmul.f32 %v11633_v48, %v5791_v19  ;;  %v11660_v4 = vmul.f32 %v5831_v45, %v11520_v37  ;;  %v5294_v19 = vpop.f32.mrf.mxu1 }
 0xcc8   :  { %v6722_v1 = vpop.eup %6721  ;;  %v5640_v0 = vmul.f32 %v11422_v51, %v5632_v58  ;;  %v5644_v30 = vmul.f32 %v11402_v28, %v5636_v46  ;;  %v5850_v24 = vmul.f32 %v5846_v13, %v11556_v41  ;;  %v5955_v61 = vmul.f32 %v11633_v48, %v11489_v7 }
 0xcc9   :  { %v5875_v55 = vmul.f32 %v6722_v1, %v11615_v20  ;;  %v5859_v12 = vmul.f32 2.0, %v11650_v23  ;;  %v11665_v27 = vadd.f32 -5.0, %v5300_v32  ;;  %v5883_v39 = vand.u32 2147483647, %v11615_v20 }
 0xcca   :  { %v5662_v15 = vsel %vm4592_vm7, %v5644_v30, 0.0  ;;  %vm5797_vm11 = vweird.f32 %v11541_v33  ;;  %v5885_v37 = vand.u32 2147483648, %v11615_v20  ;;  %v5796_v41 = vadd.f32 %v11605_v21, %v5795_v60 }
 0xccb   :  { %v5876_v43 = vsub.f32 1.0, %v5875_v55  ;;  %v5863_v16 = vsub.f32 %v11534_v59, %v5859_v12  ;;  %v5663_v58 = vadd.f32 %v5662_v15, %v5640_v0  ;;  %vm5798_vm4 = vweird.f32 %v11605_v21 }
 0xccc   :  { %vm5880_vm12 = vweird.f32 %v6722_v1  ;;  %v5803_v46 = vand.u32 2147483648, %v11541_v33  ;;  %vm5879_vm13 = vweird.f32 %v11615_v20  ;;  %v5801_v59 = vand.u32 2147483647, %v11541_v33  ;;  %vm11683_vm15 = vmor %vm5797_vm11, %vm5798_vm4 }
 0xccd   :  { %v5877_v13 = vmul.f32 %v6722_v1, %v5876_v43  ;;  %v5867_v32 = vmul.f32 %v5863_v16, %v5827_v11  ;;  %v5664_v17 = vrot.slane %v5663_v58, 4  ;;  %v5304_v30 = vmul.f32 10.0, %v5294_v19  ;;  %vm5881_vm0 = vmor %vm5879_vm13, %vm5880_vm12 }
 0xcce   :  { %vm5884_vm14 = vcmp.eq.f32.partialorder %v5883_v39, 8.507059e+37  ;;  %v5596_v0 = vmul.f32 %v11402_v28, %v5311_v50  ;;  %v5886_v15 = vor.u32 1.1754944e-38, %v5885_v37  ;;  %v5800_v16 = vsel %vm11683_vm15, %v11605_v21, %v5796_v41 }
 0xccf   :  { %v5878_v55 = vadd.f32 %v6722_v1, %v5877_v13  ;;  %v11678_v40 = vadd.f32 %v5867_v32, %v11650_v23  ;;  %v5665_v43 = vadd.f32 %v5664_v17, %v5663_v58  ;;  %v5312_v19 = vadd.f32 -5.0, %v5304_v30 }
 0xcd0   :  { %v5839_v13 = vmul.f32 %v11650_v23, %v5831_v45  ;;  %v5804_v28 = vor.u32 1.1754944e-38, %v5803_v46  ;;  %v5843_v33 = vmul.f32 %v5827_v11, %v11489_v7  ;;  %vm5802_vm1 = vcmp.eq.f32.partialorder %v5801_v59, 8.507059e+37 }
 0xcd1   :  { %v5882_v39 = vsel %vm5881_vm0, %v6722_v1, %v5878_v55  ;;  %6723 = vrcp.f32 %v11678_v40  ;;  %v5666_v32 = vrot.slane %v5665_v43, 2  ;;  %v5946_v37 = vmul.f32 %v11580_v26, %v11590_v31 }
 0xcd2   :  { %v5887_v50 = vsel %vm5884_vm14, %v5886_v15, %v5882_v39  ;;  %v11698_v58 = vmul.f32 %v5955_v61, %v11633_v48  ;;  %v5805_v21 = vsel %vm5802_vm1, %v5804_v28, %v5800_v16  ;;  %v5364_v1 = vrot.slane %v11665_v27, 1 }
 0xcd3   :  { %v11693_v56 = vmul.f32 %v5887_v50, %v5850_v24  ;;  %v5614_v45 = vsel %vm4592_vm7, %v5596_v0, 0.0  ;;  %v5667_v41 = vadd.f32 %v5666_v32, %v5665_v43  ;;  %v5365_v46 = vrot.slane %v5312_v19, 1 }
 0xcd4   :  { %v5847_v17 = vadd.f32 %v5843_v33, %v5839_v13  ;;  %v5592_v7 = vmul.f32 %v11422_v51, %v11619_v14  ;;  %v11705_v24 = vadd.f32 %v5708_v62, %v11539_v5  ;;  %v5749_v26 = vadd.f32 %v5748_v38, %v11561_v10 }
 0xcd5   :  { %v5668_v31 = vrot.slane %v5667_v41, 1  ;;  %v5806_v48 = vmul.f32 %v5805_v21, %v11598_v8  ;;  %v5366_v61 = vsel %vm5321_vm6, %v5364_v1, %v5365_v46  ;;  %v5378_v59 = vsel %vm5342_vm9, %v5365_v46, 5.0 }
 0xcd6   :  { %v5950_v55 = vadd.f32 %v5946_v37, %v11643_v52  ;;  %v5947_v0 = vmul.f32 %v5859_v12, %v5827_v11  ;;  %v11714_v60 = vadd.f32 %v5614_v45, %v5592_v7  ;;  %v5633_v51 = vsub.f32 %v5366_v61, %v11665_v27 }
 0xcd7   :  { %v6724_v30 = vpop.eup %6723  ;;  %v5898_v14 = vand.u32 2147483647, %v11678_v40  ;;  %v11719_v10 = vadd.f32 %v5668_v31, %v5667_v41  ;;  %v5637_v38 = vsub.f32 %v5378_v59, %v5312_v19  ;;  %v5851_v8 = vmul.f32 %v5847_v17, %v11635_v54 }
 0xcd8   :  { %v5890_v5 = vmul.f32 %v6724_v30, %v11678_v40  ;;  %v5900_v62 = vand.u32 2147483648, %v11678_v40  ;;  %v5856_v15 = vadd.f32 %v5749_v26, %v11705_v24  ;;  %v5808_v52 = vmul.f32 %v11640_v25, %v11594_v47 }
 0xcd9   :  { %v5824_v12 = vsub.f32 1.0, %v5806_v48  ;;  %v11727_v43 = vmul.f32 %v5805_v21, %v11719_v10  ;;  %v5645_v16 = vmul.f32 %v11444_v53, %v5637_v38  ;;  %vm5894_vm6 = vweird.f32 %v11678_v40 }
 0xcda   :  { %v5891_v11 = vsub.f32 1.0, %v5890_v5  ;;  %v5951_v39 = vadd.f32 %v5947_v0, %v11660_v4  ;;  %v5641_v54 = vmul.f32 %v11471_v44, %v5633_v51  ;;  %v5809_v13 = vsub.f32 1.0, %v5808_v52 }
 0xcdb   :  { %vm5895_vm2 = vweird.f32 %v6724_v30  ;;  %vm11733_vm3 = vcmp.eq.f32.partialorder %v5898_v14, 8.507059e+37  ;;  %v5860_v33 = vmul.f32 2.0, %v11727_v43  ;;  %v5901_v32 = vor.u32 1.1754944e-38, %v5900_v62 }
 0xcdc   :  { %v5892_v28 = vmul.f32 %v6724_v30, %v5891_v11  ;;  %v11738_v37 = vmul.f32 %v5806_v48, %v5806_v48  ;;  %v5670_v21 = vsel %vm4592_vm7, %v5645_v16, 0.0  ;;  %v5810_v1 = vmul.f32 %v11640_v25, %v5809_v13  ;;  %vm5896_vm8 = vmor %vm5894_vm6, %vm5895_vm2 }
 0xcdd   :  { %v11742_v4 = vmul.f32 %v5824_v12, %v5806_v48  ;;  %v5864_v41 = vsub.f32 %v5856_v15, %v5860_v33  ;;  %vm5813_vm5 = vweird.f32 %v11640_v25  ;;  %v5597_v46 = vmul.f32 %v11444_v53, %v5312_v19 }
 0xcde   :  { %v5893_v45 = vadd.f32 %v6724_v30, %v5892_v28  ;;  %v5671_v17 = vadd.f32 %v5670_v21, %v5641_v54  ;;  %v5811_v7 = vadd.f32 %v11640_v25, %v5810_v1  ;;  %v5818_v31 = vand.u32 2147483648, %v11594_v47 }
 0xcdf   :  { %v5868_v59 = vmul.f32 %v5864_v41, %v11742_v4  ;;  %vm5812_vm10 = vweird.f32 %v11594_v47  ;;  %v5816_v48 = vand.u32 2147483647, %v11594_v47  ;;  %v5944_v51 = vmul.f32 %v11738_v37, %v5749_v26 }
 0xce0   :  { %v5897_v61 = vsel %vm5896_vm8, %v6724_v30, %v5893_v45  ;;  %v5948_v5 = vmul.f32 %v5860_v33, %v11742_v4  ;;  %v5672_v53 = vrot.slane %v5671_v17, 4  ;;  %vm11757_vm11 = vmor %vm5812_vm10, %vm5813_vm5  ;;  %v5956_v38 = vmul.f32 %v5824_v12, %v11705_v24 }
 0xce1   :  { %v5902_v0 = vsel %vm11733_vm3, %v5901_v32, %v5897_v61  ;;  %v11764_v30 = vadd.f32 %v5868_v59, %v11727_v43  ;;  %v5815_v47 = vsel %vm11757_vm11, %v11640_v25, %v5811_v7  ;;  %v5819_v26 = vor.u32 1.1754944e-38, %v5818_v31 }
 0xce2   :  { %v11761_v14 = vmul.f32 %v5902_v0, %v5851_v8  ;;  %v5673_v62 = vadd.f32 %v5672_v53, %v5671_v17  ;;  %v5962_v15 = vadd.f32 %v11646_v3, %v5950_v55  ;;  %v5963_v52 = vadd.f32 %v11698_v58, %v5951_v39 }
 0xce3   :  { %v12228_v11 = vrot.slane %v11612_v63, 2  ;;  %v5616_v16 = vrot.slane %v11714_v60, 4  ;;  %6725 = vrcp.f32 %v11764_v30  ;;  %vm5817_vm4 = vcmp.eq.f32.partialorder %v5816_v48, 8.507059e+37 }
 0xce4   :  { %v5952_v54 = vadd.f32 %v5948_v5, %v5944_v51  ;;  %v5622_v13 = vsel %vm4592_vm7, %v5597_v46, 0.0  ;;  %v5674_v25 = vrot.slane %v5673_v62, 2  ;;  %v5820_v28 = vsel %vm5817_vm4, %v5819_v26, %v5815_v47 }
 0xce5   :  { %v11775_v8 = vadd.f32 %v12228_v11, %v11612_v63  ;;  %v5756_v50 = vrot.slane %v11602_v42, 1  ;;  %v12229_v3 = vrot.slane %v11625_v36, 4  ;;  %v5593_v63 = vmul.f32 %v11471_v44, %v11665_v27 }
 0xce6   :  { %v5716_v55 = vrot.slane %v11600_v2, 1  ;;  %v5938_v39 = vmul.f32 %v11575_v9, %v11575_v9  ;;  %v5960_v33 = vmul.f32 %v5956_v38, %v5824_v12  ;;  %v5675_v32 = vadd.f32 %v5674_v25, %v5673_v62 }
 0xce7   :  { %v5609_v58 = vadd.f32 %v12229_v3, %v11625_v36  ;;  %v5821_v21 = vmul.f32 %v5820_v28, %v11609_v34  ;;  %v5617_v1 = vadd.f32 %v5616_v16, %v11714_v60  ;;  %v5623_v45 = vadd.f32 %v5622_v13, %v5593_v63 }
 0xce8   :  { %v5604_v41 = vrot.slane %v11775_v8, 1  ;;  %v5676_v46 = vrot.slane %v5675_v32, 1  ;;  %v5964_v17 = vadd.f32 %v5960_v33, %v5952_v54  ;;  %v5966_v36 = vmul.f32 %v5962_v15, %v5938_v39 }
 0xce9   :  { %v11792_v7 = vpop.eup %6725  ;;  %v5610_v44 = vrot.slane %v5609_v58, 2  ;;  %v5939_v27 = vmul.f32 %v11650_v23, %v11650_v23  ;;  %v11797_v9 = vadd.f32 %v5716_v55, %v11600_v2  ;;  %v5757_v12 = vadd.f32 %v5756_v50, %v11602_v42 }
 0xcea   :  { %v5905_v34 = vmul.f32 %v11792_v7, %v11764_v30  ;;  %v5940_v60 = vmul.f32 %v11727_v43, %v11727_v43  ;;  %v11804_v31 = vadd.f32 %v5676_v46, %v5675_v32  ;;  %v5825_v61 = vsub.f32 1.0, %v5821_v21 }
 0xceb   :  { %v5618_v59 = vrot.slane %v5617_v1, 2  ;;  %v5624_v48 = vrot.slane %v5623_v45, 4  ;;  %v11806_v0 = vmul.f32 %v5821_v21, %v5821_v21  ;;  %v5967_v51 = vmul.f32 %v5963_v52, %v5939_v27 }
 0xcec   :  { %v5906_v23 = vsub.f32 1.0, %v5905_v34  ;;  %v11809_v2 = vmul.f32 %v5820_v28, %v11804_v31  ;;  %v5968_v5 = vmul.f32 %v5964_v17, %v5940_v60  ;;  %6727 = vlog2.f32 %v5966_v36 }
 0xced   :  { %v11811_v42 = vadd.f32 %v5610_v44, %v5609_v58  ;;  %v5840_v53 = vmul.f32 %v11727_v43, %v11738_v37  ;;  %v5857_v19 = vadd.f32 %v5757_v12, %v11797_v9  ;;  %6729 = vlog2.f32 %v11615_v20 }
 0xcee   :  { %v5907_v38 = vmul.f32 %v11792_v7, %v5906_v23  ;;  %v11818_v47 = vmul.f32 %v5825_v61, %v5821_v21  ;;  %v5861_v62 = vmul.f32 2.0, %v11809_v2  ;;  %v5957_v26 = vmul.f32 %v5825_v61, %v11797_v9 }
 0xcef   :  { %v5619_v15 = vadd.f32 %v5618_v59, %v5617_v1  ;;  %v5844_v52 = vmul.f32 %v11742_v4, %v11705_v24  ;;  %v5625_v11 = vadd.f32 %v5624_v48, %v5623_v45  ;;  %6731 = vlog2.f32 %v5967_v51 }
 0xcf0   :  { %v5865_v16 = vsub.f32 %v5857_v19, %v5861_v62  ;;  %v5945_v43 = vmul.f32 %v11806_v0, %v5757_v12  ;;  %v5949_v37 = vmul.f32 %v5861_v62, %v11818_v47  ;;  %6733 = vlog2.f32 %v5968_v5 }
 0xcf1   :  { %v5848_v20 = vadd.f32 %v5844_v52, %v5840_v53  ;;  %v5908_v54 = vadd.f32 %v11792_v7, %v5907_v38  ;;  %vm5910_vm12 = vweird.f32 %v11792_v7  ;;  %6735 = vlog2.f32 %v11678_v40 }
 0xcf2   :  { %v6728_v13 = vpop.eup %6727  ;;  %v5915_v25 = vand.u32 2147483648, %v11764_v30  ;;  %v5869_v24 = vmul.f32 %v5865_v16, %v11818_v47  ;;  %v5953_v4 = vadd.f32 %v5949_v37, %v5945_v43  ;;  %v5961_v28 = vmul.f32 %v5957_v26, %v5825_v61 }
 0xcf3   :  { %v6730_v50 = vpop.eup %6729  ;;  %v5605_v3 = vadd.f32 %v5604_v41, %v11775_v8  ;;  %vm5909_vm13 = vweird.f32 %v11764_v30  ;;  %v5913_v58 = vand.u32 2147483647, %v11764_v30  ;;  %6737 = vlog2.f32 %v11764_v30 }
 0xcf4   :  { %v5612_v63 = vrot.slane %v11811_v42, 1  ;;  %vm11836_vm14 = vmor %vm5909_vm13, %vm5910_vm12  ;;  %v11841_v55 = vadd.f32 %v5869_v24, %v11809_v2  ;;  %v5965_v39 = vadd.f32 %v5961_v28, %v5953_v4  ;;  %v5979_v33 = vmul.f32 0.6931472, %v6730_v50 }
 0xcf5   :  { %v6732_v32 = vpop.eup %6731  ;;  %v5620_v21 = vrot.slane %v5619_v15, 1  ;;  %v5912_v8 = vsel %vm11836_vm14, %v11792_v7, %v5908_v54  ;;  %v5626_v1 = vrot.slane %v5625_v11, 2  ;;  %v5941_v30 = vmul.f32 %v11809_v2, %v11809_v2 }
 0xcf6   :  { %v6734_v45 = vpop.eup %6733  ;;  %v5852_v41 = vmul.f32 %v5848_v20, %v11719_v10  ;;  %v5916_v46 = vor.u32 1.1754944e-38, %v5915_v25  ;;  %6739 = vrcp.f32 %v11841_v55  ;;  %v5971_v17 = vmul.f32 0.6931472, %v6728_v13 }
 0xcf7   :  { %v6736_v36 = vpop.eup %6735  ;;  %vm5914_vm15 = vcmp.eq.f32.partialorder %v5913_v58, 8.507059e+37  ;;  %v5969_v44 = vmul.f32 %v5965_v39, %v5941_v30  ;;  %vm5424_vm0 = vcmp.ge.f32.partialorder %v11164_v49, -5.0  ;;  %6741 = vlog2.f32 %v11841_v55 }
 0xcf8   :  { %v5917_v27 = vsel %vm5914_vm15, %v5916_v46, %v5912_v8  ;;  %v5973_v7 = vmul.f32 0.6931472, %v6732_v32  ;;  %v5981_v12 = vmul.f32 0.6931472, %v6736_v36  ;;  %v5986_v34 = vmul.f32 2.0, %v5979_v33 }
 0xcf9   :  { %v6738_v60 = vpop.eup %6737  ;;  %vm5426_vm1 = vcmp.ge.f32.partialorder %v11338_v6, -5.0  ;;  %vm5428_vm6 = vcmp.le.f32.partialorder %v11164_v49, 5.0  ;;  %vm5430_vm2 = vcmp.le.f32.partialorder %v11338_v6, 5.0  ;;  %6743 = vlog2.f32 %v5969_v44  ;;  %v6019_v33 = vld.sshfl [vmem:[#allocation1] sm:$0xff pattern:$0x75316420] }
 0xcfa   :  { %v5975_v10 = vmul.f32 0.6931472, %v6734_v45  ;;  %v5983_v61 = vmul.f32 0.6931472, %v6738_v60  ;;  %v5987_v59 = vmul.f32 2.0, %v5981_v12  ;;  %v5990_v48 = vsub.f32 %v5971_v17, %v5986_v34  ;;  %vm11861_vm3 = vmand %vm5424_vm0, %vm5428_vm6 }
 0xcfb   :  { %v5613_v51 = vadd.f32 %v5612_v63, %v11811_v42  ;;  %v5621_v23 = vadd.f32 %v5620_v21, %v5619_v15  ;;  %v5918_v5 = vmul.f32 %v5917_v27, %v5852_v41  ;;  %v5841_v53 = vmul.f32 %v11809_v2, %v11806_v0  ;;  %vm11874_vm10 = vmand %vm5426_vm1, %vm5430_vm2  ;;  %v6020_v36 = vld.sshfl [vmem:[#allocation1 + $0x8] sm:$0xff pattern:$0x75316420] }
 0xcfc   :  { %v6740_v19 = vpop.eup %6739  ;;  %v5934_v38 = vadd.f32 %v11693_v56, %v5605_v3  ;;  %v5627_v62 = vadd.f32 %v5626_v1, %v5625_v11  ;;  %v5988_v52 = vmul.f32 2.0, %v5983_v61  ;;  %v5991_v16 = vsub.f32 %v5973_v7, %v5987_v59 }
 0xcfd   :  { %v6742_v43 = vpop.eup %6741  ;;  %v5845_v42 = vmul.f32 %v11818_v47, %v11797_v9  ;;  %v5920_v15 = vmul.f32 %v6740_v19, %v11841_v55  ;;  %vm5425_vm5 = vcmp.ge.f32.partialorder %v11169_v18, -5.0  ;;  %vm5429_vm8 = vcmp.le.f32.partialorder %v11169_v18, 5.0 }
 0xcfe   :  { %vm5427_vm11 = vcmp.ge.f32.partialorder %v11348_v29, -5.0  ;;  %vm5431_vm4 = vcmp.le.f32.partialorder %v11348_v29, 5.0  ;;  %v5985_v0 = vmul.f32 0.6931472, %v6742_v43  ;;  %v5992_v9 = vsub.f32 %v5975_v10, %v5988_v52  ;;  %vm11881_vm12 = vmand %vm5425_vm5, %vm5429_vm8 }
 0xcff   :  { %v6744_v2 = vpop.eup %6743  ;;  %v5936_v47 = vadd.f32 %v5918_v5, %v5621_v23  ;;  %v5849_v11 = vadd.f32 %v5845_v42, %v5841_v53  ;;  %v5921_v37 = vsub.f32 1.0, %v5920_v15  ;;  %v5930_v20 = vand.u32 2147483648, %v11841_v55  ;;  %vm11894_vm14 = vmand %vm5427_vm11, %vm5431_vm4 }
 0xd00   :  { %v5977_v13 = vmul.f32 0.6931472, %v6744_v2  ;;  %v5989_v25 = vmul.f32 2.0, %v5985_v0  ;;  %v5998_v24 = vsel %vm11861_vm3, %v5990_v48, 0.0  ;;  %v6000_v4 = vsel %vm11874_vm10, %v5992_v9, 0.0 }
 0xd01   :  { %v5922_v28 = vmul.f32 %v6740_v19, %v5921_v37  ;;  %vm5925_vm13 = vweird.f32 %v6740_v19  ;;  %v5928_v50 = vand.u32 2147483647, %v11841_v55  ;;  %v6016_v58 = vadd.f32 %v6000_v4, %v5998_v24 }
 0xd02   :  { %v5935_v63 = vadd.f32 %v11761_v14, %v5613_v51  ;;  %v5628_v40 = vrot.slane %v5627_v62, 1  ;;  %v5993_v39 = vsub.f32 %v5977_v13, %v5989_v25  ;;  %vm5924_vm15 = vweird.f32 %v11841_v55 }
 0xd03   :  { %v5923_v32 = vadd.f32 %v6740_v19, %v5922_v28  ;;  %v5996_v21 = vsel %vm11874_vm10, %v5936_v47, %v11338_v6  ;;  %v6040_v8 = vmul.f32 %v6016_v58, %v12181_v35  ;;  %vm5926_vm0 = vmor %vm5924_vm15, %vm5925_vm13  ;;  %v5931_v1 = vor.u32 1.1754944e-38, %v5930_v20 }
 0xd04   :  { %v5994_v30 = vsel %vm11861_vm3, %v5934_v38, %v11164_v49  ;;  %v5999_v14 = vsel %vm11881_vm12, %v5991_v16, 0.0  ;;  %v6001_v45 = vsel %vm11894_vm14, %v5993_v39, 0.0  ;;  %v5853_v55 = vmul.f32 %v5849_v11, %v11804_v31 }
 0xd05   :  { %v5927_v41 = vsel %vm5926_vm0, %v6740_v19, %v5923_v32  ;;  %vm5929_vm1 = vcmp.eq.f32.partialorder %v5928_v50, 8.507059e+37  ;;  %v6017_v46 = vadd.f32 %v6001_v45, %v5999_v14  ;;  %6044 = vst [vmem:[#allocation1] sm:$0xff] %v6040_v8  ;;  %v6010_v17 = vrot.slane %v5996_v21, 1 }
 0xd06   :  { %v5932_v6 = vsel %vm5929_vm1, %v5931_v1, %v5927_v41  ;;  %v5629_v44 = vadd.f32 %v5628_v40, %v5627_v62  ;;  %v6004_v49 = vrot.slane %v5994_v30, 2  ;;  %v5995_v34 = vsel %vm11881_vm12, %v5935_v63, %v11169_v18 }
 0xd07   :  { %v5933_v27 = vmul.f32 %v5932_v6, %v5853_v55  ;;  %v6041_v7 = vmul.f32 %v6017_v46, %v12183_v22  ;;  %v6005_v10 = vrot.slane %v5995_v34, 2  ;;  %vm6051_vm6 = vcmp.lt.s32.totalorder %v12208_v57, 256 }
 0xd08   :  { %v6014_v31 = vsel %vm5342_vm9, %v6004_v49, %v6010_v17 }
 0xd09   :  { %v5937_v12 = vadd.f32 %v5933_v27, %v5629_v44  ;;  %6045 = vst [vmem:[#allocation1 + $0x9] sm:$0xff] %v6041_v7  ;;  %v6025_v59 = vrot.slane %v6014_v31, 6 }
 0xd0b   :  { %v5997_v60 = vsel %vm11894_vm14, %v5937_v12, %v11348_v29  ;;  %v6029_v5 = vsel %vm4592_vm7, %v6019_v33, %v6025_v59 }
 0xd0c   :  { %v6011_v61 = vrot.slane %v5997_v60, 1  ;;  %v6031_v57 = vmul.f32 %v6029_v5, %v12181_v35 }
 0xd0e   :  { %v6015_v48 = vsel %vm5342_vm9, %v6005_v10, %v6011_v61  ;;  %vm6036_vm9 = vcmask 1043456  }
 0xd0f   :  { %v6026_v51 = vrot.slane %v6015_v48, 6 }
 0xd10   :  { %v6047_v23 = vld [vmem:[#allocation1 + $0x2] ss:$9 sm:$0xff] }
 0xd11   :  { %v6030_v18 = vsel %vm4592_vm7, %v6020_v36, %v6026_v51  ;;  %6053 = vst.msk [vmem:[%s11939_s7] sm:$0x3] %vm6051_vm6, %v6047_v23 }
 0xd12   :  { %v6032_v53 = vmul.f32 %v6030_v18, %v12183_v22 }
 0xd14   :  { %v6035_v29 = vrot.slane %v6032_v53, 4 }
 0xd16   :  { %v6037_v19 = vsel %vm6036_vm9, %v6031_v57, %v6035_v29 }
 0xd17   :  { %6039 = vst [vmem:[#allocation2] sm:$0xff] %v6037_v19 }
 0xd18   :  { %6064 = dma.vmem_to_hbm [thread:$0]  %s6060_s9, 128, %s6062_s11, [#allocation3]  }
 0xd19   :  { %6808 = dma.done.wait [#allocation3], 128  }
 0xd1a   :  { %6809 = vsyncadd [#allocation3], 4294967168 }
 0xd1b   :  { %6073 = vsyncpa [#allocation3], 1 }

</bundles_post_ra>
